<compile_context>
chip_gen: v5e
topology: v5e:2x2
jax: 0.10.0
libtpu: 0.0.40
codegen_flags: <defaults>
</compile_context>

<pallas_src>
import functools

import jax
import jax.numpy as jnp
import numpy as np
from jax.experimental import pallas as pl
from jax.experimental.pallas import tpu as pltpu


def _pick_tile(n, cap, multiple):
    """Largest divisor of n that is <= cap and a multiple of `multiple` (else n)."""
    cap = min(cap, n)
    t = (cap // multiple) * multiple
    while t >= multiple:
        if n % t == 0:
            return t
        t -= multiple
    return n


# ---------------------------------------------------------------------------
# Kernel 1: fused RMSNorm (over channels) + QKV 1x1-conv projection
# ---------------------------------------------------------------------------
def rmsnorm_qkv_kernel(x_ref, g_ref, w_ref, qkv_ref):
    # x_ref:   [tn, C]          f32 tokens
    # g_ref:   [1, C]           f32 gain, already multiplied by sqrt(C)
    # w_ref:   [C, 3*hidden]    compute dtype; q rows pre-scaled by dim_head**-0.5
    # qkv_ref: [tn, 3*hidden]   compute dtype
    x = x_ref[...]
    ssq = jnp.sum(x * x, axis=-1, keepdims=True)
    xn = x / jnp.maximum(jnp.sqrt(ssq), 1e-12)          # F.normalize(x, dim=channel)
    xn = xn * g_ref[...]                                # * g * sqrt(C)  (folded)
    qkv = jnp.dot(xn.astype(w_ref.dtype), w_ref[...],
                  preferred_element_type=jnp.float32)
    qkv_ref[...] = qkv.astype(qkv_ref.dtype)


# ---------------------------------------------------------------------------
# Kernel 2: flash attention (online softmax over KV tiles, mem-KV init)
#           fused with the 1x1-conv output projection; lane-dense [C, tq] store
# ---------------------------------------------------------------------------
def attention_kernel(q_ref, k_ref, v_ref, mem_ref, wo_ref, bo_ref, o_ref,
                     m_sc, l_sc, acc_sc, *, heads, dim_head):
    # q_ref: [1, tq, hidden]   k_ref/v_ref: [1, tk, hidden]  (blocks of fused qkv)
    # mem_ref: [2, heads, J, d]   wo_ref: [hidden, C]   bo_ref: [1, C]
    # o_ref: [1, C, tq]   scratch: m/l [heads, tq, 1] f32, acc [heads, tq, d] f32
    kv = pl.program_id(2)
    d = dim_head

    @pl.when(kv == 0)
    def _init_from_mem_kv():
        # initialize the online-softmax state from the (tiny) memory KV block
        for h in range(heads):
            q_h = q_ref[0, :, h * d:(h + 1) * d]                  # [tq, d]
            mk = mem_ref[0, h]                                    # [J, d]
            mv = mem_ref[1, h]
            s = jax.lax.dot_general(q_h, mk, (((1,), (1,)), ((), ())),
                                    preferred_element_type=jnp.float32)  # [tq, J]
            m0 = jnp.max(s, axis=-1, keepdims=True)
            p = jnp.exp(s - m0)
            m_sc[h] = m0
            l_sc[h] = jnp.sum(p, axis=-1, keepdims=True)
            acc_sc[h] = jnp.dot(p.astype(mv.dtype), mv,
                                preferred_element_type=jnp.float32)

    # accumulate the current token KV tile (scale already folded into q)
    for h in range(heads):
        q_h = q_ref[0, :, h * d:(h + 1) * d]                      # [tq, d]
        k_h = k_ref[0, :, h * d:(h + 1) * d]                      # [tk, d]
        v_h = v_ref[0, :, h * d:(h + 1) * d]                      # [tk, d]
        s = jax.lax.dot_general(q_h, k_h, (((1,), (1,)), ((), ())),
                                preferred_element_type=jnp.float32)      # [tq, tk]
        m_prev = m_sc[h]
        m_new = jnp.maximum(m_prev, jnp.max(s, axis=-1, keepdims=True))
        alpha = jnp.exp(m_prev - m_new)
        p = jnp.exp(s - m_new)
        l_sc[h] = alpha * l_sc[h] + jnp.sum(p, axis=-1, keepdims=True)
        acc_sc[h] = alpha * acc_sc[h] + jnp.dot(p.astype(v_h.dtype), v_h,
                                                preferred_element_type=jnp.float32)
        m_sc[h] = m_new

    @pl.when(kv == pl.num_programs(2) - 1)
    def _finalize_and_project():
        # normalize, then fuse the output 1x1 conv (per-head accumulation) + bias
        y = bo_ref[...].astype(jnp.float32)                       # [1, C] -> broadcasts
        for h in range(heads):
            o_h = acc_sc[h] * pl.reciprocal(l_sc[h], approx=True)  # [tq, d] f32
            y = y + jnp.dot(o_h.astype(wo_ref.dtype),
                            wo_ref[h * d:(h + 1) * d, :],
                            preferred_element_type=jnp.float32)
        o_ref[0] = y.T.astype(o_ref.dtype)                        # [C, tq] lane-dense


# ---------------------------------------------------------------------------
# Wrapper
# ---------------------------------------------------------------------------
def attention_forward(x, params, *, heads, dim_head,
                      compute_dtype=jnp.bfloat16,
                      q_tile=256, kv_tile=512, token_tile=1024):
    """x: [B, C, H, W] float32 (NCHW, like the PyTorch module)."""
    B, C, H, W = x.shape
    N = H * W
    hidden = heads * dim_head
    # qkv channel-blocking requires heads*dim_head to be a lane multiple
    assert hidden % 128 == 0, "heads*dim_head must be a multiple of 128"

    g = params["g"].astype(jnp.float32)                 # [C]
    w_qkv = params["w_qkv"].astype(jnp.float32)         # [3*hidden, C]
    mem_kv = params["mem_kv"]                           # [2, heads, J, d]
    w_out = params["w_out"].astype(jnp.float32)         # [C, hidden]
    b_out = params["b_out"].astype(jnp.float32)         # [C]
    num_mem = mem_kv.shape[2]

    # ---- fold constants into the (tiny) weights, one-time XLA ops ------------
    g_row = (g * jnp.sqrt(jnp.float32(C))).reshape(1, C)          # RMSNorm * sqrt(C)
    qk_scale = float(dim_head) ** -0.5
    row_scale = jnp.concatenate(
        [jnp.full((hidden, 1), qk_scale, jnp.float32),
         jnp.ones((2 * hidden, 1), jnp.float32)], axis=0)
    w_qkv_t = (w_qkv * row_scale).T.astype(compute_dtype)          # [C, 3*hidden]
    w_out_t = w_out.T.astype(compute_dtype)                        # [hidden, C]
    mem = mem_kv.astype(compute_dtype)
    b_row = b_out.reshape(1, C)

    # NCHW -> token-major [B*N, C]  (only small-tensor glue left at the XLA level)
    tokens = jnp.transpose(x.reshape(B, C, N), (0, 2, 1)).reshape(B * N, C)

    # ---- Kernel 1: RMSNorm + QKV projection, tiled over tokens ---------------
    tn = _pick_tile(B * N, token_tile, 8)
    qkv = pl.pallas_call(
        rmsnorm_qkv_kernel,
        out_shape=jax.ShapeDtypeStruct((B * N, 3 * hidden), compute_dtype),
        grid=(B * N // tn,),
        in_specs=[
            pl.BlockSpec((tn, C), lambda i: (i, 0)),
            pl.BlockSpec((1, C), lambda i: (0, 0)),
            pl.BlockSpec((C, 3 * hidden), lambda i: (0, 0)),
        ],
        out_specs=pl.BlockSpec((tn, 3 * hidden), lambda i: (i, 0)),
        compiler_params=pltpu.CompilerParams(
            dimension_semantics=("parallel",),
            vmem_limit_bytes=32 * 1024 * 1024),
    )(tokens, g_row, w_qkv_t)
    qkv = qkv.reshape(B, N, 3 * hidden)        # metadata-only reshape (free)

    # ---- Kernel 2: flash attention + fused output projection -----------------
    tq = _pick_tile(N, q_tile, 128)            # tq is a lane dim of the output block
    tk = _pick_tile(N, kv_tile, 8)
    kern = functools.partial(attention_kernel, heads=heads, dim_head=dim_head)
    y = pl.pallas_call(
        kern,
        out_shape=jax.ShapeDtypeStruct((B, C, N), x.dtype),
        grid=(B, N // tq, N // tk),
        in_specs=[
            # q / k / v are three views of the SAME fused qkv buffer
            pl.BlockSpec((1, tq, hidden), lambda b, qi, kv: (b, qi, 0)),
            pl.BlockSpec((1, tk, hidden), lambda b, qi, kv: (b, kv, 1)),
            pl.BlockSpec((1, tk, hidden), lambda b, qi, kv: (b, kv, 2)),
            pl.BlockSpec((2, heads, num_mem, dim_head),
                         lambda b, qi, kv: (0, 0, 0, 0)),
            pl.BlockSpec((hidden, C), lambda b, qi, kv: (0, 0)),
            pl.BlockSpec((1, C), lambda b, qi, kv: (0, 0)),
        ],
        out_specs=pl.BlockSpec((1, C, tq), lambda b, qi, kv: (b, 0, qi)),
        scratch_shapes=[
            pltpu.VMEM((heads, tq, 1), jnp.float32),          # running max
            pltpu.VMEM((heads, tq, 1), jnp.float32),          # running denom
            pltpu.VMEM((heads, tq, dim_head), jnp.float32),   # accumulator
        ],
        compiler_params=pltpu.CompilerParams(
            dimension_semantics=("parallel", "parallel", "arbitrary"),
            vmem_limit_bytes=32 * 1024 * 1024),
    )(qkv, qkv, qkv, mem, w_out_t, b_row)

    return y.reshape(B, C, H, W)               # free reshape back to NCHW


# ---------------------------------------------------------------------------
# Pure-JAX reference (mirrors PyTorch semantics) for verification
# ---------------------------------------------------------------------------
def attention_reference(x, params, *, heads, dim_head):
    B, C, H, W = x.shape
    N = H * W
    hidden = heads * dim_head
    g, w_qkv, mem_kv = params["g"], params["w_qkv"], params["mem_kv"]
    w_out, b_out = params["w_out"], params["b_out"]
    num_mem = mem_kv.shape[2]

    l2 = jnp.sqrt(jnp.sum(x * x, axis=1, keepdims=True))
    xn = x / jnp.maximum(l2, 1e-12) * g.reshape(1, C, 1, 1) * jnp.sqrt(jnp.float32(C))

    tok = jnp.transpose(xn.reshape(B, C, N), (0, 2, 1))          # [B, N, C]
    qkv = tok @ w_qkv.T                                          # [B, N, 3*hidden]
    q, k, v = jnp.split(qkv, 3, axis=-1)
    th = lambda t: jnp.transpose(t.reshape(B, N, heads, dim_head), (0, 2, 1, 3))
    q, k, v = map(th, (q, k, v))
    mk = jnp.broadcast_to(mem_kv[0][None], (B, heads, num_mem, dim_head))
    mv = jnp.broadcast_to(mem_kv[1][None], (B, heads, num_mem, dim_head))
    k = jnp.concatenate([mk, k], axis=2)
    v = jnp.concatenate([mv, v], axis=2)

    scale = dim_head ** -0.5
    s = jnp.einsum("bhid,bhjd->bhij", q, k) * scale
    attn = jax.nn.softmax(s, axis=-1)
    o = jnp.einsum("bhij,bhjd->bhid", attn, v)                   # [B, heads, N, d]
    o = jnp.transpose(o, (0, 2, 1, 3)).reshape(B, N, hidden)
    y = o @ w_out.T + b_out[None, None, :]
    return jnp.transpose(y, (0, 2, 1)).reshape(B, C, H, W)


if __name__ == "__main__":
    # Small shapes consistent with the module: dim=8 channels, heads=4, dim_head=32.
    B, C, H, W = 2, 8, 16, 16
    heads, dim_head, num_mem_kv = 4, 32, 4
    hidden = heads * dim_head

    key = jax.random.PRNGKey(0)
    k_x, k_qkv, k_mem, k_wo, k_bo = jax.random.split(key, 5)

    x = jax.random.normal(k_x, (B, C, H, W), dtype=jnp.float32)
    params = {
        "g": jnp.ones((C,), jnp.float32),                                   # RMSNorm gain
        "w_qkv": 0.1 * jax.random.normal(k_qkv, (3 * hidden, C), jnp.float32),
        "mem_kv": jax.random.normal(k_mem, (2, heads, num_mem_kv, dim_head), jnp.float32),
        "w_out": 0.1 * jax.random.normal(k_wo, (C, hidden), jnp.float32),
        "b_out": 0.01 * jax.random.normal(k_bo, (C,), jnp.float32),
    }

    y_ref = attention_reference(x, params, heads=heads, dim_head=dim_head)

    # Small tiles here so the demo exercises multi-tile online-softmax accumulation
    # (N=256 -> 2 query tiles x 2 KV tiles); production tiles would be 256-1024.
    common = dict(heads=heads, dim_head=dim_head, q_tile=128, kv_tile=128,
                  token_tile=256)

    # f32 compute path: tight check (approx reciprocal accounts for ~1e-3 slack)
    fwd_f32 = jax.jit(functools.partial(attention_forward,
                                        compute_dtype=jnp.float32, **common))
    y32 = jax.block_until_ready(fwd_f32(x, params))
    assert y32.shape == (B, C, H, W)
    np.testing.assert_allclose(np.asarray(y32), np.asarray(y_ref), rtol=2e-3, atol=2e-3)

    # default bf16-MXU path (f32 accumulation / f32 softmax): looser check
    fwd_bf16 = jax.jit(functools.partial(attention_forward, **common))
    y16 = jax.block_until_ready(fwd_bf16(x, params))
    np.testing.assert_allclose(np.asarray(y16), np.asarray(y_ref),
                               rtol=7.5e-2, atol=7.5e-2)

    print("KERNEL_OK")
</pallas_src>

<mosaic_0001>
module attributes {stable_mosaic.version = 11 : i64} {
  func.func @rmsnorm_qkv_kernel(%arg0: i32, %arg1: memref<256x8xf32, #tpu.memory_space<vmem>>, %arg2: memref<1x8xf32, #tpu.memory_space<vmem>>, %arg3: memref<8x384xf32, #tpu.memory_space<vmem>>, %arg4: memref<256x384xf32, #tpu.memory_space<vmem>>) attributes {dimension_semantics = [#tpu.dimension_semantics<parallel>], iteration_bounds = array<i64: 2>, scalar_prefetch = 0 : i64, scratch_operands = 0 : i64, tpu.core_type = #tpu.core_type<tc>, window_params = [{transform_indices = @transform_0, window_bounds = array<i64: 256, 8>}, {pipeline_mode = #tpu.pipeline_mode<synchronous>, transform_indices = @transform_1, window_bounds = array<i64: 1, 8>}, {pipeline_mode = #tpu.pipeline_mode<synchronous>, transform_indices = @transform_2, window_bounds = array<i64: 8, 384>}, {transform_indices = @transform_3, window_bounds = array<i64: 256, 384>}]} {
    %c0 = arith.constant 0 : index
    %c0_0 = arith.constant 0 : index
    %0 = vector.load %arg1[%c0, %c0_0] : memref<256x8xf32, #tpu.memory_space<vmem>>, vector<256x8xf32>
    %1 = arith.mulf %0, %0 : vector<256x8xf32>
    %cst = arith.constant dense<0.000000e+00> : vector<256xf32>
    %2 = vector.multi_reduction <add>, %1, %cst [1] : vector<256x8xf32> to vector<256xf32>
    %3 = vector.shape_cast %2 : vector<256xf32> to vector<256x1xf32>
    %4 = math.sqrt %3 : vector<256x1xf32>
    %cst_1 = arith.constant 9.99999996E-13 : f32
    %5 = vector.broadcast %cst_1 : f32 to vector<256x1xf32>
    %6 = arith.maximumf %4, %5 : vector<256x1xf32>
    %7 = vector.broadcast %6 : vector<256x1xf32> to vector<256x8xf32>
    %8 = arith.divf %0, %7 : vector<256x8xf32>
    %c0_2 = arith.constant 0 : index
    %c0_3 = arith.constant 0 : index
    %9 = vector.load %arg2[%c0_2, %c0_3] : memref<1x8xf32, #tpu.memory_space<vmem>>, vector<1x8xf32>
    %10 = vector.broadcast %9 : vector<1x8xf32> to vector<256x8xf32>
    %11 = arith.mulf %8, %10 : vector<256x8xf32>
    %c0_4 = arith.constant 0 : index
    %c0_5 = arith.constant 0 : index
    %12 = vector.load %arg3[%c0_4, %c0_5] : memref<8x384xf32, #tpu.memory_space<vmem>>, vector<8x384xf32>
    %cst_6 = arith.constant dense<0.000000e+00> : vector<256x384xf32>
    %13 = tpu.matmul %11, %12, %cst_6 {dimension_numbers = #tpu.dot_dimension_numbers<[1], [0], [0], [1], [0, 0, 1, 1], [], []>} : vector<256x8xf32>, vector<8x384xf32>, vector<256x384xf32> -> vector<256x384xf32>
    %c0_7 = arith.constant 0 : index
    %c0_8 = arith.constant 0 : index
    %14 = vector.load %arg4[%c0_7, %c0_8] : memref<256x384xf32, #tpu.memory_space<vmem>>, vector<256x384xf32>
    tpu.vector_store %arg4[%c0_7, %c0_8], %13 {strides = array<i32>} : memref<256x384xf32, #tpu.memory_space<vmem>>, vector<256x384xf32>,
    return
  }
  func.func @transform_0(%arg0: i32) -> (i32, i32) {
    %c0_i32 = arith.constant 0 : i32
    %c0_i32_0 = arith.constant 0 : i32
    return %arg0, %c0_i32 : i32, i32
  }
  func.func @transform_1(%arg0: i32) -> (i32, i32) {
    %c0_i32 = arith.constant 0 : i32
    %c0_i32_0 = arith.constant 0 : i32
    %c0_i32_1 = arith.constant 0 : i32
    return %c0_i32, %c0_i32_0 : i32, i32
  }
  func.func @transform_2(%arg0: i32) -> (i32, i32) {
    %c0_i32 = arith.constant 0 : i32
    %c0_i32_0 = arith.constant 0 : i32
    %c0_i32_1 = arith.constant 0 : i32
    return %c0_i32, %c0_i32_0 : i32, i32
  }
  func.func @transform_3(%arg0: i32) -> (i32, i32) {
    %c0_i32 = arith.constant 0 : i32
    %c0_i32_0 = arith.constant 0 : i32
    return %arg0, %c0_i32 : i32, i32
  }
}

module attributes {stable_mosaic.version = 11 : i64} {
  func.func @attention_kernel(%arg0: i32, %arg1: i32, %arg2: i32, %arg3: memref<1x128x128xf32, #tpu.memory_space<vmem>>, %arg4: memref<1x128x128xf32, #tpu.memory_space<vmem>>, %arg5: memref<1x128x128xf32, #tpu.memory_space<vmem>>, %arg6: memref<2x4x4x32xf32, #tpu.memory_space<vmem>>, %arg7: memref<128x8xf32, #tpu.memory_space<vmem>>, %arg8: memref<1x8xf32, #tpu.memory_space<vmem>>, %arg9: memref<1x8x128xf32, #tpu.memory_space<vmem>>, %arg10: memref<4x128x1xf32, #tpu.memory_space<vmem>>, %arg11: memref<4x128x1xf32, #tpu.memory_space<vmem>>, %arg12: memref<4x128x32xf32, #tpu.memory_space<vmem>>) attributes {dimension_semantics = [#tpu.dimension_semantics<parallel>, #tpu.dimension_semantics<parallel>, #tpu.dimension_semantics<arbitrary>], iteration_bounds = array<i64: 2, 2, 2>, scalar_prefetch = 0 : i64, scratch_operands = 3 : i64, tpu.core_type = #tpu.core_type<tc>, window_params = [{transform_indices = @transform_0, window_bounds = array<i64: 1, 128, 128>}, {transform_indices = @transform_1, window_bounds = array<i64: 1, 128, 128>}, {transform_indices = @transform_2, window_bounds = array<i64: 1, 128, 128>}, {pipeline_mode = #tpu.pipeline_mode<synchronous>, transform_indices = @transform_3, window_bounds = array<i64: 2, 4, 4, 32>}, {pipeline_mode = #tpu.pipeline_mode<synchronous>, transform_indices = @transform_4, window_bounds = array<i64: 128, 8>}, {pipeline_mode = #tpu.pipeline_mode<synchronous>, transform_indices = @transform_5, window_bounds = array<i64: 1, 8>}, {transform_indices = @transform_6, window_bounds = array<i64: 1, 8, 128>}]} {
    %c0_i32 = arith.constant 0 : i32
    %0 = arith.cmpi eq, %arg2, %c0_i32 : i32
    %1 = arith.extui %0 : i1 to i32
    %c0_i32_0 = arith.constant 0 : i32
    %2 = arith.cmpi ne, %1, %c0_i32_0 : i32
    scf.if %2 {
      %c0_118 = arith.constant 0 : index
      %c0_119 = arith.constant 0 : index
      %c0_120 = arith.constant 0 : index
      %158 = vector.load %arg3[%c0_118, %c0_119, %c0_120] : memref<1x128x128xf32, #tpu.memory_space<vmem>>, vector<1x128x32xf32>
      %159 = vector.shape_cast %158 : vector<1x128x32xf32> to vector<128x32xf32>
      %c0_121 = arith.constant 0 : index
      %c0_122 = arith.constant 0 : index
      %c0_123 = arith.constant 0 : index
      %c0_124 = arith.constant 0 : index
      %160 = vector.load %arg6[%c0_121, %c0_122, %c0_123, %c0_124] : memref<2x4x4x32xf32, #tpu.memory_space<vmem>>, vector<1x1x4x32xf32>
      %161 = vector.shape_cast %160 : vector<1x1x4x32xf32> to vector<4x32xf32>
      %c1_125 = arith.constant 1 : index
      %c0_126 = arith.constant 0 : index
      %c0_127 = arith.constant 0 : index
      %c0_128 = arith.constant 0 : index
      %162 = vector.load %arg6[%c1_125, %c0_126, %c0_127, %c0_128] : memref<2x4x4x32xf32, #tpu.memory_space<vmem>>, vector<1x1x4x32xf32>
      %163 = vector.shape_cast %162 : vector<1x1x4x32xf32> to vector<4x32xf32>
      %cst_129 = arith.constant dense<0.000000e+00> : vector<128x4xf32>
      %164 = tpu.matmul %159, %161, %cst_129 {dimension_numbers = #tpu.dot_dimension_numbers<[1], [1], [0], [0], [0, 0, 1, 0], [], []>} : vector<128x32xf32>, vector<4x32xf32>, vector<128x4xf32> -> vector<128x4xf32>
      %cst_130 = arith.constant dense<0xFF800000> : vector<128xf32>
      %165 = vector.multi_reduction <maximumf>, %164, %cst_130 [1] : vector<128x4xf32> to vector<128xf32>
      %166 = vector.shape_cast %165 : vector<128xf32> to vector<128x1xf32>
      %167 = vector.broadcast %166 : vector<128x1xf32> to vector<128x4xf32>
      %168 = arith.subf %164, %167 : vector<128x4xf32>
      %169 = math.exp %168 : vector<128x4xf32>
      %c0_131 = arith.constant 0 : index
      %c0_132 = arith.constant 0 : index
      %c0_133 = arith.constant 0 : index
      %170 = vector.load %arg10[%c0_131, %c0_132, %c0_133] : memref<4x128x1xf32, #tpu.memory_space<vmem>>, vector<1x128x1xf32>
      %171 = vector.shape_cast %170 : vector<1x128x1xf32> to vector<128x1xf32>
      %172 = vector.shape_cast %166 : vector<128x1xf32> to vector<1x128x1xf32>
      tpu.vector_store %arg10[%c0_131, %c0_132, %c0_133], %172 {strides = array<i32>} : memref<4x128x1xf32, #tpu.memory_space<vmem>>, vector<1x128x1xf32>,
      %cst_134 = arith.constant dense<0.000000e+00> : vector<128xf32>
      %173 = vector.multi_reduction <add>, %169, %cst_134 [1] : vector<128x4xf32> to vector<128xf32>
      %174 = vector.shape_cast %173 : vector<128xf32> to vector<128x1xf32>
      %c0_135 = arith.constant 0 : index
      %c0_136 = arith.constant 0 : index
      %c0_137 = arith.constant 0 : index
      %175 = vector.load %arg11[%c0_135, %c0_136, %c0_137] : memref<4x128x1xf32, #tpu.memory_space<vmem>>, vector<1x128x1xf32>
      %176 = vector.shape_cast %175 : vector<1x128x1xf32> to vector<128x1xf32>
      %177 = vector.shape_cast %174 : vector<128x1xf32> to vector<1x128x1xf32>
      tpu.vector_store %arg11[%c0_135, %c0_136, %c0_137], %177 {strides = array<i32>} : memref<4x128x1xf32, #tpu.memory_space<vmem>>, vector<1x128x1xf32>,
      %cst_138 = arith.constant dense<0.000000e+00> : vector<128x32xf32>
      %178 = tpu.matmul %169, %163, %cst_138 {dimension_numbers = #tpu.dot_dimension_numbers<[1], [0], [0], [1], [0, 0, 1, 1], [], []>} : vector<128x4xf32>, vector<4x32xf32>, vector<128x32xf32> -> vector<128x32xf32>
      %c0_139 = arith.constant 0 : index
      %c0_140 = arith.constant 0 : index
      %c0_141 = arith.constant 0 : index
      %179 = vector.load %arg12[%c0_139, %c0_140, %c0_141] : memref<4x128x32xf32, #tpu.memory_space<vmem>>, vector<1x128x32xf32>
      %180 = vector.shape_cast %179 : vector<1x128x32xf32> to vector<128x32xf32>
      %181 = vector.shape_cast %178 : vector<128x32xf32> to vector<1x128x32xf32>
      tpu.vector_store %arg12[%c0_139, %c0_140, %c0_141], %181 {strides = array<i32>} : memref<4x128x32xf32, #tpu.memory_space<vmem>>, vector<1x128x32xf32>,
      %c0_142 = arith.constant 0 : index
      %c0_143 = arith.constant 0 : index
      %c32_144 = arith.constant 32 : index
      %182 = vector.load %arg3[%c0_142, %c0_143, %c32_144] : memref<1x128x128xf32, #tpu.memory_space<vmem>>, vector<1x128x32xf32>
      %183 = vector.shape_cast %182 : vector<1x128x32xf32> to vector<128x32xf32>
      %c0_145 = arith.constant 0 : index
      %c1_146 = arith.constant 1 : index
      %c0_147 = arith.constant 0 : index
      %c0_148 = arith.constant 0 : index
      %184 = vector.load %arg6[%c0_145, %c1_146, %c0_147, %c0_148] : memref<2x4x4x32xf32, #tpu.memory_space<vmem>>, vector<1x1x4x32xf32>
      %185 = vector.shape_cast %184 : vector<1x1x4x32xf32> to vector<4x32xf32>
      %c1_149 = arith.constant 1 : index
      %c1_150 = arith.constant 1 : index
      %c0_151 = arith.constant 0 : index
      %c0_152 = arith.constant 0 : index
      %186 = vector.load %arg6[%c1_149, %c1_150, %c0_151, %c0_152] : memref<2x4x4x32xf32, #tpu.memory_space<vmem>>, vector<1x1x4x32xf32>
      %187 = vector.shape_cast %186 : vector<1x1x4x32xf32> to vector<4x32xf32>
      %cst_153 = arith.constant dense<0.000000e+00> : vector<128x4xf32>
      %188 = tpu.matmul %183, %185, %cst_153 {dimension_numbers = #tpu.dot_dimension_numbers<[1], [1], [0], [0], [0, 0, 1, 0], [], []>} : vector<128x32xf32>, vector<4x32xf32>, vector<128x4xf32> -> vector<128x4xf32>
      %cst_154 = arith.constant dense<0xFF800000> : vector<128xf32>
      %189 = vector.multi_reduction <maximumf>, %188, %cst_154 [1] : vector<128x4xf32> to vector<128xf32>
      %190 = vector.shape_cast %189 : vector<128xf32> to vector<128x1xf32>
      %191 = vector.broadcast %190 : vector<128x1xf32> to vector<128x4xf32>
      %192 = arith.subf %188, %191 : vector<128x4xf32>
      %193 = math.exp %192 : vector<128x4xf32>
      %c1_155 = arith.constant 1 : index
      %c0_156 = arith.constant 0 : index
      %c0_157 = arith.constant 0 : index
      %194 = vector.load %arg10[%c1_155, %c0_156, %c0_157] : memref<4x128x1xf32, #tpu.memory_space<vmem>>, vector<1x128x1xf32>
      %195 = vector.shape_cast %194 : vector<1x128x1xf32> to vector<128x1xf32>
      %196 = vector.shape_cast %190 : vector<128x1xf32> to vector<1x128x1xf32>
      tpu.vector_store %arg10[%c1_155, %c0_156, %c0_157], %196 {strides = array<i32>} : memref<4x128x1xf32, #tpu.memory_space<vmem>>, vector<1x128x1xf32>,
      %cst_158 = arith.constant dense<0.000000e+00> : vector<128xf32>
      %197 = vector.multi_reduction <add>, %193, %cst_158 [1] : vector<128x4xf32> to vector<128xf32>
      %198 = vector.shape_cast %197 : vector<128xf32> to vector<128x1xf32>
      %c1_159 = arith.constant 1 : index
      %c0_160 = arith.constant 0 : index
      %c0_161 = arith.constant 0 : index
      %199 = vector.load %arg11[%c1_159, %c0_160, %c0_161] : memref<4x128x1xf32, #tpu.memory_space<vmem>>, vector<1x128x1xf32>
      %200 = vector.shape_cast %199 : vector<1x128x1xf32> to vector<128x1xf32>
      %201 = vector.shape_cast %198 : vector<128x1xf32> to vector<1x128x1xf32>
      tpu.vector_store %arg11[%c1_159, %c0_160, %c0_161], %201 {strides = array<i32>} : memref<4x128x1xf32, #tpu.memory_space<vmem>>, vector<1x128x1xf32>,
      %cst_162 = arith.constant dense<0.000000e+00> : vector<128x32xf32>
      %202 = tpu.matmul %193, %187, %cst_162 {dimension_numbers = #tpu.dot_dimension_numbers<[1], [0], [0], [1], [0, 0, 1, 1], [], []>} : vector<128x4xf32>, vector<4x32xf32>, vector<128x32xf32> -> vector<128x32xf32>
      %c1_163 = arith.constant 1 : index
      %c0_164 = arith.constant 0 : index
      %c0_165 = arith.constant 0 : index
      %203 = vector.load %arg12[%c1_163, %c0_164, %c0_165] : memref<4x128x32xf32, #tpu.memory_space<vmem>>, vector<1x128x32xf32>
      %204 = vector.shape_cast %203 : vector<1x128x32xf32> to vector<128x32xf32>
      %205 = vector.shape_cast %202 : vector<128x32xf32> to vector<1x128x32xf32>
      tpu.vector_store %arg12[%c1_163, %c0_164, %c0_165], %205 {strides = array<i32>} : memref<4x128x32xf32, #tpu.memory_space<vmem>>, vector<1x128x32xf32>,
      %c0_166 = arith.constant 0 : index
      %c0_167 = arith.constant 0 : index
      %c64_168 = arith.constant 64 : index
      %206 = vector.load %arg3[%c0_166, %c0_167, %c64_168] : memref<1x128x128xf32, #tpu.memory_space<vmem>>, vector<1x128x32xf32>
      %207 = vector.shape_cast %206 : vector<1x128x32xf32> to vector<128x32xf32>
      %c0_169 = arith.constant 0 : index
      %c2_170 = arith.constant 2 : index
      %c0_171 = arith.constant 0 : index
      %c0_172 = arith.constant 0 : index
      %208 = vector.load %arg6[%c0_169, %c2_170, %c0_171, %c0_172] : memref<2x4x4x32xf32, #tpu.memory_space<vmem>>, vector<1x1x4x32xf32>
      %209 = vector.shape_cast %208 : vector<1x1x4x32xf32> to vector<4x32xf32>
      %c1_173 = arith.constant 1 : index
      %c2_174 = arith.constant 2 : index
      %c0_175 = arith.constant 0 : index
      %c0_176 = arith.constant 0 : index
      %210 = vector.load %arg6[%c1_173, %c2_174, %c0_175, %c0_176] : memref<2x4x4x32xf32, #tpu.memory_space<vmem>>, vector<1x1x4x32xf32>
      %211 = vector.shape_cast %210 : vector<1x1x4x32xf32> to vector<4x32xf32>
      %cst_177 = arith.constant dense<0.000000e+00> : vector<128x4xf32>
      %212 = tpu.matmul %207, %209, %cst_177 {dimension_numbers = #tpu.dot_dimension_numbers<[1], [1], [0], [0], [0, 0, 1, 0], [], []>} : vector<128x32xf32>, vector<4x32xf32>, vector<128x4xf32> -> vector<128x4xf32>
      %cst_178 = arith.constant dense<0xFF800000> : vector<128xf32>
      %213 = vector.multi_reduction <maximumf>, %212, %cst_178 [1] : vector<128x4xf32> to vector<128xf32>
      %214 = vector.shape_cast %213 : vector<128xf32> to vector<128x1xf32>
      %215 = vector.broadcast %214 : vector<128x1xf32> to vector<128x4xf32>
      %216 = arith.subf %212, %215 : vector<128x4xf32>
      %217 = math.exp %216 : vector<128x4xf32>
      %c2_179 = arith.constant 2 : index
      %c0_180 = arith.constant 0 : index
      %c0_181 = arith.constant 0 : index
      %218 = vector.load %arg10[%c2_179, %c0_180, %c0_181] : memref<4x128x1xf32, #tpu.memory_space<vmem>>, vector<1x128x1xf32>
      %219 = vector.shape_cast %218 : vector<1x128x1xf32> to vector<128x1xf32>
      %220 = vector.shape_cast %214 : vector<128x1xf32> to vector<1x128x1xf32>
      tpu.vector_store %arg10[%c2_179, %c0_180, %c0_181], %220 {strides = array<i32>} : memref<4x128x1xf32, #tpu.memory_space<vmem>>, vector<1x128x1xf32>,
      %cst_182 = arith.constant dense<0.000000e+00> : vector<128xf32>
      %221 = vector.multi_reduction <add>, %217, %cst_182 [1] : vector<128x4xf32> to vector<128xf32>
      %222 = vector.shape_cast %221 : vector<128xf32> to vector<128x1xf32>
      %c2_183 = arith.constant 2 : index
      %c0_184 = arith.constant 0 : index
      %c0_185 = arith.constant 0 : index
      %223 = vector.load %arg11[%c2_183, %c0_184, %c0_185] : memref<4x128x1xf32, #tpu.memory_space<vmem>>, vector<1x128x1xf32>
      %224 = vector.shape_cast %223 : vector<1x128x1xf32> to vector<128x1xf32>
      %225 = vector.shape_cast %222 : vector<128x1xf32> to vector<1x128x1xf32>
      tpu.vector_store %arg11[%c2_183, %c0_184, %c0_185], %225 {strides = array<i32>} : memref<4x128x1xf32, #tpu.memory_space<vmem>>, vector<1x128x1xf32>,
      %cst_186 = arith.constant dense<0.000000e+00> : vector<128x32xf32>
      %226 = tpu.matmul %217, %211, %cst_186 {dimension_numbers = #tpu.dot_dimension_numbers<[1], [0], [0], [1], [0, 0, 1, 1], [], []>} : vector<128x4xf32>, vector<4x32xf32>, vector<128x32xf32> -> vector<128x32xf32>
      %c2_187 = arith.constant 2 : index
      %c0_188 = arith.constant 0 : index
      %c0_189 = arith.constant 0 : index
      %227 = vector.load %arg12[%c2_187, %c0_188, %c0_189] : memref<4x128x32xf32, #tpu.memory_space<vmem>>, vector<1x128x32xf32>
      %228 = vector.shape_cast %227 : vector<1x128x32xf32> to vector<128x32xf32>
      %229 = vector.shape_cast %226 : vector<128x32xf32> to vector<1x128x32xf32>
      tpu.vector_store %arg12[%c2_187, %c0_188, %c0_189], %229 {strides = array<i32>} : memref<4x128x32xf32, #tpu.memory_space<vmem>>, vector<1x128x32xf32>,
      %c0_190 = arith.constant 0 : index
      %c0_191 = arith.constant 0 : index
      %c96_192 = arith.constant 96 : index
      %230 = vector.load %arg3[%c0_190, %c0_191, %c96_192] : memref<1x128x128xf32, #tpu.memory_space<vmem>>, vector<1x128x32xf32>
      %231 = vector.shape_cast %230 : vector<1x128x32xf32> to vector<128x32xf32>
      %c0_193 = arith.constant 0 : index
      %c3_194 = arith.constant 3 : index
      %c0_195 = arith.constant 0 : index
      %c0_196 = arith.constant 0 : index
      %232 = vector.load %arg6[%c0_193, %c3_194, %c0_195, %c0_196] : memref<2x4x4x32xf32, #tpu.memory_space<vmem>>, vector<1x1x4x32xf32>
      %233 = vector.shape_cast %232 : vector<1x1x4x32xf32> to vector<4x32xf32>
      %c1_197 = arith.constant 1 : index
      %c3_198 = arith.constant 3 : index
      %c0_199 = arith.constant 0 : index
      %c0_200 = arith.constant 0 : index
      %234 = vector.load %arg6[%c1_197, %c3_198, %c0_199, %c0_200] : memref<2x4x4x32xf32, #tpu.memory_space<vmem>>, vector<1x1x4x32xf32>
      %235 = vector.shape_cast %234 : vector<1x1x4x32xf32> to vector<4x32xf32>
      %cst_201 = arith.constant dense<0.000000e+00> : vector<128x4xf32>
      %236 = tpu.matmul %231, %233, %cst_201 {dimension_numbers = #tpu.dot_dimension_numbers<[1], [1], [0], [0], [0, 0, 1, 0], [], []>} : vector<128x32xf32>, vector<4x32xf32>, vector<128x4xf32> -> vector<128x4xf32>
      %cst_202 = arith.constant dense<0xFF800000> : vector<128xf32>
      %237 = vector.multi_reduction <maximumf>, %236, %cst_202 [1] : vector<128x4xf32> to vector<128xf32>
      %238 = vector.shape_cast %237 : vector<128xf32> to vector<128x1xf32>
      %239 = vector.broadcast %238 : vector<128x1xf32> to vector<128x4xf32>
      %240 = arith.subf %236, %239 : vector<128x4xf32>
      %241 = math.exp %240 : vector<128x4xf32>
      %c3_203 = arith.constant 3 : index
      %c0_204 = arith.constant 0 : index
      %c0_205 = arith.constant 0 : index
      %242 = vector.load %arg10[%c3_203, %c0_204, %c0_205] : memref<4x128x1xf32, #tpu.memory_space<vmem>>, vector<1x128x1xf32>
      %243 = vector.shape_cast %242 : vector<1x128x1xf32> to vector<128x1xf32>
      %244 = vector.shape_cast %238 : vector<128x1xf32> to vector<1x128x1xf32>
      tpu.vector_store %arg10[%c3_203, %c0_204, %c0_205], %244 {strides = array<i32>} : memref<4x128x1xf32, #tpu.memory_space<vmem>>, vector<1x128x1xf32>,
      %cst_206 = arith.constant dense<0.000000e+00> : vector<128xf32>
      %245 = vector.multi_reduction <add>, %241, %cst_206 [1] : vector<128x4xf32> to vector<128xf32>
      %246 = vector.shape_cast %245 : vector<128xf32> to vector<128x1xf32>
      %c3_207 = arith.constant 3 : index
      %c0_208 = arith.constant 0 : index
      %c0_209 = arith.constant 0 : index
      %247 = vector.load %arg11[%c3_207, %c0_208, %c0_209] : memref<4x128x1xf32, #tpu.memory_space<vmem>>, vector<1x128x1xf32>
      %248 = vector.shape_cast %247 : vector<1x128x1xf32> to vector<128x1xf32>
      %249 = vector.shape_cast %246 : vector<128x1xf32> to vector<1x128x1xf32>
      tpu.vector_store %arg11[%c3_207, %c0_208, %c0_209], %249 {strides = array<i32>} : memref<4x128x1xf32, #tpu.memory_space<vmem>>, vector<1x128x1xf32>,
      %cst_210 = arith.constant dense<0.000000e+00> : vector<128x32xf32>
      %250 = tpu.matmul %241, %235, %cst_210 {dimension_numbers = #tpu.dot_dimension_numbers<[1], [0], [0], [1], [0, 0, 1, 1], [], []>} : vector<128x4xf32>, vector<4x32xf32>, vector<128x32xf32> -> vector<128x32xf32>
      %c3_211 = arith.constant 3 : index
      %c0_212 = arith.constant 0 : index
      %c0_213 = arith.constant 0 : index
      %251 = vector.load %arg12[%c3_211, %c0_212, %c0_213] : memref<4x128x32xf32, #tpu.memory_space<vmem>>, vector<1x128x32xf32>
      %252 = vector.shape_cast %251 : vector<1x128x32xf32> to vector<128x32xf32>
      %253 = vector.shape_cast %250 : vector<128x32xf32> to vector<1x128x32xf32>
      tpu.vector_store %arg12[%c3_211, %c0_212, %c0_213], %253 {strides = array<i32>} : memref<4x128x32xf32, #tpu.memory_space<vmem>>, vector<1x128x32xf32>,
    } else {
    }
    %c0 = arith.constant 0 : index
    %c0_1 = arith.constant 0 : index
    %c0_2 = arith.constant 0 : index
    %3 = vector.load %arg3[%c0, %c0_1, %c0_2] : memref<1x128x128xf32, #tpu.memory_space<vmem>>, vector<1x128x32xf32>
    %4 = vector.shape_cast %3 : vector<1x128x32xf32> to vector<128x32xf32>
    %c0_3 = arith.constant 0 : index
    %c0_4 = arith.constant 0 : index
    %c0_5 = arith.constant 0 : index
    %5 = vector.load %arg4[%c0_3, %c0_4, %c0_5] : memref<1x128x128xf32, #tpu.memory_space<vmem>>, vector<1x128x32xf32>
    %6 = vector.shape_cast %5 : vector<1x128x32xf32> to vector<128x32xf32>
    %c0_6 = arith.constant 0 : index
    %c0_7 = arith.constant 0 : index
    %c0_8 = arith.constant 0 : index
    %7 = vector.load %arg5[%c0_6, %c0_7, %c0_8] : memref<1x128x128xf32, #tpu.memory_space<vmem>>, vector<1x128x32xf32>
    %8 = vector.shape_cast %7 : vector<1x128x32xf32> to vector<128x32xf32>
    %cst = arith.constant dense<0.000000e+00> : vector<128x128xf32>
    %9 = tpu.matmul %4, %6, %cst {dimension_numbers = #tpu.dot_dimension_numbers<[1], [1], [0], [0], [0, 0, 1, 0], [], []>} : vector<128x32xf32>, vector<128x32xf32>, vector<128x128xf32> -> vector<128x128xf32>
    %c0_9 = arith.constant 0 : index
    %c0_10 = arith.constant 0 : index
    %c0_11 = arith.constant 0 : index
    %10 = vector.load %arg10[%c0_9, %c0_10, %c0_11] : memref<4x128x1xf32, #tpu.memory_space<vmem>>, vector<1x128x1xf32>
    %11 = vector.shape_cast %10 : vector<1x128x1xf32> to vector<128x1xf32>
    %cst_12 = arith.constant dense<0xFF800000> : vector<128xf32>
    %12 = vector.multi_reduction <maximumf>, %9, %cst_12 [1] : vector<128x128xf32> to vector<128xf32>
    %13 = vector.shape_cast %12 : vector<128xf32> to vector<128x1xf32>
    %14 = arith.maximumf %11, %13 : vector<128x1xf32>
    %15 = arith.subf %11, %14 : vector<128x1xf32>
    %16 = math.exp %15 : vector<128x1xf32>
    %17 = vector.broadcast %14 : vector<128x1xf32> to vector<128x128xf32>
    %18 = arith.subf %9, %17 : vector<128x128xf32>
    %19 = math.exp %18 : vector<128x128xf32>
    %c0_13 = arith.constant 0 : index
    %c0_14 = arith.constant 0 : index
    %c0_15 = arith.constant 0 : index
    %20 = vector.load %arg11[%c0_13, %c0_14, %c0_15] : memref<4x128x1xf32, #tpu.memory_space<vmem>>, vector<1x128x1xf32>
    %21 = vector.shape_cast %20 : vector<1x128x1xf32> to vector<128x1xf32>
    %22 = arith.mulf %16, %21 : vector<128x1xf32>
    %cst_16 = arith.constant dense<0.000000e+00> : vector<128xf32>
    %23 = vector.multi_reduction <add>, %19, %cst_16 [1] : vector<128x128xf32> to vector<128xf32>
    %24 = vector.shape_cast %23 : vector<128xf32> to vector<128x1xf32>
    %25 = arith.addf %22, %24 : vector<128x1xf32>
    %c0_17 = arith.constant 0 : index
    %c0_18 = arith.constant 0 : index
    %c0_19 = arith.constant 0 : index
    %26 = vector.load %arg11[%c0_17, %c0_18, %c0_19] : memref<4x128x1xf32, #tpu.memory_space<vmem>>, vector<1x128x1xf32>
    %27 = vector.shape_cast %26 : vector<1x128x1xf32> to vector<128x1xf32>
    %28 = vector.shape_cast %25 : vector<128x1xf32> to vector<1x128x1xf32>
    tpu.vector_store %arg11[%c0_17, %c0_18, %c0_19], %28 {strides = array<i32>} : memref<4x128x1xf32, #tpu.memory_space<vmem>>, vector<1x128x1xf32>,
    %c0_20 = arith.constant 0 : index
    %c0_21 = arith.constant 0 : index
    %c0_22 = arith.constant 0 : index
    %29 = vector.load %arg12[%c0_20, %c0_21, %c0_22] : memref<4x128x32xf32, #tpu.memory_space<vmem>>, vector<1x128x32xf32>
    %30 = vector.shape_cast %29 : vector<1x128x32xf32> to vector<128x32xf32>
    %31 = vector.broadcast %16 : vector<128x1xf32> to vector<128x32xf32>
    %32 = arith.mulf %31, %30 : vector<128x32xf32>
    %cst_23 = arith.constant dense<0.000000e+00> : vector<128x32xf32>
    %33 = tpu.matmul %19, %8, %cst_23 {dimension_numbers = #tpu.dot_dimension_numbers<[1], [0], [0], [1], [0, 0, 1, 1], [], []>} : vector<128x128xf32>, vector<128x32xf32>, vector<128x32xf32> -> vector<128x32xf32>
    %34 = arith.addf %32, %33 : vector<128x32xf32>
    %c0_24 = arith.constant 0 : index
    %c0_25 = arith.constant 0 : index
    %c0_26 = arith.constant 0 : index
    %35 = vector.load %arg12[%c0_24, %c0_25, %c0_26] : memref<4x128x32xf32, #tpu.memory_space<vmem>>, vector<1x128x32xf32>
    %36 = vector.shape_cast %35 : vector<1x128x32xf32> to vector<128x32xf32>
    %37 = vector.shape_cast %34 : vector<128x32xf32> to vector<1x128x32xf32>
    tpu.vector_store %arg12[%c0_24, %c0_25, %c0_26], %37 {strides = array<i32>} : memref<4x128x32xf32, #tpu.memory_space<vmem>>, vector<1x128x32xf32>,
    %c0_27 = arith.constant 0 : index
    %c0_28 = arith.constant 0 : index
    %c0_29 = arith.constant 0 : index
    %38 = vector.load %arg10[%c0_27, %c0_28, %c0_29] : memref<4x128x1xf32, #tpu.memory_space<vmem>>, vector<1x128x1xf32>
    %39 = vector.shape_cast %38 : vector<1x128x1xf32> to vector<128x1xf32>
    %40 = vector.shape_cast %14 : vector<128x1xf32> to vector<1x128x1xf32>
    tpu.vector_store %arg10[%c0_27, %c0_28, %c0_29], %40 {strides = array<i32>} : memref<4x128x1xf32, #tpu.memory_space<vmem>>, vector<1x128x1xf32>,
    %c0_30 = arith.constant 0 : index
    %c0_31 = arith.constant 0 : index
    %c32 = arith.constant 32 : index
    %41 = vector.load %arg3[%c0_30, %c0_31, %c32] : memref<1x128x128xf32, #tpu.memory_space<vmem>>, vector<1x128x32xf32>
    %42 = vector.shape_cast %41 : vector<1x128x32xf32> to vector<128x32xf32>
    %c0_32 = arith.constant 0 : index
    %c0_33 = arith.constant 0 : index
    %c32_34 = arith.constant 32 : index
    %43 = vector.load %arg4[%c0_32, %c0_33, %c32_34] : memref<1x128x128xf32, #tpu.memory_space<vmem>>, vector<1x128x32xf32>
    %44 = vector.shape_cast %43 : vector<1x128x32xf32> to vector<128x32xf32>
    %c0_35 = arith.constant 0 : index
    %c0_36 = arith.constant 0 : index
    %c32_37 = arith.constant 32 : index
    %45 = vector.load %arg5[%c0_35, %c0_36, %c32_37] : memref<1x128x128xf32, #tpu.memory_space<vmem>>, vector<1x128x32xf32>
    %46 = vector.shape_cast %45 : vector<1x128x32xf32> to vector<128x32xf32>
    %cst_38 = arith.constant dense<0.000000e+00> : vector<128x128xf32>
    %47 = tpu.matmul %42, %44, %cst_38 {dimension_numbers = #tpu.dot_dimension_numbers<[1], [1], [0], [0], [0, 0, 1, 0], [], []>} : vector<128x32xf32>, vector<128x32xf32>, vector<128x128xf32> -> vector<128x128xf32>
    %c1 = arith.constant 1 : index
    %c0_39 = arith.constant 0 : index
    %c0_40 = arith.constant 0 : index
    %48 = vector.load %arg10[%c1, %c0_39, %c0_40] : memref<4x128x1xf32, #tpu.memory_space<vmem>>, vector<1x128x1xf32>
    %49 = vector.shape_cast %48 : vector<1x128x1xf32> to vector<128x1xf32>
    %cst_41 = arith.constant dense<0xFF800000> : vector<128xf32>
    %50 = vector.multi_reduction <maximumf>, %47, %cst_41 [1] : vector<128x128xf32> to vector<128xf32>
    %51 = vector.shape_cast %50 : vector<128xf32> to vector<128x1xf32>
    %52 = arith.maximumf %49, %51 : vector<128x1xf32>
    %53 = arith.subf %49, %52 : vector<128x1xf32>
    %54 = math.exp %53 : vector<128x1xf32>
    %55 = vector.broadcast %52 : vector<128x1xf32> to vector<128x128xf32>
    %56 = arith.subf %47, %55 : vector<128x128xf32>
    %57 = math.exp %56 : vector<128x128xf32>
    %c1_42 = arith.constant 1 : index
    %c0_43 = arith.constant 0 : index
    %c0_44 = arith.constant 0 : index
    %58 = vector.load %arg11[%c1_42, %c0_43, %c0_44] : memref<4x128x1xf32, #tpu.memory_space<vmem>>, vector<1x128x1xf32>
    %59 = vector.shape_cast %58 : vector<1x128x1xf32> to vector<128x1xf32>
    %60 = arith.mulf %54, %59 : vector<128x1xf32>
    %cst_45 = arith.constant dense<0.000000e+00> : vector<128xf32>
    %61 = vector.multi_reduction <add>, %57, %cst_45 [1] : vector<128x128xf32> to vector<128xf32>
    %62 = vector.shape_cast %61 : vector<128xf32> to vector<128x1xf32>
    %63 = arith.addf %60, %62 : vector<128x1xf32>
    %c1_46 = arith.constant 1 : index
    %c0_47 = arith.constant 0 : index
    %c0_48 = arith.constant 0 : index
    %64 = vector.load %arg11[%c1_46, %c0_47, %c0_48] : memref<4x128x1xf32, #tpu.memory_space<vmem>>, vector<1x128x1xf32>
    %65 = vector.shape_cast %64 : vector<1x128x1xf32> to vector<128x1xf32>
    %66 = vector.shape_cast %63 : vector<128x1xf32> to vector<1x128x1xf32>
    tpu.vector_store %arg11[%c1_46, %c0_47, %c0_48], %66 {strides = array<i32>} : memref<4x128x1xf32, #tpu.memory_space<vmem>>, vector<1x128x1xf32>,
    %c1_49 = arith.constant 1 : index
    %c0_50 = arith.constant 0 : index
    %c0_51 = arith.constant 0 : index
    %67 = vector.load %arg12[%c1_49, %c0_50, %c0_51] : memref<4x128x32xf32, #tpu.memory_space<vmem>>, vector<1x128x32xf32>
    %68 = vector.shape_cast %67 : vector<1x128x32xf32> to vector<128x32xf32>
    %69 = vector.broadcast %54 : vector<128x1xf32> to vector<128x32xf32>
    %70 = arith.mulf %69, %68 : vector<128x32xf32>
    %cst_52 = arith.constant dense<0.000000e+00> : vector<128x32xf32>
    %71 = tpu.matmul %57, %46, %cst_52 {dimension_numbers = #tpu.dot_dimension_numbers<[1], [0], [0], [1], [0, 0, 1, 1], [], []>} : vector<128x128xf32>, vector<128x32xf32>, vector<128x32xf32> -> vector<128x32xf32>
    %72 = arith.addf %70, %71 : vector<128x32xf32>
    %c1_53 = arith.constant 1 : index
    %c0_54 = arith.constant 0 : index
    %c0_55 = arith.constant 0 : index
    %73 = vector.load %arg12[%c1_53, %c0_54, %c0_55] : memref<4x128x32xf32, #tpu.memory_space<vmem>>, vector<1x128x32xf32>
    %74 = vector.shape_cast %73 : vector<1x128x32xf32> to vector<128x32xf32>
    %75 = vector.shape_cast %72 : vector<128x32xf32> to vector<1x128x32xf32>
    tpu.vector_store %arg12[%c1_53, %c0_54, %c0_55], %75 {strides = array<i32>} : memref<4x128x32xf32, #tpu.memory_space<vmem>>, vector<1x128x32xf32>,
    %c1_56 = arith.constant 1 : index
    %c0_57 = arith.constant 0 : index
    %c0_58 = arith.constant 0 : index
    %76 = vector.load %arg10[%c1_56, %c0_57, %c0_58] : memref<4x128x1xf32, #tpu.memory_space<vmem>>, vector<1x128x1xf32>
    %77 = vector.shape_cast %76 : vector<1x128x1xf32> to vector<128x1xf32>
    %78 = vector.shape_cast %52 : vector<128x1xf32> to vector<1x128x1xf32>
    tpu.vector_store %arg10[%c1_56, %c0_57, %c0_58], %78 {strides = array<i32>} : memref<4x128x1xf32, #tpu.memory_space<vmem>>, vector<1x128x1xf32>,
    %c0_59 = arith.constant 0 : index
    %c0_60 = arith.constant 0 : index
    %c64 = arith.constant 64 : index
    %79 = vector.load %arg3[%c0_59, %c0_60, %c64] : memref<1x128x128xf32, #tpu.memory_space<vmem>>, vector<1x128x32xf32>
    %80 = vector.shape_cast %79 : vector<1x128x32xf32> to vector<128x32xf32>
    %c0_61 = arith.constant 0 : index
    %c0_62 = arith.constant 0 : index
    %c64_63 = arith.constant 64 : index
    %81 = vector.load %arg4[%c0_61, %c0_62, %c64_63] : memref<1x128x128xf32, #tpu.memory_space<vmem>>, vector<1x128x32xf32>
    %82 = vector.shape_cast %81 : vector<1x128x32xf32> to vector<128x32xf32>
    %c0_64 = arith.constant 0 : index
    %c0_65 = arith.constant 0 : index
    %c64_66 = arith.constant 64 : index
    %83 = vector.load %arg5[%c0_64, %c0_65, %c64_66] : memref<1x128x128xf32, #tpu.memory_space<vmem>>, vector<1x128x32xf32>
    %84 = vector.shape_cast %83 : vector<1x128x32xf32> to vector<128x32xf32>
    %cst_67 = arith.constant dense<0.000000e+00> : vector<128x128xf32>
    %85 = tpu.matmul %80, %82, %cst_67 {dimension_numbers = #tpu.dot_dimension_numbers<[1], [1], [0], [0], [0, 0, 1, 0], [], []>} : vector<128x32xf32>, vector<128x32xf32>, vector<128x128xf32> -> vector<128x128xf32>
    %c2 = arith.constant 2 : index
    %c0_68 = arith.constant 0 : index
    %c0_69 = arith.constant 0 : index
    %86 = vector.load %arg10[%c2, %c0_68, %c0_69] : memref<4x128x1xf32, #tpu.memory_space<vmem>>, vector<1x128x1xf32>
    %87 = vector.shape_cast %86 : vector<1x128x1xf32> to vector<128x1xf32>
    %cst_70 = arith.constant dense<0xFF800000> : vector<128xf32>
    %88 = vector.multi_reduction <maximumf>, %85, %cst_70 [1] : vector<128x128xf32> to vector<128xf32>
    %89 = vector.shape_cast %88 : vector<128xf32> to vector<128x1xf32>
    %90 = arith.maximumf %87, %89 : vector<128x1xf32>
    %91 = arith.subf %87, %90 : vector<128x1xf32>
    %92 = math.exp %91 : vector<128x1xf32>
    %93 = vector.broadcast %90 : vector<128x1xf32> to vector<128x128xf32>
    %94 = arith.subf %85, %93 : vector<128x128xf32>
    %95 = math.exp %94 : vector<128x128xf32>
    %c2_71 = arith.constant 2 : index
    %c0_72 = arith.constant 0 : index
    %c0_73 = arith.constant 0 : index
    %96 = vector.load %arg11[%c2_71, %c0_72, %c0_73] : memref<4x128x1xf32, #tpu.memory_space<vmem>>, vector<1x128x1xf32>
    %97 = vector.shape_cast %96 : vector<1x128x1xf32> to vector<128x1xf32>
    %98 = arith.mulf %92, %97 : vector<128x1xf32>
    %cst_74 = arith.constant dense<0.000000e+00> : vector<128xf32>
    %99 = vector.multi_reduction <add>, %95, %cst_74 [1] : vector<128x128xf32> to vector<128xf32>
    %100 = vector.shape_cast %99 : vector<128xf32> to vector<128x1xf32>
    %101 = arith.addf %98, %100 : vector<128x1xf32>
    %c2_75 = arith.constant 2 : index
    %c0_76 = arith.constant 0 : index
    %c0_77 = arith.constant 0 : index
    %102 = vector.load %arg11[%c2_75, %c0_76, %c0_77] : memref<4x128x1xf32, #tpu.memory_space<vmem>>, vector<1x128x1xf32>
    %103 = vector.shape_cast %102 : vector<1x128x1xf32> to vector<128x1xf32>
    %104 = vector.shape_cast %101 : vector<128x1xf32> to vector<1x128x1xf32>
    tpu.vector_store %arg11[%c2_75, %c0_76, %c0_77], %104 {strides = array<i32>} : memref<4x128x1xf32, #tpu.memory_space<vmem>>, vector<1x128x1xf32>,
    %c2_78 = arith.constant 2 : index
    %c0_79 = arith.constant 0 : index
    %c0_80 = arith.constant 0 : index
    %105 = vector.load %arg12[%c2_78, %c0_79, %c0_80] : memref<4x128x32xf32, #tpu.memory_space<vmem>>, vector<1x128x32xf32>
    %106 = vector.shape_cast %105 : vector<1x128x32xf32> to vector<128x32xf32>
    %107 = vector.broadcast %92 : vector<128x1xf32> to vector<128x32xf32>
    %108 = arith.mulf %107, %106 : vector<128x32xf32>
    %cst_81 = arith.constant dense<0.000000e+00> : vector<128x32xf32>
    %109 = tpu.matmul %95, %84, %cst_81 {dimension_numbers = #tpu.dot_dimension_numbers<[1], [0], [0], [1], [0, 0, 1, 1], [], []>} : vector<128x128xf32>, vector<128x32xf32>, vector<128x32xf32> -> vector<128x32xf32>
    %110 = arith.addf %108, %109 : vector<128x32xf32>
    %c2_82 = arith.constant 2 : index
    %c0_83 = arith.constant 0 : index
    %c0_84 = arith.constant 0 : index
    %111 = vector.load %arg12[%c2_82, %c0_83, %c0_84] : memref<4x128x32xf32, #tpu.memory_space<vmem>>, vector<1x128x32xf32>
    %112 = vector.shape_cast %111 : vector<1x128x32xf32> to vector<128x32xf32>
    %113 = vector.shape_cast %110 : vector<128x32xf32> to vector<1x128x32xf32>
    tpu.vector_store %arg12[%c2_82, %c0_83, %c0_84], %113 {strides = array<i32>} : memref<4x128x32xf32, #tpu.memory_space<vmem>>, vector<1x128x32xf32>,
    %c2_85 = arith.constant 2 : index
    %c0_86 = arith.constant 0 : index
    %c0_87 = arith.constant 0 : index
    %114 = vector.load %arg10[%c2_85, %c0_86, %c0_87] : memref<4x128x1xf32, #tpu.memory_space<vmem>>, vector<1x128x1xf32>
    %115 = vector.shape_cast %114 : vector<1x128x1xf32> to vector<128x1xf32>
    %116 = vector.shape_cast %90 : vector<128x1xf32> to vector<1x128x1xf32>
    tpu.vector_store %arg10[%c2_85, %c0_86, %c0_87], %116 {strides = array<i32>} : memref<4x128x1xf32, #tpu.memory_space<vmem>>, vector<1x128x1xf32>,
    %c0_88 = arith.constant 0 : index
    %c0_89 = arith.constant 0 : index
    %c96 = arith.constant 96 : index
    %117 = vector.load %arg3[%c0_88, %c0_89, %c96] : memref<1x128x128xf32, #tpu.memory_space<vmem>>, vector<1x128x32xf32>
    %118 = vector.shape_cast %117 : vector<1x128x32xf32> to vector<128x32xf32>
    %c0_90 = arith.constant 0 : index
    %c0_91 = arith.constant 0 : index
    %c96_92 = arith.constant 96 : index
    %119 = vector.load %arg4[%c0_90, %c0_91, %c96_92] : memref<1x128x128xf32, #tpu.memory_space<vmem>>, vector<1x128x32xf32>
    %120 = vector.shape_cast %119 : vector<1x128x32xf32> to vector<128x32xf32>
    %c0_93 = arith.constant 0 : index
    %c0_94 = arith.constant 0 : index
    %c96_95 = arith.constant 96 : index
    %121 = vector.load %arg5[%c0_93, %c0_94, %c96_95] : memref<1x128x128xf32, #tpu.memory_space<vmem>>, vector<1x128x32xf32>
    %122 = vector.shape_cast %121 : vector<1x128x32xf32> to vector<128x32xf32>
    %cst_96 = arith.constant dense<0.000000e+00> : vector<128x128xf32>
    %123 = tpu.matmul %118, %120, %cst_96 {dimension_numbers = #tpu.dot_dimension_numbers<[1], [1], [0], [0], [0, 0, 1, 0], [], []>} : vector<128x32xf32>, vector<128x32xf32>, vector<128x128xf32> -> vector<128x128xf32>
    %c3 = arith.constant 3 : index
    %c0_97 = arith.constant 0 : index
    %c0_98 = arith.constant 0 : index
    %124 = vector.load %arg10[%c3, %c0_97, %c0_98] : memref<4x128x1xf32, #tpu.memory_space<vmem>>, vector<1x128x1xf32>
    %125 = vector.shape_cast %124 : vector<1x128x1xf32> to vector<128x1xf32>
    %cst_99 = arith.constant dense<0xFF800000> : vector<128xf32>
    %126 = vector.multi_reduction <maximumf>, %123, %cst_99 [1] : vector<128x128xf32> to vector<128xf32>
    %127 = vector.shape_cast %126 : vector<128xf32> to vector<128x1xf32>
    %128 = arith.maximumf %125, %127 : vector<128x1xf32>
    %129 = arith.subf %125, %128 : vector<128x1xf32>
    %130 = math.exp %129 : vector<128x1xf32>
    %131 = vector.broadcast %128 : vector<128x1xf32> to vector<128x128xf32>
    %132 = arith.subf %123, %131 : vector<128x128xf32>
    %133 = math.exp %132 : vector<128x128xf32>
    %c3_100 = arith.constant 3 : index
    %c0_101 = arith.constant 0 : index
    %c0_102 = arith.constant 0 : index
    %134 = vector.load %arg11[%c3_100, %c0_101, %c0_102] : memref<4x128x1xf32, #tpu.memory_space<vmem>>, vector<1x128x1xf32>
    %135 = vector.shape_cast %134 : vector<1x128x1xf32> to vector<128x1xf32>
    %136 = arith.mulf %130, %135 : vector<128x1xf32>
    %cst_103 = arith.constant dense<0.000000e+00> : vector<128xf32>
    %137 = vector.multi_reduction <add>, %133, %cst_103 [1] : vector<128x128xf32> to vector<128xf32>
    %138 = vector.shape_cast %137 : vector<128xf32> to vector<128x1xf32>
    %139 = arith.addf %136, %138 : vector<128x1xf32>
    %c3_104 = arith.constant 3 : index
    %c0_105 = arith.constant 0 : index
    %c0_106 = arith.constant 0 : index
    %140 = vector.load %arg11[%c3_104, %c0_105, %c0_106] : memref<4x128x1xf32, #tpu.memory_space<vmem>>, vector<1x128x1xf32>
    %141 = vector.shape_cast %140 : vector<1x128x1xf32> to vector<128x1xf32>
    %142 = vector.shape_cast %139 : vector<128x1xf32> to vector<1x128x1xf32>
    tpu.vector_store %arg11[%c3_104, %c0_105, %c0_106], %142 {strides = array<i32>} : memref<4x128x1xf32, #tpu.memory_space<vmem>>, vector<1x128x1xf32>,
    %c3_107 = arith.constant 3 : index
    %c0_108 = arith.constant 0 : index
    %c0_109 = arith.constant 0 : index
    %143 = vector.load %arg12[%c3_107, %c0_108, %c0_109] : memref<4x128x32xf32, #tpu.memory_space<vmem>>, vector<1x128x32xf32>
    %144 = vector.shape_cast %143 : vector<1x128x32xf32> to vector<128x32xf32>
    %145 = vector.broadcast %130 : vector<128x1xf32> to vector<128x32xf32>
    %146 = arith.mulf %145, %144 : vector<128x32xf32>
    %cst_110 = arith.constant dense<0.000000e+00> : vector<128x32xf32>
    %147 = tpu.matmul %133, %122, %cst_110 {dimension_numbers = #tpu.dot_dimension_numbers<[1], [0], [0], [1], [0, 0, 1, 1], [], []>} : vector<128x128xf32>, vector<128x32xf32>, vector<128x32xf32> -> vector<128x32xf32>
    %148 = arith.addf %146, %147 : vector<128x32xf32>
    %c3_111 = arith.constant 3 : index
    %c0_112 = arith.constant 0 : index
    %c0_113 = arith.constant 0 : index
    %149 = vector.load %arg12[%c3_111, %c0_112, %c0_113] : memref<4x128x32xf32, #tpu.memory_space<vmem>>, vector<1x128x32xf32>
    %150 = vector.shape_cast %149 : vector<1x128x32xf32> to vector<128x32xf32>
    %151 = vector.shape_cast %148 : vector<128x32xf32> to vector<1x128x32xf32>
    tpu.vector_store %arg12[%c3_111, %c0_112, %c0_113], %151 {strides = array<i32>} : memref<4x128x32xf32, #tpu.memory_space<vmem>>, vector<1x128x32xf32>,
    %c3_114 = arith.constant 3 : index
    %c0_115 = arith.constant 0 : index
    %c0_116 = arith.constant 0 : index
    %152 = vector.load %arg10[%c3_114, %c0_115, %c0_116] : memref<4x128x1xf32, #tpu.memory_space<vmem>>, vector<1x128x1xf32>
    %153 = vector.shape_cast %152 : vector<1x128x1xf32> to vector<128x1xf32>
    %154 = vector.shape_cast %128 : vector<128x1xf32> to vector<1x128x1xf32>
    tpu.vector_store %arg10[%c3_114, %c0_115, %c0_116], %154 {strides = array<i32>} : memref<4x128x1xf32, #tpu.memory_space<vmem>>, vector<1x128x1xf32>,
    %c1_i32 = arith.constant 1 : i32
    %155 = arith.cmpi eq, %arg2, %c1_i32 : i32
    %156 = arith.extui %155 : i1 to i32
    %c0_i32_117 = arith.constant 0 : i32
    %157 = arith.cmpi ne, %156, %c0_i32_117 : i32
    scf.if %157 {
      %c0_118 = arith.constant 0 : index
      %c0_119 = arith.constant 0 : index
      %158 = vector.load %arg8[%c0_118, %c0_119] : memref<1x8xf32, #tpu.memory_space<vmem>>, vector<1x8xf32>
      %c0_120 = arith.constant 0 : index
      %c0_121 = arith.constant 0 : index
      %c0_122 = arith.constant 0 : index
      %159 = vector.load %arg12[%c0_120, %c0_121, %c0_122] : memref<4x128x32xf32, #tpu.memory_space<vmem>>, vector<1x128x32xf32>
      %160 = vector.shape_cast %159 : vector<1x128x32xf32> to vector<128x32xf32>
      %c0_123 = arith.constant 0 : index
      %c0_124 = arith.constant 0 : index
      %c0_125 = arith.constant 0 : index
      %161 = vector.load %arg11[%c0_123, %c0_124, %c0_125] : memref<4x128x1xf32, #tpu.memory_space<vmem>>, vector<1x128x1xf32>
      %162 = vector.shape_cast %161 : vector<1x128x1xf32> to vector<128x1xf32>
      %163 = tpu.reciprocal %162 {approx = true} : vector<128x1xf32> -> vector<128x1xf32>
      %164 = vector.broadcast %163 : vector<128x1xf32> to vector<128x32xf32>
      %165 = arith.mulf %160, %164 : vector<128x32xf32>
      %c0_126 = arith.constant 0 : index
      %c0_127 = arith.constant 0 : index
      %166 = vector.load %arg7[%c0_126, %c0_127] : memref<128x8xf32, #tpu.memory_space<vmem>>, vector<32x8xf32>
      %cst_128 = arith.constant dense<0.000000e+00> : vector<128x8xf32>
      %167 = tpu.matmul %165, %166, %cst_128 {dimension_numbers = #tpu.dot_dimension_numbers<[1], [0], [0], [1], [0, 0, 1, 1], [], []>} : vector<128x32xf32>, vector<32x8xf32>, vector<128x8xf32> -> vector<128x8xf32>
      %168 = vector.broadcast %158 : vector<1x8xf32> to vector<128x8xf32>
      %169 = arith.addf %168, %167 : vector<128x8xf32>
      %c1_129 = arith.constant 1 : index
      %c0_130 = arith.constant 0 : index
      %c0_131 = arith.constant 0 : index
      %170 = vector.load %arg12[%c1_129, %c0_130, %c0_131] : memref<4x128x32xf32, #tpu.memory_space<vmem>>, vector<1x128x32xf32>
      %171 = vector.shape_cast %170 : vector<1x128x32xf32> to vector<128x32xf32>
      %c1_132 = arith.constant 1 : index
      %c0_133 = arith.constant 0 : index
      %c0_134 = arith.constant 0 : index
      %172 = vector.load %arg11[%c1_132, %c0_133, %c0_134] : memref<4x128x1xf32, #tpu.memory_space<vmem>>, vector<1x128x1xf32>
      %173 = vector.shape_cast %172 : vector<1x128x1xf32> to vector<128x1xf32>
      %174 = tpu.reciprocal %173 {approx = true} : vector<128x1xf32> -> vector<128x1xf32>
      %175 = vector.broadcast %174 : vector<128x1xf32> to vector<128x32xf32>
      %176 = arith.mulf %171, %175 : vector<128x32xf32>
      %c32_135 = arith.constant 32 : index
      %c0_136 = arith.constant 0 : index
      %177 = vector.load %arg7[%c32_135, %c0_136] : memref<128x8xf32, #tpu.memory_space<vmem>>, vector<32x8xf32>
      %cst_137 = arith.constant dense<0.000000e+00> : vector<128x8xf32>
      %178 = tpu.matmul %176, %177, %cst_137 {dimension_numbers = #tpu.dot_dimension_numbers<[1], [0], [0], [1], [0, 0, 1, 1], [], []>} : vector<128x32xf32>, vector<32x8xf32>, vector<128x8xf32> -> vector<128x8xf32>
      %179 = arith.addf %169, %178 : vector<128x8xf32>
      %c2_138 = arith.constant 2 : index
      %c0_139 = arith.constant 0 : index
      %c0_140 = arith.constant 0 : index
      %180 = vector.load %arg12[%c2_138, %c0_139, %c0_140] : memref<4x128x32xf32, #tpu.memory_space<vmem>>, vector<1x128x32xf32>
      %181 = vector.shape_cast %180 : vector<1x128x32xf32> to vector<128x32xf32>
      %c2_141 = arith.constant 2 : index
      %c0_142 = arith.constant 0 : index
      %c0_143 = arith.constant 0 : index
      %182 = vector.load %arg11[%c2_141, %c0_142, %c0_143] : memref<4x128x1xf32, #tpu.memory_space<vmem>>, vector<1x128x1xf32>
      %183 = vector.shape_cast %182 : vector<1x128x1xf32> to vector<128x1xf32>
      %184 = tpu.reciprocal %183 {approx = true} : vector<128x1xf32> -> vector<128x1xf32>
      %185 = vector.broadcast %184 : vector<128x1xf32> to vector<128x32xf32>
      %186 = arith.mulf %181, %185 : vector<128x32xf32>
      %c64_144 = arith.constant 64 : index
      %c0_145 = arith.constant 0 : index
      %187 = vector.load %arg7[%c64_144, %c0_145] : memref<128x8xf32, #tpu.memory_space<vmem>>, vector<32x8xf32>
      %cst_146 = arith.constant dense<0.000000e+00> : vector<128x8xf32>
      %188 = tpu.matmul %186, %187, %cst_146 {dimension_numbers = #tpu.dot_dimension_numbers<[1], [0], [0], [1], [0, 0, 1, 1], [], []>} : vector<128x32xf32>, vector<32x8xf32>, vector<128x8xf32> -> vector<128x8xf32>
      %189 = arith.addf %179, %188 : vector<128x8xf32>
      %c3_147 = arith.constant 3 : index
      %c0_148 = arith.constant 0 : index
      %c0_149 = arith.constant 0 : index
      %190 = vector.load %arg12[%c3_147, %c0_148, %c0_149] : memref<4x128x32xf32, #tpu.memory_space<vmem>>, vector<1x128x32xf32>
      %191 = vector.shape_cast %190 : vector<1x128x32xf32> to vector<128x32xf32>
      %c3_150 = arith.constant 3 : index
      %c0_151 = arith.constant 0 : index
      %c0_152 = arith.constant 0 : index
      %192 = vector.load %arg11[%c3_150, %c0_151, %c0_152] : memref<4x128x1xf32, #tpu.memory_space<vmem>>, vector<1x128x1xf32>
      %193 = vector.shape_cast %192 : vector<1x128x1xf32> to vector<128x1xf32>
      %194 = tpu.reciprocal %193 {approx = true} : vector<128x1xf32> -> vector<128x1xf32>
      %195 = vector.broadcast %194 : vector<128x1xf32> to vector<128x32xf32>
      %196 = arith.mulf %191, %195 : vector<128x32xf32>
      %c96_153 = arith.constant 96 : index
      %c0_154 = arith.constant 0 : index
      %197 = vector.load %arg7[%c96_153, %c0_154] : memref<128x8xf32, #tpu.memory_space<vmem>>, vector<32x8xf32>
      %cst_155 = arith.constant dense<0.000000e+00> : vector<128x8xf32>
      %198 = tpu.matmul %196, %197, %cst_155 {dimension_numbers = #tpu.dot_dimension_numbers<[1], [0], [0], [1], [0, 0, 1, 1], [], []>} : vector<128x32xf32>, vector<32x8xf32>, vector<128x8xf32> -> vector<128x8xf32>
      %199 = arith.addf %189, %198 : vector<128x8xf32>
      %200 = tpu.transpose %199, [1, 0] : vector<128x8xf32> -> vector<8x128xf32>
      %c0_156 = arith.constant 0 : index
      %c0_157 = arith.constant 0 : index
      %c0_158 = arith.constant 0 : index
      %201 = vector.load %arg9[%c0_156, %c0_157, %c0_158] : memref<1x8x128xf32, #tpu.memory_space<vmem>>, vector<1x8x128xf32>
      %202 = vector.shape_cast %201 : vector<1x8x128xf32> to vector<8x128xf32>
      %203 = vector.shape_cast %200 : vector<8x128xf32> to vector<1x8x128xf32>
      tpu.vector_store %arg9[%c0_156, %c0_157, %c0_158], %203 {strides = array<i32>} : memref<1x8x128xf32, #tpu.memory_space<vmem>>, vector<1x8x128xf32>,
    } else {
    }
    return
  }
  func.func @transform_0(%arg0: i32, %arg1: i32, %arg2: i32) -> (i32, i32, i32) {
    %c0_i32 = arith.constant 0 : i32
    %c0_i32_0 = arith.constant 0 : i32
    return %arg0, %arg1, %c0_i32 : i32, i32, i32
  }
  func.func @transform_1(%arg0: i32, %arg1: i32, %arg2: i32) -> (i32, i32, i32) {
    %c1_i32 = arith.constant 1 : i32
    %c0_i32 = arith.constant 0 : i32
    return %arg0, %arg2, %c1_i32 : i32, i32, i32
  }
  func.func @transform_2(%arg0: i32, %arg1: i32, %arg2: i32) -> (i32, i32, i32) {
    %c2_i32 = arith.constant 2 : i32
    %c0_i32 = arith.constant 0 : i32
    return %arg0, %arg2, %c2_i32 : i32, i32, i32
  }
  func.func @transform_3(%arg0: i32, %arg1: i32, %arg2: i32) -> (i32, i32, i32, i32) {
    %c0_i32 = arith.constant 0 : i32
    %c0_i32_0 = arith.constant 0 : i32
    %c0_i32_1 = arith.constant 0 : i32
    %c0_i32_2 = arith.constant 0 : i32
    %c0_i32_3 = arith.constant 0 : i32
    return %c0_i32, %c0_i32_0, %c0_i32_1, %c0_i32_2 : i32, i32, i32, i32
  }
  func.func @transform_4(%arg0: i32, %arg1: i32, %arg2: i32) -> (i32, i32) {
    %c0_i32 = arith.constant 0 : i32
    %c0_i32_0 = arith.constant 0 : i32
    %c0_i32_1 = arith.constant 0 : i32
    return %c0_i32, %c0_i32_0 : i32, i32
  }
  func.func @transform_5(%arg0: i32, %arg1: i32, %arg2: i32) -> (i32, i32) {
    %c0_i32 = arith.constant 0 : i32
    %c0_i32_0 = arith.constant 0 : i32
    %c0_i32_1 = arith.constant 0 : i32
    return %c0_i32, %c0_i32_0 : i32, i32
  }
  func.func @transform_6(%arg0: i32, %arg1: i32, %arg2: i32) -> (i32, i32, i32) {
    %c0_i32 = arith.constant 0 : i32
    %c0_i32_0 = arith.constant 0 : i32
    return %arg0, %c0_i32, %arg1 : i32, i32, i32
  }
}

</mosaic_0001>

<bundles_post_ra>
// kernel: attention_forward.2
= control target key start
LH: loop header
LB: loop body
LE: loop exit
PB: predicated region body
PF: predicated region fallthrough
CT: control target
= control target key end

     0   :  { %s2165_s12 = smov 0   ;;  %s3722_s0 = inlined_call_operand.vmem [shape: f32[512,8], index: 0, kind: input, shape index: {}]   ;;  %s3723_s1 = inlined_call_operand.vmem [shape: f32[1,8], index: 1, kind: input, shape index: {}]   ;;  %s3724_s2 = inlined_call_operand.vmem [shape: f32[8,384], index: 2, kind: input, shape index: {}]   ;;  %s3725_s3 = inlined_call_operand.vmem [shape: f32[512,384], index: 3, kind: output, shape index: {}]  }
   0x1 LB: > { %s1861_s13 = sadd.s32 4294967295, %s2143_s12   ;;  %p1865_p0 = scmp.ge.s32.totalorder %s2143_s12, 1  ;;  %s2143_s12 = sphi %s2165_s12, %s13_s12  }
   0x2   : > { %p138_p1 = scmp.lt.s32.totalorder %s2143_s12, 3 }
   0x4   : > { %p139_p2 = pnand %p1865_p0, %p138_p1 }
   0x5   : > { %s1866_s14 = sshll.u32 (!%p139_p2), %s1861_s13, 5 }
   0x6   : > { %142 = sbr.rel (%p139_p2) target bundleno = 548 (0x224), region = 32  ;;  %p164_p3 = scmp.lt.s32.totalorder (!%p139_p2), %s1866_s14, 63 }
   0xb   : > { %s3757_s14 = smov (!%p164_p3, %s1866_s14), 63  ;;  %vm240_vm0 = vcmask 64512  }
   0xc   : > { %s1867_s15 = sshll.u32 %s3757_s14, 3  ;;  %s1971_s29 = smul.u32 24, %s3757_s14 }
   0xd   : > { %s2179_s18 = scalar_lea.vmem %s3722_s0, %s1867_s15 }
   0xe   : > { %v2182_v0 = vld [vmem:[%s2179_s18 + $0x10] sm:$0xff]  ;;  %v2185_v1 = vld [vmem:[%s2179_s18 + $0x8] sm:$0xff]  ;;  %v2188_v2 = vld [vmem:[%s2179_s18] sm:$0xff]  ;;  %s3342_s5 = scalar_lea.vmem %s3725_s3, %s1971_s29 }
   0xf   : > { %v210_v3 = vmul.f32 %v2182_v0, %v2182_v0  ;;  %v209_v4 = vmul.f32 %v2185_v1, %v2185_v1  ;;  %v208_v5 = vmul.f32 %v2188_v2, %v2188_v2  ;;  %v202_v6 = vld [vmem:[%s2179_s18 + $0xd0] sm:$0xff]  ;;  %v2198_v7 = vld [vmem:[%s2179_s18 + $0xc8] sm:$0xff]  ;;  %v2204_v11 = vld [vmem:[%s2179_s18 + $0xc0] sm:$0xff] }
  0x10   : > { %v234_v12 = vmul.f32 %v202_v6, %v202_v6  ;;  %v233_v13 = vmul.f32 %v2198_v7, %v2198_v7  ;;  %v232_v14 = vmul.f32 %v2204_v11, %v2204_v11  ;;  %v180_v18 = vld [vmem:[%s2179_s18 + $0x20] sm:$0xff]  ;;  %v203_v19 = vld [vmem:[%s2179_s18 + $0xd8] sm:$0xff]  ;;  %v205_v27 = vld [vmem:[%s2179_s18 + $0xe8] sm:$0xff] }
  0x11   : > { %v247_v8 = vsel %vm240_vm0, %v210_v3, 0.0  ;;  %v244_v9 = vsel %vm240_vm0, %v209_v4, 0.0  ;;  %v241_v10 = vsel %vm240_vm0, %v208_v5, 0.0  ;;  %v179_v20 = vld [vmem:[%s2179_s18 + $0x18] sm:$0xff]  ;;  %v212_v21 = vmul.f32 %v180_v18, %v180_v18  ;;  %v181_v28 = vld [vmem:[%s2179_s18 + $0x28] sm:$0xff]  ;;  %v204_v29 = vld [vmem:[%s2179_s18 + $0xe0] sm:$0xff] }
  0x12   : > { %248 = vadd.xlane.f32.xlu2 %v247_v8  ;;  %245 = vadd.xlane.f32.xlu1 %v244_v9  ;;  %v319_v15 = vsel %vm240_vm0, %v234_v12, 0.0  ;;  %v316_v16 = vsel %vm240_vm0, %v233_v13, 0.0  ;;  %v313_v17 = vsel %vm240_vm0, %v232_v14, 0.0  ;;  %v235_v22 = vmul.f32 %v203_v19, %v203_v19  ;;  %v183_v36 = vld [vmem:[%s2179_s18 + $0x38] sm:$0xff]  ;;  %v206_v37 = vld [vmem:[%s2179_s18 + $0xf0] sm:$0xff]  ;;  %v184_v45 = vld [vmem:[%s2179_s18 + $0x40] sm:$0xff] }
  0x13   : > { %242 = vadd.xlane.f32.xlu0 %v241_v10  ;;  %v211_v23 = vmul.f32 %v179_v20, %v179_v20  ;;  %v253_v24 = vsel %vm240_vm0, %v212_v21, 0.0  ;;  %v237_v30 = vmul.f32 %v205_v27, %v205_v27  ;;  %v213_v31 = vmul.f32 %v181_v28, %v181_v28  ;;  %v182_v38 = vld [vmem:[%s2179_s18 + $0x30] sm:$0xff]  ;;  %v185_v46 = vld [vmem:[%s2179_s18 + $0x48] sm:$0xff]  ;;  %v207_v47 = vld [vmem:[%s2179_s18 + $0xf8] sm:$0xff] }
  0x14   : > { %v322_v25 = vsel %vm240_vm0, %v235_v22, 0.0  ;;  %v236_v32 = vmul.f32 %v204_v29, %v204_v29  ;;  %v215_v39 = vmul.f32 %v183_v36, %v183_v36  ;;  %v238_v40 = vmul.f32 %v206_v37, %v206_v37  ;;  %v187_v54 = vld [vmem:[%s2179_s18 + $0x58] sm:$0xff]  ;;  %v188_v55 = vld [vmem:[%s2179_s18 + $0x60] sm:$0xff]  ;;  %v186_v56 = vld [vmem:[%s2179_s18 + $0x50] sm:$0xff] }
  0x15   : > { %v250_v26 = vsel %vm240_vm0, %v211_v23, 0.0  ;;  %v328_v33 = vsel %vm240_vm0, %v237_v30, 0.0  ;;  %v256_v34 = vsel %vm240_vm0, %v213_v31, 0.0  ;;  %v214_v41 = vmul.f32 %v182_v38, %v182_v38  ;;  %v190_v63 = vld [vmem:[%s2179_s18 + $0x70] sm:$0xff]  ;;  %v191_v3 = vld [vmem:[%s2179_s18 + $0x78] sm:$0xff]  ;;  %v189_v4 = vld [vmem:[%s2179_s18 + $0x68] sm:$0xff] }
  0x16   : > { %v325_v35 = vsel %vm240_vm0, %v236_v32, 0.0  ;;  %v262_v42 = vsel %vm240_vm0, %v215_v39, 0.0  ;;  %v331_v43 = vsel %vm240_vm0, %v238_v40, 0.0  ;;  %v216_v48 = vmul.f32 %v184_v45, %v184_v45  ;;  %v193_v13 = vld [vmem:[%s2179_s18 + $0x88] sm:$0xff]  ;;  %v192_v14 = vld [vmem:[%s2179_s18 + $0x80] sm:$0xff]  ;;  %v194_v19 = vld [vmem:[%s2179_s18 + $0x90] sm:$0xff] }
  0x17   : > { %v259_v44 = vsel %vm240_vm0, %v214_v41, 0.0  ;;  %v217_v49 = vmul.f32 %v185_v46, %v185_v46  ;;  %v239_v50 = vmul.f32 %v207_v47, %v207_v47  ;;  %v219_v57 = vmul.f32 %v187_v54, %v187_v54  ;;  %v195_v22 = vld [vmem:[%s2179_s18 + $0x98] sm:$0xff]  ;;  %v197_v31 = vld [vmem:[%s2179_s18 + $0xa8] sm:$0xff] }
  0x18   : > { %v265_v51 = vsel %vm240_vm0, %v216_v48, 0.0  ;;  %v220_v58 = vmul.f32 %v188_v55, %v188_v55  ;;  %v218_v59 = vmul.f32 %v186_v56, %v186_v56  ;;  %v222_v5 = vmul.f32 %v190_v63, %v190_v63  ;;  %v198_v48 = vld [vmem:[%s2179_s18 + $0xb0] sm:$0xff] }
  0x19   : > { %v268_v52 = vsel %vm240_vm0, %v217_v49, 0.0  ;;  %v334_v53 = vsel %vm240_vm0, %v239_v50, 0.0  ;;  %v274_v60 = vsel %vm240_vm0, %v219_v57, 0.0  ;;  %v223_v6 = vmul.f32 %v191_v3, %v191_v3 }
  0x1a   : > { %320 = vadd.xlane.f32.xlu2 %v319_v15  ;;  %317 = vadd.xlane.f32.xlu1 %v316_v16  ;;  %v277_v61 = vsel %vm240_vm0, %v220_v58, 0.0  ;;  %v271_v62 = vsel %vm240_vm0, %v218_v59, 0.0  ;;  %v221_v8 = vmul.f32 %v189_v4, %v189_v4  ;;  %v283_v9 = vsel %vm240_vm0, %v222_v5, 0.0 }
  0x1b   : > { %314 = vadd.xlane.f32.xlu0 %v313_v17  ;;  %v286_v10 = vsel %vm240_vm0, %v223_v6, 0.0  ;;  %v225_v15 = vmul.f32 %v193_v13, %v193_v13  ;;  %v224_v16 = vmul.f32 %v192_v14, %v192_v14  ;;  %v226_v20 = vmul.f32 %v194_v19, %v194_v19  ;;  %v2314_v19 = vld [vmem:[%s3724_s2 + $0x10] sm:$0xff] }
  0x1c   : > { %v280_v12 = vsel %vm240_vm0, %v221_v8, 0.0  ;;  %v227_v23 = vmul.f32 %v195_v22, %v195_v22  ;;  %v229_v32 = vmul.f32 %v197_v31, %v197_v31  ;;  %1609 = vmatpush.msra.mxu2 %v2314_v19 }
  0x1d   : > { %v292_v17 = vsel %vm240_vm0, %v225_v15, 0.0  ;;  %v289_v18 = vsel %vm240_vm0, %v224_v16, 0.0  ;;  %v295_v21 = vsel %vm240_vm0, %v226_v20, 0.0  ;;  %v1269_v15 = vld [vmem:[%s3724_s2] sm:$0xff]  ;;  %v1270_v16 = vld [vmem:[%s3724_s2 + $0x8] sm:$0xff] }
  0x1e   : > { %v304_v38 = vsel %vm240_vm0, %v229_v32, 0.0  ;;  %1383 = vmatpush.msra.mxu0 %v1269_v15  ;;  %1496 = vmatpush.msra.mxu1 %v1270_v16 }
  0x1f   : > { %1968 = vmatpush.msra.mxu3 %v1269_v15 }
  0x21   : > { %1969 = vmatpush.msrb.mxu3 %v1270_v16 }
  0x22   : > { %254 = vadd.xlane.f32.xlu2 %v253_v24  ;;  %323 = vadd.xlane.f32.xlu1 %v322_v25  ;;  %v298_v24 = vsel %vm240_vm0, %v227_v23, 0.0  ;;  %v196_v25 = vld [vmem:[%s2179_s18 + $0xa0] sm:$0xff] }
  0x23   : > { %251 = vadd.xlane.f32.xlu0 %v250_v26  ;;  %v228_v26 = vmul.f32 %v196_v25, %v196_v25 }
  0x25   : > { %v301_v27 = vsel %vm240_vm0, %v228_v26, 0.0 }
  0x2a   : > { %329 = vadd.xlane.f32.xlu2 %v328_v33  ;;  %257 = vadd.xlane.f32.xlu1 %v256_v34 }
  0x2b   : > { %326 = vadd.xlane.f32.xlu0 %v325_v35 }
  0x32   : > { %263 = vadd.xlane.f32.xlu2 %v262_v42  ;;  %332 = vadd.xlane.f32.xlu1 %v331_v43 }
  0x33   : > { %260 = vadd.xlane.f32.xlu0 %v259_v44 }
  0x3a   : > { %266 = vadd.xlane.f32.xlu1 %v265_v51  ;;  %269 = vadd.xlane.f32.xlu2 %v268_v52  ;;  %v230_v51 = vmul.f32 %v198_v48, %v198_v48 }
  0x3b   : > { %335 = vadd.xlane.f32.xlu0 %v334_v53 }
  0x3c   : > { %v307_v57 = vsel %vm240_vm0, %v230_v51, 0.0 }
  0x42   : > { %275 = vadd.xlane.f32.xlu1 %v274_v60  ;;  %278 = vadd.xlane.f32.xlu2 %v277_v61 }
  0x43   : > { %272 = vadd.xlane.f32.xlu0 %v271_v62 }
  0x4a   : > { %284 = vadd.xlane.f32.xlu1 %v283_v9  ;;  %287 = vadd.xlane.f32.xlu2 %v286_v10 }
  0x4b   : > { %281 = vadd.xlane.f32.xlu0 %v280_v12 }
  0x52   : > { %293 = vadd.xlane.f32.xlu1 %v292_v17  ;;  %296 = vadd.xlane.f32.xlu2 %v295_v21 }
  0x53   : > { %290 = vadd.xlane.f32.xlu0 %v289_v18 }
  0x5a   : > { %302 = vadd.xlane.f32.xlu1 %v301_v27  ;;  %305 = vadd.xlane.f32.xlu2 %v304_v38 }
  0x5b   : > { %299 = vadd.xlane.f32.xlu0 %v298_v24 }
  0x63   : > { %308 = vadd.xlane.f32.xlu0 %v307_v57 }
  0x85   : > { %v2259_v28 = vpop.xlane.xlu2 %248  ;;  %v2261_v29 = vpop.xlane.xlu1 %245 }
  0x86   : > { %1981 = vrsqrt.f32 %v2259_v28  ;;  %v2264_v30 = vpop.xlane.xlu0 %242  ;;  %vm368_vm1 = vcmp.eq.f32.partialorder %v2259_v28, inf  ;;  %v371_v24 = vand.u32 2147483648, %v2259_v28  ;;  %vm370_vm2 = vcmp.eq.f32.partialorder %v2259_v28, 0.0 }
  0x87   : > { %1983 = vrsqrt.f32 %v2261_v29  ;;  %vm356_vm3 = vcmp.eq.f32.partialorder %v2261_v29, inf  ;;  %vm358_vm4 = vcmp.eq.f32.partialorder %v2261_v29, 0.0  ;;  %vm344_vm5 = vcmp.eq.f32.partialorder %v2264_v30, inf }
  0x88   : > { %1985 = vrsqrt.f32 %v2264_v30  ;;  %vm346_vm6 = vcmp.eq.f32.partialorder %v2264_v30, 0.0 }
  0x8c   : > { %v1982_v33 = vpop.eup %1981 }
  0x8d   : > { %v1984_v34 = vpop.eup %1983  ;;  %v362_v35 = vmul.f32 %v1982_v33, %v2259_v28  ;;  %v2270_v36 = vpop.xlane.xlu2 %320 }
  0x8e   : > { %v2272_v37 = vpop.xlane.xlu1 %317  ;;  %v1986_v39 = vpop.eup %1985  ;;  %v350_v40 = vmul.f32 %v1984_v34, %v2261_v29  ;;  %1987 = vrsqrt.f32 %v2270_v36  ;;  %vm656_vm7 = vcmp.eq.f32.partialorder %v2270_v36, inf  ;;  %vm658_vm8 = vcmp.eq.f32.partialorder %v2270_v36, 0.0 }
  0x8f   : > { %v2277_v41 = vpop.xlane.xlu0 %314  ;;  %v363_v42 = vmul.f32 %v1982_v33, %v362_v35  ;;  %v338_v43 = vmul.f32 %v1986_v39, %v2264_v30  ;;  %1989 = vrsqrt.f32 %v2272_v37  ;;  %vm644_vm9 = vcmp.eq.f32.partialorder %v2272_v37, inf }
  0x90   : > { %v351_v44 = vmul.f32 %v1984_v34, %v350_v40  ;;  %1991 = vrsqrt.f32 %v2277_v41  ;;  %vm646_vm10 = vcmp.eq.f32.partialorder %v2272_v37, 0.0  ;;  %vm632_vm11 = vcmp.eq.f32.partialorder %v2277_v41, inf }
  0x91   : > { %v364_v45 = vmul.f32 0.5, %v363_v42  ;;  %v339_v46 = vmul.f32 %v1986_v39, %v338_v43  ;;  %vm634_vm12 = vcmp.eq.f32.partialorder %v2277_v41, 0.0 }
  0x92   : > { %v352_v47 = vmul.f32 0.5, %v351_v44 }
  0x93   : > { %v365_v49 = vsub.f32 1.5, %v364_v45  ;;  %v340_v50 = vmul.f32 0.5, %v339_v46  ;;  %v347_v45 = vand.u32 2147483648, %v2264_v30 }
  0x94   : > { %v1988_v52 = vpop.eup %1987  ;;  %v353_v59 = vsub.f32 1.5, %v352_v47 }
  0x95   : > { %v1990_v53 = vpop.eup %1989  ;;  %v650_v54 = vmul.f32 %v1988_v52, %v2270_v36  ;;  %v2284_v55 = vpop.xlane.xlu2 %254  ;;  %v366_v58 = vmul.f32 %v1982_v33, %v365_v49  ;;  %v341_v62 = vsub.f32 1.5, %v340_v50  ;;  %v659_v50 = vand.u32 2147483648, %v2270_v36 }
  0x96   : > { %v2286_v56 = vpop.xlane.xlu1 %323  ;;  %v638_v60 = vmul.f32 %v1990_v53, %v2272_v37  ;;  %1993 = vrsqrt.f32 %v2284_v55  ;;  %v2291_v61 = vpop.eup %1991  ;;  %v354_v9 = vmul.f32 %v1984_v34, %v353_v59  ;;  %vm392_vm13 = vcmp.eq.f32.partialorder %v2284_v55, inf }
  0x97   : > { %v651_v63 = vmul.f32 %v1988_v52, %v650_v54  ;;  %v626_v4 = vmul.f32 %v2291_v61, %v2277_v41  ;;  %v2295_v5 = vpop.xlane.xlu0 %251  ;;  %1995 = vrsqrt.f32 %v2286_v56  ;;  %v367_v8 = vmul.f32 %v366_v58, %v2259_v28 }
  0x98   : > { %v639_v3 = vmul.f32 %v1990_v53, %v638_v60  ;;  %v342_v10 = vmul.f32 %v1986_v39, %v341_v62  ;;  %v355_v21 = vmul.f32 %v354_v9, %v2261_v29  ;;  %1997 = vrsqrt.f32 %v2295_v5 }
  0x99   : > { %v652_v6 = vmul.f32 0.5, %v651_v63  ;;  %v627_v14 = vmul.f32 %v2291_v61, %v626_v4  ;;  %v369_v20 = vsel %vm368_vm1, %v2259_v28, %v367_v8  ;;  %v359_v28 = vand.u32 2147483648, %v2261_v29 }
  0x9a   : > { %v640_v12 = vmul.f32 0.5, %v639_v3  ;;  %v343_v25 = vmul.f32 %v342_v10, %v2264_v30  ;;  %v372_v33 = vsel %vm370_vm2, %v371_v24, %v369_v20  ;;  %v357_v38 = vsel %vm356_vm3, %v2261_v29, %v355_v21 }
  0x9b   : > { %v653_v17 = vsub.f32 1.5, %v652_v6  ;;  %v628_v32 = vmul.f32 0.5, %v627_v14  ;;  %v2341_v44 = vmax.f32 %v372_v33, 1e-12  ;;  %v360_v47 = vsel %vm358_vm4, %v359_v28, %v357_v38 }
  0x9c   : > { %v2299_v13 = vpop.eup %1993  ;;  %v641_v26 = vsub.f32 1.5, %v640_v12  ;;  %v345_v42 = vsel %vm344_vm5, %v2264_v30, %v343_v25  ;;  %v2357_v54 = vmax.f32 %v360_v47, 1e-12  ;;  %v635_v8 = vand.u32 2147483648, %v2277_v41 }
  0x9d   : > { %v386_v18 = vmul.f32 %v2299_v13, %v2284_v55  ;;  %v2318_v22 = vpop.xlane.xlu2 %329  ;;  %v2321_v23 = vpop.eup %1995  ;;  %v654_v34 = vmul.f32 %v1988_v52, %v653_v17  ;;  %v629_v46 = vsub.f32 1.5, %v628_v32  ;;  %v348_v29 = vsel %vm346_vm6, %v347_v45, %v345_v42 }
  0x9e   : > { %v2326_v31 = vpop.xlane.xlu1 %257  ;;  %v662_v35 = vmul.f32 %v2321_v23, %v2286_v56  ;;  %v642_v43 = vmul.f32 %v1990_v53, %v641_v26  ;;  %v2350_v52 = vpop.eup %1997  ;;  %v647_v53 = vand.u32 2147483648, %v2272_v37  ;;  %1999 = vrsqrt.f32 %v2318_v22 }
  0x9f   : > { %v387_v27 = vmul.f32 %v2299_v13, %v386_v18  ;;  %v2336_v40 = vpop.xlane.xlu0 %326  ;;  %v655_v48 = vmul.f32 %v654_v34, %v2270_v36  ;;  %2001 = vrcp.f32 %v2341_v44  ;;  %v630_v57 = vmul.f32 %v2291_v61, %v629_v46 }
  0xa0   : > { %v663_v49 = vmul.f32 %v2321_v23, %v662_v35  ;;  %v643_v30 = vmul.f32 %v642_v43, %v2272_v37  ;;  %v374_v58 = vmul.f32 %v2350_v52, %v2295_v5  ;;  %v2364_v60 = vmax.f32 %v348_v29, 1e-12 }
  0xa1   : > { %v388_v39 = vmul.f32 0.5, %v387_v27  ;;  %v657_v62 = vsel %vm656_vm7, %v2270_v36, %v655_v48  ;;  %2003 = vrsqrt.f32 %v2326_v31  ;;  %v631_v10 = vmul.f32 %v630_v57, %v2277_v41 }
  0xa2   : > { %v664_v63 = vmul.f32 0.5, %v663_v49  ;;  %v375_v4 = vmul.f32 %v2350_v52, %v374_v58  ;;  %2005 = vrsqrt.f32 %v2336_v40  ;;  %v645_v6 = vsel %vm644_vm9, %v2272_v37, %v643_v30 }
  0xa3   : > { %v389_v51 = vsub.f32 1.5, %v388_v39  ;;  %v660_v9 = vsel %vm658_vm8, %v659_v50, %v657_v62  ;;  %vm394_vm14 = vcmp.eq.f32.partialorder %v2284_v55, 0.0  ;;  %v648_v17 = vsel %vm646_vm10, %v647_v53, %v645_v6 }
  0xa4   : > { %v376_v12 = vmul.f32 0.5, %v375_v4  ;;  %v2000_v14 = vpop.eup %1999  ;;  %v665_v15 = vsub.f32 1.5, %v664_v63  ;;  %v2398_v21 = vmax.f32 %v660_v9, 1e-12  ;;  %v395_v24 = vand.u32 2147483648, %v2284_v55 }
  0xa5   : > { %v2362_v59 = vpop.xlane.xlu2 %263  ;;  %v390_v61 = vmul.f32 %v2299_v13, %v389_v51  ;;  %v2391_v16 = vpop.eup %2001  ;;  %v686_v18 = vmul.f32 %v2000_v14, %v2318_v22  ;;  %v633_v37 = vsel %vm632_vm11, %v2277_v41, %v631_v10  ;;  %v671_v27 = vand.u32 2147483648, %v2286_v56 }
  0xa6   : > { %v2370_v3 = vpop.xlane.xlu1 %332  ;;  %2007 = vrsqrt.f32 %v2362_v59  ;;  %v377_v25 = vsub.f32 1.5, %v376_v12  ;;  %v2407_v35 = vmax.f32 %v648_v17, 1e-12  ;;  %v666_v38 = vmul.f32 %v2321_v23, %v665_v15 }
  0xa7   : > { %2009 = vrcp.f32 %v2357_v54  ;;  %v2386_v13 = vpop.xlane.xlu0 %260  ;;  %v391_v36 = vmul.f32 %v390_v61, %v2284_v55  ;;  %v2004_v20 = vpop.eup %2003  ;;  %v687_v32 = vmul.f32 %v2000_v14, %v686_v18  ;;  %vm668_vm15 = vcmp.eq.f32.partialorder %v2286_v56, inf }
  0xa8   : > { %2011 = vrcp.f32 %v2364_v60  ;;  %v2006_v26 = vpop.eup %2005  ;;  %v398_v33 = vmul.f32 %v2004_v20, %v2326_v31  ;;  %v383_v39 = vand.u32 2147483648, %v2295_v5  ;;  %vm380_vm1 = vcmp.eq.f32.partialorder %v2295_v5, inf }
  0xa9   : > { %2013 = vrsqrt.f32 %v2370_v3  ;;  %v674_v28 = vmul.f32 %v2006_v26, %v2336_v40  ;;  %v393_v43 = vsel %vm392_vm13, %v2284_v55, %v391_v36  ;;  %v688_v45 = vmul.f32 0.5, %v687_v32 }
  0xaa   : > { %2015 = vrsqrt.f32 %v2386_v13  ;;  %v399_v46 = vmul.f32 %v2004_v20, %v398_v33  ;;  %v636_v23 = vsel %vm634_vm12, %v635_v8, %v633_v37  ;;  %v378_v49 = vmul.f32 %v2350_v52, %v377_v25 }
  0xab   : > { %2017 = vrcp.f32 %v2398_v21  ;;  %v675_v29 = vmul.f32 %v2006_v26, %v674_v28  ;;  %vm670_vm2 = vcmp.eq.f32.partialorder %v2286_v56, 0.0  ;;  %v689_v30 = vsub.f32 1.5, %v688_v45 }
  0xac   : > { %v2008_v34 = vpop.eup %2007  ;;  %vm692_vm3 = vcmp.eq.f32.partialorder %v2318_v22, inf  ;;  %v400_v53 = vmul.f32 0.5, %v399_v46  ;;  %v396_v41 = vsel %vm394_vm14, %v395_v24, %v393_v43  ;;  %v667_v62 = vmul.f32 %v666_v38, %v2286_v56 }
  0xad   : > { %v2413_v42 = vpop.eup %2009  ;;  %v422_v47 = vmul.f32 %v2008_v34, %v2362_v59  ;;  %vm382_vm4 = vcmp.eq.f32.partialorder %v2295_v5, 0.0  ;;  %v676_v52 = vmul.f32 0.5, %v675_v29  ;;  %v690_v61 = vmul.f32 %v2000_v14, %v689_v30 }
  0xae   : > { %v2420_v48 = vpop.eup %2011  ;;  %v2426_v50 = vpop.xlane.xlu1 %266  ;;  %v401_v4 = vsub.f32 1.5, %v400_v53  ;;  %v379_v8 = vmul.f32 %v378_v49, %v2295_v5  ;;  %v2446_v12 = vmax.f32 %v636_v23, 1e-12  ;;  %v2450_v14 = vmax.f32 %v396_v41, 1e-12 }
  0xaf   : > { %v2428_v51 = vpop.eup %2013  ;;  %v423_v57 = vmul.f32 %v2008_v34, %v422_v47  ;;  %2019 = vrsqrt.f32 %v2426_v50  ;;  %v677_v9 = vsub.f32 1.5, %v676_v52  ;;  %vm694_vm5 = vcmp.eq.f32.partialorder %v2318_v22, 0.0 }
  0xb0   : > { %v2432_v58 = vpop.eup %2015  ;;  %v698_v63 = vmul.f32 %v2428_v51, %v2370_v3  ;;  %2021 = vrcp.f32 %v2407_v35  ;;  %v402_v15 = vmul.f32 %v2004_v20, %v401_v4  ;;  %v695_v18 = vand.u32 2147483648, %v2318_v22 }
  0xb1   : > { %v424_v6 = vmul.f32 0.5, %v423_v57  ;;  %v410_v55 = vmul.f32 %v2432_v58, %v2386_v13  ;;  %v2448_v36 = vpop.eup %2017  ;;  %vm404_vm6 = vcmp.eq.f32.partialorder %v2326_v31, inf  ;;  %v669_v24 = vsel %vm668_vm15, %v2286_v56, %v667_v62 }
  0xb2   : > { %v699_v10 = vmul.f32 %v2428_v51, %v698_v63  ;;  %v691_v25 = vmul.f32 %v690_v61, %v2318_v22  ;;  %v381_v32 = vsel %vm380_vm1, %v2295_v5, %v379_v8  ;;  %v403_v33 = vmul.f32 %v402_v15, %v2326_v31 }
  0xb3   : > { %v425_v17 = vsub.f32 1.5, %v424_v6  ;;  %v411_v20 = vmul.f32 %v2432_v58, %v410_v55  ;;  %v678_v38 = vmul.f32 %v2006_v26, %v677_v9  ;;  %2023 = vrcp.f32 %v2446_v12 }
  0xb4   : > { %v700_v37 = vmul.f32 0.5, %v699_v10  ;;  %vm406_vm7 = vcmp.eq.f32.partialorder %v2326_v31, 0.0  ;;  %v407_v45 = vand.u32 2147483648, %v2326_v31  ;;  %vm680_vm8 = vcmp.eq.f32.partialorder %v2336_v40, inf }
  0xb5   : > { %v426_v28 = vmul.f32 %v2008_v34, %v425_v17  ;;  %v2464_v43 = vpop.eup %2019  ;;  %v672_v46 = vsel %vm670_vm2, %v671_v27, %v669_v24  ;;  %vm682_vm9 = vcmp.eq.f32.partialorder %v2336_v40, 0.0  ;;  %v683_v26 = vand.u32 2147483648, %v2336_v40  ;;  %v2477_v34 = vpop.xlane.xlu0 %335 }
  0xb6   : > { %vm428_vm10 = vcmp.eq.f32.partialorder %v2362_v59, inf  ;;  %v2479_v47 = vpop.eup %2021  ;;  %v384_v23 = vsel %vm382_vm4, %v383_v39, %v381_v32  ;;  %v693_v56 = vsel %vm692_vm3, %v2318_v22, %v691_v25  ;;  %v701_v27 = vsub.f32 1.5, %v700_v37  ;;  %v199_v39 = vld [vmem:[%s2179_s18 + $0xb8] sm:$0xff] }
  0xb7   : > { %v412_v49 = vmul.f32 0.5, %v411_v20  ;;  %2025 = vrcp.f32 %v2450_v14  ;;  %v405_v29 = vsel %vm404_vm6, %v2326_v31, %v403_v33  ;;  %v679_v30 = vmul.f32 %v678_v38, %v2336_v40 }
  0xb8   : > { %v427_v53 = vmul.f32 %v426_v28, %v2362_v59  ;;  %v2494_v57 = vmax.f32 %v672_v46, 1e-12  ;;  %vm430_vm11 = vcmp.eq.f32.partialorder %v2362_v59, 0.0  ;;  %v434_v5 = vmul.f32 %v2464_v43, %v2426_v50 }
  0xb9   : > { %2027 = vrsqrt.f32 %v2477_v34  ;;  %v2501_v41 = vmax.f32 %v384_v23, 1e-12  ;;  %v696_v62 = vsel %vm694_vm5, %v695_v18, %v693_v56  ;;  %v431_v52 = vand.u32 2147483648, %v2362_v59  ;;  %v2507_v63 = vpop.eup %2023  ;;  %v2555_v56 = vpop.xlane.xlu2 %269 }
  0xba   : > { %vm704_vm12 = vcmp.eq.f32.partialorder %v2370_v3, inf  ;;  %v408_v61 = vsel %vm406_vm7, %v407_v45, %v405_v29  ;;  %v702_v4 = vmul.f32 %v2428_v51, %v701_v27  ;;  %v707_v6 = vand.u32 2147483648, %v2370_v3 }
  0xbb   : > { %v413_v8 = vsub.f32 1.5, %v412_v49  ;;  %v681_v9 = vsel %vm680_vm8, %v2336_v40, %v679_v30  ;;  %v429_v22 = vsel %vm428_vm10, %v2362_v59, %v427_v53  ;;  %v231_v10 = vmul.f32 %v199_v39, %v199_v39 }
  0xbc   : > { %v754_v55 = vmul.f32 %v2420_v48, %v2364_v60  ;;  %2029 = vrcp.f32 %v2494_v57  ;;  %v2522_v31 = vmax.f32 %v696_v62, 1e-12  ;;  %vm706_vm13 = vcmp.eq.f32.partialorder %v2370_v3, 0.0  ;;  %v2576_v62 = vld [vmem:[%s3723_s1] ss:$0 sm:$0xff] }
  0xbd   : > { %vm416_vm14 = vcmp.eq.f32.partialorder %v2386_v13, inf  ;;  %v435_v51 = vmul.f32 %v2464_v43, %v434_v5  ;;  %v2527_v15 = vpop.eup %2025  ;;  %2031 = vrcp.f32 %v2501_v41  ;;  %v2530_v17 = vmax.f32 %v408_v61, 1e-12 }
  0xbe   : > { %v310_v18 = vsel %vm240_vm0, %v231_v10, 0.0  ;;  %v755_v24 = vsub.f32 1.0, %v754_v55  ;;  %v684_v37 = vsel %vm682_vm9, %v683_v26, %v681_v9  ;;  %v432_v20 = vsel %vm430_vm11, %v431_v52, %v429_v22 }
  0xbf   : > { %v2533_v25 = vpop.eup %2027  ;;  %v703_v32 = vmul.f32 %v702_v4, %v2370_v3  ;;  %v414_v33 = vmul.f32 %v2432_v58, %v413_v8  ;;  %311 = vadd.xlane.f32.xlu1 %v310_v18  ;;  %vm759_vm15 = vweird.f32 %v2420_v48  ;;  %v762_v28 = vand.u32 2147483647, %v2364_v60 }
  0xc0   : > { %v756_v38 = vmul.f32 %v2420_v48, %v755_v24  ;;  %v764_v45 = vand.u32 2147483648, %v2364_v60  ;;  %2033 = vrcp.f32 %v2522_v31  ;;  %vm418_vm1 = vcmp.eq.f32.partialorder %v2386_v13, 0.0 }
  0xc1   : > { %v419_v40 = vand.u32 2147483648, %v2386_v13  ;;  %v436_v59 = vmul.f32 0.5, %v435_v51  ;;  %v443_v46 = vand.u32 2147483648, %v2426_v50  ;;  %v2549_v26 = vmax.f32 %v684_v37, 1e-12 }
  0xc2   : > { %v710_v58 = vmul.f32 %v2533_v25, %v2477_v34  ;;  %v757_v23 = vadd.f32 %v2420_v48, %v756_v38  ;;  %vm758_vm2 = vweird.f32 %v2364_v60  ;;  %v2557_v27 = vpop.eup %2029  ;;  %2035 = vrcp.f32 %v2530_v17  ;;  %v2604_v38 = vpop.xlane.xlu0 %272 }
  0xc3   : > { %v2560_v49 = vmax.f32 %v432_v20, 1e-12  ;;  %vm760_vm3 = vmor %vm758_vm2, %vm759_vm15  ;;  %v765_v29 = vor.u32 1.1754944e-38, %v764_v45  ;;  %v769_v30 = vmul.f32 %v2413_v42, %v2357_v54  ;;  %v2566_v53 = vpop.eup %2031  ;;  %v705_v60 = vsel %vm704_vm12, %v2370_v3, %v703_v32 }
  0xc4   : > { %v415_v5 = vmul.f32 %v414_v33, %v2386_v13  ;;  %v761_v39 = vsel %vm760_vm3, %v2420_v48, %v757_v23  ;;  %vm763_vm4 = vcmp.eq.f32.partialorder %v762_v28, 8.507059e+37  ;;  %v437_v52 = vsub.f32 1.5, %v436_v59 }
  0xc5   : > { %v766_v61 = vsel %vm763_vm4, %v765_v29, %v761_v39  ;;  %2037 = vrsqrt.f32 %v2555_v56  ;;  %v770_v4 = vsub.f32 1.0, %v769_v30  ;;  %v711_v8 = vmul.f32 %v2533_v25, %v710_v58 }
  0xc6   : > { %v767_v9 = vmul.f32 %v766_v61, %v2188_v2  ;;  %v777_v22 = vand.u32 2147483647, %v2357_v54  ;;  %v779_v10 = vand.u32 2147483648, %v2357_v54  ;;  %v2583_v48 = vpop.eup %2033  ;;  %2039 = vrcp.f32 %v2549_v26 }
  0xc7   : > { %v771_v55 = vmul.f32 %v2413_v42, %v770_v4  ;;  %vm774_vm5 = vweird.f32 %v2413_v42  ;;  %v1114_v51 = vmul.f32 %v2507_v63, %v2446_v12  ;;  %2041 = vrcp.f32 %v2560_v49 }
  0xc8   : > { %v708_v2 = vsel %vm706_vm13, %v707_v6, %v705_v60  ;;  %v417_v18 = vsel %vm416_vm14, %v2386_v13, %v415_v5  ;;  %v1237_v24 = vmul.f32 %v2576_v62, %v767_v9  ;;  %v2599_v37 = vpop.eup %2035  ;;  %v438_v20 = vmul.f32 %v2464_v43, %v437_v52 }
  0xc9   : > { %v772_v32 = vadd.f32 %v2413_v42, %v771_v55  ;;  %vm773_vm6 = vweird.f32 %v2357_v54  ;;  %v1115_v33 = vsub.f32 1.0, %v1114_v51  ;;  %v712_v28 = vmul.f32 0.5, %v711_v8 }
  0xca   : > { %1870 = vmatmul.msk.f32.vlgmr.msra.gmra.mxu0 %vm240_vm0, %v1237_v24  ;;  %1902 = vmatmul.msk.f32.vlgmr.msra.gmra.mxu1 %vm240_vm0, %v1237_v24  ;;  %vm775_vm7 = vmor %vm773_vm6, %vm774_vm5  ;;  %vm778_vm8 = vcmp.eq.f32.partialorder %v777_v22, 8.507059e+37  ;;  %v780_v3 = vor.u32 1.1754944e-38, %v779_v10  ;;  %v1124_v6 = vand.u32 2147483648, %v2446_v12  ;;  %vm1119_vm9 = vweird.f32 %v2507_v63 }
  0xcb   : > { %v2611_v43 = vpop.eup %2037  ;;  %1934 = vmatmul.msk.f32.vlgmr.msra.gmra.mxu2 %vm240_vm0, %v1237_v24  ;;  %v776_v54 = vsel %vm775_vm7, %v2413_v42, %v772_v32  ;;  %v1116_v45 = vmul.f32 %v2507_v63, %v1115_v33  ;;  %v1122_v59 = vand.u32 2147483647, %v2446_v12  ;;  %v2618_v58 = vmax.f32 %v708_v2, 1e-12 }
  0xcc   : > { %v420_v23 = vsel %vm418_vm1, %v419_v40, %v417_v18  ;;  %vm440_vm10 = vcmp.eq.f32.partialorder %v2426_v50, inf  ;;  %v781_v29 = vsel %vm778_vm8, %v780_v3, %v776_v54  ;;  %2043 = vrsqrt.f32 %v2604_v38  ;;  %v2624_v30 = vpop.eup %2039 }
  0xcd   : > { %v782_v42 = vmul.f32 %v781_v29, %v2185_v1  ;;  %v1117_v60 = vadd.f32 %v2507_v63, %v1116_v45  ;;  %vm1118_vm11 = vweird.f32 %v2446_v12  ;;  %v784_v5 = vmul.f32 %v2391_v16, %v2341_v44  ;;  %v2631_v39 = vpop.eup %2041  ;;  %v2677_v45 = vpop.xlane.xlu1 %275 }
  0xce   : > { %v439_v13 = vmul.f32 %v438_v20, %v2426_v50  ;;  %v713_v40 = vsub.f32 1.5, %v712_v28  ;;  %v446_v52 = vmul.f32 %v2611_v43, %v2555_v56  ;;  %vm1120_vm12 = vmor %vm1118_vm11, %vm1119_vm9  ;;  %v1125_v61 = vor.u32 1.1754944e-38, %v1124_v6 }
  0xcf   : > { %vm442_vm13 = vcmp.eq.f32.partialorder %v2426_v50, 0.0  ;;  %vm716_vm14 = vcmp.eq.f32.partialorder %v2477_v34, inf  ;;  %v1121_v1 = vsel %vm1120_vm12, %v2507_v63, %v1117_v60  ;;  %vm1123_vm15 = vcmp.eq.f32.partialorder %v1122_v59, 8.507059e+37 }
  0xd0   : > { %v785_v12 = vsub.f32 1.0, %v784_v5  ;;  %v1129_v4 = vmul.f32 %v2479_v47, %v2407_v35  ;;  %v1238_v8 = vmul.f32 %v2576_v62, %v782_v42  ;;  %v1126_v9 = vsel %vm1123_vm15, %v1125_v61, %v1121_v1 }
  0xd1   : > { %v792_v22 = vand.u32 2147483647, %v2341_v44  ;;  %v794_v10 = vand.u32 2147483648, %v2341_v44  ;;  %v1127_v55 = vmul.f32 %v1126_v9, %v2204_v11  ;;  %vm789_vm1 = vweird.f32 %v2391_v16  ;;  %v2717_v9 = vpop.xlane.xlu2 %278 }
  0xd2   : > { %v786_v51 = vmul.f32 %v2391_v16, %v785_v12  ;;  %v1130_v2 = vsub.f32 1.0, %v1129_v4  ;;  %v2649_v63 = vpop.eup %2043  ;;  %v714_v18 = vmul.f32 %v2533_v25, %v713_v40  ;;  %vm718_vm2 = vcmp.eq.f32.partialorder %v2477_v34, 0.0  ;;  %1871 = vmatmul.msk.f32.gmra.mxu0 %vm240_vm0, %v1238_v8  ;;  %1903 = vmatmul.msk.f32.gmra.mxu1 %vm240_vm0, %v1238_v8 }
  0xd3   : > { %v447_v24 = vmul.f32 %v2611_v43, %v446_v52  ;;  %vm788_vm3 = vweird.f32 %v2341_v44  ;;  %vm1134_vm4 = vweird.f32 %v2479_v47  ;;  %v2659_v11 = vmul.f32 %v2576_v62, %v1127_v55  ;;  %1935 = vmatmul.msk.f32.gmra.mxu2 %vm240_vm0, %v1238_v8 }
  0xd4   : > { %v787_v20 = vadd.f32 %v2391_v16, %v786_v51  ;;  %v1131_v25 = vmul.f32 %v2479_v47, %v1130_v2  ;;  %v1137_v32 = vand.u32 2147483647, %v2407_v35  ;;  %v2665_v33 = vmax.f32 %v420_v23, 1e-12  ;;  %vm790_vm5 = vmor %vm788_vm3, %vm789_vm1 }
  0xd5   : > { %vm793_vm6 = vcmp.eq.f32.partialorder %v792_v22, 8.507059e+37  ;;  %v795_v44 = vor.u32 1.1754944e-38, %v794_v10  ;;  %v1139_v28 = vand.u32 2147483648, %v2407_v35  ;;  %1894 = vmatmul.msk.f32.vlgmr.msra.gmra.mxu3 %vm240_vm0, %v2659_v11  ;;  %v458_v3 = vmul.f32 %v2649_v63, %v2604_v38 }
  0xd6   : > { %v791_v6 = vsel %vm790_vm5, %v2391_v16, %v787_v20  ;;  %v1132_v54 = vadd.f32 %v2479_v47, %v1131_v25  ;;  %vm1133_vm7 = vweird.f32 %v2407_v35  ;;  %v715_v59 = vmul.f32 %v714_v18, %v2477_v34  ;;  %1970 = vmatpush.msra.mxu3 %v2314_v19 }
  0xd7   : > { %v448_v23 = vmul.f32 0.5, %v447_v24  ;;  %v796_v29 = vsel %vm793_vm6, %v795_v44, %v791_v6  ;;  %vm1135_vm8 = vmor %vm1133_vm7, %vm1134_vm4  ;;  %v1140_v42 = vor.u32 1.1754944e-38, %v1139_v28  ;;  %v441_v16 = vsel %vm440_vm10, %v2426_v50, %v439_v13 }
  0xd8   : > { %v797_v60 = vmul.f32 %v796_v29, %v2182_v0  ;;  %v1136_v35 = vsel %vm1135_vm8, %v2479_v47, %v1132_v54  ;;  %vm1138_vm9 = vcmp.eq.f32.partialorder %v1137_v32, 8.507059e+37  ;;  %v719_v5 = vand.u32 2147483648, %v2477_v34 }
  0xd9   : > { %v1141_v40 = vsel %vm1138_vm9, %v1140_v42, %v1136_v35  ;;  %2045 = vrsqrt.f32 %v2677_v45  ;;  %v799_v52 = vmul.f32 %v2566_v53, %v2501_v41  ;;  %v459_v19 = vmul.f32 %v2649_v63, %v458_v3 }
  0xda   : > { %2047 = vrcp.f32 %v2618_v58  ;;  %v1239_v61 = vmul.f32 %v2576_v62, %v797_v60  ;;  %v1142_v13 = vmul.f32 %v1141_v40, %v2198_v7  ;;  %v444_v0 = vsel %vm442_vm13, %v443_v46, %v441_v16 }
  0xdb   : > { %v717_v47 = vsel %vm716_vm14, %v2477_v34, %v715_v59  ;;  %v449_v1 = vsub.f32 1.5, %v448_v23  ;;  %v800_v12 = vsub.f32 1.0, %v799_v52  ;;  %2049 = vrcp.f32 %v2665_v33  ;;  %v2109_v59 = vld [vmem:[%s2179_s18 + $0x18] sm:$0xff] }
  0xdc   : > { %1872 = vmatmul.msk.f32.gmra.mxu0 %vm240_vm0, %v1239_v61  ;;  %v2706_v4 = vmul.f32 %v2576_v62, %v1142_v13  ;;  %1904 = vmatmul.msk.f32.gmra.mxu1 %vm240_vm0, %v1239_v61  ;;  %v809_v7 = vand.u32 2147483648, %v2501_v41  ;;  %vm452_vm10 = vcmp.eq.f32.partialorder %v2555_v56, inf  ;;  %vm804_vm11 = vweird.f32 %v2566_v53 }
  0xdd   : > { %1936 = vmatmul.msk.f32.gmra.mxu2 %vm240_vm0, %v1239_v61  ;;  %v801_v50 = vmul.f32 %v2566_v53, %v800_v12  ;;  %v807_v46 = vand.u32 2147483647, %v2501_v41  ;;  %v1144_v8 = vmul.f32 %v2448_v36, %v2398_v21  ;;  %v2719_v22 = vmax.f32 %v444_v0, 1e-12 }
  0xde   : > { %v720_v10 = vsel %vm718_vm2, %v719_v5, %v717_v47  ;;  %v455_v55 = vand.u32 2147483648, %v2555_v56  ;;  %v460_v51 = vmul.f32 0.5, %v459_v19  ;;  %1895 = vmatmul.msk.f32.gmra.mxu3 %vm240_vm0, %v2706_v4  ;;  %v450_v18 = vmul.f32 %v2611_v43, %v449_v1  ;;  %v2110_v47 = vld [vmem:[%s2179_s18 + $0xd0] sm:$0xff] }
  0xdf   : > { %v2726_v2 = vpop.eup %2045  ;;  %v802_v24 = vadd.f32 %v2566_v53, %v801_v50  ;;  %vm803_vm12 = vweird.f32 %v2501_v41  ;;  %v1145_v20 = vsub.f32 1.0, %v1144_v8  ;;  %v810_v34 = vor.u32 1.1754944e-38, %v809_v7 }
  0xe0   : > { %v2731_v25 = vpop.eup %2047  ;;  %vm805_vm13 = vmor %vm803_vm12, %vm804_vm11  ;;  %v1152_v32 = vand.u32 2147483647, %v2398_v21  ;;  %v1154_v44 = vand.u32 2147483648, %v2398_v21  ;;  %2051 = vrsqrt.f32 %v2717_v9  ;;  %vm808_vm14 = vcmp.eq.f32.partialorder %v807_v46, 8.507059e+37 }
  0xe1   : > { %v806_v43 = vsel %vm805_vm13, %v2566_v53, %v802_v24  ;;  %v1146_v28 = vmul.f32 %v2448_v36, %v1145_v20  ;;  %vm1149_vm15 = vweird.f32 %v2448_v36  ;;  %v2741_v41 = vpop.eup %2049  ;;  %2053 = vrcp.f32 %v2719_v22 }
  0xe2   : > { %v461_v3 = vsub.f32 1.5, %v460_v51  ;;  %v470_v6 = vmul.f32 %v2726_v2, %v2677_v45  ;;  %v811_v54 = vsel %vm808_vm14, %v810_v34, %v806_v43  ;;  %vm454_vm1 = vcmp.eq.f32.partialorder %v2555_v56, 0.0 }
  0xe3   : > { %v812_v23 = vmul.f32 %v2109_v59, %v811_v54  ;;  %v1147_v53 = vadd.f32 %v2448_v36, %v1146_v28  ;;  %vm1148_vm2 = vweird.f32 %v2398_v21  ;;  %v814_v29 = vmul.f32 %v2527_v15, %v2450_v14 }
  0xe4   : > { %v2752_v42 = vmax.f32 %v720_v10, 1e-12  ;;  %v451_v16 = vmul.f32 %v450_v18, %v2555_v56  ;;  %vm1150_vm3 = vmor %vm1148_vm2, %vm1149_vm15  ;;  %vm1153_vm4 = vcmp.eq.f32.partialorder %v1152_v32, 8.507059e+37  ;;  %v1155_v60 = vor.u32 1.1754944e-38, %v1154_v44 }
  0xe5   : > { %v1240_v35 = vmul.f32 %v2576_v62, %v812_v23  ;;  %v1151_v5 = vsel %vm1150_vm3, %v2448_v36, %v1147_v53  ;;  %v815_v40 = vsub.f32 1.0, %v814_v29  ;;  %v824_v52 = vand.u32 2147483648, %v2450_v14 }
  0xe6   : > { %v2758_v19 = vpop.eup %2051  ;;  %v462_v21 = vmul.f32 %v2649_v63, %v461_v3  ;;  %v471_v61 = vmul.f32 %v2726_v2, %v470_v6  ;;  %v1156_v13 = vsel %vm1153_vm4, %v1155_v60, %v1151_v5  ;;  %v1159_v0 = vmul.f32 %v2557_v27, %v2494_v57  ;;  %v2111_v6 = vld [vmem:[%s2179_s18 + $0x20] sm:$0xff] }
  0xe7   : > { %1873 = vmatmul.msk.f32.gmra.mxu0 %vm240_vm0, %v1240_v35  ;;  %v1157_v1 = vmul.f32 %v2110_v47, %v1156_v13  ;;  %1905 = vmatmul.msk.f32.gmra.mxu1 %vm240_vm0, %v1240_v35  ;;  %v816_v36 = vmul.f32 %v2527_v15, %v815_v40  ;;  %vm819_vm5 = vweird.f32 %v2527_v15  ;;  %v822_v12 = vand.u32 2147483647, %v2450_v14  ;;  %v2770_v7 = vpop.eup %2053  ;;  %v2112_v40 = vld [vmem:[%s2179_s18 + $0xd8] sm:$0xff] }
  0xe8   : > { %v453_v63 = vsel %vm452_vm10, %v2555_v56, %v451_v16  ;;  %vm464_vm6 = vcmp.eq.f32.partialorder %v2604_v38, inf  ;;  %1937 = vmatmul.msk.f32.gmra.mxu2 %vm240_vm0, %v1240_v35  ;;  %v482_v50 = vmul.f32 %v2758_v19, %v2717_v9  ;;  %v1160_v46 = vsub.f32 1.0, %v1159_v0 }
  0xe9   : > { %v2780_v8 = vmul.f32 %v2576_v62, %v1157_v1  ;;  %v817_v10 = vadd.f32 %v2527_v15, %v816_v36  ;;  %vm818_vm7 = vweird.f32 %v2450_v14  ;;  %v825_v51 = vor.u32 1.1754944e-38, %v824_v52 }
  0xea   : > { %vm820_vm8 = vmor %vm818_vm7, %vm819_vm5  ;;  %v1161_v18 = vmul.f32 %v2557_v27, %v1160_v46  ;;  %vm1164_vm9 = vweird.f32 %v2557_v27  ;;  %v1167_v24 = vand.u32 2147483647, %v2494_v57  ;;  %v1169_v20 = vand.u32 2147483648, %v2494_v57 }
  0xeb   : > { %v463_v34 = vmul.f32 %v462_v21, %v2604_v38  ;;  %v472_v32 = vmul.f32 0.5, %v471_v61  ;;  %1896 = vmatmul.msk.f32.gmra.mxu3 %vm240_vm0, %v2780_v8  ;;  %v821_v44 = vsel %vm820_vm8, %v2527_v15, %v817_v10  ;;  %vm823_vm10 = vcmp.eq.f32.partialorder %v822_v12, 8.507059e+37  ;;  %v2800_v15 = vpop.xlane.xlu0 %281 }
  0xec   : > { %v483_v14 = vmul.f32 %v2758_v19, %v482_v50  ;;  %v826_v43 = vsel %vm823_vm10, %v825_v51, %v821_v44  ;;  %v1162_v28 = vadd.f32 %v2557_v27, %v1161_v18  ;;  %vm1163_vm11 = vweird.f32 %v2494_v57 }
  0xed   : > { %vm466_vm12 = vcmp.eq.f32.partialorder %v2604_v38, 0.0  ;;  %v467_v3 = vand.u32 2147483648, %v2604_v38  ;;  %v827_v54 = vmul.f32 %v2111_v6, %v826_v43  ;;  %vm1165_vm13 = vmor %vm1163_vm11, %vm1164_vm9  ;;  %v1170_v59 = vor.u32 1.1754944e-38, %v1169_v20 }
  0xee   : > { %v456_v23 = vsel %vm454_vm1, %v455_v55, %v453_v63  ;;  %v1166_v57 = vsel %vm1165_vm13, %v2557_v27, %v1162_v28  ;;  %vm1168_vm14 = vcmp.eq.f32.partialorder %v1167_v24, 8.507059e+37  ;;  %v829_v53 = vmul.f32 %v2599_v37, %v2530_v17 }
  0xef   : > { %v465_v29 = vsel %vm464_vm6, %v2604_v38, %v463_v34  ;;  %v473_v16 = vsub.f32 1.5, %v472_v32  ;;  %v1241_v60 = vmul.f32 %v2576_v62, %v827_v54  ;;  %v1171_v35 = vsel %vm1168_vm14, %v1170_v59, %v1166_v57  ;;  %v2854_v32 = vpop.xlane.xlu1 %284  ;;  %v2114_v57 = vld [vmem:[%s2179_s18 + $0xe0] sm:$0xff] }
  0xf0   : > { %v484_v5 = vmul.f32 0.5, %v483_v14  ;;  %v1172_v52 = vmul.f32 %v2112_v40, %v1171_v35  ;;  %2055 = vrsqrt.f32 %v2800_v15  ;;  %v830_v56 = vsub.f32 1.0, %v829_v53  ;;  %v2113_v14 = vld [vmem:[%s2179_s18 + $0x28] sm:$0xff] }
  0xf1   : > { %2057 = vrcp.f32 %v2752_v42  ;;  %v2816_v27 = vmax.f32 %v456_v23, 1e-12  ;;  %1874 = vmatmul.msk.f32.gmra.mxu0 %vm240_vm0, %v1241_v60  ;;  %1906 = vmatmul.msk.f32.gmra.mxu1 %vm240_vm0, %v1241_v60  ;;  %v839_v55 = vand.u32 2147483648, %v2530_v17  ;;  %v1174_v21 = vmul.f32 %v2624_v30, %v2549_v26 }
  0xf2   : > { %v2824_v61 = vmul.f32 %v2576_v62, %v1172_v52  ;;  %1938 = vmatmul.msk.f32.gmra.mxu2 %vm240_vm0, %v1241_v60  ;;  %v831_v13 = vmul.f32 %v2599_v37, %v830_v56  ;;  %vm834_vm15 = vweird.f32 %v2599_v37  ;;  %v837_v0 = vand.u32 2147483647, %v2530_v17 }
  0xf3   : > { %v468_v47 = vsel %vm466_vm12, %v467_v3, %v465_v29  ;;  %v474_v1 = vmul.f32 %v2726_v2, %v473_v16  ;;  %vm476_vm1 = vcmp.eq.f32.partialorder %v2677_v45, inf  ;;  %v1175_v36 = vsub.f32 1.0, %v1174_v21 }
  0xf4   : > { %v485_v12 = vsub.f32 1.5, %v484_v5  ;;  %1897 = vmatmul.msk.f32.gmra.mxu3 %vm240_vm0, %v2824_v61  ;;  %v832_v63 = vadd.f32 %v2599_v37, %v831_v13  ;;  %vm833_vm2 = vweird.f32 %v2530_v17  ;;  %v1184_v50 = vand.u32 2147483648, %v2549_v26  ;;  %v2883_v5 = vpop.xlane.xlu2 %287 }
  0xf5   : > { %vm835_vm3 = vmor %vm833_vm2, %vm834_vm15  ;;  %v840_v46 = vor.u32 1.1754944e-38, %v839_v55  ;;  %v1176_v38 = vmul.f32 %v2624_v30, %v1175_v36  ;;  %vm1179_vm4 = vweird.f32 %v2624_v30  ;;  %v1182_v2 = vand.u32 2147483647, %v2549_v26 }
  0xf6   : > { %v2842_v10 = vpop.eup %2055  ;;  %2059 = vrcp.f32 %v2816_v27  ;;  %vm478_vm5 = vcmp.eq.f32.partialorder %v2677_v45, 0.0  ;;  %v479_v51 = vand.u32 2147483648, %v2677_v45  ;;  %v836_v17 = vsel %vm835_vm3, %v2599_v37, %v832_v63 }
  0xf7   : > { %vm838_vm6 = vcmp.eq.f32.partialorder %v837_v0, 8.507059e+37  ;;  %v2848_v18 = vpop.eup %2057  ;;  %v2850_v24 = vmax.f32 %v468_v47, 1e-12  ;;  %v1177_v34 = vadd.f32 %v2624_v30, %v1176_v38  ;;  %vm1178_vm7 = vweird.f32 %v2549_v26 }
  0xf8   : > { %v841_v20 = vsel %vm838_vm6, %v840_v46, %v836_v17  ;;  %v475_v44 = vmul.f32 %v474_v1, %v2677_v45  ;;  %vm1180_vm8 = vmor %vm1178_vm7, %vm1179_vm4  ;;  %v1185_v37 = vor.u32 1.1754944e-38, %v1184_v50  ;;  %v844_v28 = vmul.f32 %v2741_v41, %v2665_v33  ;;  %v2115_v17 = vld [vmem:[%s2179_s18 + $0x30] sm:$0xff] }
  0xf9   : > { %v842_v43 = vmul.f32 %v2113_v14, %v841_v20  ;;  %v486_v3 = vmul.f32 %v2758_v19, %v485_v12  ;;  %v494_v6 = vmul.f32 %v2842_v10, %v2800_v15  ;;  %v1181_v26 = vsel %vm1180_vm8, %v2624_v30, %v1177_v34 }
  0xfa   : > { %vm1183_vm9 = vcmp.eq.f32.partialorder %v1182_v2, 8.507059e+37  ;;  %2061 = vrsqrt.f32 %v2854_v32  ;;  %v845_v23 = vsub.f32 1.0, %v844_v28  ;;  %vm488_vm10 = vcmp.eq.f32.partialorder %v2717_v9, inf }
  0xfb   : > { %v1242_v54 = vmul.f32 %v2576_v62, %v842_v43  ;;  %v1186_v59 = vsel %vm1183_vm9, %v1185_v37, %v1181_v26  ;;  %v854_v29 = vand.u32 2147483648, %v2665_v33  ;;  %v1189_v19 = vmul.f32 %v2583_v48, %v2522_v31  ;;  %v2116_v43 = vld [vmem:[%s2179_s18 + $0xe8] sm:$0xff] }
  0xfc   : > { %v1187_v53 = vmul.f32 %v2114_v57, %v1186_v59  ;;  %v2873_v16 = vpop.eup %2059  ;;  %v477_v30 = vsel %vm476_vm1, %v2677_v45, %v475_v44  ;;  %v846_v60 = vmul.f32 %v2741_v41, %v845_v23  ;;  %vm849_vm11 = vweird.f32 %v2741_v41 }
  0xfd   : > { %1875 = vmatmul.msk.f32.gmra.mxu0 %vm240_vm0, %v1242_v54  ;;  %1907 = vmatmul.msk.f32.gmra.mxu1 %vm240_vm0, %v1242_v54  ;;  %v852_v35 = vand.u32 2147483647, %v2665_v33  ;;  %v487_v40 = vmul.f32 %v486_v3, %v2717_v9  ;;  %v495_v52 = vmul.f32 %v2842_v10, %v494_v6  ;;  %v1190_v55 = vsub.f32 1.0, %v1189_v19 }
  0xfe   : > { %v2888_v56 = vmul.f32 %v2576_v62, %v1187_v53  ;;  %1939 = vmatmul.msk.f32.gmra.mxu2 %vm240_vm0, %v1242_v54  ;;  %v847_v21 = vadd.f32 %v2741_v41, %v846_v60  ;;  %vm848_vm12 = vweird.f32 %v2665_v33  ;;  %v855_v13 = vor.u32 1.1754944e-38, %v854_v29  ;;  %v2942_v53 = vpop.xlane.xlu0 %290 }
  0xff   : > { %vm1194_vm13 = vweird.f32 %v2583_v48  ;;  %vm850_vm14 = vmor %vm848_vm12, %vm849_vm11  ;;  %v1191_v0 = vmul.f32 %v2583_v48, %v1190_v55  ;;  %v1197_v47 = vand.u32 2147483647, %v2522_v31  ;;  %v1199_v1 = vand.u32 2147483648, %v2522_v31 }
 0x100   : > { %1898 = vmatmul.msk.f32.gmra.mxu3 %vm240_vm0, %v2888_v56  ;;  %2063 = vrsqrt.f32 %v2883_v5  ;;  %v2900_v36 = vpop.eup %2061  ;;  %vm490_vm15 = vcmp.eq.f32.partialorder %v2717_v9, 0.0  ;;  %v491_v33 = vand.u32 2147483648, %v2717_v9  ;;  %v851_v12 = vsel %vm850_vm14, %v2741_v41, %v847_v21 }
 0x101   : > { %vm853_vm1 = vcmp.eq.f32.partialorder %v852_v35, 8.507059e+37  ;;  %v480_v63 = vsel %vm478_vm5, %v479_v51, %v477_v30  ;;  %v1192_v46 = vadd.f32 %v2583_v48, %v1191_v0  ;;  %vm1193_vm2 = vweird.f32 %v2522_v31 }
 0x102   : > { %v856_v50 = vsel %vm853_vm1, %v855_v13, %v851_v12  ;;  %v489_v38 = vsel %vm488_vm10, %v2717_v9, %v487_v40  ;;  %v496_v2 = vmul.f32 0.5, %v495_v52  ;;  %vm1195_vm3 = vmor %vm1193_vm2, %vm1194_vm13  ;;  %v1200_v41 = vor.u32 1.1754944e-38, %v1199_v1 }
 0x103   : > { %v857_v20 = vmul.f32 %v2115_v17, %v856_v50  ;;  %v506_v45 = vmul.f32 %v2900_v36, %v2854_v32  ;;  %v1196_v51 = vsel %vm1195_vm3, %v2583_v48, %v1192_v46  ;;  %vm1198_vm4 = vcmp.eq.f32.partialorder %v1197_v47, 8.507059e+37  ;;  %v2117_v50 = vld [vmem:[%s2179_s18 + $0x38] sm:$0xff] }
 0x104   : > { %v859_v31 = vmul.f32 %v2631_v39, %v2560_v49  ;;  %v1201_v44 = vsel %vm1198_vm4, %v1200_v41, %v1196_v51  ;;  %vm863_vm5 = vweird.f32 %v2560_v49  ;;  %vm864_vm6 = vweird.f32 %v2631_v39 }
 0x105   : > { %v1243_v34 = vmul.f32 %v2576_v62, %v857_v20  ;;  %v1202_v37 = vmul.f32 %v2116_v43, %v1201_v44  ;;  %v867_v3 = vand.u32 2147483647, %v2560_v49  ;;  %v869_v48 = vand.u32 2147483648, %v2560_v49  ;;  %vm2951_vm7 = vmor %vm863_vm5, %vm864_vm6 }
 0x106   : > { %v2923_v14 = vpop.eup %2063  ;;  %v860_v28 = vsub.f32 1.0, %v859_v31  ;;  %2065 = vrcp.f32 %v2850_v24  ;;  %v1204_v26 = vmul.f32 %v2731_v25, %v2618_v58  ;;  %v2935_v54 = vmax.f32 %v480_v63, 1e-12 }
 0x107   : > { %1876 = vmatmul.msk.f32.gmra.mxu0 %vm240_vm0, %v1243_v34  ;;  %1908 = vmatmul.msk.f32.gmra.mxu1 %vm240_vm0, %v1243_v34  ;;  %v518_v6 = vmul.f32 %v2923_v14, %v2883_v5  ;;  %v497_v59 = vsub.f32 1.5, %v496_v2  ;;  %v2938_v23 = vmul.f32 %v2576_v62, %v1202_v37  ;;  %v492_v29 = vsel %vm490_vm15, %v491_v33, %v489_v38 }
 0x108   : > { %1940 = vmatmul.msk.f32.gmra.mxu2 %vm240_vm0, %v1243_v34  ;;  %v861_v57 = vmul.f32 %v2631_v39, %v860_v28  ;;  %v507_v19 = vmul.f32 %v2900_v36, %v506_v45  ;;  %v870_v60 = vor.u32 1.1754944e-38, %v869_v48  ;;  %v1205_v35 = vsub.f32 1.0, %v1204_v26  ;;  %v2118_v45 = vld [vmem:[%s2179_s18 + $0xf0] sm:$0xff]  ;;  %v3011_v26 = vpop.xlane.xlu1 %293 }
 0x109   : > { %1899 = vmatmul.msk.f32.gmra.mxu3 %vm240_vm0, %v2938_v23  ;;  %v519_v40 = vmul.f32 %v2923_v14, %v518_v6  ;;  %vm868_vm8 = vcmp.eq.f32.partialorder %v867_v3, 8.507059e+37  ;;  %v1214_v52 = vand.u32 2147483648, %v2618_v58  ;;  %vm1209_vm9 = vweird.f32 %v2731_v25 }
 0x10a   : > { %v862_v9 = vadd.f32 %v2631_v39, %v861_v57  ;;  %v1206_v55 = vmul.f32 %v2731_v25, %v1205_v35  ;;  %v1212_v49 = vand.u32 2147483647, %v2618_v58  ;;  %2067 = vrsqrt.f32 %v2942_v53 }
 0x10b   : > { %v2964_v21 = vmax.f32 %v492_v29, 1e-12  ;;  %v498_v13 = vmul.f32 %v2842_v10, %v497_v59  ;;  %vm500_vm10 = vcmp.eq.f32.partialorder %v2800_v15, inf  ;;  %v508_v1 = vmul.f32 0.5, %v507_v19 }
 0x10c   : > { %v866_v0 = vsel %vm2951_vm7, %v2631_v39, %v862_v9  ;;  %v2971_v47 = vpop.eup %2065  ;;  %v1207_v12 = vadd.f32 %v2731_v25, %v1206_v55  ;;  %vm1208_vm11 = vweird.f32 %v2618_v58  ;;  %v520_v63 = vmul.f32 0.5, %v519_v40 }
 0x10d   : > { %v871_v33 = vsel %vm868_vm8, %v870_v60, %v866_v0  ;;  %vm1210_vm12 = vmor %vm1208_vm11, %vm1209_vm9  ;;  %v1215_v10 = vor.u32 1.1754944e-38, %v1214_v52  ;;  %v874_v38 = vmul.f32 %v2770_v7, %v2719_v22  ;;  %vm1213_vm13 = vcmp.eq.f32.partialorder %v1212_v49, 8.507059e+37  ;;  %v2119_v0 = vld [vmem:[%s2179_s18 + $0x40] sm:$0xff] }
 0x10e   : > { %v872_v46 = vmul.f32 %v2117_v50, %v871_v33  ;;  %v1211_v39 = vsel %vm1210_vm12, %v2731_v25, %v1207_v12  ;;  %vm878_vm14 = vweird.f32 %v2719_v22  ;;  %vm879_vm15 = vweird.f32 %v2770_v7  ;;  %v3044_v50 = vpop.xlane.xlu2 %296 }
 0x10f   : > { %v1216_v2 = vsel %vm1213_vm13, %v1215_v10, %v1211_v39  ;;  %v875_v17 = vsub.f32 1.0, %v874_v38  ;;  %v882_v20 = vand.u32 2147483647, %v2719_v22  ;;  %2069 = vrcp.f32 %v2935_v54  ;;  %vm3007_vm1 = vmor %vm878_vm14, %vm879_vm15 }
 0x110   : > { %v1244_v58 = vmul.f32 %v2576_v62, %v872_v46  ;;  %v2985_v41 = vpop.eup %2067  ;;  %v1217_v51 = vmul.f32 %v2118_v45, %v1216_v2  ;;  %v884_v31 = vand.u32 2147483648, %v2719_v22  ;;  %v1219_v25 = vmul.f32 %v2848_v18, %v2752_v42 }
 0x111   : > { %2071 = vrcp.f32 %v2964_v21  ;;  %v499_v34 = vmul.f32 %v498_v13, %v2800_v15  ;;  %v530_v44 = vmul.f32 %v2985_v41, %v2942_v53  ;;  %v876_v43 = vmul.f32 %v2770_v7, %v875_v17 }
 0x112   : > { %1877 = vmatmul.msk.f32.gmra.mxu0 %vm240_vm0, %v1244_v58  ;;  %1909 = vmatmul.msk.f32.gmra.mxu1 %vm240_vm0, %v1244_v58  ;;  %v509_v37 = vsub.f32 1.5, %v508_v1  ;;  %v3000_v28 = vmul.f32 %v2576_v62, %v1217_v51  ;;  %v885_v48 = vor.u32 1.1754944e-38, %v884_v31  ;;  %v1220_v6 = vsub.f32 1.0, %v1219_v25 }
 0x113   : > { %1941 = vmatmul.msk.f32.gmra.mxu2 %vm240_vm0, %v1244_v58  ;;  %v521_v59 = vsub.f32 1.5, %v520_v63  ;;  %v531_v57 = vmul.f32 %v2985_v41, %v530_v44  ;;  %v877_v29 = vadd.f32 %v2770_v7, %v876_v43  ;;  %vm883_vm2 = vcmp.eq.f32.partialorder %v882_v20, 8.507059e+37  ;;  %v3081_v44 = vpop.xlane.xlu0 %299 }
 0x114   : > { %1900 = vmatmul.msk.f32.gmra.mxu3 %vm240_vm0, %v3000_v28  ;;  %v1221_v19 = vmul.f32 %v2848_v18, %v1220_v6  ;;  %vm1224_vm3 = vweird.f32 %v2848_v18  ;;  %v1227_v22 = vand.u32 2147483647, %v2752_v42  ;;  %v1229_v30 = vand.u32 2147483648, %v2752_v42 }
 0x115   : > { %vm502_vm4 = vcmp.eq.f32.partialorder %v2800_v15, 0.0  ;;  %v503_v60 = vand.u32 2147483648, %v2800_v15  ;;  %v881_v35 = vsel %vm3007_vm1, %v2770_v7, %v877_v29  ;;  %2073 = vrsqrt.f32 %v3011_v26  ;;  %v3027_v40 = vpop.eup %2069 }
 0x116   : > { %v501_v9 = vsel %vm500_vm10, %v2800_v15, %v499_v34  ;;  %v886_v52 = vsel %vm883_vm2, %v885_v48, %v881_v35  ;;  %v1222_v55 = vadd.f32 %v2848_v18, %v1221_v19  ;;  %vm1223_vm5 = vweird.f32 %v2752_v42  ;;  %v2121_v35 = vld [vmem:[%s2179_s18 + $0x48] sm:$0xff] }
 0x117   : > { %v3034_v49 = vpop.eup %2071  ;;  %v510_v13 = vmul.f32 %v2900_v36, %v509_v37  ;;  %v522_v7 = vmul.f32 %v2923_v14, %v521_v59  ;;  %v887_v1 = vmul.f32 %v2119_v0, %v886_v52  ;;  %vm1225_vm6 = vmor %vm1223_vm5, %vm1224_vm3  ;;  %v1230_v33 = vor.u32 1.1754944e-38, %v1229_v30  ;;  %v2120_v14 = vld [vmem:[%s2179_s18 + $0xf8] sm:$0xff] }
 0x118   : > { %v532_v12 = vmul.f32 0.5, %v531_v57  ;;  %v1226_v63 = vsel %vm1225_vm6, %v2848_v18, %v1222_v55  ;;  %vm1228_vm7 = vcmp.eq.f32.partialorder %v1227_v22, 8.507059e+37  ;;  %v889_v42 = vmul.f32 %v2873_v16, %v2816_v27 }
 0x119   : > { %v1245_v46 = vmul.f32 %v2576_v62, %v887_v1  ;;  %v1231_v36 = vsel %vm1228_vm7, %v1230_v33, %v1226_v63  ;;  %vm893_vm8 = vweird.f32 %v2816_v27  ;;  %vm894_vm9 = vweird.f32 %v2873_v16 }
 0x11a   : > { %v1232_v10 = vmul.f32 %v2120_v14, %v1231_v36  ;;  %v890_v38 = vsub.f32 1.0, %v889_v42  ;;  %v897_v39 = vand.u32 2147483647, %v2816_v27  ;;  %v899_v18 = vand.u32 2147483648, %v2816_v27  ;;  %vm3075_vm13 = vmor %vm893_vm8, %vm894_vm9 }
 0x11b   : > { %v3052_v58 = vpop.eup %2073  ;;  %vm512_vm10 = vcmp.eq.f32.partialorder %v2854_v32, inf  ;;  %v515_v2 = vand.u32 2147483648, %v2854_v32  ;;  %1878 = vmatmul.msk.f32.gmra.mxu0 %vm240_vm0, %v1245_v46  ;;  %1910 = vmatmul.msk.f32.gmra.mxu1 %vm240_vm0, %v1245_v46  ;;  %2075 = vrsqrt.f32 %v3044_v50  ;;  %v504_v17 = vsel %vm502_vm4, %v503_v60, %v501_v9 }
 0x11c   : > { %vm514_vm11 = vcmp.eq.f32.partialorder %v2854_v32, 0.0  ;;  %v3063_v20 = vmul.f32 %v2576_v62, %v1232_v10  ;;  %1942 = vmatmul.msk.f32.gmra.mxu2 %vm240_vm0, %v1245_v46  ;;  %v542_v45 = vmul.f32 %v3052_v58, %v3011_v26  ;;  %v891_v51 = vmul.f32 %v2873_v16, %v890_v38 }
 0x11d   : > { %v511_v31 = vmul.f32 %v510_v13, %v2854_v32  ;;  %vm524_vm12 = vcmp.eq.f32.partialorder %v2883_v5, inf  ;;  %v900_v25 = vor.u32 1.1754944e-38, %v899_v18  ;;  %v904_v34 = vmul.f32 %v2971_v47, %v2850_v24 }
 0x11e   : > { %v523_v43 = vmul.f32 %v522_v7, %v2883_v5  ;;  %v533_v37 = vsub.f32 1.5, %v532_v12  ;;  %1901 = vmatmul.msk.f32.gmra.mxu3 %vm240_vm0, %v3063_v20  ;;  %v892_v3 = vadd.f32 %v2873_v16, %v891_v51  ;;  %vm898_vm14 = vcmp.eq.f32.partialorder %v897_v39, 8.507059e+37  ;;  %v3145_v39 = vpop.xlane.xlu1 %302 }
 0x11f   : > { %v905_v27 = vsub.f32 1.0, %v904_v34  ;;  %vm908_vm15 = vweird.f32 %v2850_v24  ;;  %vm909_vm1 = vweird.f32 %v2971_v47  ;;  %v912_v48 = vand.u32 2147483647, %v2850_v24 }
 0x120   : > { %v543_v6 = vmul.f32 %v3052_v58, %v542_v45  ;;  %v896_v59 = vsel %vm3075_vm13, %v2873_v16, %v892_v3  ;;  %v914_v57 = vand.u32 2147483648, %v2850_v24  ;;  %2077 = vrsqrt.f32 %v3081_v44  ;;  %vm3110_vm3 = vmor %vm908_vm15, %vm909_vm1  ;;  %v2122_v45 = vld [vmem:[%s2179_s18 + $0x50] sm:$0xff] }
 0x121   : > { %v3096_v29 = vpop.eup %2075  ;;  %v3098_v19 = vmax.f32 %v504_v17, 1e-12  ;;  %vm526_vm2 = vcmp.eq.f32.partialorder %v2883_v5, 0.0  ;;  %v901_v22 = vsel %vm898_vm14, %v900_v25, %v896_v59  ;;  %v906_v30 = vmul.f32 %v2971_v47, %v905_v27 }
 0x122   : > { %v527_v60 = vand.u32 2147483648, %v2883_v5  ;;  %v902_v9 = vmul.f32 %v2121_v35, %v901_v22  ;;  %v554_v16 = vmul.f32 %v3096_v29, %v3044_v50  ;;  %v915_v55 = vor.u32 1.1754944e-38, %v914_v57 }
 0x123   : > { %v513_v13 = vsel %vm512_vm10, %v2854_v32, %v511_v31  ;;  %v525_v7 = vsel %vm524_vm12, %v2883_v5, %v523_v43  ;;  %v907_v0 = vadd.f32 %v2971_v47, %v906_v30  ;;  %vm913_vm4 = vcmp.eq.f32.partialorder %v912_v48, 8.507059e+37 }
 0x124   : > { %v534_v1 = vmul.f32 %v2985_v41, %v533_v37  ;;  %v544_v33 = vmul.f32 0.5, %v543_v6  ;;  %v1246_v24 = vmul.f32 %v2576_v62, %v902_v9  ;;  %v919_v12 = vmul.f32 %v3027_v40, %v2935_v54 }
 0x125   : > { %v555_v63 = vmul.f32 %v3096_v29, %v554_v16  ;;  %v911_v42 = vsel %vm3110_vm3, %v2971_v47, %v907_v0  ;;  %vm923_vm5 = vweird.f32 %v2935_v54  ;;  %vm924_vm6 = vweird.f32 %v3027_v40  ;;  %v2123_v16 = vld [vmem:[%s2179_s18 + $0x58] sm:$0xff] }
 0x126   : > { %v3130_v46 = vpop.eup %2077  ;;  %1879 = vmatmul.msk.f32.gmra.mxu0 %vm240_vm0, %v1246_v24  ;;  %1911 = vmatmul.msk.f32.gmra.mxu1 %vm240_vm0, %v1246_v24  ;;  %v916_v41 = vsel %vm913_vm4, %v915_v55, %v911_v42  ;;  %v920_v36 = vsub.f32 1.0, %v919_v12  ;;  %v927_v14 = vand.u32 2147483647, %v2935_v54  ;;  %2079 = vrcp.f32 %v3098_v19  ;;  %vm3157_vm8 = vmor %vm923_vm5, %vm924_vm6  ;;  %v3226_v42 = vld [vmem:[%s3723_s1] ss:$0 sm:$0xff] }
 0x127   : > { %v516_v47 = vsel %vm514_vm11, %v515_v2, %v513_v13  ;;  %v528_v10 = vsel %vm526_vm2, %v527_v60, %v525_v7  ;;  %1926 = vmatmul.msk.f32.vlgmr.msrb.gmra.mxu3 %vm240_vm0, %v2659_v11  ;;  %1943 = vmatmul.msk.f32.gmra.mxu2 %vm240_vm0, %v1246_v24  ;;  %v929_v38 = vand.u32 2147483648, %v2935_v54  ;;  %v535_v18 = vmul.f32 %v534_v1, %v2942_v53 }
 0x128   : > { %v545_v17 = vsub.f32 1.5, %v544_v33  ;;  %v917_v51 = vmul.f32 %v2122_v45, %v916_v41  ;;  %v921_v32 = vmul.f32 %v3027_v40, %v920_v36  ;;  %vm536_vm7 = vcmp.eq.f32.partialorder %v2942_v53, inf }
 0x129   : > { %v556_v5 = vmul.f32 0.5, %v555_v63  ;;  %v566_v2 = vmul.f32 %v3130_v46, %v3081_v44  ;;  %v930_v15 = vor.u32 1.1754944e-38, %v929_v38  ;;  %v3161_v25 = vmax.f32 %v516_v47, 1e-12 }
 0x12a   : > { %v922_v34 = vadd.f32 %v3027_v40, %v921_v32  ;;  %vm928_vm9 = vcmp.eq.f32.partialorder %v927_v14, 8.507059e+37  ;;  %2081 = vrsqrt.f32 %v3145_v39  ;;  %v3165_v43 = vmax.f32 %v528_v10, 1e-12  ;;  %v2125_v32 = vld [vmem:[%s2179_s18 + $0x60] sm:$0xff] }
 0x12b   : > { %vm538_vm10 = vcmp.eq.f32.partialorder %v2942_v53, 0.0  ;;  %v539_v37 = vand.u32 2147483648, %v2942_v53  ;;  %v934_v54 = vmul.f32 %v3034_v49, %v2964_v21  ;;  %v537_v3 = vsel %vm536_vm7, %v2942_v53, %v535_v18 }
 0x12c   : > { %v546_v27 = vmul.f32 %v3052_v58, %v545_v17  ;;  %v1247_v48 = vmul.f32 %v2576_v62, %v917_v51  ;;  %v926_v6 = vsel %vm3157_vm8, %v3027_v40, %v922_v34  ;;  %v3177_v59 = vpop.eup %2079  ;;  %v557_v57 = vsub.f32 1.5, %v556_v5  ;;  %v3190_v58 = vpop.xlane.xlu2 %305 }
 0x12d   : > { %v567_v22 = vmul.f32 %v3130_v46, %v566_v2  ;;  %v931_v30 = vsel %vm928_vm9, %v930_v15, %v926_v6  ;;  %v935_v60 = vsub.f32 1.0, %v934_v54  ;;  %vm938_vm11 = vweird.f32 %v2964_v21 }
 0x12e   : > { %1880 = vmatmul.msk.f32.gmra.mxu0 %vm240_vm0, %v1247_v48  ;;  %1912 = vmatmul.msk.f32.gmra.mxu1 %vm240_vm0, %v1247_v48  ;;  %vm939_vm12 = vweird.f32 %v3034_v49  ;;  %v942_v62 = vand.u32 2147483647, %v2964_v21  ;;  %v944_v40 = vand.u32 2147483648, %v2964_v21  ;;  %2083 = vrcp.f32 %v3161_v25 }
 0x12f   : > { %1927 = vmatmul.msk.f32.gmra.mxu3 %vm240_vm0, %v2706_v4  ;;  %1944 = vmatmul.msk.f32.gmra.mxu2 %vm240_vm0, %v1247_v48  ;;  %v547_v9 = vmul.f32 %v546_v27, %v3011_v26  ;;  %vm548_vm13 = vcmp.eq.f32.partialorder %v3011_v26, inf  ;;  %v932_v52 = vmul.f32 %v2123_v16, %v931_v30  ;;  %v936_v55 = vmul.f32 %v3034_v49, %v935_v60  ;;  %vm3206_vm14 = vmor %vm938_vm11, %vm939_vm12  ;;  %v3266_v27 = vpop.xlane.xlu0 %308 }
 0x130   : > { %v3192_v35 = vpop.eup %2081  ;;  %2085 = vrcp.f32 %v3165_v43  ;;  %v540_v13 = vsel %vm538_vm10, %v539_v37, %v537_v3  ;;  %v558_v7 = vmul.f32 %v3096_v29, %v557_v57  ;;  %v945_v1 = vor.u32 1.1754944e-38, %v944_v40 }
 0x131   : > { %v568_v33 = vmul.f32 0.5, %v567_v22  ;;  %v937_v24 = vadd.f32 %v3034_v49, %v936_v55  ;;  %vm943_vm15 = vcmp.eq.f32.partialorder %v942_v62, 8.507059e+37  ;;  %2087 = vrsqrt.f32 %v3190_v58 }
 0x132   : > { %vm550_vm1 = vcmp.eq.f32.partialorder %v3011_v26, 0.0  ;;  %v551_v53 = vand.u32 2147483648, %v3011_v26  ;;  %v578_v29 = vmul.f32 %v3192_v35, %v3145_v39  ;;  %v949_v21 = vmul.f32 %v3177_v59, %v3098_v19 }
 0x133   : > { %v3218_v12 = vmax.f32 %v540_v13, 1e-12  ;;  %v549_v63 = vsel %vm548_vm13, %v3011_v26, %v547_v9  ;;  %v1248_v41 = vmul.f32 %v3226_v42, %v932_v52  ;;  %v941_v36 = vsel %vm3206_vm14, %v3034_v49, %v937_v24  ;;  %v3310_v24 = vpop.xlane.xlu1 %311 }
 0x134   : > { %v3232_v14 = vpop.eup %2083  ;;  %v946_v47 = vsel %vm943_vm15, %v945_v1, %v941_v36  ;;  %v950_v10 = vsub.f32 1.0, %v949_v21  ;;  %vm953_vm2 = vweird.f32 %v3098_v19  ;;  %vm954_vm3 = vweird.f32 %v3177_v59 }
 0x135   : > { %v559_v38 = vmul.f32 %v558_v7, %v3044_v50  ;;  %v569_v18 = vsub.f32 1.5, %v568_v33  ;;  %v957_v17 = vand.u32 2147483647, %v3098_v19  ;;  %v959_v49 = vand.u32 2147483648, %v3098_v19  ;;  %vm3258_vm6 = vmor %vm953_vm2, %vm954_vm3 }
 0x136   : > { %1881 = vmatmul.msk.f32.gmra.mxu0 %vm240_vm0, %v1248_v41  ;;  %1913 = vmatmul.msk.f32.gmra.mxu1 %vm240_vm0, %v1248_v41  ;;  %v3241_v45 = vpop.eup %2085  ;;  %vm560_vm4 = vcmp.eq.f32.partialorder %v3044_v50, inf  ;;  %v579_v51 = vmul.f32 %v3192_v35, %v578_v29  ;;  %v947_v5 = vmul.f32 %v2125_v32, %v946_v47  ;;  %v951_v2 = vmul.f32 %v3177_v59, %v950_v10 }
 0x137   : > { %1928 = vmatmul.msk.f32.gmra.mxu3 %vm240_vm0, %v2780_v8  ;;  %1945 = vmatmul.msk.f32.gmra.mxu2 %vm240_vm0, %v1248_v41  ;;  %v3250_v31 = vpop.eup %2087  ;;  %vm562_vm5 = vcmp.eq.f32.partialorder %v3044_v50, 0.0  ;;  %v563_v15 = vand.u32 2147483648, %v3044_v50  ;;  %2089 = vrcp.f32 %v3218_v12  ;;  %v552_v37 = vsel %vm550_vm1, %v551_v53, %v549_v63 }
 0x138   : > { %v952_v54 = vadd.f32 %v3177_v59, %v951_v2  ;;  %v960_v3 = vor.u32 1.1754944e-38, %v959_v49  ;;  %v561_v48 = vsel %vm560_vm4, %v3044_v50, %v559_v38  ;;  %v570_v19 = vmul.f32 %v3130_v46, %v569_v18  ;;  %v2126_v50 = vld [vmem:[%s2179_s18 + $0x68] sm:$0xff] }
 0x139   : > { %vm958_vm7 = vcmp.eq.f32.partialorder %v957_v17, 8.507059e+37  ;;  %v964_v6 = vmul.f32 %v3232_v14, %v3161_v25  ;;  %v580_v57 = vmul.f32 0.5, %v579_v51  ;;  %v1249_v22 = vmul.f32 %v3226_v42, %v947_v5 }
 0x13a   : > { %v590_v26 = vmul.f32 %v3250_v31, %v3190_v58  ;;  %v956_v30 = vsel %vm3258_vm6, %v3177_v59, %v952_v54  ;;  %2091 = vrsqrt.f32 %v3266_v27  ;;  %vm968_vm8 = vweird.f32 %v3161_v25 }
 0x13b   : > { %v965_v60 = vsub.f32 1.0, %v964_v6  ;;  %vm969_vm9 = vweird.f32 %v3232_v14  ;;  %v3283_v46 = vmax.f32 %v552_v37, 1e-12  ;;  %v961_v62 = vsel %vm958_vm7, %v960_v3, %v956_v30 }
 0x13c   : > { %v974_v40 = vand.u32 2147483648, %v3161_v25  ;;  %v972_v59 = vand.u32 2147483647, %v3161_v25  ;;  %v564_v52 = vsel %vm562_vm5, %v563_v15, %v561_v48  ;;  %v571_v55 = vmul.f32 %v570_v19, %v3081_v44  ;;  %vm3303_vm10 = vmor %vm968_vm8, %vm969_vm9  ;;  %v2127_v48 = vld [vmem:[%s2179_s18 + $0x70] sm:$0xff] }
 0x13d   : > { %v966_v9 = vmul.f32 %v3232_v14, %v965_v60  ;;  %v3290_v16 = vpop.eup %2089  ;;  %v581_v13 = vsub.f32 1.5, %v580_v57  ;;  %v591_v7 = vmul.f32 %v3250_v31, %v590_v26  ;;  %vm572_vm11 = vcmp.eq.f32.partialorder %v3081_v44, inf }
 0x13e   : > { %1882 = vmatmul.msk.f32.gmra.mxu0 %vm240_vm0, %v1249_v22  ;;  %1914 = vmatmul.msk.f32.gmra.mxu1 %vm240_vm0, %v1249_v22  ;;  %v962_v1 = vmul.f32 %v2126_v50, %v961_v62  ;;  %v979_v53 = vmul.f32 %v3241_v45, %v3165_v43  ;;  %2093 = vrcp.f32 %v3283_v46  ;;  %vm574_vm12 = vcmp.eq.f32.partialorder %v3081_v44, 0.0 }
 0x13f   : > { %1929 = vmatmul.msk.f32.gmra.mxu3 %vm240_vm0, %v2824_v61  ;;  %1946 = vmatmul.msk.f32.gmra.mxu2 %vm240_vm0, %v1249_v22  ;;  %v967_v33 = vadd.f32 %v3232_v14, %v966_v9  ;;  %v575_v25 = vand.u32 2147483648, %v3081_v44  ;;  %v975_v29 = vor.u32 1.1754944e-38, %v974_v40  ;;  %v3320_v63 = vmax.f32 %v564_v52, 1e-12 }
 0x140   : > { %v3317_v21 = vpop.eup %2091  ;;  %vm973_vm13 = vcmp.eq.f32.partialorder %v972_v59, 8.507059e+37  ;;  %v980_v36 = vsub.f32 1.0, %v979_v53  ;;  %v573_v47 = vsel %vm572_vm11, %v3081_v44, %v571_v55  ;;  %v582_v10 = vmul.f32 %v3192_v35, %v581_v13 }
 0x141   : > { %v971_v41 = vsel %vm3303_vm10, %v3232_v14, %v967_v33  ;;  %v592_v38 = vmul.f32 0.5, %v591_v7  ;;  %2095 = vrsqrt.f32 %v3310_v24  ;;  %v1250_v18 = vmul.f32 %v3226_v42, %v962_v1 }
 0x142   : > { %v981_v17 = vmul.f32 %v3241_v45, %v980_v36  ;;  %vm983_vm14 = vweird.f32 %v3165_v43  ;;  %vm984_vm15 = vweird.f32 %v3241_v45  ;;  %v602_v14 = vmul.f32 %v3317_v21, %v3266_v27 }
 0x143   : > { %v976_v49 = vsel %vm973_vm13, %v975_v29, %v971_v41  ;;  %v989_v51 = vand.u32 2147483648, %v3165_v43  ;;  %v994_v35 = vmul.f32 %v3290_v16, %v3218_v12  ;;  %v987_v5 = vand.u32 2147483647, %v3165_v43  ;;  %vm3356_vm1 = vmor %vm983_vm14, %vm984_vm15 }
 0x144   : > { %v982_v32 = vadd.f32 %v3241_v45, %v981_v17  ;;  %v3348_v2 = vpop.eup %2093  ;;  %v583_v15 = vmul.f32 %v582_v10, %v3145_v39  ;;  %v576_v54 = vsel %vm574_vm12, %v575_v25, %v573_v47  ;;  %vm584_vm2 = vcmp.eq.f32.partialorder %v3145_v39, inf  ;;  %v2128_v25 = vld [vmem:[%s2179_s18 + $0x78] sm:$0xff] }
 0x145   : > { %v995_v37 = vsub.f32 1.0, %v994_v35  ;;  %v593_v3 = vsub.f32 1.5, %v592_v38  ;;  %v977_v19 = vmul.f32 %v2127_v48, %v976_v49  ;;  %2097 = vrcp.f32 %v3320_v63 }
 0x146   : > { %1883 = vmatmul.msk.f32.gmra.mxu0 %vm240_vm0, %v1250_v18  ;;  %1915 = vmatmul.msk.f32.gmra.mxu1 %vm240_vm0, %v1250_v18  ;;  %v603_v43 = vmul.f32 %v3317_v21, %v602_v14  ;;  %v990_v26 = vor.u32 1.1754944e-38, %v989_v51  ;;  %v986_v44 = vsel %vm3356_vm1, %v3241_v45, %v982_v32  ;;  %vm988_vm3 = vcmp.eq.f32.partialorder %v987_v5, 8.507059e+37 }
 0x147   : > { %1930 = vmatmul.msk.f32.gmra.mxu3 %vm240_vm0, %v2888_v56  ;;  %1947 = vmatmul.msk.f32.gmra.mxu2 %vm240_vm0, %v1250_v18  ;;  %v1385_v6 = vpop.f32.mrf.mxu0  ;;  %v1498_v57 = vpop.f32.mrf.mxu1  ;;  %v996_v30 = vmul.f32 %v3290_v16, %v995_v37  ;;  %v1009_v60 = vmul.f32 %v3348_v2, %v3283_v46  ;;  %v3376_v62 = vmax.f32 %v576_v54, 1e-12  ;;  %v585_v40 = vsel %vm584_vm2, %v3145_v39, %v583_v15 }
 0x148   : > { %v3364_v22 = vpop.eup %2095  ;;  %1707 = vst [vmem:[%s3342_s5] sm:$0xff] %v1385_v6  ;;  %vm586_vm4 = vcmp.eq.f32.partialorder %v3145_v39, 0.0  ;;  %v587_v9 = vand.u32 2147483648, %v3145_v39  ;;  %v594_v59 = vmul.f32 %v3250_v31, %v593_v3  ;;  %v1251_v45 = vmul.f32 %v3226_v42, %v977_v19  ;;  %v2129_v6 = vld [vmem:[%s2179_s18 + $0x80] sm:$0xff] }
 0x149   : > { %1708 = vst [vmem:[%s3342_s5 + $0x8] sm:$0xff] %v1498_v57  ;;  %vm998_vm5 = vweird.f32 %v3218_v12  ;;  %vm999_vm6 = vweird.f32 %v3290_v16  ;;  %v604_v52 = vmul.f32 0.5, %v603_v43  ;;  %v614_v55 = vmul.f32 %v3364_v22, %v3310_v24 }
 0x14a   : > { %v991_v13 = vsel %vm988_vm3, %v990_v26, %v986_v44  ;;  %v1004_v7 = vand.u32 2147483648, %v3218_v12  ;;  %v997_v31 = vadd.f32 %v3290_v16, %v996_v30  ;;  %v1002_v0 = vand.u32 2147483647, %v3218_v12  ;;  %vm3399_vm7 = vmor %vm998_vm5, %vm999_vm6 }
 0x14b   : > { %v1010_v50 = vsub.f32 1.0, %v1009_v60  ;;  %v3394_v1 = vpop.eup %2097  ;;  %2099 = vrcp.f32 %v3376_v62  ;;  %v588_v12 = vsel %vm586_vm4, %v587_v9, %v585_v40  ;;  %v992_v29 = vmul.f32 %v2128_v25, %v991_v13 }
 0x14c   : > { %v595_v47 = vmul.f32 %v594_v59, %v3190_v58  ;;  %v605_v10 = vsub.f32 1.5, %v604_v52  ;;  %v615_v38 = vmul.f32 %v3364_v22, %v614_v55  ;;  %v1005_v18 = vor.u32 1.1754944e-38, %v1004_v7 }
 0x14d   : > { %v1001_v17 = vsel %vm3399_vm7, %v3290_v16, %v997_v31  ;;  %vm1003_vm8 = vcmp.eq.f32.partialorder %v1002_v0, 8.507059e+37  ;;  %v1011_v39 = vmul.f32 %v3348_v2, %v1010_v50  ;;  %v1024_v14 = vmul.f32 %v3394_v1, %v3320_v63 }
 0x14e   : > { %1884 = vmatmul.msk.f32.gmra.mxu0 %vm240_vm0, %v1251_v45  ;;  %1916 = vmatmul.msk.f32.gmra.mxu1 %vm240_vm0, %v1251_v45  ;;  %v1611_v53 = vpop.f32.mrf.mxu2  ;;  %vm596_vm9 = vcmp.eq.f32.partialorder %v3190_v58, inf  ;;  %vm598_vm10 = vcmp.eq.f32.partialorder %v3190_v58, 0.0  ;;  %v599_v49 = vand.u32 2147483648, %v3190_v58  ;;  %v3421_v51 = vmax.f32 %v588_v12, 1e-12  ;;  %v2130_v12 = vld [vmem:[%s2179_s18 + $0x88] sm:$0xff] }
 0x14f   : > { %1931 = vmatmul.msk.f32.gmra.mxu3 %vm240_vm0, %v2938_v23  ;;  %1948 = vmatmul.msk.f32.gmra.mxu2 %vm240_vm0, %v1251_v45  ;;  %1709 = vst [vmem:[%s3342_s5 + $0x10] sm:$0xff] %v1611_v53  ;;  %v1388_v41 = vpop.f32.mrf.mxu0  ;;  %v1501_v36 = vpop.f32.mrf.mxu1  ;;  %v1252_v35 = vmul.f32 %v3226_v42, %v992_v29  ;;  %vm1013_vm11 = vweird.f32 %v3283_v46  ;;  %vm1014_vm12 = vweird.f32 %v3348_v2  ;;  %v606_v16 = vmul.f32 %v3317_v21, %v605_v10 }
 0x150   : > { %1710 = vst [vmem:[%s3342_s5 + $0x18] sm:$0xff] %v1388_v41  ;;  %v616_v32 = vmul.f32 0.5, %v615_v38  ;;  %v1006_v5 = vsel %vm1003_vm8, %v1005_v18, %v1001_v17  ;;  %v1019_v15 = vand.u32 2147483648, %v3283_v46  ;;  %v597_v37 = vsel %vm596_vm9, %v3190_v58, %v595_v47  ;;  %vm3440_vm13 = vmor %vm1013_vm11, %vm1014_vm12 }
 0x151   : > { %1711 = vst [vmem:[%s3342_s5 + $0x20] sm:$0xff] %v1501_v36  ;;  %v3428_v34 = vpop.eup %2099  ;;  %v1012_v54 = vadd.f32 %v3348_v2, %v1011_v39  ;;  %v1017_v3 = vand.u32 2147483647, %v3283_v46  ;;  %v1025_v48 = vsub.f32 1.0, %v1024_v14  ;;  %2101 = vrcp.f32 %v3421_v51 }
 0x152   : > { %v1007_v57 = vmul.f32 %v2129_v6, %v1006_v5  ;;  %v600_v43 = vsel %vm598_vm10, %v599_v49, %v597_v37  ;;  %v607_v26 = vmul.f32 %v606_v16, %v3266_v27  ;;  %v617_v44 = vsub.f32 1.5, %v616_v32 }
 0x153   : > { %v1020_v30 = vor.u32 1.1754944e-38, %v1019_v15  ;;  %v1016_v40 = vsel %vm3440_vm13, %v3348_v2, %v1012_v54  ;;  %vm1018_vm14 = vcmp.eq.f32.partialorder %v1017_v3, 8.507059e+37  ;;  %v1026_v59 = vmul.f32 %v3394_v1, %v1025_v48  ;;  %v2131_v3 = vld [vmem:[%s2179_s18 + $0x90] sm:$0xff] }
 0x154   : > { %v1039_v58 = vmul.f32 %v3428_v34, %v3376_v62  ;;  %vm608_vm15 = vcmp.eq.f32.partialorder %v3266_v27, inf  ;;  %vm610_vm1 = vcmp.eq.f32.partialorder %v3266_v27, 0.0  ;;  %v611_v45 = vand.u32 2147483648, %v3266_v27 }
 0x155   : > { %v1253_v52 = vmul.f32 %v3226_v42, %v1007_v57  ;;  %vm1028_vm2 = vweird.f32 %v3320_v63  ;;  %vm1029_vm3 = vweird.f32 %v3394_v1  ;;  %v3465_v2 = vmax.f32 %v600_v43, 1e-12 }
 0x156   : > { %1885 = vmatmul.msk.f32.gmra.mxu0 %vm240_vm0, %v1252_v35  ;;  %1917 = vmatmul.msk.f32.gmra.mxu1 %vm240_vm0, %v1252_v35  ;;  %v1614_v19 = vpop.f32.mrf.mxu2  ;;  %v618_v55 = vmul.f32 %v3364_v22, %v617_v44  ;;  %v1021_v13 = vsel %vm1018_vm14, %v1020_v30, %v1016_v40  ;;  %v1034_v7 = vand.u32 2147483648, %v3320_v63  ;;  %v609_v0 = vsel %vm608_vm15, %v3266_v27, %v607_v26  ;;  %vm3481_vm4 = vmor %vm1028_vm2, %vm1029_vm3 }
 0x157   : > { %1932 = vmatmul.msk.f32.gmra.mxu3 %vm240_vm0, %v3000_v28  ;;  %1949 = vmatmul.msk.f32.gmra.mxu2 %vm240_vm0, %v1252_v35  ;;  %1712 = vst [vmem:[%s3342_s5 + $0x28] sm:$0xff] %v1614_v19  ;;  %v3469_v31 = vpop.eup %2101  ;;  %v1027_v50 = vadd.f32 %v3394_v1, %v1026_v59  ;;  %v1032_v33 = vand.u32 2147483647, %v3320_v63  ;;  %v1040_v53 = vsub.f32 1.0, %v1039_v58  ;;  %v1022_v25 = vmul.f32 %v2130_v12, %v1021_v13  ;;  %v2132_v58 = vld [vmem:[%s2179_s18 + $0x98] sm:$0xff] }
 0x158   : > { %v1457_v46 = vpop.f32.mrf.mxu3  ;;  %2103 = vrcp.f32 %v3465_v2  ;;  %v612_v41 = vsel %vm610_vm1, %v611_v45, %v609_v0  ;;  %v619_v36 = vmul.f32 %v618_v55, %v3310_v24  ;;  %v1035_v47 = vor.u32 1.1754944e-38, %v1034_v7 }
 0x159   : > { %v1391_v60 = vpop.f32.mrf.mxu0  ;;  %1779 = vst [vmem:[%s3342_s5 + $0x240] sm:$0xff] %v1457_v46  ;;  %v1504_v9 = vpop.f32.mrf.mxu1  ;;  %v1031_v63 = vsel %vm3481_vm4, %v3394_v1, %v1027_v50  ;;  %vm1033_vm5 = vcmp.eq.f32.partialorder %v1032_v33, 8.507059e+37  ;;  %v1041_v38 = vmul.f32 %v3428_v34, %v1040_v53  ;;  %v1054_v18 = vmul.f32 %v3469_v31, %v3421_v51 }
 0x15a   : > { %1713 = vst [vmem:[%s3342_s5 + $0x30] sm:$0xff] %v1391_v60  ;;  %vm620_vm6 = vcmp.eq.f32.partialorder %v3310_v24, inf  ;;  %vm622_vm7 = vcmp.eq.f32.partialorder %v3310_v24, 0.0  ;;  %v1254_v27 = vmul.f32 %v3226_v42, %v1022_v25  ;;  %vm1043_vm8 = vweird.f32 %v3376_v62 }
 0x15b   : > { %1714 = vst [vmem:[%s3342_s5 + $0x38] sm:$0xff] %v1504_v9  ;;  %vm1044_vm9 = vweird.f32 %v3428_v34  ;;  %v3503_v1 = vmax.f32 %v612_v41, 1e-12  ;;  %v623_v14 = vand.u32 2147483648, %v3310_v24  ;;  %v1036_v49 = vsel %vm1033_vm5, %v1035_v47, %v1031_v63 }
 0x15c   : > { %v1049_v35 = vand.u32 2147483648, %v3376_v62  ;;  %v621_v16 = vsel %vm620_vm6, %v3310_v24, %v619_v36  ;;  %v1042_v32 = vadd.f32 %v3428_v34, %v1041_v38  ;;  %v1047_v5 = vand.u32 2147483647, %v3376_v62  ;;  %vm3523_vm10 = vmor %vm1043_vm8, %vm1044_vm9 }
 0x15d   : > { %v1055_v15 = vsub.f32 1.0, %v1054_v18  ;;  %v1037_v48 = vmul.f32 %v2131_v3, %v1036_v49  ;;  %2105 = vrcp.f32 %v3503_v1  ;;  %v624_v21 = vsel %vm622_vm7, %v623_v14, %v621_v16 }
 0x15e   : > { %1886 = vmatmul.msk.f32.gmra.mxu0 %vm240_vm0, %v1253_v52  ;;  %1918 = vmatmul.msk.f32.gmra.mxu1 %vm240_vm0, %v1253_v52  ;;  %v3514_v37 = vpop.eup %2103  ;;  %v1050_v19 = vor.u32 1.1754944e-38, %v1049_v35  ;;  %vm1048_vm11 = vcmp.eq.f32.partialorder %v1047_v5, 8.507059e+37  ;;  %vm1058_vm12 = vweird.f32 %v3421_v51  ;;  %vm1059_vm13 = vweird.f32 %v3469_v31  ;;  %v2134_v35 = vld [vmem:[%s2179_s18 + $0xa8] sm:$0xff] }
 0x15f   : > { %1933 = vmatmul.msk.f32.gmra.mxu3 %vm240_vm0, %v3063_v20  ;;  %1950 = vmatmul.msk.f32.gmra.mxu2 %vm240_vm0, %v1253_v52  ;;  %v1056_v6 = vmul.f32 %v3469_v31, %v1055_v15  ;;  %v1069_v62 = vmul.f32 %v3514_v37, %v3465_v2  ;;  %v1255_v43 = vmul.f32 %v3226_v42, %v1037_v48  ;;  %v3541_v24 = vmax.f32 %v624_v21, 1e-12  ;;  %vm1060_vm14 = vmor %vm1058_vm12, %vm1059_vm13 }
 0x160   : > { %v1617_v29 = vpop.f32.mrf.mxu2  ;;  %v1062_v60 = vand.u32 2147483647, %v3421_v51  ;;  %vm1073_vm1 = vweird.f32 %v3465_v2  ;;  %vm1074_vm2 = vweird.f32 %v3514_v37  ;;  %v1079_v50 = vand.u32 2147483648, %v3465_v2 }
 0x161   : > { %v1460_v10 = vpop.f32.mrf.mxu3  ;;  %1715 = vst [vmem:[%s3342_s5 + $0x40] sm:$0xff] %v1617_v29  ;;  %v1057_v46 = vadd.f32 %v3469_v31, %v1056_v6  ;;  %v1070_v40 = vsub.f32 1.0, %v1069_v62  ;;  %2107 = vrcp.f32 %v3541_v24  ;;  %v1077_v33 = vand.u32 2147483647, %v3465_v2  ;;  %vm3582_vm3 = vmor %vm1073_vm1, %vm1074_vm2  ;;  %v2133_v29 = vld [vmem:[%s2179_s18 + $0xa0] sm:$0xff]  ;;  %v2135_v6 = vld [vmem:[%s2179_s18 + $0xb0] sm:$0xff] }
 0x162   : > { %1782 = vst [vmem:[%s3342_s5 + $0x258] sm:$0xff] %v1460_v10  ;;  %vm1063_vm15 = vcmp.eq.f32.partialorder %v1062_v60, 8.507059e+37  ;;  %v1080_v10 = vor.u32 1.1754944e-38, %v1079_v50  ;;  %vm1088_vm5 = vweird.f32 %v3503_v1  ;;  %vm1103_vm9 = vweird.f32 %v3541_v24 }
 0x163   : > { %v3548_v9 = vpop.eup %2105  ;;  %v1061_v55 = vsel %vm1060_vm14, %v3469_v31, %v1057_v46  ;;  %vm1078_vm4 = vcmp.eq.f32.partialorder %v1077_v33, 8.507059e+37  ;;  %v1109_v21 = vand.u32 2147483648, %v3541_v24  ;;  %v2136_v46 = vld [vmem:[%s2179_s18 + $0xb8] sm:$0xff] }
 0x164   : > { %v1394_v17 = vpop.f32.mrf.mxu0  ;;  %v1507_v39 = vpop.f32.mrf.mxu1  ;;  %v1084_v13 = vmul.f32 %v3548_v9, %v3503_v1  ;;  %vm1089_vm6 = vweird.f32 %v3548_v9 }
 0x165   : > { %1716 = vst [vmem:[%s3342_s5 + $0x48] sm:$0xff] %v1394_v17  ;;  %vm3607_vm7 = vmor %vm1088_vm5, %vm1089_vm6 }
 0x166   : > { %1887 = vmatmul.msk.f32.gmra.mxu0 %vm240_vm0, %v1254_v27  ;;  %1919 = vmatmul.msk.f32.gmra.mxu1 %vm240_vm0, %v1254_v27  ;;  %1717 = vst [vmem:[%s3342_s5 + $0x50] sm:$0xff] %v1507_v39  ;;  %v1085_v53 = vsub.f32 1.0, %v1084_v13  ;;  %v1092_v39 = vand.u32 2147483647, %v3503_v1 }
 0x167   : > { %1951 = vmatmul.msk.f32.gmra.mxu2 %vm240_vm0, %v1254_v27  ;;  %1958 = vmatmul.msk.f32.vlgmr.msra.gmra.mxu3 %vm240_vm0, %v2659_v11  ;;  %v1046_v11 = vsel %vm3523_vm10, %v3428_v34, %v1042_v32  ;;  %v1064_v34 = vand.u32 2147483648, %v3421_v51  ;;  %v3575_v22 = vpop.eup %2107  ;;  %v1094_v27 = vand.u32 2147483648, %v3503_v1 }
 0x168   : > { %v1051_v26 = vsel %vm1048_vm11, %v1050_v19, %v1046_v11  ;;  %v1099_v2 = vmul.f32 %v3575_v22, %v3541_v24  ;;  %vm1093_vm8 = vcmp.eq.f32.partialorder %v1092_v39, 8.507059e+37  ;;  %vm1104_vm10 = vweird.f32 %v3575_v22 }
 0x169   : > { %v1052_v45 = vmul.f32 %v2132_v58, %v1051_v26  ;;  %v1065_v52 = vor.u32 1.1754944e-38, %v1064_v34  ;;  %v1095_v5 = vor.u32 1.1754944e-38, %v1094_v27  ;;  %v1107_v11 = vand.u32 2147483647, %v3541_v24  ;;  %vm1105_vm11 = vmor %vm1103_vm9, %vm1104_vm10 }
 0x16a   : > { %v1100_v14 = vsub.f32 1.0, %v1099_v2 }
 0x16b   : > { %v1620_v57 = vpop.f32.mrf.mxu2  ;;  %v1256_v7 = vmul.f32 %v3226_v42, %v1052_v45  ;;  %v1066_v51 = vsel %vm1063_vm15, %v1065_v52, %v1061_v55  ;;  %vm1108_vm12 = vcmp.eq.f32.partialorder %v1107_v11, 8.507059e+37 }
 0x16c   : > { %1718 = vst [vmem:[%s3342_s5 + $0x58] sm:$0xff] %v1620_v57  ;;  %v1067_v41 = vmul.f32 %v2133_v29, %v1066_v51  ;;  %v1110_v57 = vor.u32 1.1754944e-38, %v1109_v21 }
 0x16e   : > { %1888 = vmatmul.msk.f32.gmra.mxu0 %vm240_vm0, %v1255_v43  ;;  %1920 = vmatmul.msk.f32.gmra.mxu1 %vm240_vm0, %v1255_v43  ;;  %v1463_v44 = vpop.f32.mrf.mxu3  ;;  %v1397_v30 = vpop.f32.mrf.mxu0  ;;  %v1257_v38 = vmul.f32 %v3226_v42, %v1067_v41 }
 0x16f   : > { %1952 = vmatmul.msk.f32.gmra.mxu2 %vm240_vm0, %v1255_v43  ;;  %1959 = vmatmul.msk.f32.gmra.mxu3 %vm240_vm0, %v2706_v4  ;;  %1785 = vst [vmem:[%s3342_s5 + $0x270] sm:$0xff] %v1463_v44  ;;  %v1510_v59 = vpop.f32.mrf.mxu1  ;;  %v1071_v4 = vmul.f32 %v3514_v37, %v1070_v40 }
 0x170   : > { %1719 = vst [vmem:[%s3342_s5 + $0x60] sm:$0xff] %v1397_v30 }
 0x171   : > { %1720 = vst [vmem:[%s3342_s5 + $0x68] sm:$0xff] %v1510_v59  ;;  %v1072_v31 = vadd.f32 %v3514_v37, %v1071_v4 }
 0x173   : > { %v1076_v63 = vsel %vm3582_vm3, %v3514_v37, %v1072_v31  ;;  %v1101_v37 = vmul.f32 %v3575_v22, %v1100_v14 }
 0x174   : > { %v1081_v18 = vsel %vm1078_vm4, %v1080_v10, %v1076_v63 }
 0x175   : > { %v1623_v0 = vpop.f32.mrf.mxu2  ;;  %v1082_v16 = vmul.f32 %v2134_v35, %v1081_v18  ;;  %v1102_v19 = vadd.f32 %v3575_v22, %v1101_v37 }
 0x176   : > { %1889 = vmatmul.msk.f32.gmra.mxu0 %vm240_vm0, %v1256_v7  ;;  %1921 = vmatmul.msk.f32.gmra.mxu1 %vm240_vm0, %v1256_v7  ;;  %1721 = vst [vmem:[%s3342_s5 + $0x70] sm:$0xff] %v1623_v0 }
 0x177   : > { %1953 = vmatmul.msk.f32.gmra.mxu2 %vm240_vm0, %v1256_v7  ;;  %1960 = vmatmul.msk.f32.gmra.mxu3 %vm240_vm0, %v2780_v8  ;;  %v1466_v12 = vpop.f32.mrf.mxu3  ;;  %v1086_v8 = vmul.f32 %v3548_v9, %v1085_v53  ;;  %v1258_v3 = vmul.f32 %v3226_v42, %v1082_v16  ;;  %v1106_v26 = vsel %vm1105_vm11, %v3575_v22, %v1102_v19 }
 0x178   : > { %1788 = vst [vmem:[%s3342_s5 + $0x288] sm:$0xff] %v1466_v12  ;;  %v1111_v44 = vsel %vm1108_vm12, %v1110_v57, %v1106_v26 }
 0x179   : > { %v1087_v17 = vadd.f32 %v3548_v9, %v1086_v8  ;;  %v1112_v60 = vmul.f32 %v2136_v46, %v1111_v44 }
 0x17a   : > { %v1400_v36 = vpop.f32.mrf.mxu0  ;;  %v1513_v47 = vpop.f32.mrf.mxu1 }
 0x17b   : > { %1722 = vst [vmem:[%s3342_s5 + $0x78] sm:$0xff] %v1400_v36  ;;  %v1091_v1 = vsel %vm3607_vm7, %v3548_v9, %v1087_v17  ;;  %v1260_v40 = vmul.f32 %v3226_v42, %v1112_v60 }
 0x17c   : > { %1723 = vst [vmem:[%s3342_s5 + $0x80] sm:$0xff] %v1513_v47  ;;  %v1096_v48 = vsel %vm1093_vm8, %v1095_v5, %v1091_v1 }
 0x17d   : > { %v1097_v62 = vmul.f32 %v2135_v6, %v1096_v48 }
 0x17e   : > { %1890 = vmatmul.msk.f32.gmra.mxu0 %vm240_vm0, %v1257_v38  ;;  %1922 = vmatmul.msk.f32.gmra.mxu1 %vm240_vm0, %v1257_v38 }
 0x17f   : > { %1954 = vmatmul.msk.f32.gmra.mxu2 %vm240_vm0, %v1257_v38  ;;  %1961 = vmatmul.msk.f32.gmra.mxu3 %vm240_vm0, %v2824_v61  ;;  %v1259_v34 = vmul.f32 %v3226_v42, %v1097_v62 }
 0x181   : > { %v1626_v32 = vpop.f32.mrf.mxu2 }
 0x182   : > { %1724 = vst [vmem:[%s3342_s5 + $0x88] sm:$0xff] %v1626_v32 }
 0x183   : > { %v1469_v15 = vpop.f32.mrf.mxu3 }
 0x184   : > { %1791 = vst [vmem:[%s3342_s5 + $0x2a0] sm:$0xff] %v1469_v15  ;;  %v1403_v61 = vpop.f32.mrf.mxu0  ;;  %v1516_v54 = vpop.f32.mrf.mxu1 }
 0x185   : > { %1725 = vst [vmem:[%s3342_s5 + $0x90] sm:$0xff] %v1403_v61 }
 0x186   : > { %1726 = vst [vmem:[%s3342_s5 + $0x98] sm:$0xff] %v1516_v54  ;;  %1891 = vmatmul.msk.f32.gmra.mxu0 %vm240_vm0, %v1258_v3  ;;  %1923 = vmatmul.msk.f32.gmra.mxu1 %vm240_vm0, %v1258_v3 }
 0x187   : > { %1955 = vmatmul.msk.f32.gmra.mxu2 %vm240_vm0, %v1258_v3  ;;  %1962 = vmatmul.msk.f32.gmra.mxu3 %vm240_vm0, %v2888_v56 }
 0x18b   : > { %v1629_v43 = vpop.f32.mrf.mxu2 }
 0x18c   : > { %1727 = vst [vmem:[%s3342_s5 + $0xa0] sm:$0xff] %v1629_v43  ;;  %v1472_v24 = vpop.f32.mrf.mxu3 }
 0x18d   : > { %1794 = vst [vmem:[%s3342_s5 + $0x2b8] sm:$0xff] %v1472_v24 }
 0x18e   : > { %1892 = vmatmul.msk.f32.gmra.mxu0 %vm240_vm0, %v1259_v34  ;;  %1924 = vmatmul.msk.f32.gmra.mxu1 %vm240_vm0, %v1259_v34 }
 0x18f   : > { %v1406_v56 = vpop.f32.mrf.mxu0  ;;  %v1519_v30 = vpop.f32.mrf.mxu1  ;;  %1956 = vmatmul.msk.f32.gmra.mxu2 %vm240_vm0, %v1259_v34  ;;  %1963 = vmatmul.msk.f32.gmra.mxu3 %vm240_vm0, %v2938_v23 }
 0x190   : > { %1728 = vst [vmem:[%s3342_s5 + $0xa8] sm:$0xff] %v1406_v56 }
 0x191   : > { %1729 = vst [vmem:[%s3342_s5 + $0xb0] sm:$0xff] %v1519_v30 }
 0x196   : > { %v1632_v9 = vpop.f32.mrf.mxu2  ;;  %1893 = vmatmul.msk.f32.gmra.mxu0 %vm240_vm0, %v1260_v40  ;;  %1925 = vmatmul.msk.f32.gmra.mxu1 %vm240_vm0, %v1260_v40 }
 0x197   : > { %1730 = vst [vmem:[%s3342_s5 + $0xb8] sm:$0xff] %v1632_v9  ;;  %1957 = vmatmul.msk.f32.gmra.mxu2 %vm240_vm0, %v1260_v40  ;;  %1964 = vmatmul.msk.f32.gmra.mxu3 %vm240_vm0, %v3000_v28  ;;  %v1475_v23 = vpop.f32.mrf.mxu3 }
 0x198   : > { %1797 = vst [vmem:[%s3342_s5 + $0x2d0] sm:$0xff] %v1475_v23  ;;  %v1409_v59 = vpop.f32.mrf.mxu0  ;;  %v1522_v58 = vpop.f32.mrf.mxu1 }
 0x199   : > { %1731 = vst [vmem:[%s3342_s5 + $0xc0] sm:$0xff] %v1409_v59 }
 0x19a   : > { %1732 = vst [vmem:[%s3342_s5 + $0xc8] sm:$0xff] %v1522_v58 }
 0x19f   : > { %1965 = vmatmul.msk.f32.gmra.mxu3 %vm240_vm0, %v3063_v20  ;;  %v1635_v42 = vpop.f32.mrf.mxu2 }
 0x1a0   : > { %1733 = vst [vmem:[%s3342_s5 + $0xd0] sm:$0xff] %v1635_v42 }
 0x1a1   : > { %v1478_v45 = vpop.f32.mrf.mxu3 }
 0x1a2   : > { %1800 = vst [vmem:[%s3342_s5 + $0x2e8] sm:$0xff] %v1478_v45 }
 0x1a3   : > { %v1412_v52 = vpop.f32.mrf.mxu0  ;;  %v1525_v28 = vpop.f32.mrf.mxu1 }
 0x1a4   : > { %1734 = vst [vmem:[%s3342_s5 + $0xd8] sm:$0xff] %v1412_v52 }
 0x1a5   : > { %1735 = vst [vmem:[%s3342_s5 + $0xe0] sm:$0xff] %v1525_v28 }
 0x1aa   : > { %v1570_v55 = vpop.f32.mrf.mxu3  ;;  %v1638_v4 = vpop.f32.mrf.mxu2 }
 0x1ab   : > { %1780 = vst [vmem:[%s3342_s5 + $0x248] sm:$0xff] %v1570_v55  ;;  %v1415_v13 = vpop.f32.mrf.mxu0  ;;  %v1528_v7 = vpop.f32.mrf.mxu1 }
 0x1ac   : > { %1736 = vst [vmem:[%s3342_s5 + $0xe8] sm:$0xff] %v1638_v4 }
 0x1ad   : > { %1737 = vst [vmem:[%s3342_s5 + $0xf0] sm:$0xff] %v1415_v13 }
 0x1ae   : > { %1738 = vst [vmem:[%s3342_s5 + $0xf8] sm:$0xff] %v1528_v7 }
 0x1b2   : > { %v1573_v20 = vpop.f32.mrf.mxu3  ;;  %v1641_v51 = vpop.f32.mrf.mxu2 }
 0x1b3   : > { %1783 = vst [vmem:[%s3342_s5 + $0x260] sm:$0xff] %v1573_v20  ;;  %v1418_v0 = vpop.f32.mrf.mxu0  ;;  %v1531_v50 = vpop.f32.mrf.mxu1 }
 0x1b4   : > { %1739 = vst [vmem:[%s3342_s5 + $0x100] sm:$0xff] %v1641_v51 }
 0x1b5   : > { %1740 = vst [vmem:[%s3342_s5 + $0x108] sm:$0xff] %v1418_v0 }
 0x1b6   : > { %1741 = vst [vmem:[%s3342_s5 + $0x110] sm:$0xff] %v1531_v50 }
 0x1ba   : > { %v1576_v31 = vpop.f32.mrf.mxu3  ;;  %v1644_v33 = vpop.f32.mrf.mxu2 }
 0x1bb   : > { %1786 = vst [vmem:[%s3342_s5 + $0x278] sm:$0xff] %v1576_v31  ;;  %v1421_v53 = vpop.f32.mrf.mxu0  ;;  %v1534_v22 = vpop.f32.mrf.mxu1 }
 0x1bc   : > { %1742 = vst [vmem:[%s3342_s5 + $0x118] sm:$0xff] %v1644_v33 }
 0x1bd   : > { %1743 = vst [vmem:[%s3342_s5 + $0x120] sm:$0xff] %v1421_v53 }
 0x1be   : > { %1744 = vst [vmem:[%s3342_s5 + $0x128] sm:$0xff] %v1534_v22 }
 0x1c2   : > { %v1579_v12 = vpop.f32.mrf.mxu3  ;;  %v1647_v25 = vpop.f32.mrf.mxu2 }
 0x1c3   : > { %1789 = vst [vmem:[%s3342_s5 + $0x290] sm:$0xff] %v1579_v12  ;;  %v1424_v29 = vpop.f32.mrf.mxu0  ;;  %v1537_v41 = vpop.f32.mrf.mxu1 }
 0x1c4   : > { %1745 = vst [vmem:[%s3342_s5 + $0x130] sm:$0xff] %v1647_v25 }
 0x1c5   : > { %1746 = vst [vmem:[%s3342_s5 + $0x138] sm:$0xff] %v1424_v29 }
 0x1c6   : > { %1747 = vst [vmem:[%s3342_s5 + $0x140] sm:$0xff] %v1537_v41 }
 0x1ca   : > { %v1582_v36 = vpop.f32.mrf.mxu3  ;;  %v1650_v47 = vpop.f32.mrf.mxu2 }
 0x1cb   : > { %1792 = vst [vmem:[%s3342_s5 + $0x2a8] sm:$0xff] %v1582_v36  ;;  %v1427_v10 = vpop.f32.mrf.mxu0  ;;  %v1540_v63 = vpop.f32.mrf.mxu1 }
 0x1cc   : > { %1748 = vst [vmem:[%s3342_s5 + $0x148] sm:$0xff] %v1650_v47 }
 0x1cd   : > { %1749 = vst [vmem:[%s3342_s5 + $0x150] sm:$0xff] %v1427_v10 }
 0x1ce   : > { %1750 = vst [vmem:[%s3342_s5 + $0x158] sm:$0xff] %v1540_v63 }
 0x1d2   : > { %v1585_v8 = vpop.f32.mrf.mxu3  ;;  %v1653_v2 = vpop.f32.mrf.mxu2 }
 0x1d3   : > { %1795 = vst [vmem:[%s3342_s5 + $0x2c0] sm:$0xff] %v1585_v8  ;;  %v1430_v38 = vpop.f32.mrf.mxu0  ;;  %v1543_v18 = vpop.f32.mrf.mxu1 }
 0x1d4   : > { %1751 = vst [vmem:[%s3342_s5 + $0x160] sm:$0xff] %v1653_v2 }
 0x1d5   : > { %1752 = vst [vmem:[%s3342_s5 + $0x168] sm:$0xff] %v1430_v38 }
 0x1d6   : > { %1753 = vst [vmem:[%s3342_s5 + $0x170] sm:$0xff] %v1543_v18 }
 0x1da   : > { %v1588_v27 = vpop.f32.mrf.mxu3  ;;  %v1656_v17 = vpop.f32.mrf.mxu2 }
 0x1db   : > { %1798 = vst [vmem:[%s3342_s5 + $0x2d8] sm:$0xff] %v1588_v27  ;;  %v1433_v39 = vpop.f32.mrf.mxu0  ;;  %v1546_v14 = vpop.f32.mrf.mxu1 }
 0x1dc   : > { %1754 = vst [vmem:[%s3342_s5 + $0x178] sm:$0xff] %v1656_v17 }
 0x1dd   : > { %1755 = vst [vmem:[%s3342_s5 + $0x180] sm:$0xff] %v1433_v39 }
 0x1de   : > { %1756 = vst [vmem:[%s3342_s5 + $0x188] sm:$0xff] %v1546_v14 }
 0x1e2   : > { %v1591_v49 = vpop.f32.mrf.mxu3  ;;  %v1659_v35 = vpop.f32.mrf.mxu2 }
 0x1e3   : > { %1801 = vst [vmem:[%s3342_s5 + $0x2f0] sm:$0xff] %v1591_v49  ;;  %v1436_v16 = vpop.f32.mrf.mxu0  ;;  %v1549_v32 = vpop.f32.mrf.mxu1 }
 0x1e4   : > { %1757 = vst [vmem:[%s3342_s5 + $0x190] sm:$0xff] %v1659_v35 }
 0x1e5   : > { %1758 = vst [vmem:[%s3342_s5 + $0x198] sm:$0xff] %v1436_v16 }
 0x1e6   : > { %1759 = vst [vmem:[%s3342_s5 + $0x1a0] sm:$0xff] %v1549_v32 }
 0x1ea   : > { %v1662_v5 = vpop.f32.mrf.mxu2  ;;  %v1683_v15 = vpop.f32.mrf.mxu3 }
 0x1eb   : > { %1760 = vst [vmem:[%s3342_s5 + $0x1a8] sm:$0xff] %v1662_v5  ;;  %v1439_v1 = vpop.f32.mrf.mxu0  ;;  %v1552_v37 = vpop.f32.mrf.mxu1 }
 0x1ec   : > { %1781 = vst [vmem:[%s3342_s5 + $0x250] sm:$0xff] %v1683_v15 }
 0x1ed   : > { %1761 = vst [vmem:[%s3342_s5 + $0x1b0] sm:$0xff] %v1439_v1 }
 0x1ee   : > { %1762 = vst [vmem:[%s3342_s5 + $0x1b8] sm:$0xff] %v1552_v37 }
 0x1f2   : > { %v1665_v61 = vpop.f32.mrf.mxu2  ;;  %v1686_v54 = vpop.f32.mrf.mxu3 }
 0x1f3   : > { %1763 = vst [vmem:[%s3342_s5 + $0x1c0] sm:$0xff] %v1665_v61  ;;  %v1442_v3 = vpop.f32.mrf.mxu0  ;;  %v1555_v48 = vpop.f32.mrf.mxu1 }
 0x1f4   : > { %1784 = vst [vmem:[%s3342_s5 + $0x268] sm:$0xff] %v1686_v54 }
 0x1f5   : > { %1764 = vst [vmem:[%s3342_s5 + $0x1c8] sm:$0xff] %v1442_v3 }
 0x1f6   : > { %1765 = vst [vmem:[%s3342_s5 + $0x1d0] sm:$0xff] %v1555_v48 }
 0x1fa   : > { %v1668_v21 = vpop.f32.mrf.mxu2  ;;  %v1689_v19 = vpop.f32.mrf.mxu3 }
 0x1fb   : > { %1766 = vst [vmem:[%s3342_s5 + $0x1d8] sm:$0xff] %v1668_v21  ;;  %v1445_v11 = vpop.f32.mrf.mxu0  ;;  %v1558_v6 = vpop.f32.mrf.mxu1 }
 0x1fc   : > { %1787 = vst [vmem:[%s3342_s5 + $0x280] sm:$0xff] %v1689_v19 }
 0x1fd   : > { %1767 = vst [vmem:[%s3342_s5 + $0x1e0] sm:$0xff] %v1445_v11 }
 0x1fe   : > { %1768 = vst [vmem:[%s3342_s5 + $0x1e8] sm:$0xff] %v1558_v6 }
 0x202   : > { %v1671_v62 = vpop.f32.mrf.mxu2  ;;  %v1692_v57 = vpop.f32.mrf.mxu3 }
 0x203   : > { %1769 = vst [vmem:[%s3342_s5 + $0x1f0] sm:$0xff] %v1671_v62  ;;  %v1448_v43 = vpop.f32.mrf.mxu0  ;;  %v1561_v26 = vpop.f32.mrf.mxu1 }
 0x204   : > { %1790 = vst [vmem:[%s3342_s5 + $0x298] sm:$0xff] %v1692_v57 }
 0x205   : > { %1770 = vst [vmem:[%s3342_s5 + $0x1f8] sm:$0xff] %v1448_v43 }
 0x206   : > { %1771 = vst [vmem:[%s3342_s5 + $0x200] sm:$0xff] %v1561_v26 }
 0x20a   : > { %v1674_v34 = vpop.f32.mrf.mxu2  ;;  %v1695_v24 = vpop.f32.mrf.mxu3 }
 0x20b   : > { %1772 = vst [vmem:[%s3342_s5 + $0x208] sm:$0xff] %v1674_v34  ;;  %v1451_v44 = vpop.f32.mrf.mxu0  ;;  %v1564_v56 = vpop.f32.mrf.mxu1 }
 0x20c   : > { %1793 = vst [vmem:[%s3342_s5 + $0x2b0] sm:$0xff] %v1695_v24 }
 0x20d   : > { %1773 = vst [vmem:[%s3342_s5 + $0x210] sm:$0xff] %v1451_v44 }
 0x20e   : > { %1774 = vst [vmem:[%s3342_s5 + $0x218] sm:$0xff] %v1564_v56 }
 0x212   : > { %v1677_v30 = vpop.f32.mrf.mxu2  ;;  %v1698_v46 = vpop.f32.mrf.mxu3 }
 0x213   : > { %1775 = vst [vmem:[%s3342_s5 + $0x220] sm:$0xff] %v1677_v30  ;;  %v1454_v60 = vpop.f32.mrf.mxu0  ;;  %v1567_v40 = vpop.f32.mrf.mxu1 }
 0x214   : > { %1796 = vst [vmem:[%s3342_s5 + $0x2c8] sm:$0xff] %v1698_v46 }
 0x215   : > { %1776 = vst [vmem:[%s3342_s5 + $0x228] sm:$0xff] %v1454_v60 }
 0x216   : > { %1777 = vst [vmem:[%s3342_s5 + $0x230] sm:$0xff] %v1567_v40 }
 0x21a   : > { %v1680_v9 = vpop.f32.mrf.mxu2  ;;  %v1701_v23 = vpop.f32.mrf.mxu3 }
 0x21b   : > { %1778 = vst [vmem:[%s3342_s5 + $0x238] sm:$0xff] %v1680_v9 }
 0x21c   : > { %1799 = vst [vmem:[%s3342_s5 + $0x2e0] sm:$0xff] %v1701_v23 }
 0x222   : > { %v1704_v59 = vpop.f32.mrf.mxu3 }
 0x223   : > { %1802 = vst [vmem:[%s3342_s5 + $0x2f8] sm:$0xff] %v1704_v59 }
 0x224 PF: > { %s13_s12 = sadd.s32 1, %s2143_s12  }
 0x225   : > { %p10_p4 = scmp.ge.s32.totalorder %s13_s12, 4  }
 0x227   :  { %12 = sbr.rel (!%p10_p4) target bundleno = 1 (0x1), region = 62 }

// kernel: attention_forward.3
= control target key start
LH: loop header
LB: loop body
LE: loop exit
PB: predicated region body
PF: predicated region fallthrough
CT: control target
= control target key end

     0   :  { %s12731_s0 = inlined_call_operand.vmem [shape: f32[2,256,384], index: 0, kind: input, shape index: {}, may-alias: {0,1,2}]   ;;  %s12732_s1 = inlined_call_operand.vmem [shape: f32[2,256,384], index: 1, kind: input, shape index: {}, may-alias: {0,1,2}]   ;;  %s12733_s2 = inlined_call_operand.vmem [shape: f32[2,256,384], index: 2, kind: input, shape index: {}, may-alias: {0,1,2}]   ;;  %s12734_s3 = inlined_call_operand.vmem [shape: f32[2,4,4,32], index: 3, kind: input, shape index: {}]   ;;  %s12735_s4 = inlined_call_operand.vmem [shape: f32[128,8], index: 4, kind: input, shape index: {}]   ;;  %s12736_s5 = inlined_call_operand.vmem [shape: f32[1,8], index: 5, kind: input, shape index: {}]   ;;  %s12737_s6 = inlined_call_operand.vmem [shape: f32[2,8,256], index: 6, kind: output, shape index: {}]  }
   0x1   :  { %12814 = sst [smem:[#allocation56_spill]] %s12736_s5 }
   0x2   :  { %s8570_s21 = smov 0   ;;  %s8572_s22 = smov 0  }
   0x3   :  { %s8574_s23 = smov 0   ;;  %s8576_s24 = smov 0  }
   0x4   :  { %s8578_s25 = smov 0   ;;  %s8580_s26 = smov 0  }
   0x5   :  { %s8582_s27 = smov 0   ;;  %s8584_s28 = smov 0  }
   0x6   :  { %s8586_s29 = smov 0   ;;  %s8588_s30 = smov 0  }
   0x7   :  { %s8590_s7 = smov 0  }
   0x8 LB: > { %s28_s8 = sadd.s32 1, %s8513_s28  ;;  %s31_s9 = sadd.s32 1, %s8517_s29  ;;  %s8525_s7 = sphi %s8590_s7, %s16_s7   ;;  %s8521_s30 = sphi %s8588_s30, %s12999_s30   ;;  %s8517_s29 = sphi %s8586_s29, %s12998_s29   ;;  %s8513_s28 = sphi %s8584_s28, %s12997_s28   ;;  %s8509_s27 = sphi %s8582_s27, %s12996_s27   ;;  %s8505_s26 = sphi %s8580_s26, %s12995_s26   ;;  %s8501_s25 = sphi %s8578_s25, %s12994_s25   ;;  %s8497_s24 = sphi %s8576_s24, %s12993_s24   ;;  %s8493_s23 = sphi %s8574_s23, %s12992_s23   ;;  %s8489_s22 = sphi %s8572_s22, %s12991_s22   ;;  %s8485_s21 = sphi %s8570_s21, %s12990_s21  }
   0x9   : > { %p29_p0 = scmp.ge.s32.totalorder %s28_s8, 2  ;;  %p51_p1 = scmp.ne.s32.totalorder %s8497_s24, %s8493_s23 }
   0xa   : > { %p52_p2 = scmp.eq.s32.totalorder %s8525_s7, 0  ;;  %s35_s10 = sadd.s32 1, %s8521_s30 }
   0xb   : > { %s13001_s8 = smov (%p29_p0, %s28_s8), 0  ;;  %s13003_s9 = smov (!%p29_p0, %s31_s9), %s8517_s29 }
   0xc   : > { %12815 = sst [smem:[#allocation8_spill]] %s13001_s8  ;;  %p33_p3 = scmp.ge.s32.totalorder %s13003_s9, 2 }
   0xd   : > { %p8634_p4 = por %p52_p2, %p51_p1  ;;  %p79_p5 = scmp.ne.s32.totalorder %s8489_s22, %s8485_s21 }
   0xe   : > { %s13005_s9 = smov (%p33_p3, %s13003_s9), 0  ;;  %s13007_s10 = smov (!%p33_p3, %s35_s10), %s8521_s30 }
   0xf   : > { %12817 = sst [smem:[#allocation9_spill]] %s13005_s9  ;;  %p8643_p6 = por %p79_p5, %p52_p2 }
  0x10   : > { %p37_p7 = scmp.ge.s32.totalorder %s13007_s10, 2  ;;  %s40_s13 = ssub.s32 %s8517_s29, %s13005_s9 }
  0x11   : > { %s68_s14 = ssub.s32 %s8513_s28, %s13001_s8  ;;  %s44_s15 = sadd.s32 1, %s8497_s24 }
  0x12   : > { %s13009_s10 = smov (%p37_p7, %s13007_s10), 0  ;;  %s72_s17 = sadd.s32 1, %s8489_s22 }
  0x13   : > { %12819 = sst [smem:[#allocation10_spill]] %s13009_s10  ;;  %s39_s16 = ssub.s32 %s8521_s30, %s13009_s10 }
  0x14   : > { %s41_s18 = sor.u32 %s40_s13, %s39_s16  ;;  %s69_s19 = sor.u32 %s68_s14, %s39_s16 }
  0x15   : > { %p42_p8 = scmp.eq.s32.totalorder %s41_s18, 0  ;;  %p70_p9 = scmp.eq.s32.totalorder %s69_s19, 0 }
  0x16   : > { %p7281_p10 = scmp.ge.s32.totalorder %s8525_s7, 8 }
  0x17   : > { %s8658_s20 = scalar_select %p42_p8, %s8497_s24, %s44_s15  }
  0x18   : > { %s8661_s5 = scalar_select %p70_p9, %s8489_s22, %s72_s17  }
  0x19   : > { %233 = sbr.rel (%p7281_p10) target bundleno = 102 (0x66), region = 28 }
  0x1e   : > { %236 = sbr.rel (!%p8634_p4) target bundleno = 54 (0x36), region = 32  ;;  %s238_s9 = sand.u32 (%p8634_p4), 1, %s8497_s24  }
  0x1f   : > { %s7699_s10 = smul.u32 (%p8634_p4), 48, %s8517_s29  ;;  %s7282_s8 = sshll.u32 (%p8634_p4), %s238_s9, 7 }
  0x20   : > { %s7700_s13 = smul.u32 (%p8634_p4), 96, %s8521_s30  ;;  %s240_s9 = scalar_lea.vmem (%p8634_p4), [#allocation5], %s7282_s8 }
  0x22   : > { %s244_s14 = sadd.s32 (%p8634_p4), %s7700_s13, %s7699_s10 }
  0x23   : > { %s7285_s16 = sshll.u32 %s244_s14, 3 }
  0x24   : > { %s8672_s17 = scalar_lea.vmem %s12731_s0, %s7285_s16 }
  0x25   : > { %v305_v0 = vld [vmem:[%s8672_s17] sm:$0xff]  ;;  %v307_v1 = vld [vmem:[%s8672_s17 + $0x18] sm:$0xff]  ;;  %v309_v2 = vld [vmem:[%s8672_s17 + $0x30] sm:$0xff] }
  0x26   : > { %306 = vst [vmem:[%s240_s9] sm:$0xff] %v305_v0  ;;  %v311_v3 = vld [vmem:[%s8672_s17 + $0x48] sm:$0xff]  ;;  %v313_v4 = vld [vmem:[%s8672_s17 + $0x60] sm:$0xff]  ;;  %v315_v5 = vld [vmem:[%s8672_s17 + $0x78] sm:$0xff] }
  0x27   : > { %308 = vst [vmem:[%s240_s9 + $0x8] sm:$0xff] %v307_v1  ;;  %v317_v6 = vld [vmem:[%s8672_s17 + $0x90] sm:$0xff]  ;;  %v319_v7 = vld [vmem:[%s8672_s17 + $0xa8] sm:$0xff]  ;;  %v321_v8 = vld [vmem:[%s8672_s17 + $0xc0] sm:$0xff] }
  0x28   : > { %310 = vst [vmem:[%s240_s9 + $0x10] sm:$0xff] %v309_v2  ;;  %v323_v9 = vld [vmem:[%s8672_s17 + $0xd8] sm:$0xff]  ;;  %v325_v10 = vld [vmem:[%s8672_s17 + $0xf0] sm:$0xff]  ;;  %v327_v11 = vld [vmem:[%s8672_s17 + $0x108] sm:$0xff] }
  0x29   : > { %312 = vst [vmem:[%s240_s9 + $0x18] sm:$0xff] %v311_v3  ;;  %v329_v12 = vld [vmem:[%s8672_s17 + $0x120] sm:$0xff]  ;;  %v331_v13 = vld [vmem:[%s8672_s17 + $0x138] sm:$0xff]  ;;  %v333_v14 = vld [vmem:[%s8672_s17 + $0x150] sm:$0xff] }
  0x2a   : > { %314 = vst [vmem:[%s240_s9 + $0x20] sm:$0xff] %v313_v4  ;;  %v335_v15 = vld [vmem:[%s8672_s17 + $0x168] sm:$0xff] }
  0x2b   : > { %316 = vst [vmem:[%s240_s9 + $0x28] sm:$0xff] %v315_v5 }
  0x2c   : > { %318 = vst [vmem:[%s240_s9 + $0x30] sm:$0xff] %v317_v6 }
  0x2d   : > { %320 = vst [vmem:[%s240_s9 + $0x38] sm:$0xff] %v319_v7 }
  0x2e   : > { %322 = vst [vmem:[%s240_s9 + $0x40] sm:$0xff] %v321_v8 }
  0x2f   : > { %324 = vst [vmem:[%s240_s9 + $0x48] sm:$0xff] %v323_v9 }
  0x30   : > { %326 = vst [vmem:[%s240_s9 + $0x50] sm:$0xff] %v325_v10 }
  0x31   : > { %328 = vst [vmem:[%s240_s9 + $0x58] sm:$0xff] %v327_v11 }
  0x32   : > { %330 = vst [vmem:[%s240_s9 + $0x60] sm:$0xff] %v329_v12 }
  0x33   : > { %332 = vst [vmem:[%s240_s9 + $0x68] sm:$0xff] %v331_v13 }
  0x34   : > { %334 = vst [vmem:[%s240_s9 + $0x70] sm:$0xff] %v333_v14 }
  0x35   : > { %336 = vst [vmem:[%s240_s9 + $0x78] sm:$0xff] %v335_v15 }
  0x36 PF: > { %342 = sbr.rel (!%p8643_p6) target bundleno = 78 (0x4e), region = 70  ;;  %s344_s8 = sand.u32 (%p8643_p6), 1, %s8489_s22  }
  0x37   : > { %s7175_s10 = smul.u32 (%p8643_p6), 48, %s8513_s28  ;;  %s7286_s11 = sshll.u32 (%p8643_p6), %s344_s8, 7 }
  0x38   : > { %s7176_s19 = smul.u32 (%p8643_p6), 96, %s8521_s30  ;;  %s346_s17 = scalar_lea.vmem (%p8643_p6), [#allocation6], %s7286_s11 }
  0x3a   : > { %s7177_s13 = sadd.s32 (%p8643_p6), %s7176_s19, %s7175_s10 }
  0x3b   : > { %s7287_s14 = sshll.u32 %s7177_s13, 3 }
  0x3c   : > { %s8698_s15 = scalar_lea.vmem %s12732_s1, %s7287_s14 }
  0x3d   : > { %v7288_v16 = vld [vmem:[%s8698_s15 + $0x8] sm:$0xff]  ;;  %v7289_v17 = vld [vmem:[%s8698_s15 + $0x20] sm:$0xff]  ;;  %v7290_v18 = vld [vmem:[%s8698_s15 + $0x38] sm:$0xff] }
  0x3e   : > { %413 = vst [vmem:[%s346_s17] sm:$0xff] %v7288_v16  ;;  %v7291_v19 = vld [vmem:[%s8698_s15 + $0x50] sm:$0xff]  ;;  %v7292_v20 = vld [vmem:[%s8698_s15 + $0x68] sm:$0xff]  ;;  %v7293_v21 = vld [vmem:[%s8698_s15 + $0x80] sm:$0xff] }
  0x3f   : > { %415 = vst [vmem:[%s346_s17 + $0x8] sm:$0xff] %v7289_v17  ;;  %v7294_v22 = vld [vmem:[%s8698_s15 + $0x98] sm:$0xff]  ;;  %v7295_v23 = vld [vmem:[%s8698_s15 + $0xb0] sm:$0xff]  ;;  %v7296_v24 = vld [vmem:[%s8698_s15 + $0xc8] sm:$0xff] }
  0x40   : > { %417 = vst [vmem:[%s346_s17 + $0x10] sm:$0xff] %v7290_v18  ;;  %v7297_v25 = vld [vmem:[%s8698_s15 + $0xe0] sm:$0xff]  ;;  %v7298_v26 = vld [vmem:[%s8698_s15 + $0xf8] sm:$0xff]  ;;  %v7299_v27 = vld [vmem:[%s8698_s15 + $0x110] sm:$0xff] }
  0x41   : > { %419 = vst [vmem:[%s346_s17 + $0x18] sm:$0xff] %v7291_v19  ;;  %v7300_v28 = vld [vmem:[%s8698_s15 + $0x128] sm:$0xff]  ;;  %v7301_v29 = vld [vmem:[%s8698_s15 + $0x140] sm:$0xff]  ;;  %v7302_v30 = vld [vmem:[%s8698_s15 + $0x158] sm:$0xff] }
  0x42   : > { %421 = vst [vmem:[%s346_s17 + $0x20] sm:$0xff] %v7292_v20  ;;  %v7303_v31 = vld [vmem:[%s8698_s15 + $0x170] sm:$0xff] }
  0x43   : > { %423 = vst [vmem:[%s346_s17 + $0x28] sm:$0xff] %v7293_v21 }
  0x44   : > { %425 = vst [vmem:[%s346_s17 + $0x30] sm:$0xff] %v7294_v22 }
  0x45   : > { %427 = vst [vmem:[%s346_s17 + $0x38] sm:$0xff] %v7295_v23 }
  0x46   : > { %429 = vst [vmem:[%s346_s17 + $0x40] sm:$0xff] %v7296_v24 }
  0x47   : > { %431 = vst [vmem:[%s346_s17 + $0x48] sm:$0xff] %v7297_v25 }
  0x48   : > { %433 = vst [vmem:[%s346_s17 + $0x50] sm:$0xff] %v7298_v26 }
  0x49   : > { %435 = vst [vmem:[%s346_s17 + $0x58] sm:$0xff] %v7299_v27 }
  0x4a   : > { %437 = vst [vmem:[%s346_s17 + $0x60] sm:$0xff] %v7300_v28 }
  0x4b   : > { %439 = vst [vmem:[%s346_s17 + $0x68] sm:$0xff] %v7301_v29 }
  0x4c   : > { %441 = vst [vmem:[%s346_s17 + $0x70] sm:$0xff] %v7302_v30 }
  0x4d   : > { %443 = vst [vmem:[%s346_s17 + $0x78] sm:$0xff] %v7303_v31 }
  0x4e PF: > { %449 = sbr.rel (!%p8643_p6) target bundleno = 102 (0x66), region = 108  ;;  %s451_s9 = sand.u32 (%p8643_p6), 1, %s8489_s22  }
  0x4f   : > { %s7183_s8 = smul.u32 (%p8643_p6), 48, %s8513_s28  ;;  %s7304_s10 = sshll.u32 (%p8643_p6), %s451_s9, 7 }
  0x50   : > { %s7184_s11 = smul.u32 (%p8643_p6), 96, %s8521_s30  ;;  %s453_s12 = scalar_lea.vmem (%p8643_p6), [#allocation7], %s7304_s10 }
  0x52   : > { %s7185_s19 = sadd.s32 (%p8643_p6), %s7184_s11, %s7183_s8 }
  0x53   : > { %s7305_s13 = sshll.u32 %s7185_s19, 3 }
  0x54   : > { %s8724_s18 = scalar_lea.vmem %s12733_s2, %s7305_s13 }
  0x55   : > { %v7306_v32 = vld [vmem:[%s8724_s18 + $0x10] sm:$0xff]  ;;  %v7307_v33 = vld [vmem:[%s8724_s18 + $0x28] sm:$0xff]  ;;  %v7308_v34 = vld [vmem:[%s8724_s18 + $0x40] sm:$0xff] }
  0x56   : > { %520 = vst [vmem:[%s453_s12] sm:$0xff] %v7306_v32  ;;  %v7309_v35 = vld [vmem:[%s8724_s18 + $0x58] sm:$0xff]  ;;  %v7310_v36 = vld [vmem:[%s8724_s18 + $0x70] sm:$0xff]  ;;  %v7311_v37 = vld [vmem:[%s8724_s18 + $0x88] sm:$0xff] }
  0x57   : > { %522 = vst [vmem:[%s453_s12 + $0x8] sm:$0xff] %v7307_v33  ;;  %v7312_v38 = vld [vmem:[%s8724_s18 + $0xa0] sm:$0xff]  ;;  %v7313_v39 = vld [vmem:[%s8724_s18 + $0xb8] sm:$0xff]  ;;  %v7314_v40 = vld [vmem:[%s8724_s18 + $0xd0] sm:$0xff] }
  0x58   : > { %524 = vst [vmem:[%s453_s12 + $0x10] sm:$0xff] %v7308_v34  ;;  %v7315_v41 = vld [vmem:[%s8724_s18 + $0xe8] sm:$0xff]  ;;  %v7316_v42 = vld [vmem:[%s8724_s18 + $0x100] sm:$0xff]  ;;  %v7317_v43 = vld [vmem:[%s8724_s18 + $0x118] sm:$0xff] }
  0x59   : > { %526 = vst [vmem:[%s453_s12 + $0x18] sm:$0xff] %v7309_v35  ;;  %v7318_v44 = vld [vmem:[%s8724_s18 + $0x130] sm:$0xff]  ;;  %v7319_v45 = vld [vmem:[%s8724_s18 + $0x148] sm:$0xff]  ;;  %v7320_v46 = vld [vmem:[%s8724_s18 + $0x160] sm:$0xff] }
  0x5a   : > { %528 = vst [vmem:[%s453_s12 + $0x20] sm:$0xff] %v7310_v36  ;;  %v7321_v47 = vld [vmem:[%s8724_s18 + $0x178] sm:$0xff] }
  0x5b   : > { %530 = vst [vmem:[%s453_s12 + $0x28] sm:$0xff] %v7311_v37 }
  0x5c   : > { %532 = vst [vmem:[%s453_s12 + $0x30] sm:$0xff] %v7312_v38 }
  0x5d   : > { %534 = vst [vmem:[%s453_s12 + $0x38] sm:$0xff] %v7313_v39 }
  0x5e   : > { %536 = vst [vmem:[%s453_s12 + $0x40] sm:$0xff] %v7314_v40 }
  0x5f   : > { %538 = vst [vmem:[%s453_s12 + $0x48] sm:$0xff] %v7315_v41 }
  0x60   : > { %540 = vst [vmem:[%s453_s12 + $0x50] sm:$0xff] %v7316_v42 }
  0x61   : > { %542 = vst [vmem:[%s453_s12 + $0x58] sm:$0xff] %v7317_v43 }
  0x62   : > { %544 = vst [vmem:[%s453_s12 + $0x60] sm:$0xff] %v7318_v44 }
  0x63   : > { %546 = vst [vmem:[%s453_s12 + $0x68] sm:$0xff] %v7319_v45 }
  0x64   : > { %548 = vst [vmem:[%s453_s12 + $0x70] sm:$0xff] %v7320_v46 }
  0x65   : > { %550 = vst [vmem:[%s453_s12 + $0x78] sm:$0xff] %v7321_v47 }
  0x66 PF: > { %p7322_p11 = scmp.ge.s32.totalorder %s8525_s7, 1  ;;  %p555_p12 = scmp.lt.s32.totalorder %s8525_s7, 9 }
  0x68   : > { %p556_p13 = pnand %p7322_p11, %p555_p12 }
  0x6a   : > { %559 = sbr.rel (%p556_p13) target bundleno = 4813 (0x12cd), region = 146 }
  0x6f   : > { %s562_s15 = sand.u32 1, %s8493_s23   ;;  %s569_s17 = sand.u32 1, %s8485_s21  }
  0x70   : > { %s7323_s9 = sshll.u32 %s562_s15, 7  ;;  %s7324_s8 = sshll.u32 %s569_s17, 7 }
  0x71   : > { %p619_p0 = scmp.lt.s32.totalorder %s8509_s27, 1  ;;  %p621_p1 = scmp.lt.s32.totalorder %s8505_s26, 1 }
  0x72   : > { %s8755_s18 = scalar_lea.vmem [#allocation5], %s7323_s9  ;;  %s8757_s12 = scalar_lea.vmem [#allocation6], %s7324_s8 }
  0x73   : > { %s13011_s27 = smov (!%p619_p0, %s8509_s27), 1  ;;  %s13013_s26 = smov (!%p621_p1, %s8505_s26), 1 }
  0x74   : > { %s7326_s10 = sshll.u32 %s13011_s27, 1  ;;  %s8759_s23 = scalar_lea.vmem [#allocation7], %s7324_s8 }
  0x75   : > { %s624_s11 = sadd.s32 %s7326_s10, %s13013_s26  ;;  %p7328_p2 = scmp.ne.s32.totalorder %s8501_s25, 0 }
  0x76   : > { %s7327_s19 = sshll.u32 %s624_s11, 3 }
  0x77   : > { %s8753_s16 = scalar_lea.vmem %s12737_s6, %s7327_s19  ;;  %630 = sbr.rel (%p7328_p2) target bundleno = 1287 (0x507), region = 162 }
  0x7c   : > { %v1078_v48 = vld [vmem:[%s8755_s18] sm:$0xff]  ;;  %vm650_vm0 = vcmask 261120   ;;  %v8767_v50 = vld [vmem:[%s8755_s18 + $0x8] sm:$0xff]  ;;  %s8527_s27 = smov 96   ;;  %v8772_v51 = vld [vmem:[%s8755_s18 + $0x10] sm:$0xff]  ;;  %s8528_s15 = smov 64  }
  0x7d   : > { %v647_v49 = vld [vmem:[%s12734_s3] sm:$0xf]  ;;  %1114 = vrot.lane.b32.xlu0 %v1078_v48, %s8527_s27  ;;  %1116 = vrot.lane.b32.xlu1 %v8767_v50, %s8527_s27  ;;  %v8780_v52 = vld [vmem:[%s8755_s18 + $0x28] sm:$0xff]  ;;  %s8529_s17 = smov 32   ;;  %vm767_vm1 = vcmask 31744   ;;  %vm993_vm2 = vcmask 1043456  }
  0x7e   : > { %7330 = vmatpush.xpose.msk.msra.mxu0 %vm650_vm0, %v647_v49  ;;  %1118 = vrot.lane.b32.xlu2 %v8772_v51, %s8527_s27  ;;  %v8783_v53 = vld [vmem:[%s8755_s18 + $0x18] sm:$0xff]  ;;  %v8792_v54 = vld [vmem:[%s8755_s18 + $0x30] sm:$0xff]  ;;  %v8800_v56 = vld [vmem:[%s8755_s18 + $0x20] sm:$0xff]  ;;  %vm864_vm3 = vcmask 7168  }
  0x7f   : > { %v8797_v55 = vld [vmem:[%s8755_s18 + $0x38] sm:$0xff]  ;;  %v8809_v57 = vld [vmem:[%s8755_s18 + $0x40] sm:$0xff]  ;;  %v8816_v58 = vld [vmem:[%s8755_s18 + $0x48] sm:$0xff] }
  0x80   : > { %v8823_v59 = vld [vmem:[%s8755_s18 + $0x68] sm:$0xff]  ;;  %v8830_v60 = vld [vmem:[%s8755_s18 + $0x50] sm:$0xff]  ;;  %v8842_v62 = vld [vmem:[%s8755_s18 + $0x58] sm:$0xff] }
  0x81   : > { %7331 = vmatmul.msk.f32.vlgmr.msra.gmra.mxu0 %vm650_vm0, %v1078_v48  ;;  %v8835_v61 = vld [vmem:[%s8755_s18 + $0x70] sm:$0xff]  ;;  %v8847_v63 = vld [vmem:[%s8755_s18 + $0x78] sm:$0xff]  ;;  %v8854_v0 = vld [vmem:[%s8755_s18 + $0x60] sm:$0xff] }
  0x82   : > { %v7364_v1 = vld [vmem:[%s12734_s3 + $0x4] sm:$0xf]  ;;  %v7329_v37 = vld [vmem:[%s12734_s3 + $0x10] sm:$0xf] }
  0x83   : > { %7366 = vmatpush.xpose.msk.msra.mxu2 %vm650_vm0, %v7364_v1  ;;  %7347 = vmatpush.msk.msra.mxu1 %vm993_vm2, %v7329_v37  ;;  %v7436_v1 = vld [vmem:[%s12734_s3 + $0xc] sm:$0xf] }
  0x84   : > { %7438 = vmatpush.xpose.msk.msrb.mxu0 %vm650_vm0, %v7436_v1 }
  0x85   : > { %1124 = vrot.lane.b32.xlu0 %v8780_v52, %s8527_s27  ;;  %1126 = vrot.lane.b32.xlu1 %v8792_v54, %s8527_s27 }
  0x86   : > { %1120 = vrot.lane.b32.xlu2 %v8783_v53, %s8527_s27 }
  0x89   : > { %7332 = vmatmul.msk.f32.gmra.mxu0 %vm650_vm0, %v8767_v50 }
  0x8d   : > { %1128 = vrot.lane.b32.xlu0 %v8797_v55, %s8527_s27  ;;  %1138 = vrot.lane.b32.xlu1 %v8854_v0, %s8527_s27 }
  0x8e   : > { %1122 = vrot.lane.b32.xlu2 %v8800_v56, %s8527_s27 }
  0x91   : > { %7333 = vmatmul.msk.f32.gmra.mxu0 %vm650_vm0, %v8772_v51 }
  0x95   : > { %1130 = vrot.lane.b32.xlu0 %v8809_v57, %s8527_s27 }
  0x96   : > { %1134 = vrot.lane.b32.xlu2 %v8830_v60, %s8527_s27 }
  0x99   : > { %7334 = vmatmul.msk.f32.gmra.mxu0 %vm650_vm0, %v8783_v53 }
  0x9d   : > { %1132 = vrot.lane.b32.xlu0 %v8816_v58, %s8527_s27 }
  0x9e   : > { %1136 = vrot.lane.b32.xlu2 %v8842_v62, %s8527_s27 }
  0xa1   : > { %7335 = vmatmul.msk.f32.gmra.mxu0 %vm650_vm0, %v8800_v56 }
  0xa5   : > { %1140 = vrot.lane.b32.xlu0 %v8823_v59, %s8527_s27 }
  0xa6   : > { %1593 = vrot.lane.b32.xlu2 %v1078_v48, %s8528_s15 }
  0xa9   : > { %7336 = vmatmul.msk.f32.gmra.mxu0 %vm650_vm0, %v8780_v52 }
  0xad   : > { %1142 = vrot.lane.b32.xlu0 %v8835_v61, %s8527_s27 }
  0xb1   : > { %7337 = vmatmul.msk.f32.gmra.mxu0 %vm650_vm0, %v8792_v54 }
  0xb5   : > { %1144 = vrot.lane.b32.xlu0 %v8847_v63, %s8527_s27 }
  0xb9   : > { %7338 = vmatmul.msk.f32.gmra.mxu0 %vm650_vm0, %v8797_v55 }
  0xbd   : > { %2072 = vrot.lane.b32.xlu0 %v1078_v48, %s8529_s17 }
  0xc1   : > { %7339 = vmatmul.msk.f32.gmra.mxu0 %vm650_vm0, %v8809_v57 }
  0xc9   : > { %7340 = vmatmul.msk.f32.gmra.mxu0 %vm650_vm0, %v8816_v58 }
  0xd1   : > { %7341 = vmatmul.msk.f32.gmra.mxu0 %vm650_vm0, %v8830_v60 }
  0xd8   : > { %v1119_v4 = vpop.permute.xlu2 %1118 }
  0xd9   : > { %7342 = vmatmul.msk.f32.gmra.mxu0 %vm650_vm0, %v8842_v62 }
  0xe0   : > { %v1121_v7 = vpop.permute.xlu2 %1120 }
  0xe1   : > { %7343 = vmatmul.msk.f32.gmra.mxu0 %vm650_vm0, %v8854_v0 }
  0xe8   : > { %v1123_v11 = vpop.permute.xlu2 %1122 }
  0xe9   : > { %7344 = vmatmul.msk.f32.gmra.mxu0 %vm650_vm0, %v8823_v59 }
  0xef   : > { %v1115_v2 = vpop.permute.xlu0 %1114  ;;  %v1117_v3 = vpop.permute.xlu1 %1116 }
  0xf0   : > { %7367 = vmatmul.msk.f32.vlgmr.msra.gmra.mxu2 %vm650_vm0, %v1115_v2  ;;  %v1135_v24 = vpop.permute.xlu2 %1134 }
  0xf1   : > { %7345 = vmatmul.msk.f32.gmra.mxu0 %vm650_vm0, %v8835_v61 }
  0xf7   : > { %v1125_v14 = vpop.permute.xlu0 %1124  ;;  %v1127_v17 = vpop.permute.xlu1 %1126 }
  0xf8   : > { %7368 = vmatmul.msk.f32.gmra.mxu2 %vm650_vm0, %v1117_v3  ;;  %v1137_v27 = vpop.permute.xlu2 %1136 }
  0xf9   : > { %7346 = vmatmul.msk.f32.gmra.mxu0 %vm650_vm0, %v8847_v63 }
  0xfe   : > { %v8882_v5 = vpop.f32.mrf.mxu0 }
  0xff   : > { %v768_v6 = vsel %vm767_vm1, %v8882_v5, -inf  ;;  %v1129_v18 = vpop.permute.xlu0 %1128  ;;  %v1139_v32 = vpop.permute.xlu1 %1138 }
 0x100   : > { %769 = vmax.xlane.f32.xlu0 %v768_v6  ;;  %7369 = vmatmul.msk.f32.gmra.mxu2 %vm650_vm0, %v1119_v4 }
 0x106   : > { %v8887_v8 = vpop.f32.mrf.mxu0 }
 0x107   : > { %v771_v9 = vsel %vm767_vm1, %v8887_v8, -inf  ;;  %v1131_v20 = vpop.permute.xlu0 %1130 }
 0x108   : > { %772 = vmax.xlane.f32.xlu1 %v771_v9  ;;  %7370 = vmatmul.msk.f32.gmra.mxu2 %vm650_vm0, %v1121_v7 }
 0x10e   : > { %v8892_v10 = vpop.f32.mrf.mxu0 }
 0x10f   : > { %v774_v12 = vsel %vm767_vm1, %v8892_v10, -inf  ;;  %v1133_v23 = vpop.permute.xlu0 %1132 }
 0x110   : > { %775 = vmax.xlane.f32.xlu2 %v774_v12  ;;  %7371 = vmatmul.msk.f32.gmra.mxu2 %vm650_vm0, %v1123_v11 }
 0x116   : > { %v8897_v13 = vpop.f32.mrf.mxu0 }
 0x117   : > { %v777_v15 = vsel %vm767_vm1, %v8897_v13, -inf  ;;  %v1141_v29 = vpop.permute.xlu0 %1140 }
 0x118   : > { %778 = vmax.xlane.f32.xlu0 %v777_v15  ;;  %7372 = vmatmul.msk.f32.gmra.mxu2 %vm650_vm0, %v1125_v14 }
 0x11e   : > { %v8902_v16 = vpop.f32.mrf.mxu0 }
 0x11f   : > { %v780_v28 = vsel %vm767_vm1, %v8902_v16, -inf  ;;  %v1143_v33 = vpop.permute.xlu0 %1142 }
 0x120   : > { %7373 = vmatmul.msk.f32.gmra.mxu2 %vm650_vm0, %v1127_v17 }
 0x121   : > { %1597 = vrot.lane.b32.xlu1 %v8772_v51, %s8528_s15 }
 0x126   : > { %v8907_v19 = vpop.f32.mrf.mxu0 }
 0x127   : > { %v783_v35 = vsel %vm767_vm1, %v8907_v19, -inf  ;;  %v1145_v40 = vpop.permute.xlu0 %1144 }
 0x128   : > { %2076 = vrot.lane.b32.xlu2 %v8772_v51, %s8529_s17  ;;  %7374 = vmatmul.msk.f32.gmra.mxu2 %vm650_vm0, %v1129_v18  ;;  %v8972_v51 = vpop.permute.xlu2 %1593 }
 0x12c   : > { %1595 = vrot.lane.b32.xlu0 %v8767_v50, %s8528_s15 }
 0x12e   : > { %v8914_v21 = vpop.f32.mrf.mxu0 }
 0x12f   : > { %v786_v31 = vsel %vm767_vm1, %v8914_v21, -inf  ;;  %v2073_v44 = vpop.permute.xlu0 %2072 }
 0x130   : > { %2078 = vrot.lane.b32.xlu2 %v8783_v53, %s8529_s17  ;;  %7375 = vmatmul.msk.f32.gmra.mxu2 %vm650_vm0, %v1131_v20 }
 0x131   : > { %7439 = vmatmul.msk.f32.vlgmr.msrb.gmra.mxu0 %vm650_vm0, %v2073_v44 }
 0x134   : > { %2074 = vrot.lane.b32.xlu0 %v8767_v50, %s8529_s17 }
 0x136   : > { %v8921_v22 = vpop.f32.mrf.mxu0 }
 0x137   : > { %v789_v39 = vsel %vm767_vm1, %v8921_v22, -inf }
 0x138   : > { %7376 = vmatmul.msk.f32.gmra.mxu2 %vm650_vm0, %v1133_v23 }
 0x13c   : > { %1599 = vrot.lane.b32.xlu0 %v8783_v53, %s8528_s15 }
 0x13e   : > { %v8926_v25 = vpop.f32.mrf.mxu0 }
 0x13f   : > { %v792_v43 = vsel %vm767_vm1, %v8926_v25, -inf }
 0x140   : > { %7377 = vmatmul.msk.f32.gmra.mxu2 %vm650_vm0, %v1135_v24 }
 0x146   : > { %v8929_v26 = vpop.f32.mrf.mxu0 }
 0x147   : > { %v795_v46 = vsel %vm767_vm1, %v8929_v26, -inf }
 0x148   : > { %7378 = vmatmul.msk.f32.gmra.mxu2 %vm650_vm0, %v1137_v27 }
 0x14b   : > { %781 = vmax.xlane.f32.xlu1 %v780_v28 }
 0x14e   : > { %v8934_v30 = vpop.f32.mrf.mxu0 }
 0x14f   : > { %v798_v36 = vsel %vm767_vm1, %v8934_v30, -inf }
 0x150   : > { %7379 = vmatmul.msk.f32.gmra.mxu2 %vm650_vm0, %v1139_v32 }
 0x153   : > { %787 = vmax.xlane.f32.xlu1 %v786_v31 }
 0x156   : > { %v8939_v34 = vpop.f32.mrf.mxu0 }
 0x157   : > { %v801_v41 = vsel %vm767_vm1, %v8939_v34, -inf }
 0x158   : > { %7380 = vmatmul.msk.f32.gmra.mxu2 %vm650_vm0, %v1141_v29 }
 0x159   : > { %784 = vmax.xlane.f32.xlu2 %v783_v35 }
 0x15b   : > { %799 = vmax.xlane.f32.xlu1 %v798_v36 }
 0x15e   : > { %v8949_v38 = vpop.f32.mrf.mxu0 }
 0x15f   : > { %v804_v24 = vsel %vm767_vm1, %v8949_v38, -inf }
 0x160   : > { %7381 = vmatmul.msk.f32.gmra.mxu2 %vm650_vm0, %v1143_v33 }
 0x161   : > { %790 = vmax.xlane.f32.xlu2 %v789_v39 }
 0x166   : > { %802 = vmax.xlane.f32.xlu0 %v801_v41  ;;  %v8957_v42 = vpop.f32.mrf.mxu0 }
 0x167   : > { %v807_v15 = vsel %vm767_vm1, %v8957_v42, -inf }
 0x168   : > { %7382 = vmatmul.msk.f32.gmra.mxu2 %vm650_vm0, %v1145_v40 }
 0x169   : > { %793 = vmax.xlane.f32.xlu2 %v792_v43 }
 0x16e   : > { %v8962_v45 = vpop.f32.mrf.mxu0 }
 0x16f   : > { %v810_v47 = vsel %vm767_vm1, %v8962_v45, -inf }
 0x170   : > { %811 = vmax.xlane.f32.xlu1 %v810_v47 }
 0x171   : > { %796 = vmax.xlane.f32.xlu2 %v795_v46 }
 0x173   : > { %v770_v48 = vpop.xlane.xlu0 %769 }
 0x174   : > { %v816_v49 = vsub.f32 %v8882_v5, %v770_v48  ;;  %865 = vst.msk [vmem:[#allocation2] sm:$0xff] %vm864_vm3, %v770_v48 }
 0x176   : > { %v832_v50 = vmul.f32 1.442695, %v816_v49 }
 0x178   : > { %7797 = vpow2.f32 %v832_v50 }
 0x17a   : > { %1601 = vrot.lane.b32.xlu0 %v8800_v56, %s8528_s15 }
 0x17b   : > { %v773_v53 = vpop.xlane.xlu1 %772 }
 0x17c   : > { %v817_v2 = vsub.f32 %v8887_v8, %v773_v53  ;;  %866 = vst.msk [vmem:[#allocation2 + $0x8] sm:$0xff] %vm864_vm3, %v773_v53 }
 0x17e   : > { %v8980_v3 = vpop.eup %7797  ;;  %v834_v4 = vmul.f32 1.442695, %v817_v2 }
 0x17f   : > { %7348 = vmatmul.msk.f32.vlgmr.msra.gmra.mxu1 %vm767_vm1, %v8980_v3 }
 0x180   : > { %7799 = vpow2.f32 %v834_v4 }
 0x183   : > { %v776_v5 = vpop.xlane.xlu2 %775 }
 0x184   : > { %v818_v6 = vsub.f32 %v8892_v10, %v776_v5  ;;  %867 = vst.msk [vmem:[#allocation2 + $0x10] sm:$0xff] %vm864_vm3, %v776_v5 }
 0x186   : > { %v8987_v7 = vpop.eup %7799  ;;  %v836_v8 = vmul.f32 1.442695, %v818_v6 }
 0x187   : > { %7349 = vmatmul.msk.f32.gmra.mxu1 %vm767_vm1, %v8987_v7 }
 0x188   : > { %7801 = vpow2.f32 %v836_v8 }
 0x189   : > { %2080 = vrot.lane.b32.xlu2 %v8800_v56, %s8529_s17  ;;  %1603 = vrot.lane.b32.xlu1 %v8780_v52, %s8528_s15 }
 0x18b   : > { %v779_v9 = vpop.xlane.xlu0 %778  ;;  %v2077_v20 = vpop.permute.xlu2 %2076 }
 0x18c   : > { %v819_v11 = vsub.f32 %v8897_v13, %v779_v9  ;;  %868 = vst.msk [vmem:[#allocation2 + $0x18] sm:$0xff] %vm864_vm3, %v779_v9  ;;  %v9009_v13 = vpop.f32.mrf.mxu2 }
 0x18d   : > { %v1246_v18 = vsel %vm767_vm1, %v9009_v13, -inf }
 0x18e   : > { %v8997_v10 = vpop.eup %7801  ;;  %v838_v12 = vmul.f32 1.442695, %v819_v11  ;;  %v9077_v11 = vpop.f32.mrf.mxu0 }
 0x18f   : > { %7350 = vmatmul.msk.f32.gmra.mxu1 %vm767_vm1, %v8997_v10 }
 0x190   : > { %7803 = vpow2.f32 %v838_v12 }
 0x193   : > { %v9021_v28 = vpop.permute.xlu1 %1597  ;;  %v2079_v29 = vpop.permute.xlu2 %2078 }
 0x194   : > { %v9014_v23 = vpop.f32.mrf.mxu2 }
 0x195   : > { %v1249_v27 = vsel %vm767_vm1, %v9014_v23, -inf }
 0x196   : > { %v9001_v14 = vpop.eup %7803 }
 0x197   : > { %7351 = vmatmul.msk.f32.gmra.mxu1 %vm767_vm1, %v9001_v14 }
 0x19c   : > { %v9042_v43 = vpop.f32.mrf.mxu2 }
 0x19e   : > { %v9005_v56 = vpop.permute.xlu0 %1595 }
 0x1a4   : > { %808 = vmax.xlane.f32.xlu0 %v807_v15  ;;  %v9053_v48 = vpop.f32.mrf.mxu2 }
 0x1a6   : > { %v2075_v17 = vpop.permute.xlu0 %2074 }
 0x1a7   : > { %7440 = vmatmul.msk.f32.gmra.mxu0 %vm650_vm0, %v2075_v17 }
 0x1ac   : > { %1247 = vmax.xlane.f32.xlu0 %v1246_v18 }
 0x1ae   : > { %v9040_v41 = vpop.permute.xlu0 %1599 }
 0x1af   : > { %7441 = vmatmul.msk.f32.gmra.mxu0 %vm650_vm0, %v2077_v20 }
 0x1b2   : > { %805 = vmax.xlane.f32.xlu2 %v804_v24 }
 0x1b3   : > { %1250 = vmax.xlane.f32.xlu1 %v1249_v27 }
 0x1b7   : > { %7442 = vmatmul.msk.f32.gmra.mxu0 %vm650_vm0, %v2079_v29 }
 0x1be   : > { %v782_v31 = vpop.xlane.xlu1 %781 }
 0x1bf   : > { %v820_v32 = vsub.f32 %v8902_v16, %v782_v31  ;;  %869 = vst.msk [vmem:[#allocation2 + $0x20] sm:$0xff] %vm864_vm3, %v782_v31 }
 0x1c0   : > { %1607 = vrot.lane.b32.xlu0 %v8797_v55, %s8528_s15 }
 0x1c1   : > { %v840_v33 = vmul.f32 1.442695, %v820_v32 }
 0x1c3   : > { %7805 = vpow2.f32 %v840_v33 }
 0x1c6   : > { %v788_v35 = vpop.xlane.xlu1 %787 }
 0x1c7   : > { %871 = vst.msk [vmem:[#allocation2 + $0x30] sm:$0xff] %vm864_vm3, %v788_v35  ;;  %v822_v44 = vsub.f32 %v8914_v21, %v788_v35 }
 0x1c9   : > { %v9029_v36 = vpop.eup %7805 }
 0x1ca   : > { %7352 = vmatmul.msk.f32.gmra.mxu1 %vm767_vm1, %v9029_v36  ;;  %2082 = vrot.lane.b32.xlu2 %v8780_v52, %s8529_s17 }
 0x1cc   : > { %v785_v37 = vpop.xlane.xlu2 %784  ;;  %2086 = vrot.lane.b32.xlu1 %v8797_v55, %s8529_s17  ;;  %v844_v55 = vmul.f32 1.442695, %v822_v44 }
 0x1cd   : > { %v821_v16 = vsub.f32 %v8907_v19, %v785_v37  ;;  %870 = vst.msk [vmem:[#allocation2 + $0x28] sm:$0xff] %vm864_vm3, %v785_v37 }
 0x1ce   : > { %v800_v39 = vpop.xlane.xlu1 %799 }
 0x1cf   : > { %v842_v40 = vmul.f32 1.442695, %v821_v16  ;;  %875 = vst.msk [vmem:[#allocation2 + $0x50] sm:$0xff] %vm864_vm3, %v800_v39  ;;  %v826_v18 = vsub.f32 %v8934_v30, %v800_v39  ;;  %v7365_v16 = vld [vmem:[%s12734_s3 + $0x14] sm:$0xf] }
 0x1d0   : > { %7383 = vmatpush.msk.msra.mxu3 %vm993_vm2, %v7365_v16 }
 0x1d1   : > { %7807 = vpow2.f32 %v842_v40  ;;  %v852_v20 = vmul.f32 1.442695, %v826_v18 }
 0x1d2   : > { %7809 = vpow2.f32 %v844_v55 }
 0x1d4   : > { %v791_v52 = vpop.xlane.xlu2 %790  ;;  %2088 = vrot.lane.b32.xlu1 %v8809_v57, %s8529_s17 }
 0x1d5   : > { %872 = vst.msk [vmem:[#allocation2 + $0x38] sm:$0xff] %vm864_vm3, %v791_v52  ;;  %v823_v46 = vsub.f32 %v8921_v22, %v791_v52  ;;  %v9064_v22 = vpop.f32.mrf.mxu2 }
 0x1d6   : > { %v1258_v32 = vsel %vm767_vm1, %v9064_v22, -inf }
 0x1d7   : > { %v9048_v19 = vpop.eup %7807  ;;  %v846_v49 = vmul.f32 1.442695, %v823_v46 }
 0x1d8   : > { %7353 = vmatmul.msk.f32.gmra.mxu1 %vm767_vm1, %v9048_v19  ;;  %v9057_v50 = vpop.eup %7809 }
 0x1d9   : > { %v803_v47 = vpop.xlane.xlu0 %802  ;;  %7811 = vpow2.f32 %v846_v49 }
 0x1da   : > { %876 = vst.msk [vmem:[#allocation2 + $0x58] sm:$0xff] %vm864_vm3, %v803_v47  ;;  %v827_v27 = vsub.f32 %v8939_v34, %v803_v47 }
 0x1dc   : > { %v794_v21 = vpop.xlane.xlu2 %793  ;;  %v854_v31 = vmul.f32 1.442695, %v827_v27 }
 0x1dd   : > { %873 = vst.msk [vmem:[#allocation2 + $0x40] sm:$0xff] %vm864_vm3, %v794_v21  ;;  %v824_v53 = vsub.f32 %v8926_v25, %v794_v21  ;;  %v1255_v25 = vsel %vm767_vm1, %v9053_v48, -inf  ;;  %v9079_v12 = vpop.f32.mrf.mxu2 }
 0x1de   : > { %v1261_v17 = vsel %vm767_vm1, %v9079_v12, -inf }
 0x1df   : > { %v848_v4 = vmul.f32 1.442695, %v824_v53  ;;  %v9069_v5 = vpop.eup %7811 }
 0x1e0   : > { %7354 = vmatmul.msk.f32.gmra.mxu1 %vm767_vm1, %v9057_v50 }
 0x1e1   : > { %7813 = vpow2.f32 %v848_v4 }
 0x1e3   : > { %v9062_v1 = vpop.xlane.xlu1 %811 }
 0x1e4   : > { %v797_v2 = vpop.xlane.xlu2 %796  ;;  %879 = vst.msk [vmem:[#allocation2 + $0x70] sm:$0xff] %vm864_vm3, %v9062_v1 }
 0x1e5   : > { %874 = vst.msk [vmem:[#allocation2 + $0x48] sm:$0xff] %vm864_vm3, %v797_v2  ;;  %v825_v6 = vsub.f32 %v8929_v26, %v797_v2  ;;  %v813_v26 = vsel %vm767_vm1, %v9077_v11, -inf  ;;  %v9138_v4 = vpop.f32.mrf.mxu2 }
 0x1e7   : > { %v850_v9 = vmul.f32 1.442695, %v825_v6  ;;  %v9081_v15 = vpop.eup %7813 }
 0x1e8   : > { %7355 = vmatmul.msk.f32.gmra.mxu1 %vm767_vm1, %v9069_v5 }
 0x1e9   : > { %7815 = vpow2.f32 %v850_v9 }
 0x1ea   : > { %1256 = vmax.xlane.f32.xlu0 %v1255_v25  ;;  %7817 = vpow2.f32 %v852_v20 }
 0x1eb   : > { %7819 = vpow2.f32 %v854_v31 }
 0x1ec   : > { %v2081_v8 = vpop.permute.xlu2 %2080  ;;  %v9112_v37 = vpop.permute.xlu0 %1601 }
 0x1ed   : > { %7443 = vmatmul.msk.f32.gmra.mxu0 %vm650_vm0, %v2081_v8  ;;  %v830_v8 = vsub.f32 %v8962_v45, %v9062_v1  ;;  %v1252_v45 = vsel %vm767_vm1, %v9042_v43, -inf }
 0x1ef   : > { %v9090_v24 = vpop.eup %7815 }
 0x1f0   : > { %7356 = vmatmul.msk.f32.gmra.mxu1 %vm767_vm1, %v9081_v15  ;;  %v9098_v30 = vpop.eup %7817 }
 0x1f1   : > { %v9105_v34 = vpop.eup %7819 }
 0x1f2   : > { %1262 = vmax.xlane.f32.xlu0 %v1261_v17  ;;  %12820 = vst [vmem:[#allocation11_spill] sm:$0xff] %v9105_v34  ;;  %v860_v17 = vmul.f32 1.442695, %v830_v8 }
 0x1f3   : > { %814 = vmax.xlane.f32.xlu2 %v813_v26 }
 0x1f8   : > { %7357 = vmatmul.msk.f32.gmra.mxu1 %vm767_vm1, %v9090_v24 }
 0x1fb   : > { %v9126_v44 = vpop.permute.xlu1 %1603 }
 0x1fc   : > { %v1014_v29 = vpop.f32.mrf.mxu1 }
 0x1fd   : > { %1062 = vst.msk [vmem:[#allocation4] sm:$0xff] %vm650_vm0, %v1014_v29 }
 0x1fe   : > { %1259 = vmax.xlane.f32.xlu1 %v1258_v32  ;;  %v7400_v32 = vld [vmem:[%s12734_s3 + $0x8] sm:$0xf] }
 0x1ff   : > { %7402 = vmatpush.xpose.msk.msrb.mxu1 %vm650_vm0, %v7400_v32 }
 0x200   : > { %7358 = vmatmul.msk.f32.gmra.mxu1 %vm767_vm1, %v9098_v30 }
 0x204   : > { %v1017_v33 = vpop.f32.mrf.mxu1 }
 0x205   : > { %1063 = vst.msk [vmem:[#allocation4 + $0x8] sm:$0xff] %vm650_vm0, %v1017_v33 }
 0x206   : > { %2092 = vrot.lane.b32.xlu0 %v8830_v60, %s8529_s17 }
 0x208   : > { %7359 = vmatmul.msk.f32.gmra.mxu1 %vm767_vm1, %v9105_v34 }
 0x20b   : > { %1605 = vrot.lane.b32.xlu2 %v8792_v54, %s8528_s15 }
 0x20c   : > { %v1020_v35 = vpop.f32.mrf.mxu1 }
 0x20d   : > { %1064 = vst.msk [vmem:[#allocation4 + $0x10] sm:$0xff] %vm650_vm0, %v1020_v35 }
 0x20e   : > { %2094 = vrot.lane.b32.xlu0 %v8842_v62, %s8529_s17 }
 0x213   : > { %2084 = vrot.lane.b32.xlu2 %v8792_v54, %s8529_s17 }
 0x214   : > { %v1023_v39 = vpop.f32.mrf.mxu1 }
 0x215   : > { %1065 = vst.msk [vmem:[#allocation4 + $0x18] sm:$0xff] %vm650_vm0, %v1023_v39 }
 0x217   : > { %v809_v40 = vpop.xlane.xlu0 %808  ;;  %1615 = vrot.lane.b32.xlu1 %v8842_v62, %s8528_s15 }
 0x218   : > { %878 = vst.msk [vmem:[#allocation2 + $0x68] sm:$0xff] %vm864_vm3, %v809_v40 }
 0x21f   : > { %1617 = vrot.lane.b32.xlu1 %v8854_v0, %s8528_s15  ;;  %v1248_v52 = vpop.xlane.xlu0 %1247 }
 0x220   : > { %v1294_v55 = vsub.f32 %v9009_v13, %v1248_v52  ;;  %1343 = vst.msk [vmem:[#allocation2 + $0x80] sm:$0xff] %vm864_vm3, %v1248_v52  ;;  %v829_v13 = vsub.f32 %v8957_v42, %v809_v40  ;;  %v9154_v42 = vpop.f32.mrf.mxu2 }
 0x221   : > { %v1267_v9 = vsel %vm767_vm1, %v9154_v42, -inf }
 0x222   : > { %v1310_v54 = vmul.f32 1.442695, %v1294_v55  ;;  %v858_v6 = vmul.f32 1.442695, %v829_v13 }
 0x224   : > { %7821 = vpow2.f32 %v1310_v54 }
 0x225   : > { %v806_v46 = vpop.xlane.xlu2 %805 }
 0x226   : > { %v828_v47 = vsub.f32 %v8949_v38, %v806_v46  ;;  %877 = vst.msk [vmem:[#allocation2 + $0x60] sm:$0xff] %vm864_vm3, %v806_v46  ;;  %v1251_v62 = vpop.xlane.xlu1 %1250 }
 0x227   : > { %v1295_v21 = vsub.f32 %v9014_v23, %v1251_v62  ;;  %1344 = vst.msk [vmem:[#allocation2 + $0x88] sm:$0xff] %vm864_vm3, %v1251_v62 }
 0x228   : > { %v856_v49 = vmul.f32 1.442695, %v828_v47  ;;  %v9168_v18 = vpop.f32.mrf.mxu2 }
 0x229   : > { %v1312_v53 = vmul.f32 1.442695, %v1295_v21  ;;  %v1270_v27 = vsel %vm767_vm1, %v9168_v18, -inf }
 0x22a   : > { %v9136_v2 = vpop.eup %7821  ;;  %7823 = vpow2.f32 %v856_v49 }
 0x22b   : > { %7825 = vpow2.f32 %v1312_v53  ;;  %7384 = vmatmul.msk.f32.vlgmr.msra.gmra.mxu3 %vm767_vm1, %v9136_v2 }
 0x22c   : > { %7827 = vpow2.f32 %v858_v6 }
 0x22d   : > { %v2083_v38 = vpop.permute.xlu2 %2082  ;;  %7829 = vpow2.f32 %v860_v17 }
 0x22e   : > { %7444 = vmatmul.msk.f32.gmra.mxu0 %vm650_vm0, %v2083_v38 }
 0x230   : > { %v9144_v23 = vpop.eup %7823  ;;  %v9186_v33 = vpop.f32.mrf.mxu2 }
 0x231   : > { %v9146_v25 = vpop.eup %7825  ;;  %7360 = vmatmul.msk.f32.gmra.mxu1 %vm767_vm1, %v9144_v23 }
 0x232   : > { %12821 = vst [vmem:[#allocation12_spill] sm:$0xff] %v9146_v25  ;;  %v9158_v26 = vpop.eup %7827  ;;  %v9175_v29 = vpop.permute.xlu0 %1607 }
 0x233   : > { %7385 = vmatmul.msk.f32.gmra.mxu3 %vm767_vm1, %v9146_v25  ;;  %v9164_v1 = vpop.eup %7829 }
 0x234   : > { %12822 = vst [vmem:[#allocation13_spill] sm:$0xff] %v9164_v1 }
 0x238   : > { %1268 = vmax.xlane.f32.xlu0 %v1267_v9 }
 0x239   : > { %7361 = vmatmul.msk.f32.gmra.mxu1 %vm767_vm1, %v9158_v26 }
 0x23c   : > { %1253 = vmax.xlane.f32.xlu2 %v1252_v45 }
 0x23e   : > { %v2087_v35 = vpop.permute.xlu1 %2086 }
 0x241   : > { %7362 = vmatmul.msk.f32.gmra.mxu1 %vm767_vm1, %v9164_v1 }
 0x246   : > { %v2089_v46 = vpop.permute.xlu1 %2088 }
 0x247   : > { %v1026_v20 = vpop.f32.mrf.mxu1 }
 0x248   : > { %1066 = vst.msk [vmem:[#allocation4 + $0x20] sm:$0xff] %vm650_vm0, %v1026_v20  ;;  %v9253_v20 = vpop.f32.mrf.mxu0 }
 0x249   : > { %1271 = vmax.xlane.f32.xlu1 %v1270_v27  ;;  %v1264_v27 = vsel %vm767_vm1, %v9138_v4, -inf }
 0x24c   : > { %2098 = vrot.lane.b32.xlu0 %v8823_v59, %s8529_s17 }
 0x250   : > { %v9263_v32 = vpop.f32.mrf.mxu0 }
 0x254   : > { %1621 = vrot.lane.b32.xlu0 %v8835_v61, %s8528_s15  ;;  %1609 = vrot.lane.b32.xlu2 %v8809_v57, %s8528_s15  ;;  %v9195_v57 = vpop.f32.mrf.mxu2 }
 0x255   : > { %v1029_v31 = vpop.f32.mrf.mxu1  ;;  %v1276_v38 = vsel %vm767_vm1, %v9195_v57, -inf }
 0x256   : > { %1067 = vst.msk [vmem:[#allocation4 + $0x28] sm:$0xff] %vm650_vm0, %v1029_v31 }
 0x25c   : > { %1611 = vrot.lane.b32.xlu2 %v8816_v58, %s8528_s15 }
 0x25d   : > { %v1032_v16 = vpop.f32.mrf.mxu1  ;;  %v9190_v39 = vpop.xlane.xlu0 %1256 }
 0x25e   : > { %1068 = vst.msk [vmem:[#allocation4 + $0x30] sm:$0xff] %vm650_vm0, %v1032_v16  ;;  %v2207_v16 = vsel %vm767_vm1, %v9263_v32, -inf }
 0x25f   : > { %1346 = vst.msk [vmem:[#allocation2 + $0x98] sm:$0xff] %vm864_vm3, %v9190_v39 }
 0x262   : > { %2100 = vrot.lane.b32.xlu1 %v8835_v61, %s8529_s17 }
 0x264   : > { %2090 = vrot.lane.b32.xlu2 %v8816_v58, %s8529_s17  ;;  %v9210_v58 = vpop.f32.mrf.mxu2 }
 0x265   : > { %v1035_v40 = vpop.f32.mrf.mxu1  ;;  %v9202_v52 = vpop.xlane.xlu0 %1262 }
 0x266   : > { %1069 = vst.msk [vmem:[#allocation4 + $0x38] sm:$0xff] %vm650_vm0, %v1035_v40  ;;  %v815_v55 = vpop.xlane.xlu2 %814  ;;  %v9269_v40 = vpop.f32.mrf.mxu0 }
 0x267   : > { %1348 = vst.msk [vmem:[#allocation2 + $0xa8] sm:$0xff] %vm864_vm3, %v9202_v52  ;;  %v831_v54 = vsub.f32 %v9077_v11, %v815_v55 }
 0x268   : > { %880 = vst.msk [vmem:[#allocation2 + $0x78] sm:$0xff] %vm864_vm3, %v815_v55 }
 0x269   : > { %v862_v47 = vmul.f32 1.442695, %v831_v54  ;;  %v2210_v54 = vsel %vm767_vm1, %v9269_v40, -inf }
 0x26a   : > { %1623 = vrot.lane.b32.xlu1 %v8847_v63, %s8528_s15 }
 0x26b   : > { %7831 = vpow2.f32 %v862_v47 }
 0x26c   : > { %1613 = vrot.lane.b32.xlu2 %v8830_v60, %s8528_s15  ;;  %v9223_v49 = vpop.f32.mrf.mxu2 }
 0x26d   : > { %v1038_v61 = vpop.f32.mrf.mxu1  ;;  %v1282_v9 = vsel %vm767_vm1, %v9223_v49, -inf }
 0x26e   : > { %1070 = vst.msk [vmem:[#allocation4 + $0x40] sm:$0xff] %vm650_vm0, %v1038_v61  ;;  %v1606_v62 = vpop.permute.xlu2 %1605 }
 0x271   : > { %v9215_v21 = vpop.eup %7831  ;;  %v9217_v11 = vpop.xlane.xlu1 %1259 }
 0x272   : > { %1347 = vst.msk [vmem:[#allocation2 + $0xa0] sm:$0xff] %vm864_vm3, %v9217_v11  ;;  %7363 = vmatmul.msk.f32.gmra.mxu1 %vm767_vm1, %v9215_v21 }
 0x274   : > { %v9231_v6 = vpop.f32.mrf.mxu2 }
 0x275   : > { %v1041_v53 = vpop.f32.mrf.mxu1 }
 0x276   : > { %1071 = vst.msk [vmem:[#allocation4 + $0x48] sm:$0xff] %vm650_vm0, %v1041_v53  ;;  %v2085_v60 = vpop.permute.xlu2 %2084 }
 0x277   : > { %7445 = vmatmul.msk.f32.gmra.mxu0 %vm650_vm0, %v2085_v60  ;;  %v1297_v60 = vsub.f32 %v9053_v48, %v9190_v39  ;;  %v1298_v48 = vsub.f32 %v9064_v22, %v9217_v11  ;;  %v1299_v22 = vsub.f32 %v9079_v12, %v9202_v52  ;;  %v1273_v12 = vsel %vm767_vm1, %v9186_v33, -inf }
 0x278   : > { %v2093_v31 = vpop.permute.xlu0 %2092 }
 0x27a   : > { %7403 = vmatmul.msk.f32.vlgmr.msrb.gmra.mxu1 %vm650_vm0, %v8972_v51 }
 0x27c   : > { %v9241_v51 = vpop.f32.mrf.mxu2 }
 0x27d   : > { %v1044_v13 = vpop.f32.mrf.mxu1  ;;  %v1288_v17 = vsel %vm767_vm1, %v9241_v51, -inf }
 0x27e   : > { %1072 = vst.msk [vmem:[#allocation4 + $0x50] sm:$0xff] %vm650_vm0, %v1044_v13  ;;  %1277 = vmax.xlane.f32.xlu0 %v1276_v38  ;;  %v1316_v38 = vmul.f32 1.442695, %v1297_v60 }
 0x27f   : > { %7446 = vmatmul.msk.f32.gmra.mxu0 %vm650_vm0, %v2087_v35 }
 0x280   : > { %v2095_v35 = vpop.permute.xlu0 %2094 }
 0x282   : > { %7404 = vmatmul.msk.f32.gmra.mxu1 %vm650_vm0, %v9005_v56  ;;  %v1279_v56 = vsel %vm767_vm1, %v9210_v58, -inf }
 0x284   : > { %v9247_v45 = vpop.f32.mrf.mxu2 }
 0x285   : > { %v1047_v8 = vpop.f32.mrf.mxu1 }
 0x286   : > { %1073 = vst.msk [vmem:[#allocation4 + $0x58] sm:$0xff] %vm650_vm0, %v1047_v8  ;;  %1283 = vmax.xlane.f32.xlu0 %v1282_v9  ;;  %v1318_v9 = vmul.f32 1.442695, %v1298_v48 }
 0x287   : > { %7447 = vmatmul.msk.f32.gmra.mxu0 %vm650_vm0, %v2089_v46 }
 0x289   : > { %v1616_v55 = vpop.permute.xlu1 %1615 }
 0x28a   : > { %7405 = vmatmul.msk.f32.gmra.mxu1 %vm650_vm0, %v9021_v28  ;;  %v1291_v28 = vsel %vm767_vm1, %v9247_v45, -inf }
 0x28e   : > { %1289 = vmax.xlane.f32.xlu0 %v1288_v17 }
 0x291   : > { %v1618_v53 = vpop.permute.xlu1 %1617 }
 0x292   : > { %7406 = vmatmul.msk.f32.gmra.mxu1 %vm650_vm0, %v9040_v41  ;;  %v2204_v41 = vsel %vm767_vm1, %v9253_v20, -inf }
 0x294   : > { %1280 = vmax.xlane.f32.xlu1 %v1279_v56  ;;  %v1320_v56 = vmul.f32 1.442695, %v1299_v22 }
 0x295   : > { %1265 = vmax.xlane.f32.xlu2 %v1264_v27 }
 0x296   : > { %1292 = vmax.xlane.f32.xlu0 %v1291_v28 }
 0x29a   : > { %7407 = vmatmul.msk.f32.gmra.mxu1 %vm650_vm0, %v9112_v37 }
 0x29c   : > { %2205 = vmax.xlane.f32.xlu1 %v2204_v41 }
 0x2a2   : > { %7408 = vmatmul.msk.f32.gmra.mxu1 %vm650_vm0, %v9126_v44 }
 0x2a4   : > { %2208 = vmax.xlane.f32.xlu1 %v2207_v16 }
 0x2aa   : > { %7409 = vmatmul.msk.f32.gmra.mxu1 %vm650_vm0, %v1606_v62 }
 0x2ab   : > { %v9272_v37 = vpop.xlane.xlu0 %1268 }
 0x2ac   : > { %1350 = vst.msk [vmem:[#allocation2 + $0xb8] sm:$0xff] %vm864_vm3, %v9272_v37  ;;  %2211 = vmax.xlane.f32.xlu1 %v2210_v54 }
 0x2ad   : > { %2096 = vrot.lane.b32.xlu2 %v8854_v0, %s8529_s17 }
 0x2ae   : > { %v1050_v46 = vpop.f32.mrf.mxu1  ;;  %v1492_v44 = vpop.f32.mrf.mxu3 }
 0x2af   : > { %1074 = vst.msk [vmem:[#allocation4 + $0x60] sm:$0xff] %vm650_vm0, %v1050_v46  ;;  %v1254_v47 = vpop.xlane.xlu2 %1253 }
 0x2b0   : > { %v1296_v61 = vsub.f32 %v9042_v43, %v1254_v47  ;;  %1345 = vst.msk [vmem:[#allocation2 + $0x90] sm:$0xff] %vm864_vm3, %v1254_v47 }
 0x2b1   : > { %1541 = vst.msk [vmem:[#allocation4 + $0x80] sm:$0xff] %vm650_vm0, %v1492_v44  ;;  %v9344_v44 = vpop.f32.mrf.mxu0 }
 0x2b2   : > { %v1314_v62 = vmul.f32 1.442695, %v1296_v61  ;;  %7410 = vmatmul.msk.f32.gmra.mxu1 %vm650_vm0, %v9175_v29  ;;  %v7437_v61 = vld [vmem:[%s12734_s3 + $0x1c] sm:$0xf] }
 0x2b3   : > { %7455 = vmatpush.msk.msrb.mxu2 %vm993_vm2, %v7437_v61 }
 0x2b4   : > { %7833 = vpow2.f32 %v1314_v62 }
 0x2b5   : > { %1619 = vrot.lane.b32.xlu2 %v8823_v59, %s8528_s15  ;;  %7835 = vpow2.f32 %v1316_v38 }
 0x2b6   : > { %v1053_v0 = vpop.f32.mrf.mxu1  ;;  %v1495_v13 = vpop.f32.mrf.mxu3  ;;  %7837 = vpow2.f32 %v1318_v9 }
 0x2b7   : > { %1075 = vst.msk [vmem:[#allocation4 + $0x68] sm:$0xff] %vm650_vm0, %v1053_v0  ;;  %v1610_v43 = vpop.permute.xlu2 %1609  ;;  %7839 = vpow2.f32 %v1320_v56 }
 0x2b8   : > { %1542 = vst.msk [vmem:[#allocation4 + $0x88] sm:$0xff] %vm650_vm0, %v1495_v13 }
 0x2b9   : > { %v9360_v60 = vpop.f32.mrf.mxu0 }
 0x2ba   : > { %v9292_v8 = vpop.eup %7833  ;;  %7411 = vmatmul.msk.f32.gmra.mxu1 %vm650_vm0, %v1610_v43 }
 0x2bb   : > { %7386 = vmatmul.msk.f32.gmra.mxu3 %vm767_vm1, %v9292_v8  ;;  %v9304_v17 = vpop.eup %7835 }
 0x2bc   : > { %v9299_v59 = vpop.xlane.xlu1 %1271  ;;  %v9312_v27 = vpop.eup %7837 }
 0x2bd   : > { %1351 = vst.msk [vmem:[#allocation2 + $0xc0] sm:$0xff] %vm864_vm3, %v9299_v59  ;;  %v9318_v41 = vpop.eup %7839 }
 0x2be   : > { %v1056_v29 = vpop.f32.mrf.mxu1  ;;  %12823 = vst [vmem:[#allocation14_spill] sm:$0xff] %v9312_v27  ;;  %v9326_v52 = vpop.permute.xlu0 %2098 }
 0x2bf   : > { %1076 = vst.msk [vmem:[#allocation4 + $0x70] sm:$0xff] %vm650_vm0, %v1056_v29  ;;  %v1612_v39 = vpop.permute.xlu2 %1611 }
 0x2c1   : > { %v9374_v29 = vpop.f32.mrf.mxu0 }
 0x2c2   : > { %7412 = vmatmul.msk.f32.gmra.mxu1 %vm650_vm0, %v1612_v39 }
 0x2c3   : > { %7387 = vmatmul.msk.f32.gmra.mxu3 %vm767_vm1, %v9304_v17 }
 0x2c6   : > { %v9329_v16 = vpop.permute.xlu0 %1621 }
 0x2c7   : > { %v2091_v11 = vpop.permute.xlu2 %2090 }
 0x2c8   : > { %7448 = vmatmul.msk.f32.gmra.mxu0 %vm650_vm0, %v2091_v11  ;;  %v1301_v11 = vsub.f32 %v9154_v42, %v9272_v37 }
 0x2cb   : > { %7388 = vmatmul.msk.f32.gmra.mxu3 %vm767_vm1, %v9312_v27 }
 0x2cf   : > { %v1614_v28 = vpop.permute.xlu2 %1613 }
 0x2d0   : > { %7413 = vmatmul.msk.f32.gmra.mxu1 %vm650_vm0, %v1614_v28  ;;  %7449 = vmatmul.msk.f32.gmra.mxu0 %vm650_vm0, %v2093_v31 }
 0x2d3   : > { %7389 = vmatmul.msk.f32.gmra.mxu3 %vm767_vm1, %v9318_v41 }
 0x2d8   : > { %7450 = vmatmul.msk.f32.gmra.mxu0 %vm650_vm0, %v2095_v35  ;;  %7414 = vmatmul.msk.f32.gmra.mxu1 %vm650_vm0, %v1616_v55  ;;  %v9336_v35 = vpop.permute.xlu1 %2100 }
 0x2de   : > { %1274 = vmax.xlane.f32.xlu2 %v1273_v12 }
 0x2e0   : > { %7415 = vmatmul.msk.f32.gmra.mxu1 %vm650_vm0, %v1618_v53 }
 0x2ef   : > { %v1059_v31 = vpop.f32.mrf.mxu1 }
 0x2f0   : > { %1077 = vst.msk [vmem:[#allocation4 + $0x78] sm:$0xff] %vm650_vm0, %v1059_v31  ;;  %v2213_v31 = vsel %vm767_vm1, %v9344_v44, -inf }
 0x2f1   : > { %v9332_v54 = vpop.xlane.xlu0 %1277 }
 0x2f2   : > { %1353 = vst.msk [vmem:[#allocation2 + $0xd0] sm:$0xff] %vm864_vm3, %v9332_v54 }
 0x2f4   : > { %v9390_v61 = vpop.f32.mrf.mxu0 }
 0x2f6   : > { %2102 = vrot.lane.b32.xlu2 %v8847_v63, %s8529_s17  ;;  %v9354_v63 = vpop.permute.xlu1 %1623 }
 0x2f7   : > { %v9340_v55 = vpop.f32.mrf.mxu1 }
 0x2f8   : > { %v1725_v46 = vsel %vm767_vm1, %v9340_v55, -inf }
 0x2f9   : > { %v9346_v47 = vpop.xlane.xlu0 %1283  ;;  %1726 = vmax.xlane.f32.xlu0 %v1725_v46  ;;  %v1324_v46 = vmul.f32 1.442695, %v1301_v11 }
 0x2fa   : > { %1355 = vst.msk [vmem:[#allocation2 + $0xe0] sm:$0xff] %vm864_vm3, %v9346_v47 }
 0x2ff   : > { %v9356_v62 = vpop.f32.mrf.mxu1 }
 0x300   : > { %v1728_v53 = vsel %vm767_vm1, %v9356_v62, -inf }
 0x301   : > { %v9362_v0 = vpop.xlane.xlu0 %1289  ;;  %1729 = vmax.xlane.f32.xlu0 %v1728_v53 }
 0x302   : > { %1357 = vst.msk [vmem:[#allocation2 + $0xf0] sm:$0xff] %vm864_vm3, %v9362_v0 }
 0x307   : > { %v9366_v13 = vpop.xlane.xlu1 %1280  ;;  %v9368_v43 = vpop.f32.mrf.mxu1 }
 0x308   : > { %1354 = vst.msk [vmem:[#allocation2 + $0xd8] sm:$0xff] %vm864_vm3, %v9366_v13  ;;  %v1266_v38 = vpop.xlane.xlu2 %1265  ;;  %v1731_v48 = vsel %vm767_vm1, %v9368_v43, -inf }
 0x309   : > { %v1300_v39 = vsub.f32 %v9138_v4, %v1266_v38  ;;  %1349 = vst.msk [vmem:[#allocation2 + $0xb0] sm:$0xff] %vm864_vm3, %v1266_v38  ;;  %v9378_v9 = vpop.xlane.xlu0 %1292  ;;  %1732 = vmax.xlane.f32.xlu0 %v1731_v48 }
 0x30a   : > { %1358 = vst.msk [vmem:[#allocation2 + $0xf8] sm:$0xff] %vm864_vm3, %v9378_v9 }
 0x30b   : > { %v1322_v22 = vmul.f32 1.442695, %v1300_v39 }
 0x30d   : > { %7841 = vpow2.f32 %v1322_v22 }
 0x30f   : > { %v2206_v56 = vpop.xlane.xlu1 %2205  ;;  %v9384_v28 = vpop.f32.mrf.mxu1 }
 0x310   : > { %v2252_v12 = vsub.f32 %v9253_v20, %v2206_v56  ;;  %2301 = vst.msk [vmem:[#allocation2 + $0x180] sm:$0xff] %vm864_vm3, %v2206_v56  ;;  %v2097_v4 = vpop.permute.xlu2 %2096  ;;  %v1302_v20 = vsub.f32 %v9168_v18, %v9299_v59  ;;  %v9406_v56 = vpop.f32.mrf.mxu0 }
 0x311   : > { %2214 = vmax.xlane.f32.xlu0 %v2213_v31  ;;  %7451 = vmatmul.msk.f32.gmra.mxu0 %vm650_vm0, %v2097_v4 }
 0x312   : > { %v2268_v53 = vmul.f32 1.442695, %v2252_v12  ;;  %v1326_v11 = vmul.f32 1.442695, %v1302_v20 }
 0x313   : > { %v9393_v42 = vpop.eup %7841 }
 0x314   : > { %7843 = vpow2.f32 %v2268_v53  ;;  %7390 = vmatmul.msk.f32.gmra.mxu3 %vm767_vm1, %v9393_v42 }
 0x315   : > { %7845 = vpow2.f32 %v1324_v46 }
 0x317   : > { %v2209_v37 = vpop.xlane.xlu1 %2208  ;;  %v9399_v38 = vpop.f32.mrf.mxu1 }
 0x318   : > { %v2253_v48 = vsub.f32 %v9263_v32, %v2209_v37  ;;  %2302 = vst.msk [vmem:[#allocation2 + $0x188] sm:$0xff] %vm864_vm3, %v2209_v37  ;;  %v1620_v39 = vpop.permute.xlu2 %1619  ;;  %v1737_v22 = vsel %vm767_vm1, %v9399_v38, -inf  ;;  %v1285_v32 = vsel %vm767_vm1, %v9231_v6, -inf }
 0x319   : > { %1738 = vmax.xlane.f32.xlu1 %v1737_v22  ;;  %7416 = vmatmul.msk.f32.gmra.mxu1 %vm650_vm0, %v1620_v39  ;;  %v1734_v39 = vsel %vm767_vm1, %v9384_v28, -inf }
 0x31a   : > { %v9408_v12 = vpop.eup %7843  ;;  %v2270_v18 = vmul.f32 1.442695, %v2253_v48  ;;  %7452 = vmatmul.msk.f32.gmra.mxu0 %vm650_vm0, %v9326_v52  ;;  %v2219_v52 = vsel %vm767_vm1, %v9374_v29, -inf  ;;  %v9438_v48 = vpop.f32.mrf.mxu0 }
 0x31b   : > { %12824 = vst [vmem:[#allocation15_spill] sm:$0xff] %v9408_v12  ;;  %v9412_v59 = vpop.eup %7845  ;;  %7456 = vmatmul.msk.f32.vlgmr.msrb.gmra.mxu2 %vm767_vm1, %v9408_v12  ;;  %v1304_v12 = vsub.f32 %v9195_v57, %v9332_v54  ;;  %v1305_v57 = vsub.f32 %v9210_v58, %v9366_v13 }
 0x31c   : > { %12825 = vst [vmem:[#allocation16_spill] sm:$0xff] %v9412_v59  ;;  %7847 = vpow2.f32 %v2270_v18  ;;  %7391 = vmatmul.msk.f32.gmra.mxu3 %vm767_vm1, %v9412_v59  ;;  %v2216_v18 = vsel %vm767_vm1, %v9360_v60, -inf }
 0x31d   : > { %7849 = vpow2.f32 %v1326_v11  ;;  %v1332_v54 = vmul.f32 1.442695, %v1305_v57 }
 0x31f   : > { %v2212_v4 = vpop.xlane.xlu1 %2211  ;;  %1286 = vmax.xlane.f32.xlu2 %v1285_v32  ;;  %v9420_v31 = vpop.f32.mrf.mxu1 }
 0x320   : > { %v2254_v46 = vsub.f32 %v9269_v40, %v2212_v4  ;;  %2303 = vst.msk [vmem:[#allocation2 + $0x190] sm:$0xff] %vm864_vm3, %v2212_v4  ;;  %v1740_v53 = vsel %vm767_vm1, %v9420_v31, -inf }
 0x321   : > { %2220 = vmax.xlane.f32.xlu1 %v2219_v52  ;;  %1741 = vmax.xlane.f32.xlu0 %v1740_v53 }
 0x322   : > { %v9428_v20 = vpop.eup %7847  ;;  %v2272_v37 = vmul.f32 1.442695, %v2254_v46  ;;  %7453 = vmatmul.msk.f32.gmra.mxu0 %vm650_vm0, %v9336_v35  ;;  %7417 = vmatmul.msk.f32.gmra.mxu1 %vm650_vm0, %v9329_v16  ;;  %v2228_v35 = vsel %vm767_vm1, %v9438_v48, -inf  ;;  %v2222_v16 = vsel %vm767_vm1, %v9390_v61, -inf }
 0x323   : > { %12826 = vst [vmem:[#allocation17_spill] sm:$0xff] %v9428_v20  ;;  %v9434_v40 = vpop.eup %7849  ;;  %7457 = vmatmul.msk.f32.gmra.mxu2 %vm767_vm1, %v9428_v20 }
 0x324   : > { %7851 = vpow2.f32 %v2272_v37  ;;  %7392 = vmatmul.msk.f32.gmra.mxu3 %vm767_vm1, %v9434_v40 }
 0x327   : > { %1735 = vmax.xlane.f32.xlu2 %v1734_v39  ;;  %v9446_v22 = vpop.f32.mrf.mxu1 }
 0x328   : > { %v1743_v46 = vsel %vm767_vm1, %v9446_v22, -inf }
 0x329   : > { %2223 = vmax.xlane.f32.xlu0 %v2222_v16  ;;  %2229 = vmax.xlane.f32.xlu1 %v2228_v35 }
 0x32a   : > { %v9450_v11 = vpop.eup %7851  ;;  %7418 = vmatmul.msk.f32.gmra.mxu1 %vm650_vm0, %v9354_v63  ;;  %v2225_v63 = vsel %vm767_vm1, %v9406_v56, -inf }
 0x32b   : > { %12827 = vst [vmem:[#allocation18_spill] sm:$0xff] %v9450_v11  ;;  %7458 = vmatmul.msk.f32.gmra.mxu2 %vm767_vm1, %v9450_v11 }
 0x32f   : > { %2217 = vmax.xlane.f32.xlu2 %v2216_v18  ;;  %v9458_v32 = vpop.f32.mrf.mxu1 }
 0x330   : > { %v1746_v4 = vsel %vm767_vm1, %v9458_v32, -inf }
 0x331   : > { %1747 = vmax.xlane.f32.xlu1 %v1746_v4 }
 0x337   : > { %1744 = vmax.xlane.f32.xlu2 %v1743_v46  ;;  %v9472_v35 = vpop.f32.mrf.mxu1 }
 0x338   : > { %v1749_v4 = vsel %vm767_vm1, %v9472_v35, -inf }
 0x33e   : > { %v1498_v52 = vpop.f32.mrf.mxu3 }
 0x33f   : > { %1543 = vst.msk [vmem:[#allocation4 + $0x90] sm:$0xff] %vm650_vm0, %v1498_v52  ;;  %2226 = vmax.xlane.f32.xlu2 %v2225_v63 }
 0x345   : > { %v9467_v53 = vpop.f32.mrf.mxu0 }
 0x346   : > { %v1501_v37 = vpop.f32.mrf.mxu3  ;;  %v2231_v39 = vsel %vm767_vm1, %v9467_v53, -inf }
 0x347   : > { %1544 = vst.msk [vmem:[#allocation4 + $0x98] sm:$0xff] %vm650_vm0, %v1501_v37  ;;  %2232 = vmax.xlane.f32.xlu0 %v2231_v39  ;;  %v9483_v37 = vpop.f32.mrf.mxu1 }
 0x34d   : > { %v9474_v16 = vpop.f32.mrf.mxu0 }
 0x34e   : > { %v1504_v18 = vpop.f32.mrf.mxu3  ;;  %v2234_v46 = vsel %vm767_vm1, %v9474_v16, -inf }
 0x34f   : > { %1545 = vst.msk [vmem:[#allocation4 + $0xa0] sm:$0xff] %vm650_vm0, %v1504_v18  ;;  %1750 = vmax.xlane.f32.xlu0 %v1749_v4  ;;  %2235 = vmax.xlane.f32.xlu2 %v2234_v46  ;;  %v1752_v18 = vsel %vm767_vm1, %v9483_v37, -inf  ;;  %v1330_v46 = vmul.f32 1.442695, %v1304_v12  ;;  %v1306_v12 = vsub.f32 %v9223_v49, %v9346_v47 }
 0x351   : > { %v1275_v52 = vpop.xlane.xlu2 %1274 }
 0x352   : > { %v1303_v63 = vsub.f32 %v9186_v33, %v1275_v52  ;;  %1352 = vst.msk [vmem:[#allocation2 + $0xc8] sm:$0xff] %vm864_vm3, %v1275_v52 }
 0x354   : > { %v1328_v39 = vmul.f32 1.442695, %v1303_v63 }
 0x355   : > { %v9485_v11 = vpop.f32.mrf.mxu0 }
 0x356   : > { %7853 = vpow2.f32 %v1328_v39  ;;  %v1507_v59 = vpop.f32.mrf.mxu3  ;;  %v2237_v4 = vsel %vm767_vm1, %v9485_v11, -inf  ;;  %v1334_v39 = vmul.f32 1.442695, %v1306_v12 }
 0x357   : > { %1546 = vst.msk [vmem:[#allocation4 + $0xa8] sm:$0xff] %vm650_vm0, %v1507_v59  ;;  %1753 = vmax.xlane.f32.xlu2 %v1752_v18  ;;  %2238 = vmax.xlane.f32.xlu1 %v2237_v4  ;;  %7855 = vpow2.f32 %v1330_v46  ;;  %v7401_v59 = vld [vmem:[%s12734_s3 + $0x18] sm:$0xf] }
 0x358   : > { %7857 = vpow2.f32 %v1332_v54  ;;  %7419 = vmatpush.msk.msrb.mxu3 %vm993_vm2, %v7401_v59  ;;  %v9537_v54 = vpop.f32.mrf.mxu1 }
 0x359   : > { %v2103_v33 = vpop.permute.xlu2 %2102  ;;  %7859 = vpow2.f32 %v1334_v39 }
 0x35a   : > { %7454 = vmatmul.msk.f32.gmra.mxu0 %vm650_vm0, %v2103_v33 }
 0x35c   : > { %v9495_v52 = vpop.eup %7853 }
 0x35d   : > { %7393 = vmatmul.msk.f32.gmra.mxu3 %vm767_vm1, %v9495_v52  ;;  %v9501_v63 = vpop.eup %7855 }
 0x35e   : > { %12828 = vst [vmem:[#allocation19_spill] sm:$0xff] %v9501_v63  ;;  %v9511_v18 = vpop.eup %7857 }
 0x35f   : > { %v9519_v49 = vpop.eup %7859 }
 0x360   : > { %v9552_v27 = vpop.f32.mrf.mxu1 }
 0x365   : > { %7394 = vmatmul.msk.f32.gmra.mxu3 %vm767_vm1, %v9501_v63 }
 0x36c   : > { %v9513_v58 = vpop.xlane.xlu0 %1726 }
 0x36d   : > { %1822 = vst.msk [vmem:[#allocation2 + $0x100] sm:$0xff] %vm864_vm3, %v9513_v58  ;;  %7395 = vmatmul.msk.f32.gmra.mxu3 %vm767_vm1, %v9511_v18 }
 0x374   : > { %v9521_v47 = vpop.xlane.xlu0 %1729 }
 0x375   : > { %1823 = vst.msk [vmem:[#allocation2 + $0x108] sm:$0xff] %vm864_vm3, %v9521_v47  ;;  %7396 = vmatmul.msk.f32.gmra.mxu3 %vm767_vm1, %v9519_v49 }
 0x37c   : > { %v9527_v13 = vpop.xlane.xlu0 %1732 }
 0x37d   : > { %1824 = vst.msk [vmem:[#allocation2 + $0x110] sm:$0xff] %vm864_vm3, %v9527_v13 }
 0x384   : > { %v2215_v4 = vpop.xlane.xlu0 %2214 }
 0x385   : > { %v2255_v33 = vsub.f32 %v9344_v44, %v2215_v4  ;;  %2304 = vst.msk [vmem:[#allocation2 + $0x198] sm:$0xff] %vm864_vm3, %v2215_v4 }
 0x387   : > { %v2274_v46 = vmul.f32 1.442695, %v2255_v33 }
 0x389   : > { %7861 = vpow2.f32 %v2274_v46 }
 0x38c   : > { %v9533_v57 = vpop.xlane.xlu1 %1738 }
 0x38d   : > { %1826 = vst.msk [vmem:[#allocation2 + $0x120] sm:$0xff] %vm864_vm3, %v9533_v57 }
 0x38e   : > { %v9539_v12 = vpop.f32.mrf.mxu0 }
 0x38f   : > { %v9541_v59 = vpop.eup %7861  ;;  %v2240_v39 = vsel %vm767_vm1, %v9539_v12, -inf }
 0x390   : > { %12829 = vst [vmem:[#allocation20_spill] sm:$0xff] %v9541_v59  ;;  %7459 = vmatmul.msk.f32.gmra.mxu2 %vm767_vm1, %v9541_v59  ;;  %2241 = vmax.xlane.f32.xlu0 %v2240_v39  ;;  %v1308_v59 = vsub.f32 %v9241_v51, %v9362_v0  ;;  %v1309_v0 = vsub.f32 %v9247_v45, %v9378_v9  ;;  %v9586_v9 = vpop.f32.mrf.mxu1 }
 0x392   : > { %v1287_v44 = vpop.xlane.xlu2 %1286  ;;  %v1338_v20 = vmul.f32 1.442695, %v1308_v59 }
 0x393   : > { %v1307_v4 = vsub.f32 %v9231_v6, %v1287_v44  ;;  %1356 = vst.msk [vmem:[#allocation2 + $0xe8] sm:$0xff] %vm864_vm3, %v1287_v44 }
 0x394   : > { %v2221_v33 = vpop.xlane.xlu1 %2220  ;;  %v9549_v46 = vpop.xlane.xlu0 %1741 }
 0x395   : > { %v1336_v63 = vmul.f32 1.442695, %v1307_v4  ;;  %2306 = vst.msk [vmem:[#allocation2 + $0x1a8] sm:$0xff] %vm864_vm3, %v2221_v33 }
 0x396   : > { %1827 = vst.msk [vmem:[#allocation2 + $0x128] sm:$0xff] %vm864_vm3, %v9549_v46 }
 0x397   : > { %7863 = vpow2.f32 %v1336_v63  ;;  %v9558_v39 = vpop.f32.mrf.mxu0  ;;  %v1510_v6 = vpop.f32.mrf.mxu3 }
 0x398   : > { %12830 = vst [vmem:[#allocation21_spill] sm:$0xff] %v9558_v39  ;;  %v2243_v44 = vsel %vm767_vm1, %v9558_v39, -inf  ;;  %7865 = vpow2.f32 %v1338_v20 }
 0x399   : > { %1547 = vst.msk [vmem:[#allocation4 + $0xb0] sm:$0xff] %vm650_vm0, %v1510_v6  ;;  %2244 = vmax.xlane.f32.xlu2 %v2243_v44  ;;  %v884_v44 = vsel %vm767_vm1, %v8987_v7, 0.0  ;;  %v1773_v7 = vsub.f32 %v9340_v55, %v9513_v58 }
 0x39a   : > { %v9563_v4 = vpop.xlane.xlu2 %1735 }
 0x39b   : > { %1825 = vst.msk [vmem:[#allocation2 + $0x118] sm:$0xff] %vm864_vm3, %v9563_v4  ;;  %v1789_v55 = vmul.f32 1.442695, %v1773_v7 }
 0x39c   : > { %v2224_v25 = vpop.xlane.xlu0 %2223  ;;  %v9567_v1 = vpop.xlane.xlu1 %2229 }
 0x39d   : > { %v9569_v51 = vpop.eup %7863  ;;  %2307 = vst.msk [vmem:[#allocation2 + $0x1b0] sm:$0xff] %vm864_vm3, %v2224_v25  ;;  %v2258_v7 = vsub.f32 %v9390_v61, %v2224_v25  ;;  %v902_v61 = vsel %vm767_vm1, %v9069_v5, 0.0  ;;  %v1776_v5 = vsub.f32 %v9384_v28, %v9563_v4 }
 0x39e   : > { %12831 = vst [vmem:[#allocation22_spill] sm:$0xff] %v9569_v51  ;;  %7397 = vmatmul.msk.f32.gmra.mxu3 %vm767_vm1, %v9569_v51  ;;  %v2450_v63 = vpop.f32.mrf.mxu2  ;;  %v1340_v51 = vmul.f32 1.442695, %v1309_v0  ;;  %v9592_v34 = vpop.eup %7865 }
 0x39f   : > { %2309 = vst.msk [vmem:[#allocation2 + $0x1c0] sm:$0xff] %vm864_vm3, %v9567_v1  ;;  %v9578_v59 = vpop.f32.mrf.mxu0  ;;  %v1513_v6 = vpop.f32.mrf.mxu3 }
 0x3a0   : > { %2499 = vst.msk [vmem:[#allocation4 + $0x180] sm:$0xff] %vm650_vm0, %v2450_v63  ;;  %v2246_v45 = vsel %vm767_vm1, %v9578_v59, -inf  ;;  %7867 = vpow2.f32 %v1340_v51  ;;  %v1755_v51 = vsel %vm767_vm1, %v9537_v54, -inf }
 0x3a1   : > { %1548 = vst.msk [vmem:[#allocation4 + $0xb8] sm:$0xff] %vm650_vm0, %v1513_v6  ;;  %885 = vadd.xlane.f32.xlu2 %v884_v44  ;;  %2247 = vmax.xlane.f32.xlu1 %v2246_v45  ;;  %v1761_v44 = vsel %vm767_vm1, %v9586_v9, -inf  ;;  %v9607_v45 = vpop.f32.mrf.mxu1 }
 0x3a2   : > { %v2218_v39 = vpop.xlane.xlu2 %2217 }
 0x3a3   : > { %v2256_v20 = vsub.f32 %v9360_v60, %v2218_v39  ;;  %2305 = vst.msk [vmem:[#allocation2 + $0x1a0] sm:$0xff] %vm864_vm3, %v2218_v39  ;;  %v2257_v60 = vsub.f32 %v9374_v29, %v2221_v33 }
 0x3a4   : > { %v9590_v63 = vpop.xlane.xlu1 %1747 }
 0x3a5   : > { %v2276_v6 = vmul.f32 1.442695, %v2256_v20  ;;  %1829 = vst.msk [vmem:[#allocation2 + $0x138] sm:$0xff] %vm864_vm3, %v9590_v63  ;;  %v2278_v29 = vmul.f32 1.442695, %v2257_v60  ;;  %v893_v60 = vsel %vm767_vm1, %v9029_v36, 0.0  ;;  %v1775_v36 = vsub.f32 %v9368_v43, %v9527_v13 }
 0x3a6   : > { %7398 = vmatmul.msk.f32.gmra.mxu3 %vm767_vm1, %v9592_v34  ;;  %v2453_v0 = vpop.f32.mrf.mxu2  ;;  %v9613_v33 = vpop.eup %7867 }
 0x3a7   : > { %7869 = vpow2.f32 %v2276_v6  ;;  %2500 = vst.msk [vmem:[#allocation4 + $0x188] sm:$0xff] %vm650_vm0, %v2453_v0  ;;  %v1516_v39 = vpop.f32.mrf.mxu3  ;;  %v1774_v6 = vsub.f32 %v9356_v62, %v9521_v47 }
 0x3a8   : > { %1549 = vst.msk [vmem:[#allocation4 + $0xc0] sm:$0xff] %vm650_vm0, %v1516_v39  ;;  %7871 = vpow2.f32 %v1789_v55  ;;  %v881_v39 = vsel %vm767_vm1, %v8980_v3, 0.0 }
 0x3a9   : > { %1762 = vmax.xlane.f32.xlu2 %v1761_v44  ;;  %1756 = vmax.xlane.f32.xlu1 %v1755_v51  ;;  %7873 = vpow2.f32 %v2278_v29  ;;  %v9629_v62 = vpop.f32.mrf.mxu1  ;;  %v1791_v47 = vmul.f32 1.442695, %v1774_v6  ;;  %v2280_v51 = vmul.f32 1.442695, %v2258_v7  ;;  %v890_v29 = vsel %vm767_vm1, %v9001_v14, 0.0 }
 0x3aa   : > { %v9609_v58 = vpop.xlane.xlu2 %1744  ;;  %v1793_v6 = vmul.f32 1.442695, %v1775_v36 }
 0x3ab   : > { %1828 = vst.msk [vmem:[#allocation2 + $0x130] sm:$0xff] %vm864_vm3, %v9609_v58  ;;  %7875 = vpow2.f32 %v1791_v47  ;;  %v1795_v47 = vmul.f32 1.442695, %v1776_v5  ;;  %v920_v5 = vsel %vm767_vm1, %v9158_v26, 0.0 }
 0x3ac   : > { %7877 = vpow2.f32 %v2280_v51 }
 0x3ad   : > { %v9615_v20 = vpop.eup %7869  ;;  %7879 = vpow2.f32 %v1793_v6 }
 0x3ae   : > { %7399 = vmatmul.msk.f32.gmra.mxu3 %vm767_vm1, %v9613_v33  ;;  %v2456_v0 = vpop.f32.mrf.mxu2  ;;  %7460 = vmatmul.msk.f32.gmra.mxu2 %vm767_vm1, %v9615_v20  ;;  %v9632_v55 = vpop.eup %7871 }
 0x3af   : > { %2501 = vst.msk [vmem:[#allocation4 + $0x190] sm:$0xff] %vm650_vm0, %v2456_v0  ;;  %v9634_v25 = vpop.eup %7873 }
 0x3b1   : > { %894 = vadd.xlane.f32.xlu2 %v893_v60  ;;  %882 = vadd.xlane.f32.xlu1 %v881_v39  ;;  %v9648_v13 = vpop.f32.mrf.mxu1  ;;  %v9650_v7 = vpop.eup %7875  ;;  %v1764_v39 = vsel %vm767_vm1, %v9607_v45, -inf }
 0x3b2   : > { %v2227_v44 = vpop.xlane.xlu2 %2226  ;;  %v9652_v60 = vpop.eup %7877  ;;  %v1770_v14 = vsel %vm767_vm1, %v9648_v13, -inf }
 0x3b3   : > { %2308 = vst.msk [vmem:[#allocation2 + $0x1b8] sm:$0xff] %vm864_vm3, %v2227_v44  ;;  %v2259_v3 = vsub.f32 %v9406_v56, %v2227_v44  ;;  %v2260_v56 = vsub.f32 %v9438_v48, %v9567_v1  ;;  %v9670_v51 = vpop.eup %7879  ;;  %v1777_v1 = vsub.f32 %v9399_v38, %v9533_v57 }
 0x3b5   : > { %v2282_v43 = vmul.f32 1.442695, %v2259_v3  ;;  %v2284_v44 = vmul.f32 1.442695, %v2260_v56  ;;  %v899_v3 = vsel %vm767_vm1, %v9057_v50, 0.0  ;;  %v1778_v50 = vsub.f32 %v9420_v31, %v9549_v46 }
 0x3b6   : > { %7420 = vmatmul.msk.f32.vlgmr.msrb.gmra.mxu3 %vm767_vm1, %v9632_v55  ;;  %7461 = vmatmul.msk.f32.gmra.mxu2 %vm767_vm1, %v9634_v25 }
 0x3b7   : > { %7881 = vpow2.f32 %v2282_v43 }
 0x3b8   : > { %7883 = vpow2.f32 %v1795_v47  ;;  %v1359_v47 = vsel %vm767_vm1, %v9136_v2, 0.0  ;;  %v1780_v2 = vsub.f32 %v9458_v32, %v9590_v63  ;;  %v1377_v63 = vsel %vm767_vm1, %v9393_v42, 0.0 }
 0x3b9   : > { %903 = vadd.xlane.f32.xlu2 %v902_v61  ;;  %891 = vadd.xlane.f32.xlu1 %v890_v29  ;;  %7885 = vpow2.f32 %v2284_v44  ;;  %v911_v61 = vsel %vm767_vm1, %v9098_v30, 0.0  ;;  %v1797_v29 = vmul.f32 1.442695, %v1777_v1  ;;  %v1374_v42 = vsel %vm767_vm1, %v9318_v41, 0.0 }
 0x3ba   : > { %v2233_v0 = vpop.xlane.xlu0 %2232  ;;  %v1767_v41 = vsel %vm767_vm1, %v9629_v62, -inf }
 0x3bb   : > { %2310 = vst.msk [vmem:[#allocation2 + $0x1c8] sm:$0xff] %vm864_vm3, %v2233_v0  ;;  %v2261_v48 = vsub.f32 %v9467_v53, %v2233_v0  ;;  %7887 = vpow2.f32 %v1797_v29  ;;  %v908_v0 = vsel %vm767_vm1, %v9090_v24, 0.0 }
 0x3bd   : > { %v9673_v36 = vpop.eup %7881  ;;  %v2286_v6 = vmul.f32 1.442695, %v2261_v48 }
 0x3be   : > { %7421 = vmatmul.msk.f32.gmra.mxu3 %vm767_vm1, %v9650_v7  ;;  %7462 = vmatmul.msk.f32.gmra.mxu2 %vm767_vm1, %v9652_v60  ;;  %v9689_v43 = vpop.eup %7883 }
 0x3bf   : > { %v9693_v53 = vpop.eup %7885  ;;  %7889 = vpow2.f32 %v2286_v6  ;;  %v887_v6 = vsel %vm767_vm1, %v8997_v10, 0.0  ;;  %v896_v10 = vsel %vm767_vm1, %v9048_v19, 0.0 }
 0x3c1   : > { %1765 = vmax.xlane.f32.xlu1 %v1764_v39  ;;  %1771 = vmax.xlane.f32.xlu2 %v1770_v14  ;;  %v1799_v14 = vmul.f32 1.442695, %v1778_v50  ;;  %v9706_v31 = vpop.eup %7887  ;;  %v1779_v39 = vsub.f32 %v9446_v22, %v9609_v58 }
 0x3c2   : > { %v9666_v28 = vpop.xlane.xlu0 %1750  ;;  %v2236_v4 = vpop.xlane.xlu2 %2235 }
 0x3c3   : > { %1830 = vst.msk [vmem:[#allocation2 + $0x140] sm:$0xff] %vm864_vm3, %v9666_v28  ;;  %v2262_v30 = vsub.f32 %v9474_v16, %v2236_v4  ;;  %7891 = vpow2.f32 %v1799_v14  ;;  %v917_v16 = vsel %vm767_vm1, %v9144_v23, 0.0  ;;  %v1801_v58 = vmul.f32 1.442695, %v1779_v39 }
 0x3c4   : > { %2311 = vst.msk [vmem:[#allocation2 + $0x1d0] sm:$0xff] %vm864_vm3, %v2236_v4  ;;  %v926_v23 = vsel %vm767_vm1, %v9215_v21, 0.0  ;;  %v1781_v21 = vsub.f32 %v9472_v35, %v9666_v28  ;;  %v1386_v28 = vsel %vm767_vm1, %v9495_v52, 0.0  ;;  %v1392_v14 = vsel %vm767_vm1, %v9511_v18, 0.0 }
 0x3c5   : > { %v2288_v56 = vmul.f32 1.442695, %v2262_v30  ;;  %v9708_v46 = vpop.eup %7889  ;;  %v1844_v18 = vsel %vm767_vm1, %v9670_v51, 0.0 }
 0x3c6   : > { %7422 = vmatmul.msk.f32.gmra.mxu3 %vm767_vm1, %v9670_v51  ;;  %7463 = vmatmul.msk.f32.gmra.mxu2 %vm767_vm1, %v9673_v36  ;;  %v1805_v50 = vmul.f32 1.442695, %v1781_v21  ;;  %v1850_v21 = vsel %vm767_vm1, %v9706_v31, 0.0 }
 0x3c7   : > { %7893 = vpow2.f32 %v2288_v56 }
 0x3c8   : > { %7895 = vpow2.f32 %v1801_v58 }
 0x3c9   : > { %900 = vadd.xlane.f32.xlu1 %v899_v3  ;;  %912 = vadd.xlane.f32.xlu2 %v911_v61  ;;  %v9725_v44 = vpop.eup %7891  ;;  %v1758_v3 = vsel %vm767_vm1, %v9552_v27, -inf  ;;  %v1803_v61 = vmul.f32 1.442695, %v1780_v2  ;;  %v12834_v2 = vld [vmem:[#allocation13_spill] sm:$0xff] }
 0x3ca   : > { %v2239_v38 = vpop.xlane.xlu1 %2238  ;;  %v9686_v57 = vpop.xlane.xlu2 %1753  ;;  %v1853_v51 = vsel %vm767_vm1, %v9725_v44, 0.0 }
 0x3cb   : > { %2312 = vst.msk [vmem:[#allocation2 + $0x1d8] sm:$0xff] %vm864_vm3, %v2239_v38  ;;  %v2263_v24 = vsub.f32 %v9485_v11, %v2239_v38  ;;  %v1368_v11 = vsel %vm767_vm1, %v9304_v17, 0.0  ;;  %v1365_v17 = vsel %vm767_vm1, %v9292_v8, 0.0  ;;  %v1782_v8 = vsub.f32 %v9483_v37, %v9686_v57 }
 0x3cc   : > { %1831 = vst.msk [vmem:[#allocation2 + $0x148] sm:$0xff] %vm864_vm3, %v9686_v57  ;;  %v1383_v37 = vsel %vm767_vm1, %v9434_v40, 0.0  ;;  %v1395_v57 = vsel %vm767_vm1, %v9519_v49, 0.0  ;;  %v1404_v40 = vsel %vm767_vm1, %v9613_v33, 0.0  ;;  %v905_v49 = vsel %vm767_vm1, %v9081_v15, 0.0  ;;  %v12832_v33 = vld [vmem:[#allocation11_spill] sm:$0xff] }
 0x3cd   : > { %v2290_v4 = vmul.f32 1.442695, %v2263_v24  ;;  %v9727_v1 = vpop.eup %7893 }
 0x3ce   : > { %7423 = vmatmul.msk.f32.gmra.mxu3 %vm767_vm1, %v9689_v43  ;;  %7464 = vmatmul.msk.f32.gmra.mxu2 %vm767_vm1, %v9693_v53  ;;  %v9742_v29 = vpop.eup %7895 }
 0x3cf   : > { %7897 = vpow2.f32 %v2290_v4 }
 0x3d0   : > { %7899 = vpow2.f32 %v1803_v61 }
 0x3d1   : > { %909 = vadd.xlane.f32.xlu1 %v908_v0  ;;  %921 = vadd.xlane.f32.xlu2 %v920_v5  ;;  %7901 = vpow2.f32 %v1805_v50  ;;  %v1807_v0 = vmul.f32 1.442695, %v1782_v8 }
 0x3d3   : > { %7903 = vpow2.f32 %v1807_v0 }
 0x3d5   : > { %v9744_v32 = vpop.eup %7897 }
 0x3d6   : > { %7424 = vmatmul.msk.f32.gmra.mxu3 %vm767_vm1, %v9706_v31  ;;  %7465 = vmatmul.msk.f32.gmra.mxu2 %vm767_vm1, %v9708_v46  ;;  %v9759_v30 = vpop.eup %7899 }
 0x3d7   : > { %v9717_v26 = vpop.f32.mrf.mxu0  ;;  %v7902_v5 = vpop.eup %7901 }
 0x3d8   : > { %v2249_v22 = vsel %vm767_vm1, %v9717_v26, -inf }
 0x3d9   : > { %918 = vadd.xlane.f32.xlu1 %v917_v16  ;;  %1360 = vadd.xlane.f32.xlu2 %v1359_v47  ;;  %v9780_v19 = vpop.eup %7903  ;;  %v1401_v16 = vsel %vm767_vm1, %v9592_v34, 0.0  ;;  %v914_v47 = vsel %vm767_vm1, %v12832_v33, 0.0  ;;  %v1841_v34 = vsel %vm767_vm1, %v9650_v7, 0.0 }
 0x3da   : > { %2250 = vmax.xlane.f32.xlu0 %v2249_v22  ;;  %v12833_v22 = vld [vmem:[#allocation21_spill] sm:$0xff] }
 0x3de   : > { %7425 = vmatmul.msk.f32.gmra.mxu3 %vm767_vm1, %v9725_v44  ;;  %7466 = vmatmul.msk.f32.gmra.mxu2 %vm767_vm1, %v9727_v1 }
 0x3e0   : > { %v1519_v48 = vpop.f32.mrf.mxu3 }
 0x3e1   : > { %927 = vadd.xlane.f32.xlu1 %v926_v23  ;;  %1369 = vadd.xlane.f32.xlu2 %v1368_v11  ;;  %1550 = vst.msk [vmem:[#allocation4 + $0xc8] sm:$0xff] %vm650_vm0, %v1519_v48  ;;  %v923_v23 = vsel %vm767_vm1, %v12834_v2, 0.0  ;;  %v12842_v2 = vld [vmem:[#allocation22_spill] sm:$0xff] }
 0x3e2   : > { %1759 = vmax.xlane.f32.xlu0 %v1758_v3 }
 0x3e6   : > { %7426 = vmatmul.msk.f32.gmra.mxu3 %vm767_vm1, %v9742_v29  ;;  %7467 = vmatmul.msk.f32.gmra.mxu2 %vm767_vm1, %v9744_v32 }
 0x3e8   : > { %v1522_v38 = vpop.f32.mrf.mxu3 }
 0x3e9   : > { %1366 = vadd.xlane.f32.xlu1 %v1365_v17  ;;  %1378 = vadd.xlane.f32.xlu2 %v1377_v63  ;;  %1551 = vst.msk [vmem:[#allocation4 + $0xd0] sm:$0xff] %vm650_vm0, %v1522_v38  ;;  %v1862_v17 = vsel %vm767_vm1, %v7902_v5, 0.0  ;;  %v12835_v63 = vld [vmem:[#allocation12_spill] sm:$0xff] }
 0x3ea   : > { %888 = vadd.xlane.f32.xlu0 %v887_v6 }
 0x3ee   : > { %7427 = vmatmul.msk.f32.gmra.mxu3 %vm767_vm1, %v9759_v30 }
 0x3f0   : > { %v1525_v35 = vpop.f32.mrf.mxu3 }
 0x3f1   : > { %1375 = vadd.xlane.f32.xlu1 %v1374_v42  ;;  %1552 = vst.msk [vmem:[#allocation4 + $0xd8] sm:$0xff] %vm650_vm0, %v1525_v35  ;;  %1387 = vadd.xlane.f32.xlu2 %v1386_v28  ;;  %v1859_v42 = vsel %vm767_vm1, %v9759_v30, 0.0  ;;  %v12836_v35 = vld [vmem:[#allocation17_spill] sm:$0xff] }
 0x3f2   : > { %897 = vadd.xlane.f32.xlu0 %v896_v10  ;;  %v2320_v28 = vsel %vm767_vm1, %v12836_v35, 0.0 }
 0x3f6   : > { %7428 = vmatmul.msk.f32.gmra.mxu3 %vm767_vm1, %v7902_v5 }
 0x3f8   : > { %v1528_v52 = vpop.f32.mrf.mxu3 }
 0x3f9   : > { %1384 = vadd.xlane.f32.xlu1 %v1383_v37  ;;  %1553 = vst.msk [vmem:[#allocation4 + $0xe0] sm:$0xff] %vm650_vm0, %v1528_v52  ;;  %1396 = vadd.xlane.f32.xlu2 %v1395_v57  ;;  %v12838_v52 = vld [vmem:[#allocation16_spill] sm:$0xff] }
 0x3fa   : > { %1768 = vmax.xlane.f32.xlu0 %v1767_v41  ;;  %v1380_v57 = vsel %vm767_vm1, %v12838_v52, 0.0 }
 0x3fe   : > { %7429 = vmatmul.msk.f32.gmra.mxu3 %vm767_vm1, %v9780_v19 }
 0x401   : > { %1393 = vadd.xlane.f32.xlu1 %v1392_v14  ;;  %1405 = vadd.xlane.f32.xlu2 %v1404_v40 }
 0x402   : > { %906 = vadd.xlane.f32.xlu0 %v905_v49 }
 0x403   : > { %v2242_v56 = vpop.xlane.xlu0 %2241 }
 0x404   : > { %v2264_v39 = vsub.f32 %v9539_v12, %v2242_v56  ;;  %2313 = vst.msk [vmem:[#allocation2 + $0x1e0] sm:$0xff] %vm864_vm3, %v2242_v56  ;;  %v12839_v56 = vld [vmem:[#allocation15_spill] sm:$0xff] }
 0x406   : > { %v2292_v24 = vmul.f32 1.442695, %v2264_v39  ;;  %v2317_v39 = vsel %vm767_vm1, %v12839_v56, 0.0 }
 0x408   : > { %7905 = vpow2.f32 %v2292_v24  ;;  %v12840_v24 = vld [vmem:[#allocation19_spill] sm:$0xff] }
 0x409   : > { %1402 = vadd.xlane.f32.xlu1 %v1401_v16  ;;  %1845 = vadd.xlane.f32.xlu2 %v1844_v18  ;;  %v1389_v16 = vsel %vm767_vm1, %v12840_v24, 0.0 }
 0x40a   : > { %915 = vadd.xlane.f32.xlu0 %v914_v47 }
 0x40c   : > { %v2245_v15 = vpop.xlane.xlu2 %2244 }
 0x40d   : > { %v2265_v58 = vsub.f32 %v12833_v22, %v2245_v15  ;;  %2314 = vst.msk [vmem:[#allocation2 + $0x1e8] sm:$0xff] %vm864_vm3, %v2245_v15 }
 0x40e   : > { %v9800_v12 = vpop.eup %7905 }
 0x40f   : > { %v2294_v4 = vmul.f32 1.442695, %v2265_v58  ;;  %7468 = vmatmul.msk.f32.gmra.mxu2 %vm767_vm1, %v9800_v12 }
 0x411   : > { %7907 = vpow2.f32 %v2294_v4  ;;  %1842 = vadd.xlane.f32.xlu1 %v1841_v34  ;;  %1854 = vadd.xlane.f32.xlu2 %v1853_v51  ;;  %v12841_v4 = vld [vmem:[#allocation20_spill] sm:$0xff] }
 0x412   : > { %924 = vadd.xlane.f32.xlu0 %v923_v23  ;;  %v2326_v34 = vsel %vm767_vm1, %v12841_v4, 0.0  ;;  %v1398_v23 = vsel %vm767_vm1, %v12842_v2, 0.0 }
 0x413   : > { %v2459_v11 = vpop.f32.mrf.mxu2 }
 0x414   : > { %2502 = vst.msk [vmem:[#allocation4 + $0x198] sm:$0xff] %vm650_vm0, %v2459_v11  ;;  %v2248_v48 = vpop.xlane.xlu1 %2247  ;;  %v886_v3 = vpop.xlane.xlu2 %885 }
 0x415   : > { %v2266_v61 = vsub.f32 %v9578_v59, %v2248_v48  ;;  %2315 = vst.msk [vmem:[#allocation2 + $0x1f0] sm:$0xff] %vm864_vm3, %v2248_v48  ;;  %v1362_v59 = vsel %vm767_vm1, %v12835_v63, 0.0 }
 0x416   : > { %930 = vst.msk [vmem:[#allocation3 + $0x8] sm:$0xff] %vm864_vm3, %v886_v3 }
 0x417   : > { %v9814_v7 = vpop.eup %7907  ;;  %v2296_v44 = vmul.f32 1.442695, %v2266_v61 }
 0x418   : > { %7469 = vmatmul.msk.f32.gmra.mxu2 %vm767_vm1, %v9814_v7 }
 0x419   : > { %7909 = vpow2.f32 %v2296_v44  ;;  %1851 = vadd.xlane.f32.xlu1 %v1850_v21  ;;  %1863 = vadd.xlane.f32.xlu2 %v1862_v17  ;;  %v1838_v21 = vsel %vm767_vm1, %v9632_v55, 0.0  ;;  %v1847_v55 = vsel %vm767_vm1, %v9689_v43, 0.0  ;;  %v2344_v43 = vsel %vm767_vm1, %v9708_v46, 0.0 }
 0x41a   : > { %1363 = vadd.xlane.f32.xlu0 %v1362_v59 }
 0x41c   : > { %v1757_v38 = vpop.xlane.xlu1 %1756  ;;  %v9823_v6 = vpop.xlane.xlu2 %1762 }
 0x41d   : > { %v1783_v50 = vsub.f32 %v9537_v54, %v1757_v38  ;;  %1832 = vst.msk [vmem:[#allocation2 + $0x150] sm:$0xff] %vm864_vm3, %v1757_v38  ;;  %v12837_v54 = vld [vmem:[#allocation14_spill] sm:$0xff]  ;;  %v2335_v38 = vsel %vm767_vm1, %v9652_v60, 0.0 }
 0x41e   : > { %1834 = vst.msk [vmem:[#allocation2 + $0x160] sm:$0xff] %vm864_vm3, %v9823_v6  ;;  %v1371_v10 = vsel %vm767_vm1, %v12837_v54, 0.0 }
 0x41f   : > { %v9829_v31 = vpop.eup %7909  ;;  %v1809_v8 = vmul.f32 1.442695, %v1783_v50 }
 0x420   : > { %7470 = vmatmul.msk.f32.gmra.mxu2 %vm767_vm1, %v9829_v31 }
 0x421   : > { %7911 = vpow2.f32 %v1809_v8  ;;  %1860 = vadd.xlane.f32.xlu1 %v1859_v42  ;;  %2321 = vadd.xlane.f32.xlu2 %v2320_v28  ;;  %v1531_v0 = vpop.f32.mrf.mxu3 }
 0x422   : > { %1372 = vadd.xlane.f32.xlu0 %v1371_v10  ;;  %1554 = vst.msk [vmem:[#allocation4 + $0xe8] sm:$0xff] %vm650_vm0, %v1531_v0  ;;  %v1856_v0 = vsel %vm767_vm1, %v9742_v29, 0.0  ;;  %v1785_v29 = vsub.f32 %v9586_v9, %v9823_v6 }
 0x424   : > { %v883_v5 = vpop.xlane.xlu1 %882  ;;  %v895_v41 = vpop.xlane.xlu2 %894 }
 0x425   : > { %929 = vst.msk [vmem:[#allocation3] sm:$0xff] %vm864_vm3, %v883_v5 }
 0x426   : > { %933 = vst.msk [vmem:[#allocation3 + $0x20] sm:$0xff] %vm864_vm3, %v895_v41 }
 0x427   : > { %v7912_v30 = vpop.eup %7911 }
 0x428   : > { %7430 = vmatmul.msk.f32.gmra.mxu3 %vm767_vm1, %v7912_v30  ;;  %v1868_v37 = vsel %vm767_vm1, %v7912_v30, 0.0 }
 0x429   : > { %1869 = vadd.xlane.f32.xlu1 %v1868_v37  ;;  %v1534_v14 = vpop.f32.mrf.mxu3 }
 0x42a   : > { %1381 = vadd.xlane.f32.xlu0 %v1380_v57  ;;  %1555 = vst.msk [vmem:[#allocation4 + $0xf0] sm:$0xff] %vm650_vm0, %v1534_v14  ;;  %v2353_v57 = vsel %vm767_vm1, %v9800_v12, 0.0 }
 0x42c   : > { %v892_v40 = vpop.xlane.xlu1 %891  ;;  %v904_v49 = vpop.xlane.xlu2 %903 }
 0x42d   : > { %932 = vst.msk [vmem:[#allocation3 + $0x18] sm:$0xff] %vm864_vm3, %v892_v40 }
 0x42e   : > { %936 = vst.msk [vmem:[#allocation3 + $0x38] sm:$0xff] %vm864_vm3, %v904_v49  ;;  %v1865_v49 = vsel %vm767_vm1, %v9780_v19, 0.0 }
 0x431   : > { %2318 = vadd.xlane.f32.xlu1 %v2317_v39  ;;  %v1537_v18 = vpop.f32.mrf.mxu3  ;;  %v2462_v33 = vpop.f32.mrf.mxu2 }
 0x432   : > { %1390 = vadd.xlane.f32.xlu0 %v1389_v16  ;;  %1556 = vst.msk [vmem:[#allocation4 + $0xf8] sm:$0xff] %vm650_vm0, %v1537_v18  ;;  %v12843_v18 = vld [vmem:[#allocation18_spill] sm:$0xff] }
 0x433   : > { %2503 = vst.msk [vmem:[#allocation4 + $0x1a0] sm:$0xff] %vm650_vm0, %v2462_v33  ;;  %v2323_v33 = vsel %vm767_vm1, %v12843_v18, 0.0 }
 0x434   : > { %v1766_v47 = vpop.xlane.xlu1 %1765  ;;  %v9855_v15 = vpop.xlane.xlu2 %1771 }
 0x435   : > { %v1786_v22 = vsub.f32 %v9607_v45, %v1766_v47  ;;  %1835 = vst.msk [vmem:[#allocation2 + $0x168] sm:$0xff] %vm864_vm3, %v1766_v47 }
 0x436   : > { %1837 = vst.msk [vmem:[#allocation2 + $0x178] sm:$0xff] %vm864_vm3, %v9855_v15 }
 0x437   : > { %v1815_v58 = vmul.f32 1.442695, %v1786_v22 }
 0x439   : > { %7913 = vpow2.f32 %v1815_v58  ;;  %2327 = vadd.xlane.f32.xlu1 %v2326_v34  ;;  %v1971_v51 = vpop.f32.mrf.mxu3  ;;  %v2465_v11 = vpop.f32.mrf.mxu2  ;;  %v2329_v34 = vsel %vm767_vm1, %v9615_v20, 0.0  ;;  %v1788_v20 = vsub.f32 %v9648_v13, %v9855_v15 }
 0x43a   : > { %2020 = vst.msk [vmem:[#allocation4 + $0x100] sm:$0xff] %vm650_vm0, %v1971_v51  ;;  %1399 = vadd.xlane.f32.xlu0 %v1398_v23 }
 0x43b   : > { %2504 = vst.msk [vmem:[#allocation4 + $0x1a8] sm:$0xff] %vm650_vm0, %v2465_v11 }
 0x43c   : > { %v901_v45 = vpop.xlane.xlu1 %900  ;;  %v913_v48 = vpop.xlane.xlu2 %912 }
 0x43d   : > { %935 = vst.msk [vmem:[#allocation3 + $0x30] sm:$0xff] %vm864_vm3, %v901_v45 }
 0x43e   : > { %939 = vst.msk [vmem:[#allocation3 + $0x50] sm:$0xff] %vm864_vm3, %v913_v48 }
 0x43f   : > { %v9869_v3 = vpop.eup %7913 }
 0x440   : > { %v1877_v61 = vsel %vm767_vm1, %v9869_v3, 0.0 }
 0x441   : > { %1878 = vadd.xlane.f32.xlu1 %v1877_v61  ;;  %v1974_v44 = vpop.f32.mrf.mxu3  ;;  %v2468_v17 = vpop.f32.mrf.mxu2 }
 0x442   : > { %2021 = vst.msk [vmem:[#allocation4 + $0x108] sm:$0xff] %vm650_vm0, %v1974_v44  ;;  %1839 = vadd.xlane.f32.xlu0 %v1838_v21 }
 0x443   : > { %2505 = vst.msk [vmem:[#allocation4 + $0x1b0] sm:$0xff] %vm650_vm0, %v2468_v17  ;;  %v2338_v17 = vsel %vm767_vm1, %v9673_v36, 0.0 }
 0x444   : > { %v910_v63 = vpop.xlane.xlu1 %909  ;;  %v922_v59 = vpop.xlane.xlu2 %921 }
 0x445   : > { %938 = vst.msk [vmem:[#allocation3 + $0x48] sm:$0xff] %vm864_vm3, %v910_v63  ;;  %v2332_v63 = vsel %vm767_vm1, %v9634_v25, 0.0 }
 0x446   : > { %942 = vst.msk [vmem:[#allocation3 + $0x68] sm:$0xff] %vm864_vm3, %v922_v59 }
 0x449   : > { %2336 = vadd.xlane.f32.xlu1 %v2335_v38  ;;  %v1977_v50 = vpop.f32.mrf.mxu3  ;;  %v2471_v8 = vpop.f32.mrf.mxu2 }
 0x44a   : > { %2022 = vst.msk [vmem:[#allocation4 + $0x110] sm:$0xff] %vm650_vm0, %v1977_v50  ;;  %1848 = vadd.xlane.f32.xlu0 %v1847_v55 }
 0x44b   : > { %2506 = vst.msk [vmem:[#allocation4 + $0x1b8] sm:$0xff] %vm650_vm0, %v2471_v8 }
 0x44c   : > { %v919_v42 = vpop.xlane.xlu1 %918  ;;  %v1361_v35 = vpop.xlane.xlu2 %1360 }
 0x44d   : > { %941 = vst.msk [vmem:[#allocation3 + $0x60] sm:$0xff] %vm864_vm3, %v919_v42  ;;  %v2251_v28 = vpop.xlane.xlu0 %2250 }
 0x44e   : > { %1408 = vst.msk [vmem:[#allocation3 + $0x80] sm:$0xff] %vm864_vm3, %v1361_v35  ;;  %v2267_v60 = vsub.f32 %v9717_v26, %v2251_v28  ;;  %v2347_v35 = vsel %vm767_vm1, %v9727_v1, 0.0  ;;  %v2350_v1 = vsel %vm767_vm1, %v9744_v32, 0.0 }
 0x44f   : > { %2316 = vst.msk [vmem:[#allocation2 + $0x1f8] sm:$0xff] %vm864_vm3, %v2251_v28 }
 0x450   : > { %v2298_v54 = vmul.f32 1.442695, %v2267_v60 }
 0x451   : > { %2345 = vadd.xlane.f32.xlu1 %v2344_v43  ;;  %v1980_v10 = vpop.f32.mrf.mxu3  ;;  %v2474_v5 = vpop.f32.mrf.mxu2 }
 0x452   : > { %7915 = vpow2.f32 %v2298_v54  ;;  %2023 = vst.msk [vmem:[#allocation4 + $0x118] sm:$0xff] %vm650_vm0, %v1980_v10  ;;  %1857 = vadd.xlane.f32.xlu0 %v1856_v0  ;;  %v2356_v10 = vsel %vm767_vm1, %v9814_v7, 0.0 }
 0x453   : > { %2507 = vst.msk [vmem:[#allocation4 + $0x1c0] sm:$0xff] %vm650_vm0, %v2474_v5 }
 0x454   : > { %v928_v41 = vpop.xlane.xlu1 %927  ;;  %v1370_v26 = vpop.xlane.xlu2 %1369 }
 0x455   : > { %944 = vst.msk [vmem:[#allocation3 + $0x78] sm:$0xff] %vm864_vm3, %v928_v41  ;;  %v1760_v30 = vpop.xlane.xlu0 %1759 }
 0x456   : > { %1411 = vst.msk [vmem:[#allocation3 + $0x98] sm:$0xff] %vm864_vm3, %v1370_v26  ;;  %v1784_v46 = vsub.f32 %v9552_v27, %v1760_v30  ;;  %v1813_v27 = vmul.f32 1.442695, %v1785_v29  ;;  %v2359_v26 = vsel %vm767_vm1, %v9829_v31, 0.0 }
 0x457   : > { %1833 = vst.msk [vmem:[#allocation2 + $0x158] sm:$0xff] %vm864_vm3, %v1760_v30 }
 0x458   : > { %v7916_v37 = vpop.eup %7915  ;;  %v1811_v52 = vmul.f32 1.442695, %v1784_v46 }
 0x459   : > { %2354 = vadd.xlane.f32.xlu1 %v2353_v57  ;;  %7471 = vmatmul.msk.f32.gmra.mxu2 %vm767_vm1, %v7916_v37  ;;  %v1983_v14 = vpop.f32.mrf.mxu3  ;;  %v2477_v40 = vpop.f32.mrf.mxu2  ;;  %v2362_v19 = vsel %vm767_vm1, %v7916_v37, 0.0 }
 0x45a   : > { %7917 = vpow2.f32 %v1811_v52  ;;  %2024 = vst.msk [vmem:[#allocation4 + $0x120] sm:$0xff] %vm650_vm0, %v1983_v14  ;;  %1866 = vadd.xlane.f32.xlu0 %v1865_v49 }
 0x45b   : > { %2508 = vst.msk [vmem:[#allocation4 + $0x1c8] sm:$0xff] %vm650_vm0, %v2477_v40  ;;  %7919 = vpow2.f32 %v1813_v27 }
 0x45c   : > { %v1367_v9 = vpop.xlane.xlu1 %1366  ;;  %v1379_v6 = vpop.xlane.xlu2 %1378 }
 0x45d   : > { %1410 = vst.msk [vmem:[#allocation3 + $0x90] sm:$0xff] %vm864_vm3, %v1367_v9  ;;  %v889_v12 = vpop.xlane.xlu0 %888 }
 0x45e   : > { %1414 = vst.msk [vmem:[#allocation3 + $0xb0] sm:$0xff] %vm864_vm3, %v1379_v6 }
 0x45f   : > { %931 = vst.msk [vmem:[#allocation3 + $0x10] sm:$0xff] %vm864_vm3, %v889_v12 }
 0x460   : > { %v7918_v56 = vpop.eup %7917 }
 0x461   : > { %2363 = vadd.xlane.f32.xlu1 %v2362_v19  ;;  %7431 = vmatmul.msk.f32.gmra.mxu3 %vm767_vm1, %v7918_v56  ;;  %v1871_v39 = vsel %vm767_vm1, %v7918_v56, 0.0  ;;  %v1986_v24 = vpop.f32.mrf.mxu3  ;;  %v2480_v16 = vpop.f32.mrf.mxu2 }
 0x462   : > { %1872 = vadd.xlane.f32.xlu2 %v1871_v39  ;;  %2025 = vst.msk [vmem:[#allocation4 + $0x128] sm:$0xff] %vm650_vm0, %v1986_v24  ;;  %2324 = vadd.xlane.f32.xlu0 %v2323_v33  ;;  %v7920_v4 = vpop.eup %7919 }
 0x463   : > { %2509 = vst.msk [vmem:[#allocation4 + $0x1d0] sm:$0xff] %vm650_vm0, %v2480_v16  ;;  %v1874_v23 = vsel %vm767_vm1, %v7920_v4, 0.0 }
 0x464   : > { %v1376_v47 = vpop.xlane.xlu1 %1375  ;;  %v1388_v22 = vpop.xlane.xlu2 %1387 }
 0x465   : > { %1413 = vst.msk [vmem:[#allocation3 + $0xa8] sm:$0xff] %vm864_vm3, %v1376_v47  ;;  %v898_v58 = vpop.xlane.xlu0 %897 }
 0x466   : > { %1417 = vst.msk [vmem:[#allocation3 + $0xc8] sm:$0xff] %vm864_vm3, %v1388_v22 }
 0x467   : > { %934 = vst.msk [vmem:[#allocation3 + $0x28] sm:$0xff] %vm864_vm3, %v898_v58 }
 0x469   : > { %7432 = vmatmul.msk.f32.gmra.mxu3 %vm767_vm1, %v7920_v4  ;;  %v1989_v51 = vpop.f32.mrf.mxu3  ;;  %v2483_v2 = vpop.f32.mrf.mxu2 }
 0x46a   : > { %2330 = vadd.xlane.f32.xlu2 %v2329_v34  ;;  %2026 = vst.msk [vmem:[#allocation4 + $0x130] sm:$0xff] %vm650_vm0, %v1989_v51  ;;  %1875 = vadd.xlane.f32.xlu0 %v1874_v23 }
 0x46b   : > { %2510 = vst.msk [vmem:[#allocation4 + $0x1d8] sm:$0xff] %vm650_vm0, %v2483_v2 }
 0x46c   : > { %v1385_v11 = vpop.xlane.xlu1 %1384  ;;  %v1397_v45 = vpop.xlane.xlu2 %1396 }
 0x46d   : > { %1416 = vst.msk [vmem:[#allocation3 + $0xc0] sm:$0xff] %vm864_vm3, %v1385_v11  ;;  %v1769_v48 = vpop.xlane.xlu0 %1768 }
 0x46e   : > { %1420 = vst.msk [vmem:[#allocation3 + $0xe0] sm:$0xff] %vm864_vm3, %v1397_v45  ;;  %v1787_v61 = vsub.f32 %v9629_v62, %v1769_v48  ;;  %v1819_v62 = vmul.f32 1.442695, %v1788_v20 }
 0x46f   : > { %1836 = vst.msk [vmem:[#allocation2 + $0x170] sm:$0xff] %vm864_vm3, %v1769_v48 }
 0x470   : > { %v1817_v44 = vmul.f32 1.442695, %v1787_v61 }
 0x471   : > { %7433 = vmatmul.msk.f32.gmra.mxu3 %vm767_vm1, %v9869_v3  ;;  %v1992_v21 = vpop.f32.mrf.mxu3  ;;  %v2341_v3 = vsel %vm767_vm1, %v9693_v53, 0.0 }
 0x472   : > { %7921 = vpow2.f32 %v1817_v44  ;;  %2027 = vst.msk [vmem:[#allocation4 + $0x138] sm:$0xff] %vm650_vm0, %v1992_v21  ;;  %2339 = vadd.xlane.f32.xlu2 %v2338_v17  ;;  %2333 = vadd.xlane.f32.xlu0 %v2332_v63 }
 0x473   : > { %7923 = vpow2.f32 %v1819_v62 }
 0x474   : > { %v1394_v59 = vpop.xlane.xlu1 %1393  ;;  %v1406_v38 = vpop.xlane.xlu2 %1405 }
 0x475   : > { %1419 = vst.msk [vmem:[#allocation3 + $0xd8] sm:$0xff] %vm864_vm3, %v1394_v59  ;;  %v907_v13 = vpop.xlane.xlu0 %906 }
 0x476   : > { %1423 = vst.msk [vmem:[#allocation3 + $0xf8] sm:$0xff] %vm864_vm3, %v1406_v38 }
 0x477   : > { %937 = vst.msk [vmem:[#allocation3 + $0x40] sm:$0xff] %vm864_vm3, %v907_v13 }
 0x478   : > { %v7922_v15 = vpop.eup %7921 }
 0x479   : > { %7434 = vmatmul.msk.f32.gmra.mxu3 %vm767_vm1, %v7922_v15  ;;  %v1995_v25 = vpop.f32.mrf.mxu3  ;;  %v1880_v36 = vsel %vm767_vm1, %v7922_v15, 0.0  ;;  %v7924_v42 = vpop.eup %7923 }
 0x47a   : > { %2028 = vst.msk [vmem:[#allocation4 + $0x140] sm:$0xff] %vm650_vm0, %v1995_v25  ;;  %1881 = vadd.xlane.f32.xlu2 %v1880_v36  ;;  %2342 = vadd.xlane.f32.xlu0 %v2341_v3  ;;  %v1883_v28 = vsel %vm767_vm1, %v7924_v42, 0.0 }
 0x47c   : > { %v1403_v50 = vpop.xlane.xlu1 %1402  ;;  %v1846_v55 = vpop.xlane.xlu2 %1845 }
 0x47d   : > { %1422 = vst.msk [vmem:[#allocation3 + $0xf0] sm:$0xff] %vm864_vm3, %v1403_v50  ;;  %v916_v8 = vpop.xlane.xlu0 %915 }
 0x47e   : > { %1889 = vst.msk [vmem:[#allocation3 + $0x110] sm:$0xff] %vm864_vm3, %v1846_v55 }
 0x47f   : > { %940 = vst.msk [vmem:[#allocation3 + $0x58] sm:$0xff] %vm864_vm3, %v916_v8 }
 0x481   : > { %7435 = vmatmul.msk.f32.gmra.mxu3 %vm767_vm1, %v7924_v42  ;;  %v1998_v53 = vpop.f32.mrf.mxu3 }
 0x482   : > { %2348 = vadd.xlane.f32.xlu2 %v2347_v35  ;;  %2029 = vst.msk [vmem:[#allocation4 + $0x148] sm:$0xff] %vm650_vm0, %v1998_v53  ;;  %1884 = vadd.xlane.f32.xlu0 %v1883_v28 }
 0x484   : > { %v1843_v60 = vpop.xlane.xlu1 %1842  ;;  %v1855_v54 = vpop.xlane.xlu2 %1854 }
 0x485   : > { %1888 = vst.msk [vmem:[#allocation3 + $0x108] sm:$0xff] %vm864_vm3, %v1843_v60  ;;  %v925_v43 = vpop.xlane.xlu0 %924 }
 0x486   : > { %1892 = vst.msk [vmem:[#allocation3 + $0x128] sm:$0xff] %vm864_vm3, %v1855_v54 }
 0x487   : > { %943 = vst.msk [vmem:[#allocation3 + $0x70] sm:$0xff] %vm864_vm3, %v925_v43 }
 0x48a   : > { %2357 = vadd.xlane.f32.xlu2 %v2356_v10  ;;  %2351 = vadd.xlane.f32.xlu0 %v2350_v1 }
 0x48c   : > { %v1852_v0 = vpop.xlane.xlu1 %1851  ;;  %v1864_v5 = vpop.xlane.xlu2 %1863 }
 0x48d   : > { %1891 = vst.msk [vmem:[#allocation3 + $0x120] sm:$0xff] %vm864_vm3, %v1852_v0  ;;  %v1364_v41 = vpop.xlane.xlu0 %1363 }
 0x48e   : > { %1895 = vst.msk [vmem:[#allocation3 + $0x140] sm:$0xff] %vm864_vm3, %v1864_v5 }
 0x48f   : > { %1409 = vst.msk [vmem:[#allocation3 + $0x88] sm:$0xff] %vm864_vm3, %v1364_v41 }
 0x492   : > { %2360 = vadd.xlane.f32.xlu0 %v2359_v26  ;;  %v2486_v30 = vpop.f32.mrf.mxu2 }
 0x493   : > { %2511 = vst.msk [vmem:[#allocation4 + $0x1e0] sm:$0xff] %vm650_vm0, %v2486_v30 }
 0x494   : > { %v1861_v7 = vpop.xlane.xlu1 %1860  ;;  %v2322_v32 = vpop.xlane.xlu2 %2321 }
 0x495   : > { %1894 = vst.msk [vmem:[#allocation3 + $0x138] sm:$0xff] %vm864_vm3, %v1861_v7  ;;  %v1373_v46 = vpop.xlane.xlu0 %1372 }
 0x496   : > { %2367 = vst.msk [vmem:[#allocation3 + $0x188] sm:$0xff] %vm864_vm3, %v2322_v32 }
 0x497   : > { %1412 = vst.msk [vmem:[#allocation3 + $0xa0] sm:$0xff] %vm864_vm3, %v1373_v46 }
 0x49b   : > { %v2489_v37 = vpop.f32.mrf.mxu2 }
 0x49c   : > { %2512 = vst.msk [vmem:[#allocation4 + $0x1e8] sm:$0xff] %vm650_vm0, %v2489_v37  ;;  %v1870_v29 = vpop.xlane.xlu1 %1869 }
 0x49d   : > { %1897 = vst.msk [vmem:[#allocation3 + $0x150] sm:$0xff] %vm864_vm3, %v1870_v29  ;;  %v1382_v31 = vpop.xlane.xlu0 %1381 }
 0x49e   : > { %1415 = vst.msk [vmem:[#allocation3 + $0xb8] sm:$0xff] %vm864_vm3, %v1382_v31 }
 0x4a3   : > { %v2492_v52 = vpop.f32.mrf.mxu2 }
 0x4a4   : > { %2513 = vst.msk [vmem:[#allocation4 + $0x1f0] sm:$0xff] %vm650_vm0, %v2492_v52  ;;  %v2319_v57 = vpop.xlane.xlu1 %2318 }
 0x4a5   : > { %2366 = vst.msk [vmem:[#allocation3 + $0x180] sm:$0xff] %vm864_vm3, %v2319_v57  ;;  %v1391_v14 = vpop.xlane.xlu0 %1390 }
 0x4a6   : > { %1418 = vst.msk [vmem:[#allocation3 + $0xd0] sm:$0xff] %vm864_vm3, %v1391_v14 }
 0x4ab   : > { %v2001_v40 = vpop.f32.mrf.mxu3 }
 0x4ac   : > { %2030 = vst.msk [vmem:[#allocation4 + $0x150] sm:$0xff] %vm650_vm0, %v2001_v40  ;;  %v2328_v49 = vpop.xlane.xlu1 %2327 }
 0x4ad   : > { %2369 = vst.msk [vmem:[#allocation3 + $0x198] sm:$0xff] %vm864_vm3, %v2328_v49  ;;  %v1400_v27 = vpop.xlane.xlu0 %1399 }
 0x4ae   : > { %1421 = vst.msk [vmem:[#allocation3 + $0xe8] sm:$0xff] %vm864_vm3, %v1400_v27 }
 0x4b4   : > { %v1879_v9 = vpop.xlane.xlu1 %1878 }
 0x4b5   : > { %1900 = vst.msk [vmem:[#allocation3 + $0x168] sm:$0xff] %vm864_vm3, %v1879_v9  ;;  %v1840_v6 = vpop.xlane.xlu0 %1839 }
 0x4b6   : > { %1887 = vst.msk [vmem:[#allocation3 + $0x100] sm:$0xff] %vm864_vm3, %v1840_v6 }
 0x4bc   : > { %v2337_v12 = vpop.xlane.xlu1 %2336 }
 0x4bd   : > { %2372 = vst.msk [vmem:[#allocation3 + $0x1b0] sm:$0xff] %vm864_vm3, %v2337_v12  ;;  %v1849_v56 = vpop.xlane.xlu0 %1848 }
 0x4be   : > { %1890 = vst.msk [vmem:[#allocation3 + $0x118] sm:$0xff] %vm864_vm3, %v1849_v56 }
 0x4c4   : > { %v2346_v19 = vpop.xlane.xlu1 %2345 }
 0x4c5   : > { %2375 = vst.msk [vmem:[#allocation3 + $0x1c8] sm:$0xff] %vm864_vm3, %v2346_v19  ;;  %v1858_v39 = vpop.xlane.xlu0 %1857 }
 0x4c6   : > { %1893 = vst.msk [vmem:[#allocation3 + $0x130] sm:$0xff] %vm864_vm3, %v1858_v39 }
 0x4cc   : > { %v2355_v24 = vpop.xlane.xlu1 %2354 }
 0x4cd   : > { %2378 = vst.msk [vmem:[#allocation3 + $0x1e0] sm:$0xff] %vm864_vm3, %v2355_v24  ;;  %v1867_v16 = vpop.xlane.xlu0 %1866 }
 0x4ce   : > { %1896 = vst.msk [vmem:[#allocation3 + $0x148] sm:$0xff] %vm864_vm3, %v1867_v16 }
 0x4d4   : > { %v2364_v18 = vpop.xlane.xlu1 %2363 }
 0x4d5   : > { %2381 = vst.msk [vmem:[#allocation3 + $0x1f8] sm:$0xff] %vm864_vm3, %v2364_v18  ;;  %v2325_v33 = vpop.xlane.xlu0 %2324  ;;  %v1873_v47 = vpop.xlane.xlu2 %1872 }
 0x4d6   : > { %2368 = vst.msk [vmem:[#allocation3 + $0x190] sm:$0xff] %vm864_vm3, %v2325_v33 }
 0x4d7   : > { %1898 = vst.msk [vmem:[#allocation3 + $0x158] sm:$0xff] %vm864_vm3, %v1873_v47 }
 0x4dc   : > { %v2495_v22 = vpop.f32.mrf.mxu2 }
 0x4dd   : > { %2514 = vst.msk [vmem:[#allocation4 + $0x1f8] sm:$0xff] %vm650_vm0, %v2495_v22  ;;  %v1876_v58 = vpop.xlane.xlu0 %1875  ;;  %v2331_v4 = vpop.xlane.xlu2 %2330 }
 0x4de   : > { %1899 = vst.msk [vmem:[#allocation3 + $0x160] sm:$0xff] %vm864_vm3, %v1876_v58 }
 0x4df   : > { %2370 = vst.msk [vmem:[#allocation3 + $0x1a0] sm:$0xff] %vm864_vm3, %v2331_v4 }
 0x4e4   : > { %v2004_v34 = vpop.f32.mrf.mxu3 }
 0x4e5   : > { %2031 = vst.msk [vmem:[#allocation4 + $0x158] sm:$0xff] %vm650_vm0, %v2004_v34  ;;  %v2334_v51 = vpop.xlane.xlu0 %2333  ;;  %v2340_v2 = vpop.xlane.xlu2 %2339 }
 0x4e6   : > { %2371 = vst.msk [vmem:[#allocation3 + $0x1a8] sm:$0xff] %vm864_vm3, %v2334_v51 }
 0x4e7   : > { %2373 = vst.msk [vmem:[#allocation3 + $0x1b8] sm:$0xff] %vm864_vm3, %v2340_v2 }
 0x4ec   : > { %v2007_v23 = vpop.f32.mrf.mxu3 }
 0x4ed   : > { %2032 = vst.msk [vmem:[#allocation4 + $0x160] sm:$0xff] %vm650_vm0, %v2007_v23  ;;  %v2343_v11 = vpop.xlane.xlu0 %2342  ;;  %v1882_v45 = vpop.xlane.xlu2 %1881 }
 0x4ee   : > { %2374 = vst.msk [vmem:[#allocation3 + $0x1c0] sm:$0xff] %vm864_vm3, %v2343_v11 }
 0x4ef   : > { %1901 = vst.msk [vmem:[#allocation3 + $0x170] sm:$0xff] %vm864_vm3, %v1882_v45 }
 0x4f4   : > { %v2010_v48 = vpop.f32.mrf.mxu3 }
 0x4f5   : > { %2033 = vst.msk [vmem:[#allocation4 + $0x168] sm:$0xff] %vm650_vm0, %v2010_v48  ;;  %v1885_v61 = vpop.xlane.xlu0 %1884  ;;  %v2349_v20 = vpop.xlane.xlu2 %2348 }
 0x4f6   : > { %1902 = vst.msk [vmem:[#allocation3 + $0x178] sm:$0xff] %vm864_vm3, %v1885_v61 }
 0x4f7   : > { %2376 = vst.msk [vmem:[#allocation3 + $0x1d0] sm:$0xff] %vm864_vm3, %v2349_v20 }
 0x4fc   : > { %v2013_v44 = vpop.f32.mrf.mxu3 }
 0x4fd   : > { %2034 = vst.msk [vmem:[#allocation4 + $0x170] sm:$0xff] %vm650_vm0, %v2013_v44  ;;  %v2352_v21 = vpop.xlane.xlu0 %2351  ;;  %v2358_v17 = vpop.xlane.xlu2 %2357 }
 0x4fe   : > { %2377 = vst.msk [vmem:[#allocation3 + $0x1d8] sm:$0xff] %vm864_vm3, %v2352_v21 }
 0x4ff   : > { %2379 = vst.msk [vmem:[#allocation3 + $0x1e8] sm:$0xff] %vm864_vm3, %v2358_v17 }
 0x504   : > { %v2016_v63 = vpop.f32.mrf.mxu3 }
 0x505   : > { %2035 = vst.msk [vmem:[#allocation4 + $0x178] sm:$0xff] %vm650_vm0, %v2016_v63  ;;  %v2361_v62 = vpop.xlane.xlu0 %2360 }
 0x506   : > { %2380 = vst.msk [vmem:[#allocation3 + $0x1f0] sm:$0xff] %vm864_vm3, %v2361_v62 }
 0x507 PF: > { %v10010_v59 = vld [vmem:[%s8755_s18] sm:$0xff]  ;;  %v10013_v38 = vld [vmem:[%s8757_s12 + $0x78] sm:$0xff]  ;;  %vm2563_vm4 = vcmask 261120   ;;  %s8530_s10 = smov 96   ;;  %v10020_v13 = vld [vmem:[%s8755_s18 + $0x10] sm:$0xff]  ;;  %vm3045_vm5 = vcmask 7168  }
 0x508   : > { %3351 = vrot.lane.b32.xlu0 %v10010_v59, %s8530_s10  ;;  %7472 = vmatpush.xpose.msk.msra.mxu0 %vm2563_vm4, %v10013_v38  ;;  %v10023_v15 = vld [vmem:[%s8757_s12 + $0x70] sm:$0xff]  ;;  %v10028_v25 = vld [vmem:[%s8755_s18 + $0x8] sm:$0xff]  ;;  %v10035_v36 = vld [vmem:[%s8755_s18 + $0x18] sm:$0xff]  ;;  %s8532_s11 = smov 64   ;;  %p7600_p3 = scmp.ne.s32.totalorder %s8501_s25, 1 }
 0x509   : > { %3355 = vrot.lane.b32.xlu1 %v10020_v13, %s8530_s10  ;;  %3353 = vrot.lane.b32.xlu2 %v10028_v25, %s8530_s10  ;;  %v10038_v3 = vld [vmem:[%s8757_s12 + $0x68] sm:$0xff]  ;;  %v10048_v55 = vld [vmem:[%s8755_s18 + $0x20] sm:$0xff] }
 0x50a   : > { %v10041_v50 = vld [vmem:[%s8755_s18 + $0x28] sm:$0xff]  ;;  %v2543_v8 = vld [vmem:[%s8757_s12 + $0x60] sm:$0xff]  ;;  %v10057_v42 = vld [vmem:[%s8755_s18 + $0x30] sm:$0xff] }
 0x50b   : > { %v2542_v35 = vld [vmem:[%s8757_s12 + $0x58] sm:$0xff]  ;;  %v10061_v53 = vld [vmem:[%s8755_s18 + $0x40] sm:$0xff]  ;;  %v2541_v60 = vld [vmem:[%s8757_s12 + $0x50] sm:$0xff] }
 0x50c   : > { %7473 = vmatpush.xpose.msk.msra.mxu0 %vm2563_vm4, %v10023_v15  ;;  %v10067_v28 = vld [vmem:[%s8755_s18 + $0x38] sm:$0xff]  ;;  %v10076_v54 = vld [vmem:[%s8755_s18 + $0x48] sm:$0xff]  ;;  %v10086_v1 = vld [vmem:[%s8755_s18 + $0x50] sm:$0xff] }
 0x50d   : > { %v2540_v43 = vld [vmem:[%s8757_s12 + $0x48] sm:$0xff]  ;;  %v10080_v10 = vld [vmem:[%s8755_s18 + $0x58] sm:$0xff]  ;;  %v2539_v0 = vld [vmem:[%s8757_s12 + $0x40] sm:$0xff] }
 0x50e   : > { %v10095_v5 = vld [vmem:[%s8755_s18 + $0x60] sm:$0xff]  ;;  %v2538_v41 = vld [vmem:[%s8757_s12 + $0x38] sm:$0xff]  ;;  %v10099_v26 = vld [vmem:[%s8755_s18 + $0x70] sm:$0xff] }
 0x50f   : > { %v10105_v30 = vld [vmem:[%s8755_s18 + $0x68] sm:$0xff]  ;;  %v2537_v7 = vld [vmem:[%s8757_s12 + $0x30] sm:$0xff]  ;;  %v10114_v32 = vld [vmem:[%s8755_s18 + $0x78] sm:$0xff] }
 0x510   : > { %3357 = vrot.lane.b32.xlu0 %v10035_v36, %s8530_s10  ;;  %7474 = vmatpush.xpose.msk.msra.mxu0 %vm2563_vm4, %v10038_v3  ;;  %v2536_v46 = vld [vmem:[%s8757_s12 + $0x28] sm:$0xff]  ;;  %v3303_v29 = vld [vmem:[%s8757_s12] sm:$0xff]  ;;  %v3305_v52 = vld [vmem:[%s8757_s12 + $0x10] sm:$0xff] }
 0x511   : > { %3361 = vrot.lane.b32.xlu1 %v10041_v50, %s8530_s10  ;;  %3359 = vrot.lane.b32.xlu2 %v10048_v55, %s8530_s10  ;;  %v3304_v37 = vld [vmem:[%s8757_s12 + $0x8] sm:$0xff]  ;;  %v2535_v31 = vld [vmem:[%s8757_s12 + $0x20] sm:$0xff] }
 0x512   : > { %v2534_v57 = vld [vmem:[%s8757_s12 + $0x18] sm:$0xff]  ;;  %v10172_v9 = vld [vmem:[%s8759_s23] sm:$0xff]  ;;  %v10175_v6 = vld [vmem:[%s8759_s23 + $0x8] sm:$0xff] }
 0x513   : > { %v7925_v56 = vpack.i.bf16 %v10175_v6, %v10172_v9  ;;  %v10189_v24 = vld [vmem:[%s8759_s23 + $0x30] sm:$0xff]  ;;  %v10192_v16 = vld [vmem:[%s8759_s23 + $0x38] sm:$0xff]  ;;  %v10237_v21 = vld [vmem:[%s8759_s23 + $0x40] sm:$0xff] }
 0x514   : > { %7475 = vmatpush.xpose.msk.msra.mxu0 %vm2563_vm4, %v2543_v8  ;;  %v7940_v33 = vpack.i.bf16 %v10192_v16, %v10189_v24  ;;  %v10222_v11 = vld [vmem:[%s8759_s23 + $0x10] sm:$0xff]  ;;  %v10225_v45 = vld [vmem:[%s8759_s23 + $0x18] sm:$0xff]  ;;  %v10240_v17 = vld [vmem:[%s8759_s23 + $0x48] sm:$0xff] }
 0x515   : > { %v7930_v61 = vpack.i.bf16 %v10225_v45, %v10222_v11  ;;  %v7945_v63 = vpack.i.bf16 %v10240_v17, %v10237_v21 }
 0x518   : > { %3363 = vrot.lane.b32.xlu0 %v10057_v42, %s8530_s10  ;;  %7476 = vmatpush.xpose.msk.msra.mxu0 %vm2563_vm4, %v2542_v35 }
 0x519   : > { %3367 = vrot.lane.b32.xlu1 %v10061_v53, %s8530_s10  ;;  %3365 = vrot.lane.b32.xlu2 %v10067_v28, %s8530_s10 }
 0x51c   : > { %7477 = vmatpush.xpose.msk.msra.mxu0 %vm2563_vm4, %v2541_v60 }
 0x520   : > { %3369 = vrot.lane.b32.xlu0 %v10076_v54, %s8530_s10  ;;  %7478 = vmatpush.xpose.msk.msra.mxu0 %vm2563_vm4, %v2540_v43 }
 0x521   : > { %3373 = vrot.lane.b32.xlu1 %v10080_v10, %s8530_s10  ;;  %3371 = vrot.lane.b32.xlu2 %v10086_v1, %s8530_s10 }
 0x524   : > { %7479 = vmatpush.xpose.msk.msra.mxu0 %vm2563_vm4, %v2539_v0 }
 0x528   : > { %3375 = vrot.lane.b32.xlu0 %v10095_v5, %s8530_s10  ;;  %7480 = vmatpush.xpose.msk.msra.mxu0 %vm2563_vm4, %v2538_v41 }
 0x529   : > { %3379 = vrot.lane.b32.xlu1 %v10099_v26, %s8530_s10  ;;  %3377 = vrot.lane.b32.xlu2 %v10105_v30, %s8530_s10 }
 0x52c   : > { %7481 = vmatpush.xpose.msk.msra.mxu0 %vm2563_vm4, %v2537_v7 }
 0x530   : > { %3381 = vrot.lane.b32.xlu0 %v10114_v32, %s8530_s10  ;;  %7482 = vmatpush.xpose.msk.msra.mxu0 %vm2563_vm4, %v2536_v46 }
 0x531   : > { %3401 = vrot.lane.b32.xlu1 %v3304_v37, %s8530_s10  ;;  %3399 = vrot.lane.b32.xlu2 %v3303_v29, %s8530_s10 }
 0x534   : > { %7483 = vmatpush.xpose.msk.msra.mxu0 %vm2563_vm4, %v2535_v31 }
 0x538   : > { %3403 = vrot.lane.b32.xlu0 %v3305_v52, %s8530_s10  ;;  %7484 = vmatpush.xpose.msk.msra.mxu0 %vm2563_vm4, %v2534_v57 }
 0x539   : > { %3407 = vrot.lane.b32.xlu1 %v2535_v31, %s8530_s10  ;;  %3405 = vrot.lane.b32.xlu2 %v2534_v57, %s8530_s10 }
 0x53c   : > { %7485 = vmatpush.xpose.msk.msra.mxu0 %vm2563_vm4, %v3305_v52  ;;  %v8531_v52 = vmov 0  }
 0x53d   : > { %7955 = vset.pattern.permute.xlu1 %v8531_v52  ;;  %7956 = vset.pattern.permute.xlu2 %v8531_v52 }
 0x53e   : > { %7957 = vset.pattern.permute.xlu0 %v8531_v52  ;;  %v10426_v52 = vld [vmem:[#allocation2 + $0x38] sm:$0xff] }
 0x540   : > { %3409 = vrot.lane.b32.xlu0 %v2536_v46, %s8530_s10  ;;  %7486 = vmatpush.xpose.msk.msra.mxu0 %vm2563_vm4, %v3304_v37 }
 0x541   : > { %3413 = vrot.lane.b32.xlu1 %v2538_v41, %s8530_s10  ;;  %3411 = vrot.lane.b32.xlu2 %v2537_v7, %s8530_s10 }
 0x544   : > { %7487 = vmatpush.xpose.msk.msra.mxu0 %vm2563_vm4, %v3303_v29 }
 0x547   : > { %7488 = vmatmul.msk.f32.vlgmr.msra.gmra.mxu0 %vm2563_vm4, %v10010_v59 }
 0x548   : > { %3415 = vrot.lane.b32.xlu0 %v2539_v0, %s8530_s10 }
 0x549   : > { %3419 = vrot.lane.b32.xlu1 %v2541_v60, %s8530_s10  ;;  %3417 = vrot.lane.b32.xlu2 %v2540_v43, %s8530_s10 }
 0x54f   : > { %7489 = vmatmul.msk.f32.gmra.mxu0 %vm2563_vm4, %v10028_v25 }
 0x550   : > { %3421 = vrot.lane.b32.xlu0 %v2542_v35, %s8530_s10 }
 0x551   : > { %3425 = vrot.lane.b32.xlu1 %v10038_v3, %s8530_s10  ;;  %3423 = vrot.lane.b32.xlu2 %v2543_v8, %s8530_s10  ;;  %v10262_v8 = vld [vmem:[%s8759_s23 + $0x58] sm:$0xff] }
 0x557   : > { %7490 = vmatmul.msk.f32.gmra.mxu0 %vm2563_vm4, %v10020_v13  ;;  %v10248_v13 = vld [vmem:[%s8759_s23 + $0x20] sm:$0xff] }
 0x558   : > { %3427 = vrot.lane.b32.xlu0 %v10023_v15, %s8530_s10  ;;  %v10251_v15 = vld [vmem:[%s8759_s23 + $0x28] sm:$0xff] }
 0x559   : > { %3429 = vrot.lane.b32.xlu2 %v10013_v38, %s8530_s10  ;;  %7931 = vrot.lane.b32.xlu1 %v7930_v61, %s8530_s10  ;;  %v7935_v25 = vpack.i.bf16 %v10251_v15, %v10248_v13 }
 0x55f   : > { %7491 = vmatmul.msk.f32.gmra.mxu0 %vm2563_vm4, %v10035_v36 }
 0x560   : > { %7926 = vrot.lane.b32.xlu0 %v7925_v56, %s8530_s10 }
 0x561   : > { %7946 = vrot.lane.b32.xlu1 %v7945_v63, %s8530_s10  ;;  %7936 = vrot.lane.b32.xlu2 %v7935_v25, %s8530_s10 }
 0x563   : > { %v10157_v14 = vpop.permute.xlu2 %3353 }
 0x567   : > { %7492 = vmatmul.msk.f32.gmra.mxu0 %vm2563_vm4, %v10048_v55  ;;  %v10259_v55 = vld [vmem:[%s8759_s23 + $0x50] sm:$0xff] }
 0x568   : > { %7941 = vrot.lane.b32.xlu0 %v7940_v33, %s8530_s10 }
 0x56b   : > { %v10161_v40 = vpop.permute.xlu2 %3359 }
 0x56f   : > { %7493 = vmatmul.msk.f32.gmra.mxu0 %vm2563_vm4, %v10041_v50 }
 0x573   : > { %v10165_v49 = vpop.permute.xlu2 %3365 }
 0x577   : > { %7494 = vmatmul.msk.f32.gmra.mxu0 %vm2563_vm4, %v10057_v42  ;;  %v7950_v42 = vpack.i.bf16 %v10262_v8, %v10259_v55 }
 0x579   : > { %7951 = vrot.lane.b32.xlu2 %v7950_v42, %s8530_s10 }
 0x57a   : > { %v10169_v27 = vpop.permute.xlu0 %3351 }
 0x57b   : > { %v10177_v12 = vpop.permute.xlu1 %3355  ;;  %v10181_v19 = vpop.permute.xlu2 %3371 }
 0x57f   : > { %7495 = vmatmul.msk.f32.gmra.mxu0 %vm2563_vm4, %v10067_v28 }
 0x582   : > { %v10186_v39 = vpop.permute.xlu0 %3357 }
 0x583   : > { %v10194_v18 = vpop.permute.xlu1 %3361  ;;  %v10198_v47 = vpop.permute.xlu2 %3377 }
 0x587   : > { %7496 = vmatmul.msk.f32.gmra.mxu0 %vm2563_vm4, %v10061_v53 }
 0x58a   : > { %v10203_v22 = vpop.permute.xlu0 %3363 }
 0x58b   : > { %v10205_v58 = vpop.permute.xlu1 %3367  ;;  %v10207_v4 = vpop.permute.xlu2 %3399 }
 0x58f   : > { %7497 = vmatmul.msk.f32.gmra.mxu0 %vm2563_vm4, %v10076_v54 }
 0x592   : > { %v10211_v34 = vpop.permute.xlu0 %3369 }
 0x593   : > { %v10213_v51 = vpop.permute.xlu1 %3373  ;;  %v10215_v2 = vpop.permute.xlu2 %3405 }
 0x597   : > { %7498 = vmatmul.msk.f32.gmra.mxu0 %vm2563_vm4, %v10086_v1 }
 0x59a   : > { %v10219_v23 = vpop.permute.xlu0 %3375 }
 0x59b   : > { %v10227_v48 = vpop.permute.xlu1 %3379  ;;  %v3412_v20 = vpop.permute.xlu2 %3411 }
 0x59f   : > { %7499 = vmatmul.msk.f32.gmra.mxu0 %vm2563_vm4, %v10080_v10 }
 0x5a2   : > { %v10234_v44 = vpop.permute.xlu0 %3381 }
 0x5a3   : > { %v3402_v62 = vpop.permute.xlu1 %3401  ;;  %v3418_v59 = vpop.permute.xlu2 %3417 }
 0x5a7   : > { %7500 = vmatmul.msk.f32.gmra.mxu0 %vm2563_vm4, %v10095_v5 }
 0x5aa   : > { %v3404_v38 = vpop.permute.xlu0 %3403 }
 0x5ab   : > { %v3424_v36 = vpop.permute.xlu2 %3423  ;;  %v3408_v3 = vpop.permute.xlu1 %3407 }
 0x5af   : > { %7501 = vmatmul.msk.f32.gmra.mxu0 %vm2563_vm4, %v10105_v30 }
 0x5b2   : > { %v3410_v50 = vpop.permute.xlu0 %3409 }
 0x5b3   : > { %v3430_v35 = vpop.permute.xlu2 %3429  ;;  %v3414_v53 = vpop.permute.xlu1 %3413 }
 0x5b4   : > { %7504 = vmatpush.xpose.msk.msra.mxu2 %vm2563_vm4, %v3430_v35  ;;  %v10396_v35 = vld [vmem:[#allocation2 + $0x20] sm:$0xff] }
 0x5b7   : > { %7502 = vmatmul.msk.f32.gmra.mxu0 %vm2563_vm4, %v10099_v26 }
 0x5ba   : > { %v3416_v28 = vpop.permute.xlu0 %3415 }
 0x5bb   : > { %v3420_v54 = vpop.permute.xlu1 %3419 }
 0x5bf   : > { %7503 = vmatmul.msk.f32.gmra.mxu0 %vm2563_vm4, %v10114_v32 }
 0x5c2   : > { %v3422_v60 = vpop.permute.xlu0 %3421 }
 0x5c3   : > { %v3426_v0 = vpop.permute.xlu1 %3425 }
 0x5c4   : > { %v10272_v43 = vpop.f32.mrf.mxu0 }
 0x5c5   : > { %2741 = vmax.xlane.f32.xlu0 %v10272_v43 }
 0x5ca   : > { %v3428_v10 = vpop.permute.xlu0 %3427 }
 0x5cb   : > { %7505 = vmatpush.xpose.msk.msra.mxu2 %vm2563_vm4, %v3428_v10  ;;  %v10417_v10 = vld [vmem:[#allocation2 + $0x30] sm:$0xff] }
 0x5cc   : > { %v10276_v1 = vpop.f32.mrf.mxu0 }
 0x5cd   : > { %2743 = vmax.xlane.f32.xlu0 %v10276_v1 }
 0x5cf   : > { %7506 = vmatpush.xpose.msk.msra.mxu2 %vm2563_vm4, %v3426_v0 }
 0x5d3   : > { %7507 = vmatpush.xpose.msk.msra.mxu2 %vm2563_vm4, %v3424_v36 }
 0x5d4   : > { %v10281_v5 = vpop.f32.mrf.mxu0 }
 0x5d5   : > { %2745 = vmax.xlane.f32.xlu1 %v10281_v5 }
 0x5d7   : > { %7508 = vmatpush.xpose.msk.msra.mxu2 %vm2563_vm4, %v3422_v60 }
 0x5db   : > { %7509 = vmatpush.xpose.msk.msra.mxu2 %vm2563_vm4, %v3420_v54 }
 0x5dc   : > { %v10286_v41 = vpop.f32.mrf.mxu0 }
 0x5dd   : > { %2747 = vmax.xlane.f32.xlu1 %v10286_v41 }
 0x5df   : > { %7510 = vmatpush.xpose.msk.msra.mxu2 %vm2563_vm4, %v3418_v59  ;;  %v10373_v59 = vld [vmem:[#allocation2 + $0x10] sm:$0xff] }
 0x5e3   : > { %7511 = vmatpush.xpose.msk.msra.mxu2 %vm2563_vm4, %v3416_v28  ;;  %v10405_v28 = vld [vmem:[#allocation2 + $0x28] sm:$0xff] }
 0x5e4   : > { %v10291_v26 = vpop.f32.mrf.mxu0 }
 0x5e5   : > { %2749 = vmax.xlane.f32.xlu2 %v10291_v26 }
 0x5e7   : > { %7512 = vmatpush.xpose.msk.msra.mxu2 %vm2563_vm4, %v3414_v53 }
 0x5eb   : > { %7513 = vmatpush.xpose.msk.msra.mxu2 %vm2563_vm4, %v3412_v20 }
 0x5ec   : > { %v10296_v30 = vpop.f32.mrf.mxu0 }
 0x5ed   : > { %2751 = vmax.xlane.f32.xlu2 %v10296_v30 }
 0x5ef   : > { %7514 = vmatpush.xpose.msk.msra.mxu2 %vm2563_vm4, %v3410_v50 }
 0x5f3   : > { %7515 = vmatpush.xpose.msk.msra.mxu2 %vm2563_vm4, %v3408_v3 }
 0x5f4   : > { %v10301_v7 = vpop.f32.mrf.mxu0 }
 0x5f5   : > { %2753 = vmax.xlane.f32.xlu0 %v10301_v7 }
 0x5f7   : > { %7516 = vmatpush.xpose.msk.msra.mxu2 %vm2563_vm4, %v10215_v2  ;;  %v2726_v2 = vld [vmem:[#allocation2 + $0x8] sm:$0xff] }
 0x5fb   : > { %7517 = vmatpush.xpose.msk.msra.mxu2 %vm2563_vm4, %v3404_v38 }
 0x5fc   : > { %v10307_v32 = vpop.f32.mrf.mxu0 }
 0x5fd   : > { %2755 = vmax.xlane.f32.xlu1 %v10307_v32 }
 0x5ff   : > { %7518 = vmatpush.xpose.msk.msra.mxu2 %vm2563_vm4, %v3402_v62  ;;  %v10368_v62 = vpop.permute.xlu2 %7936 }
 0x600   : > { %12848 = vst [vmem:[#allocation27_spill] sm:$0xff] %v10368_v62 }
 0x603   : > { %7519 = vmatpush.xpose.msk.msra.mxu2 %vm2563_vm4, %v10207_v4 }
 0x604   : > { %v10313_v46 = vpop.f32.mrf.mxu0 }
 0x605   : > { %2757 = vmax.xlane.f32.xlu2 %v10313_v46 }
 0x606   : > { %7520 = vmatmul.msk.f32.vlgmr.msra.gmra.mxu2 %vm2563_vm4, %v10169_v27 }
 0x607   : > { %v10382_v36 = vpop.permute.xlu2 %7951 }
 0x608   : > { %12849 = vst [vmem:[#allocation28_spill] sm:$0xff] %v10382_v36 }
 0x60c   : > { %v10318_v37 = vpop.f32.mrf.mxu0 }
 0x60d   : > { %2759 = vmax.xlane.f32.xlu0 %v10318_v37 }
 0x60e   : > { %7521 = vmatmul.msk.f32.gmra.mxu2 %vm2563_vm4, %v10157_v14  ;;  %v10338_v14 = vpop.permute.xlu0 %7926 }
 0x60f   : > { %12844 = vst [vmem:[#allocation23_spill] sm:$0xff] %v10338_v14 }
 0x614   : > { %v10323_v29 = vpop.f32.mrf.mxu0 }
 0x615   : > { %2761 = vmax.xlane.f32.xlu1 %v10323_v29 }
 0x616   : > { %7522 = vmatmul.msk.f32.gmra.mxu2 %vm2563_vm4, %v10177_v12  ;;  %v10345_v12 = vpop.permute.xlu0 %7941 }
 0x617   : > { %12845 = vst [vmem:[#allocation24_spill] sm:$0xff] %v10345_v12 }
 0x61c   : > { %v10328_v31 = vpop.f32.mrf.mxu0 }
 0x61d   : > { %2763 = vmax.xlane.f32.xlu2 %v10328_v31 }
 0x61e   : > { %7523 = vmatmul.msk.f32.gmra.mxu2 %vm2563_vm4, %v10186_v39  ;;  %v10349_v39 = vpop.permute.xlu1 %7931 }
 0x61f   : > { %12846 = vst [vmem:[#allocation25_spill] sm:$0xff] %v10349_v39 }
 0x624   : > { %v10333_v57 = vpop.f32.mrf.mxu0 }
 0x625   : > { %2765 = vmax.xlane.f32.xlu0 %v10333_v57 }
 0x626   : > { %7524 = vmatmul.msk.f32.gmra.mxu2 %vm2563_vm4, %v10161_v40  ;;  %v10354_v40 = vld [vmem:[#allocation2] sm:$0xff]  ;;  %v10365_v61 = vpop.permute.xlu1 %7946 }
 0x627   : > { %12847 = vst [vmem:[#allocation26_spill] sm:$0xff] %v10365_v61 }
 0x62c   : > { %v10340_v27 = vpop.f32.mrf.mxu0 }
 0x62d   : > { %2767 = vmax.xlane.f32.xlu1 %v10340_v27 }
 0x62e   : > { %7525 = vmatmul.msk.f32.gmra.mxu2 %vm2563_vm4, %v10194_v18 }
 0x634   : > { %v10347_v56 = vpop.f32.mrf.mxu0 }
 0x635   : > { %2769 = vmax.xlane.f32.xlu2 %v10347_v56 }
 0x636   : > { %7526 = vmatmul.msk.f32.gmra.mxu2 %vm2563_vm4, %v10203_v22 }
 0x638   : > { %v2742_v33 = vpop.xlane.xlu0 %2741 }
 0x639   : > { %v10357_v4 = vmax.f32 %v10354_v40, %v2742_v33 }
 0x63b   : > { %v2789_v18 = vsub.f32 %v10354_v40, %v10357_v4  ;;  %3271 = vst.msk [vmem:[#allocation2] sm:$0xff] %vm3045_vm5, %v10357_v4 }
 0x63c   : > { %v10407_v60 = vpop.f32.mrf.mxu0 }
 0x63d   : > { %2771 = vmax.xlane.f32.xlu0 %v10407_v60 }
 0x63e   : > { %7527 = vmatmul.msk.f32.gmra.mxu2 %vm2563_vm4, %v10165_v49 }
 0x640   : > { %v2744_v22 = vpop.xlane.xlu0 %2743 }
 0x641   : > { %v2774_v20 = vmax.f32 %v2726_v2, %v2744_v22 }
 0x643   : > { %3272 = vst.msk [vmem:[#allocation2 + $0x8] sm:$0xff] %vm3045_vm5, %v2774_v20  ;;  %v2790_v63 = vsub.f32 %v2726_v2, %v2774_v20 }
 0x645   : > { %v2807_v38 = vmul.f32 1.442695, %v2790_v63 }
 0x646   : > { %7528 = vmatmul.msk.f32.gmra.mxu2 %vm2563_vm4, %v10205_v58  ;;  %2839 = vperm.xlu1 %7955, %v10357_v4   ;;  %v10384_v58 = vld [vmem:[#allocation2 + $0x18] sm:$0xff] }
 0x647   : > { %8048 = vpow2.f32 %v2807_v38 }
 0x648   : > { %v2746_v25 = vpop.xlane.xlu1 %2745 }
 0x649   : > { %v10376_v49 = vmax.f32 %v10373_v59, %v2746_v25  ;;  %v10452_v25 = vld [vmem:[#allocation2 + $0x50] sm:$0xff] }
 0x64b   : > { %3273 = vst.msk [vmem:[#allocation2 + $0x10] sm:$0xff] %vm3045_vm5, %v10376_v49 }
 0x64d   : > { %2844 = vperm.xlu2 %7956, %v2774_v20   ;;  %v10389_v42 = vpop.eup %8048 }
 0x64e   : > { %7529 = vmatmul.msk.f32.gmra.mxu2 %vm2563_vm4, %v10211_v34 }
 0x650   : > { %v2748_v3 = vpop.xlane.xlu1 %2747 }
 0x651   : > { %v10387_v50 = vmax.f32 %v10384_v58, %v2748_v3  ;;  %v2561_v3 = vld [vmem:[%s8759_s23 + $0x70] sm:$0xff] }
 0x653   : > { %3274 = vst.msk [vmem:[#allocation2 + $0x18] sm:$0xff] %vm3045_vm5, %v10387_v50 }
 0x655   : > { %3085 = vperm.xlu2 %7956, %v10389_v42  }
 0x656   : > { %7530 = vmatmul.msk.f32.gmra.mxu2 %vm2563_vm4, %v10181_v19 }
 0x658   : > { %v2750_v34 = vpop.xlane.xlu2 %2749 }
 0x659   : > { %v10399_v53 = vmax.f32 %v10396_v35, %v2750_v34 }
 0x65b   : > { %3275 = vst.msk [vmem:[#allocation2 + $0x20] sm:$0xff] %vm3045_vm5, %v10399_v53 }
 0x65e   : > { %7531 = vmatmul.msk.f32.gmra.mxu2 %vm2563_vm4, %v10213_v51 }
 0x660   : > { %v2752_v54 = vpop.xlane.xlu2 %2751 }
 0x661   : > { %v10411_v19 = vmax.f32 %v10405_v28, %v2752_v54  ;;  %v2560_v54 = vld [vmem:[%s8759_s23 + $0x68] sm:$0xff] }
 0x663   : > { %3276 = vst.msk [vmem:[#allocation2 + $0x28] sm:$0xff] %vm3045_vm5, %v10411_v19 }
 0x666   : > { %7532 = vmatmul.msk.f32.gmra.mxu2 %vm2563_vm4, %v10219_v23  ;;  %v10435_v23 = vld [vmem:[#allocation2 + $0x40] sm:$0xff] }
 0x668   : > { %v2754_v0 = vpop.xlane.xlu0 %2753 }
 0x669   : > { %v10420_v51 = vmax.f32 %v10417_v10, %v2754_v0 }
 0x66b   : > { %3277 = vst.msk [vmem:[#allocation2 + $0x30] sm:$0xff] %vm3045_vm5, %v10420_v51 }
 0x66e   : > { %7533 = vmatmul.msk.f32.gmra.mxu2 %vm2563_vm4, %v10198_v47  ;;  %v10444_v47 = vld [vmem:[#allocation2 + $0x48] sm:$0xff] }
 0x670   : > { %v2756_v33 = vpop.xlane.xlu1 %2755 }
 0x671   : > { %v10429_v2 = vmax.f32 %v10426_v52, %v2756_v33  ;;  %v2559_v33 = vld [vmem:[%s8759_s23 + $0x60] sm:$0xff] }
 0x673   : > { %3278 = vst.msk [vmem:[#allocation2 + $0x38] sm:$0xff] %vm3045_vm5, %v10429_v2  ;;  %v2796_v12 = vsub.f32 %v10426_v52, %v10429_v2  ;;  %v10618_v52 = vld [vmem:[#allocation2 + $0x98] sm:$0xff] }
 0x676   : > { %7534 = vmatmul.msk.f32.gmra.mxu2 %vm2563_vm4, %v10227_v48  ;;  %v2562_v48 = vld [vmem:[%s8759_s23 + $0x78] sm:$0xff] }
 0x677   : > { %3174 = vmatpush.msra.mxu1 %v2562_v48 }
 0x678   : > { %v2758_v22 = vpop.xlane.xlu2 %2757 }
 0x679   : > { %v10438_v20 = vmax.f32 %v10435_v23, %v2758_v22  ;;  %3175 = vmatpush.msra.mxu1 %v2561_v3  ;;  %v10466_v22 = vld [vmem:[#allocation2 + $0x58] sm:$0xff] }
 0x67b   : > { %3279 = vst.msk [vmem:[#allocation2 + $0x40] sm:$0xff] %vm3045_vm5, %v10438_v20  ;;  %3176 = vmatpush.msra.mxu1 %v2560_v54 }
 0x67d   : > { %3177 = vmatpush.msra.mxu1 %v2559_v33 }
 0x67e   : > { %7535 = vmatmul.msk.f32.gmra.mxu2 %vm2563_vm4, %v10234_v44 }
 0x67f   : > { %3178 = vmatpush.msra.mxu1 %v10262_v8  ;;  %v10480_v8 = vld [vmem:[#allocation2 + $0x60] sm:$0xff] }
 0x680   : > { %v2760_v63 = vpop.xlane.xlu0 %2759 }
 0x681   : > { %v10447_v38 = vmax.f32 %v10444_v47, %v2760_v63  ;;  %3179 = vmatpush.msra.mxu1 %v10259_v55  ;;  %v2805_v55 = vmul.f32 1.442695, %v2789_v18 }
 0x683   : > { %3280 = vst.msk [vmem:[#allocation2 + $0x48] sm:$0xff] %vm3045_vm5, %v10447_v38  ;;  %3180 = vmatpush.msra.mxu1 %v10240_v17  ;;  %8050 = vpow2.f32 %v2805_v55 }
 0x685   : > { %3181 = vmatpush.msra.mxu1 %v10237_v21 }
 0x687   : > { %3182 = vmatpush.msra.mxu1 %v10192_v16  ;;  %v2791_v16 = vsub.f32 %v10373_v59, %v10376_v49 }
 0x688   : > { %v2762_v34 = vpop.xlane.xlu1 %2761 }
 0x689   : > { %v10456_v0 = vpop.f32.mrf.mxu2  ;;  %v10459_v44 = vmax.f32 %v10452_v25, %v2762_v34  ;;  %3183 = vmatpush.msra.mxu1 %v10189_v24  ;;  %v10497_v24 = vld [vmem:[#allocation2 + $0x68] sm:$0xff]  ;;  %v10506_v40 = vpop.eup %8050  ;;  %v2809_v4 = vmul.f32 1.442695, %v2791_v16 }
 0x68a   : > { %12850 = vst [vmem:[#allocation29_spill] sm:$0xff] %v10456_v0  ;;  %3577 = vmax.xlane.f32.xlu1 %v10456_v0 }
 0x68b   : > { %3281 = vst.msk [vmem:[#allocation2 + $0x50] sm:$0xff] %vm3045_vm5, %v10459_v44  ;;  %3184 = vmatpush.msra.mxu1 %v10251_v15  ;;  %8052 = vpow2.f32 %v2809_v4 }
 0x68d   : > { %3185 = vmatpush.msra.mxu1 %v10248_v13 }
 0x68f   : > { %3186 = vmatpush.msra.mxu1 %v10225_v45  ;;  %v10513_v45 = vld [vmem:[#allocation2 + $0x70] sm:$0xff] }
 0x690   : > { %v2764_v63 = vpop.xlane.xlu2 %2763 }
 0x691   : > { %v10469_v48 = vpop.f32.mrf.mxu2  ;;  %v10472_v3 = vmax.f32 %v10466_v22, %v2764_v63  ;;  %3187 = vmatpush.msra.mxu1 %v10222_v11 }
 0x692   : > { %12851 = vst [vmem:[#allocation30_spill] sm:$0xff] %v10469_v48  ;;  %3579 = vmax.xlane.f32.xlu0 %v10469_v48 }
 0x693   : > { %3282 = vst.msk [vmem:[#allocation2 + $0x58] sm:$0xff] %vm3045_vm5, %v10472_v3  ;;  %3188 = vmatpush.msra.mxu1 %v10175_v6  ;;  %v10520_v6 = vpop.eup %8052 }
 0x695   : > { %3189 = vmatpush.msra.mxu1 %v10172_v9 }
 0x698   : > { %v2766_v34 = vpop.xlane.xlu0 %2765 }
 0x699   : > { %v10486_v54 = vpop.f32.mrf.mxu2  ;;  %v10489_v17 = vmax.f32 %v10480_v8, %v2766_v34 }
 0x69a   : > { %12852 = vst [vmem:[#allocation31_spill] sm:$0xff] %v10486_v54  ;;  %3581 = vmax.xlane.f32.xlu2 %v10486_v54 }
 0x69b   : > { %3283 = vst.msk [vmem:[#allocation2 + $0x60] sm:$0xff] %vm3045_vm5, %v10489_v17 }
 0x6a0   : > { %v2768_v21 = vpop.xlane.xlu1 %2767 }
 0x6a1   : > { %v10503_v15 = vmax.f32 %v10497_v24, %v2768_v21  ;;  %v10532_v16 = vpop.f32.mrf.mxu2  ;;  %v2792_v21 = vsub.f32 %v10384_v58, %v10387_v50 }
 0x6a2   : > { %12853 = vst [vmem:[#allocation32_spill] sm:$0xff] %v10532_v16 }
 0x6a3   : > { %3080 = vperm.xlu1 %7955, %v10506_v40   ;;  %3284 = vst.msk [vmem:[#allocation2 + $0x68] sm:$0xff] %vm3045_vm5, %v10503_v15 }
 0x6a6   : > { %2849 = vperm.xlu0 %7957, %v10376_v49  }
 0x6a8   : > { %v2770_v11 = vpop.xlane.xlu2 %2769 }
 0x6a9   : > { %v10516_v13 = vmax.f32 %v10513_v45, %v2770_v11 }
 0x6ab   : > { %3285 = vst.msk [vmem:[#allocation2 + $0x70] sm:$0xff] %vm3045_vm5, %v10516_v13 }
 0x6ae   : > { %3090 = vperm.xlu0 %7957, %v10520_v6  }
 0x6b0   : > { %v2845_v59 = vpop.permute.xlu2 %2844 }
 0x6b1   : > { %v2918_v33 = vsub.f32 %v10276_v1, %v2845_v59  ;;  %v2793_v1 = vsub.f32 %v10396_v35, %v10399_v53  ;;  %v2772_v59 = vpop.xlane.xlu0 %2771 }
 0x6b2   : > { %2854 = vperm.xlu2 %7956, %v10387_v50   ;;  %v2794_v50 = vsub.f32 %v10405_v28, %v10411_v19  ;;  %v10574_v28 = vld [vmem:[#allocation2 + $0x88] sm:$0xff] }
 0x6b3   : > { %v2935_v63 = vmul.f32 1.442695, %v2918_v33  ;;  %v2813_v4 = vmul.f32 1.442695, %v2793_v1 }
 0x6b4   : > { %v2815_v33 = vmul.f32 1.442695, %v2794_v50  ;;  %v10583_v50 = vld [vmem:[#allocation2 + $0x90] sm:$0xff] }
 0x6b8   : > { %v2840_v18 = vpop.permute.xlu1 %2839 }
 0x6b9   : > { %v2917_v9 = vsub.f32 %v10272_v43, %v2840_v18  ;;  %v10536_v43 = vpop.f32.mrf.mxu2  ;;  %v2811_v18 = vmul.f32 1.442695, %v2792_v21 }
 0x6ba   : > { %2864 = vperm.xlu2 %7956, %v10411_v19   ;;  %12854 = vst [vmem:[#allocation33_spill] sm:$0xff] %v10536_v43  ;;  %v3086_v19 = vpop.permute.xlu2 %3085 }
 0x6bb   : > { %v2933_v49 = vmul.f32 1.442695, %v2917_v9  ;;  %v10546_v9 = vld [vmem:[#allocation2 + $0x78] sm:$0xff] }
 0x6bd   : > { %8054 = vpow2.f32 %v2933_v49  ;;  %v10549_v49 = vmax.f32 %v10546_v9, %v2772_v59 }
 0x6be   : > { %8056 = vpow2.f32 %v2935_v63  ;;  %v10566_v63 = vld [vmem:[#allocation2 + $0x80] sm:$0xff] }
 0x6bf   : > { %8058 = vpow2.f32 %v2813_v4  ;;  %3286 = vst.msk [vmem:[#allocation2 + $0x78] sm:$0xff] %vm3045_vm5, %v10549_v49 }
 0x6c0   : > { %8060 = vpow2.f32 %v2811_v18 }
 0x6c1   : > { %v10543_v11 = vpop.f32.mrf.mxu2  ;;  %8062 = vpow2.f32 %v2815_v33 }
 0x6c2   : > { %12855 = vst [vmem:[#allocation34_spill] sm:$0xff] %v10543_v11 }
 0x6c3   : > { %v10527_v55 = vpop.eup %8054 }
 0x6c4   : > { %3190 = vmatmul.f32.vlgmr.msra.gmra.mxu1 %v10527_v55  ;;  %v10530_v34 = vpop.eup %8056 }
 0x6c5   : > { %v10554_v58 = vpop.eup %8058 }
 0x6c6   : > { %12856 = vst [vmem:[#allocation35_spill] sm:$0xff] %v10554_v58  ;;  %v10559_v35 = vpop.eup %8060 }
 0x6c9   : > { %v10581_v59 = vpop.f32.mrf.mxu2 }
 0x6ca   : > { %12857 = vst [vmem:[#allocation36_spill] sm:$0xff] %v10581_v59 }
 0x6cc   : > { %3193 = vmatmul.f32.gmra.mxu1 %v10530_v34 }
 0x6cd   : > { %3583 = vmax.xlane.f32.xlu1 %v10532_v16 }
 0x6d1   : > { %v10590_v14 = vpop.f32.mrf.mxu2 }
 0x6d2   : > { %12858 = vst [vmem:[#allocation37_spill] sm:$0xff] %v10590_v14 }
 0x6d8   : > { %3585 = vmax.xlane.f32.xlu0 %v10536_v43 }
 0x6e3   : > { %3587 = vmax.xlane.f32.xlu2 %v10543_v11 }
 0x6e6   : > { %2859 = vperm.xlu1 %7955, %v10399_v53   ;;  %v10563_v53 = vpop.eup %8062 }
 0x6ec   : > { %3100 = vperm.xlu0 %7957, %v10554_v58  }
 0x6ee   : > { %3095 = vperm.xlu1 %7955, %v10559_v35  }
 0x6f6   : > { %2869 = vperm.xlu1 %7955, %v10420_v51  }
 0x6fb   : > { %3105 = vperm.xlu2 %7956, %v10563_v53  }
 0x6fd   : > { %v3578_v1 = vpop.xlane.xlu1 %3577 }
 0x6fe   : > { %v10569_v21 = vmax.f32 %v10566_v63, %v3578_v1 }
 0x700   : > { %4172 = vst.msk [vmem:[#allocation2 + $0x80] sm:$0xff] %vm3045_vm5, %v10569_v21 }
 0x703   : > { %2874 = vperm.xlu2 %7956, %v10429_v2  }
 0x705   : > { %v3580_v4 = vpop.xlane.xlu0 %3579 }
 0x706   : > { %v10577_v18 = vmax.f32 %v10574_v28, %v3580_v4 }
 0x708   : > { %4173 = vst.msk [vmem:[#allocation2 + $0x88] sm:$0xff] %vm3045_vm5, %v10577_v18 }
 0x70d   : > { %v3582_v33 = vpop.xlane.xlu2 %3581 }
 0x70e   : > { %v10586_v1 = vmax.f32 %v10583_v50, %v3582_v33  ;;  %v2819_v33 = vmul.f32 1.442695, %v2796_v12 }
 0x710   : > { %4174 = vst.msk [vmem:[#allocation2 + $0x90] sm:$0xff] %vm3045_vm5, %v10586_v1 }
 0x715   : > { %v2855_v62 = vpop.permute.xlu2 %2854 }
 0x716   : > { %3591 = vmax.xlane.f32.xlu0 %v10590_v14  ;;  %v2920_v36 = vsub.f32 %v10286_v41, %v2855_v62  ;;  %v10608_v41 = vpop.f32.mrf.mxu2 }
 0x717   : > { %12860 = vst [vmem:[#allocation39_spill] sm:$0xff] %v10608_v41 }
 0x718   : > { %v2850_v4 = vpop.permute.xlu0 %2849  ;;  %v2939_v11 = vmul.f32 1.442695, %v2920_v36  ;;  %v3081_v36 = vpop.permute.xlu1 %3080 }
 0x719   : > { %v2919_v39 = vsub.f32 %v10281_v5, %v2850_v4  ;;  %v2795_v5 = vsub.f32 %v10417_v10, %v10420_v51  ;;  %v3062_v51 = vld [vmem:[#allocation4] sm:$0xff] }
 0x71a   : > { %v3158_v2 = vmul.f32 %v3081_v36, %v3062_v51  ;;  %v10632_v51 = vld [vmem:[#allocation2 + $0xa0] sm:$0xff] }
 0x71b   : > { %v2937_v61 = vmul.f32 1.442695, %v2919_v39  ;;  %v2817_v12 = vmul.f32 1.442695, %v2795_v5 }
 0x71d   : > { %8064 = vpow2.f32 %v2937_v61  ;;  %v2797_v61 = vsub.f32 %v10435_v23, %v10438_v20 }
 0x71e   : > { %8066 = vpow2.f32 %v2819_v33 }
 0x71f   : > { %8068 = vpow2.f32 %v2939_v11  ;;  %v2821_v10 = vmul.f32 1.442695, %v2797_v61  ;;  %v3063_v61 = vld [vmem:[#allocation4 + $0x8] sm:$0xff] }
 0x720   : > { %3589 = vmax.xlane.f32.xlu1 %v10581_v59  ;;  %8070 = vpow2.f32 %v2817_v12  ;;  %v10626_v12 = vpop.permute.xlu0 %3090  ;;  %v3159_v36 = vmul.f32 %v3086_v19, %v3063_v61 }
 0x721   : > { %8072 = vpow2.f32 %v2821_v10 }
 0x723   : > { %v10598_v54 = vpop.eup %8064 }
 0x724   : > { %3196 = vmatmul.f32.gmra.mxu1 %v10598_v54  ;;  %v10601_v16 = vpop.eup %8066 }
 0x725   : > { %12859 = vst [vmem:[#allocation38_spill] sm:$0xff] %v10601_v16  ;;  %v10606_v39 = vpop.eup %8068 }
 0x726   : > { %v10615_v62 = vpop.eup %8070 }
 0x727   : > { %v10624_v23 = vpop.eup %8072 }
 0x728   : > { %12861 = vst [vmem:[#allocation40_spill] sm:$0xff] %v10624_v23 }
 0x72a   : > { %3115 = vperm.xlu0 %7957, %v10601_v16  }
 0x72c   : > { %3593 = vmax.xlane.f32.xlu2 %v10608_v41  ;;  %3199 = vmatmul.f32.gmra.mxu1 %v10606_v39  ;;  %v10643_v41 = vld [vmem:[#allocation2 + $0xa8] sm:$0xff] }
 0x732   : > { %2884 = vperm.xlu0 %7957, %v10447_v38  }
 0x739   : > { %3110 = vperm.xlu1 %7955, %v10615_v62  }
 0x740   : > { %v3584_v11 = vpop.xlane.xlu1 %3583 }
 0x741   : > { %v10621_v4 = vmax.f32 %v10618_v52, %v3584_v11  ;;  %2879 = vperm.xlu1 %7955, %v10438_v20   ;;  %v3191_v33 = vpop.f32.mrf.mxu1 }
 0x742   : > { %v3239_v5 = vadd.f32 %v3191_v33, %v3158_v2  ;;  %v2865_v33 = vpop.permute.xlu2 %2864 }
 0x743   : > { %4175 = vst.msk [vmem:[#allocation2 + $0x98] sm:$0xff] %vm3045_vm5, %v10621_v4  ;;  %v2922_v59 = vsub.f32 %v10296_v30, %v2865_v33 }
 0x744   : > { %3255 = vst.msk [vmem:[#allocation4] sm:$0xff] %vm2563_vm4, %v3239_v5  ;;  %3120 = vperm.xlu2 %7956, %v10624_v23   ;;  %v10641_v5 = vpop.f32.mrf.mxu2 }
 0x745   : > { %12862 = vst [vmem:[#allocation41_spill] sm:$0xff] %v10641_v5  ;;  %v2943_v43 = vmul.f32 1.442695, %v2922_v59 }
 0x749   : > { %v3194_v10 = vpop.f32.mrf.mxu1 }
 0x74a   : > { %v3240_v11 = vadd.f32 %v3194_v10, %v3159_v36 }
 0x74b   : > { %v3586_v20 = vpop.xlane.xlu0 %3585 }
 0x74c   : > { %3256 = vst.msk [vmem:[#allocation4 + $0x8] sm:$0xff] %vm2563_vm4, %v3240_v11  ;;  %v10636_v2 = vmax.f32 %v10632_v51, %v3586_v20  ;;  %2889 = vperm.xlu2 %7956, %v10459_v44   ;;  %v10651_v11 = vpop.f32.mrf.mxu2 }
 0x74d   : > { %12863 = vst [vmem:[#allocation42_spill] sm:$0xff] %v10651_v11 }
 0x74e   : > { %4176 = vst.msk [vmem:[#allocation2 + $0xa0] sm:$0xff] %vm3045_vm5, %v10636_v2 }
 0x756   : > { %v3588_v19 = vpop.xlane.xlu2 %3587 }
 0x757   : > { %v10646_v61 = vmax.f32 %v10643_v41, %v3588_v19  ;;  %v2799_v19 = vsub.f32 %v10452_v25, %v10459_v44 }
 0x758   : > { %v2860_v36 = vpop.permute.xlu1 %2859 }
 0x759   : > { %4177 = vst.msk [vmem:[#allocation2 + $0xa8] sm:$0xff] %vm3045_vm5, %v10646_v61  ;;  %v2921_v10 = vsub.f32 %v10291_v26, %v2860_v36  ;;  %v2825_v23 = vmul.f32 1.442695, %v2799_v19  ;;  %v2800_v19 = vsub.f32 %v10466_v22, %v10472_v3  ;;  %v10703_v22 = vld [vmem:[#allocation2 + $0xb0] sm:$0xff] }
 0x75b   : > { %v2941_v20 = vmul.f32 1.442695, %v2921_v10 }
 0x75c   : > { %3597 = vmax.xlane.f32.xlu0 %v10651_v11 }
 0x75d   : > { %8074 = vpow2.f32 %v2941_v20 }
 0x75e   : > { %v10659_v0 = vpop.permute.xlu2 %3105  ;;  %8076 = vpow2.f32 %v2943_v43 }
 0x75f   : > { %8078 = vpow2.f32 %v2825_v23  ;;  %v10675_v23 = vpop.f32.mrf.mxu2 }
 0x760   : > { %v10655_v14 = vpop.permute.xlu1 %3095  ;;  %12865 = vst [vmem:[#allocation44_spill] sm:$0xff] %v10675_v23 }
 0x763   : > { %v10661_v16 = vpop.eup %8074 }
 0x764   : > { %3202 = vmatmul.f32.gmra.mxu1 %v10661_v16  ;;  %v10666_v10 = vpop.eup %8076 }
 0x765   : > { %v10670_v44 = vpop.eup %8078 }
 0x766   : > { %v2875_v30 = vpop.permute.xlu2 %2874  ;;  %12864 = vst [vmem:[#allocation43_spill] sm:$0xff] %v10670_v44 }
 0x767   : > { %v2924_v25 = vsub.f32 %v10307_v32, %v2875_v30 }
 0x768   : > { %v2870_v26 = vpop.permute.xlu1 %2869 }
 0x769   : > { %v2923_v36 = vsub.f32 %v10301_v7, %v2870_v26  ;;  %v2947_v43 = vmul.f32 1.442695, %v2924_v25  ;;  %v2798_v7 = vsub.f32 %v10444_v47, %v10447_v38  ;;  %v10687_v26 = vpop.permute.xlu0 %3100  ;;  %v10692_v38 = vld [vmem:[#allocation2 + $0xb8] sm:$0xff] }
 0x76b   : > { %v2945_v33 = vmul.f32 1.442695, %v2923_v36  ;;  %3595 = vmax.xlane.f32.xlu1 %v10641_v5  ;;  %v2823_v32 = vmul.f32 1.442695, %v2798_v7  ;;  %v2827_v36 = vmul.f32 1.442695, %v2800_v19 }
 0x76c   : > { %3205 = vmatmul.f32.gmra.mxu1 %v10666_v10  ;;  %v3064_v19 = vld [vmem:[#allocation4 + $0x10] sm:$0xff] }
 0x76d   : > { %8080 = vpow2.f32 %v2945_v33 }
 0x76e   : > { %8082 = vpow2.f32 %v2947_v43 }
 0x76f   : > { %8084 = vpow2.f32 %v2823_v32  ;;  %v10711_v32 = vpop.f32.mrf.mxu2 }
 0x770   : > { %3130 = vperm.xlu0 %7957, %v10670_v44   ;;  %8086 = vpow2.f32 %v2827_v36  ;;  %12868 = vst [vmem:[#allocation47_spill] sm:$0xff] %v10711_v32  ;;  %v10713_v36 = vld [vmem:[#allocation2 + $0xc0] sm:$0xff]  ;;  %v3065_v44 = vld [vmem:[#allocation4 + $0x18] sm:$0xff] }
 0x773   : > { %v10673_v59 = vpop.eup %8080 }
 0x774   : > { %3208 = vmatmul.f32.gmra.mxu1 %v10673_v59  ;;  %v10682_v20 = vpop.eup %8082 }
 0x775   : > { %3599 = vmax.xlane.f32.xlu2 %v10675_v23  ;;  %v10689_v47 = vpop.eup %8084 }
 0x776   : > { %12866 = vst [vmem:[#allocation45_spill] sm:$0xff] %v10689_v47  ;;  %v10697_v25 = vpop.eup %8086 }
 0x777   : > { %12867 = vst [vmem:[#allocation46_spill] sm:$0xff] %v10697_v25  ;;  %v10719_v5 = vpop.f32.mrf.mxu2 }
 0x778   : > { %2899 = vperm.xlu0 %7957, %v10489_v17   ;;  %12869 = vst [vmem:[#allocation48_spill] sm:$0xff] %v10719_v5 }
 0x77c   : > { %3211 = vmatmul.f32.gmra.mxu1 %v10682_v20 }
 0x784   : > { %3125 = vperm.xlu1 %7955, %v10689_v47  }
 0x789   : > { %v3592_v30 = vpop.xlane.xlu0 %3591 }
 0x78a   : > { %v10695_v33 = vmax.f32 %v10692_v38, %v3592_v30 }
 0x78c   : > { %4179 = vst.msk [vmem:[#allocation2 + $0xb8] sm:$0xff] %vm3045_vm5, %v10695_v33  ;;  %2894 = vperm.xlu1 %7955, %v10472_v3   ;;  %v3160_v3 = vmul.f32 %v10626_v12, %v3064_v19  ;;  %v3161_v12 = vmul.f32 %v10655_v14, %v3065_v44 }
 0x78d   : > { %3135 = vperm.xlu2 %7956, %v10697_v25   ;;  %v2802_v25 = vsub.f32 %v10497_v24, %v10503_v15 }
 0x78f   : > { %v2831_v48 = vmul.f32 1.442695, %v2802_v25  ;;  %v10741_v25 = vpop.f32.mrf.mxu2 }
 0x790   : > { %12871 = vst [vmem:[#allocation50_spill] sm:$0xff] %v10741_v25 }
 0x791   : > { %8088 = vpow2.f32 %v2831_v48 }
 0x793   : > { %v3590_v43 = vpop.xlane.xlu1 %3589 }
 0x794   : > { %v10706_v7 = vmax.f32 %v10703_v22, %v3590_v43 }
 0x795   : > { %2904 = vperm.xlu2 %7956, %v10503_v15  }
 0x796   : > { %4178 = vst.msk [vmem:[#allocation2 + $0xb0] sm:$0xff] %vm3045_vm5, %v10706_v7 }
 0x79c   : > { %v10728_v47 = vpop.permute.xlu0 %3115 }
 0x79f   : > { %v3594_v30 = vpop.xlane.xlu2 %3593 }
 0x7a0   : > { %v10717_v23 = vmax.f32 %v10713_v36, %v3594_v30 }
 0x7a1   : > { %v3197_v43 = vpop.f32.mrf.mxu1 }
 0x7a2   : > { %4180 = vst.msk [vmem:[#allocation2 + $0xc0] sm:$0xff] %vm3045_vm5, %v10717_v23  ;;  %v3241_v11 = vadd.f32 %v3197_v43, %v3160_v3  ;;  %3603 = vmax.xlane.f32.xlu0 %v10719_v5  ;;  %v10736_v5 = vpop.eup %8088 }
 0x7a3   : > { %12870 = vst [vmem:[#allocation49_spill] sm:$0xff] %v10736_v5 }
 0x7a4   : > { %3257 = vst.msk [vmem:[#allocation4 + $0x10] sm:$0xff] %vm2563_vm4, %v3241_v11  ;;  %v2885_v24 = vpop.permute.xlu0 %2884 }
 0x7a5   : > { %v2926_v14 = vsub.f32 %v10318_v37, %v2885_v24 }
 0x7a7   : > { %v10733_v3 = vpop.permute.xlu2 %3120  ;;  %v2951_v44 = vmul.f32 1.442695, %v2926_v14 }
 0x7a9   : > { %v3200_v19 = vpop.f32.mrf.mxu1 }
 0x7aa   : > { %v3242_v30 = vadd.f32 %v3200_v19, %v3161_v12  ;;  %v3625_v19 = vsub.f32 %v10566_v63, %v10569_v21 }
 0x7ab   : > { %v10730_v58 = vpop.permute.xlu1 %3110 }
 0x7ac   : > { %3258 = vst.msk [vmem:[#allocation4 + $0x18] sm:$0xff] %vm2563_vm4, %v3242_v30 }
 0x7af   : > { %v2890_v48 = vpop.permute.xlu2 %2889 }
 0x7b0   : > { %v2927_v37 = vsub.f32 %v10323_v29, %v2890_v48  ;;  %v10763_v29 = vld [vmem:[#allocation2 + $0xd0] sm:$0xff]  ;;  %v10779_v48 = vld [vmem:[#allocation2 + $0xc8] sm:$0xff] }
 0x7b3   : > { %v2880_v43 = vpop.permute.xlu1 %2879 }
 0x7b4   : > { %v2925_v11 = vsub.f32 %v10313_v46, %v2880_v43  ;;  %v2801_v46 = vsub.f32 %v10480_v8, %v10489_v17  ;;  %v3641_v43 = vmul.f32 1.442695, %v3625_v19  ;;  %v2803_v8 = vsub.f32 %v10513_v45, %v10516_v13 }
 0x7b6   : > { %v2949_v15 = vmul.f32 1.442695, %v2925_v11  ;;  %3601 = vmax.xlane.f32.xlu1 %v10711_v32  ;;  %3145 = vperm.xlu0 %7957, %v10736_v5   ;;  %v2829_v30 = vmul.f32 1.442695, %v2801_v46  ;;  %v2953_v11 = vmul.f32 1.442695, %v2927_v37 }
 0x7b7   : > { %v2833_v17 = vmul.f32 1.442695, %v2803_v8  ;;  %v3066_v46 = vld [vmem:[#allocation4 + $0x20] sm:$0xff]  ;;  %v3067_v8 = vld [vmem:[#allocation4 + $0x28] sm:$0xff]  ;;  %v3069_v32 = vld [vmem:[#allocation4 + $0x38] sm:$0xff] }
 0x7b8   : > { %8090 = vpow2.f32 %v2949_v15 }
 0x7b9   : > { %8092 = vpow2.f32 %v2951_v44 }
 0x7ba   : > { %8094 = vpow2.f32 %v2829_v30  ;;  %v3162_v30 = vmul.f32 %v10687_v26, %v3066_v46  ;;  %v3068_v46 = vld [vmem:[#allocation4 + $0x30] sm:$0xff] }
 0x7bb   : > { %8096 = vpow2.f32 %v3641_v43 }
 0x7bc   : > { %8098 = vpow2.f32 %v2953_v11 }
 0x7bd   : > { %8100 = vpow2.f32 %v2833_v17  ;;  %v10788_v17 = vld [vmem:[#allocation2 + $0xd8] sm:$0xff] }
 0x7be   : > { %v10743_v12 = vpop.eup %8090  ;;  %3605 = vmax.xlane.f32.xlu2 %v10741_v25  ;;  %2914 = vperm.xlu0 %7957, %v10549_v49  }
 0x7bf   : > { %3214 = vmatmul.f32.gmra.mxu1 %v10743_v12  ;;  %v10753_v24 = vpop.eup %8092 }
 0x7c0   : > { %v10759_v63 = vpop.eup %8094 }
 0x7c1   : > { %v10761_v15 = vpop.eup %8096 }
 0x7c2   : > { %12872 = vst [vmem:[#allocation51_spill] sm:$0xff] %v10761_v15  ;;  %v10765_v14 = vpop.eup %8098 }
 0x7c3   : > { %v10775_v44 = vpop.eup %8100 }
 0x7c6   : > { %3675 = vperm.xlu0 %7957, %v10569_v21  }
 0x7c7   : > { %3217 = vmatmul.f32.gmra.mxu1 %v10753_v24 }
 0x7ce   : > { %3917 = vperm.xlu0 %7957, %v10761_v15  }
 0x7cf   : > { %3140 = vperm.xlu1 %7955, %v10759_v63   ;;  %3220 = vmatmul.f32.gmra.mxu1 %v10765_v14  ;;  %v3598_v45 = vpop.xlane.xlu0 %3597 }
 0x7d0   : > { %v10771_v21 = vmax.f32 %v10763_v29, %v3598_v45  ;;  %v3163_v45 = vmul.f32 %v10659_v0, %v3067_v8  ;;  %v3165_v8 = vmul.f32 %v10728_v47, %v3069_v32  ;;  %v3628_v47 = vsub.f32 %v10618_v52, %v10621_v4 }
 0x7d1   : > { %v3627_v52 = vsub.f32 %v10583_v50, %v10586_v1 }
 0x7d2   : > { %4182 = vst.msk [vmem:[#allocation2 + $0xd0] sm:$0xff] %vm3045_vm5, %v10771_v21 }
 0x7d6   : > { %3150 = vperm.xlu2 %7956, %v10775_v44  }
 0x7d7   : > { %2909 = vperm.xlu1 %7955, %v10516_v13  }
 0x7de   : > { %v3596_v19 = vpop.xlane.xlu1 %3595 }
 0x7df   : > { %v10782_v37 = vmax.f32 %v10779_v48, %v3596_v19 }
 0x7e1   : > { %4181 = vst.msk [vmem:[#allocation2 + $0xc8] sm:$0xff] %vm3045_vm5, %v10782_v37  ;;  %v3203_v43 = vpop.f32.mrf.mxu1 }
 0x7e2   : > { %v3243_v11 = vadd.f32 %v3203_v43, %v3162_v30  ;;  %v3164_v30 = vmul.f32 %v10730_v58, %v3068_v46  ;;  %v10799_v5 = vpop.permute.xlu0 %3130  ;;  %v10810_v46 = vpop.f32.mrf.mxu2 }
 0x7e3   : > { %12873 = vst [vmem:[#allocation52_spill] sm:$0xff] %v10810_v46 }
 0x7e4   : > { %3259 = vst.msk [vmem:[#allocation4 + $0x20] sm:$0xff] %vm2563_vm4, %v3243_v11 }
 0x7e8   : > { %v3600_v13 = vpop.xlane.xlu2 %3599 }
 0x7e9   : > { %v10792_v25 = vmax.f32 %v10788_v17, %v3600_v13  ;;  %v3206_v19 = vpop.f32.mrf.mxu1 }
 0x7ea   : > { %v3244_v26 = vadd.f32 %v3206_v19, %v3163_v45 }
 0x7eb   : > { %4183 = vst.msk [vmem:[#allocation2 + $0xd8] sm:$0xff] %vm3045_vm5, %v10792_v25 }
 0x7ec   : > { %3260 = vst.msk [vmem:[#allocation4 + $0x28] sm:$0xff] %vm2563_vm4, %v3244_v26 }
 0x7f0   : > { %v10806_v19 = vpop.permute.xlu2 %3135 }
 0x7f1   : > { %v3209_v43 = vpop.f32.mrf.mxu1 }
 0x7f2   : > { %v3245_v11 = vadd.f32 %v3209_v43, %v3164_v30  ;;  %v2900_v30 = vpop.permute.xlu0 %2899 }
 0x7f4   : > { %3261 = vst.msk [vmem:[#allocation4 + $0x30] sm:$0xff] %vm2563_vm4, %v3245_v11 }
 0x7f6   : > { %v10801_v0 = vpop.permute.xlu1 %3125 }
 0x7f8   : > { %3001 = vadd.xlane.f32.xlu0 %v10598_v54  ;;  %v2929_v54 = vsub.f32 %v10333_v57, %v2900_v30  ;;  %v2905_v11 = vpop.permute.xlu2 %2904 }
 0x7f9   : > { %v3212_v13 = vpop.f32.mrf.mxu1 }
 0x7fa   : > { %v3246_v45 = vadd.f32 %v3212_v13, %v3165_v8  ;;  %v2957_v32 = vmul.f32 1.442695, %v2929_v54  ;;  %v3647_v13 = vmul.f32 1.442695, %v3628_v47 }
 0x7fc   : > { %3262 = vst.msk [vmem:[#allocation4 + $0x38] sm:$0xff] %vm2563_vm4, %v3246_v45 }
 0x7fe   : > { %v2895_v58 = vpop.permute.xlu1 %2894 }
 0x7ff   : > { %v2928_v26 = vsub.f32 %v10328_v31, %v2895_v58  ;;  %2997 = vadd.xlane.f32.xlu2 %v10527_v55  ;;  %v2804_v31 = vsub.f32 %v10546_v9, %v10549_v49  ;;  %v2930_v55 = vsub.f32 %v10340_v27, %v2905_v11  ;;  %v10830_v9 = vld [vmem:[#allocation2 + $0xe8] sm:$0xff]  ;;  %v3645_v49 = vmul.f32 1.442695, %v3627_v52 }
 0x800   : > { %12875 = vst [vmem:[#allocation54_spill] sm:$0xff] %v10830_v9  ;;  %v3629_v27 = vsub.f32 %v10632_v51, %v10636_v2 }
 0x801   : > { %v2955_v43 = vmul.f32 1.442695, %v2928_v26  ;;  %3607 = vmax.xlane.f32.xlu1 %v10810_v46  ;;  %v2835_v57 = vmul.f32 1.442695, %v2804_v31  ;;  %v2959_v45 = vmul.f32 1.442695, %v2930_v55 }
 0x802   : > { %v3649_v54 = vmul.f32 1.442695, %v3629_v27  ;;  %v10861_v31 = vld [vmem:[#allocation2 + $0xf0] sm:$0xff] }
 0x803   : > { %8102 = vpow2.f32 %v2955_v43 }
 0x804   : > { %8104 = vpow2.f32 %v2957_v32  ;;  %v10854_v32 = vld [vmem:[#allocation2 + $0xe0] sm:$0xff] }
 0x805   : > { %8106 = vpow2.f32 %v3647_v13 }
 0x806   : > { %8108 = vpow2.f32 %v2835_v57 }
 0x807   : > { %8110 = vpow2.f32 %v2959_v45  ;;  %v3070_v45 = vld [vmem:[#allocation4 + $0x40] sm:$0xff] }
 0x808   : > { %8112 = vpow2.f32 %v3645_v49  ;;  %v3166_v52 = vmul.f32 %v10733_v3, %v3070_v45 }
 0x809   : > { %v10816_v8 = vpop.eup %8102  ;;  %8114 = vpow2.f32 %v3649_v54 }
 0x80a   : > { %3223 = vmatmul.f32.gmra.mxu1 %v10816_v8  ;;  %v10825_v58 = vpop.eup %8104 }
 0x80b   : > { %v10828_v26 = vpop.eup %8106 }
 0x80c   : > { %3690 = vperm.xlu0 %7957, %v10621_v4   ;;  %12874 = vst [vmem:[#allocation53_spill] sm:$0xff] %v10828_v26  ;;  %v10839_v50 = vpop.eup %8108 }
 0x80d   : > { %v10843_v43 = vpop.eup %8110 }
 0x80e   : > { %v10848_v51 = vpop.eup %8112 }
 0x80f   : > { %12876 = vst [vmem:[#allocation55_spill] sm:$0xff] %v10848_v51  ;;  %v10851_v47 = vpop.eup %8114 }
 0x812   : > { %3226 = vmatmul.f32.gmra.mxu1 %v10825_v58 }
 0x814   : > { %3932 = vperm.xlu0 %7957, %v10828_v26  }
 0x815   : > { %v3604_v4 = vpop.xlane.xlu0 %3603 }
 0x816   : > { %v10836_v30 = vmax.f32 %v10830_v9, %v3604_v4  ;;  %v3071_v4 = vld [vmem:[#allocation4 + $0x48] sm:$0xff] }
 0x817   : > { %3680 = vperm.xlu2 %7956, %v10577_v18   ;;  %v3167_v46 = vmul.f32 %v10801_v0, %v3071_v4  ;;  %v2965_v4 = vld [vmem:[#allocation3] sm:$0xff] }
 0x818   : > { %4185 = vst.msk [vmem:[#allocation2 + $0xe8] sm:$0xff] %vm3045_vm5, %v10836_v30 }
 0x81a   : > { %3155 = vperm.xlu1 %7955, %v10839_v50   ;;  %3229 = vmatmul.f32.gmra.mxu1 %v10843_v43 }
 0x81c   : > { %3700 = vperm.xlu0 %7957, %v10646_v61  }
 0x81f   : > { %3927 = vperm.xlu2 %7956, %v10848_v51   ;;  %v3072_v51 = vld [vmem:[#allocation4 + $0x50] sm:$0xff] }
 0x824   : > { %3937 = vperm.xlu0 %7957, %v10851_v47  }
 0x828   : > { %v10870_v54 = vpop.permute.xlu0 %3145 }
 0x829   : > { %v3602_v11 = vpop.xlane.xlu1 %3601 }
 0x82a   : > { %v10857_v13 = vmax.f32 %v10854_v32, %v3602_v11 }
 0x82c   : > { %4184 = vst.msk [vmem:[#allocation2 + $0xe0] sm:$0xff] %vm3045_vm5, %v10857_v13 }
 0x831   : > { %v3606_v55 = vpop.xlane.xlu2 %3605 }
 0x832   : > { %v10864_v57 = vmax.f32 %v10861_v31, %v3606_v55 }
 0x834   : > { %4186 = vst.msk [vmem:[#allocation2 + $0xf0] sm:$0xff] %vm3045_vm5, %v10864_v57 }
 0x83c   : > { %v3215_v49 = vpop.f32.mrf.mxu1 }
 0x83d   : > { %v3247_v27 = vadd.f32 %v3215_v49, %v3166_v52  ;;  %v3168_v52 = vmul.f32 %v10799_v5, %v3072_v51  ;;  %v2915_v49 = vpop.permute.xlu0 %2914 }
 0x83e   : > { %v2932_v0 = vsub.f32 %v10407_v60, %v2915_v49  ;;  %v3632_v60 = vsub.f32 %v10692_v38, %v10695_v33  ;;  %v2967_v38 = vld [vmem:[#allocation3 + $0x10] sm:$0xff] }
 0x83f   : > { %3263 = vst.msk [vmem:[#allocation4 + $0x40] sm:$0xff] %vm2563_vm4, %v3247_v27 }
 0x841   : > { %v3141_v11 = vpop.permute.xlu1 %3140 }
 0x844   : > { %2999 = vadd.xlane.f32.xlu1 %v10530_v34  ;;  %v3218_v55 = vpop.f32.mrf.mxu1  ;;  %v2963_v34 = vmul.f32 1.442695, %v2932_v0 }
 0x845   : > { %v3248_v9 = vadd.f32 %v3218_v55, %v3167_v46  ;;  %v2981_v55 = vmul.f32 %v10506_v40, %v2965_v4  ;;  %v3074_v40 = vld [vmem:[#allocation4 + $0x60] sm:$0xff]  ;;  %v3635_v4 = vsub.f32 %v10763_v29, %v10771_v21 }
 0x847   : > { %3264 = vst.msk [vmem:[#allocation4 + $0x48] sm:$0xff] %vm2563_vm4, %v3248_v9  ;;  %v10903_v9 = vpop.permute.xlu2 %3150 }
 0x848   : > { %3003 = vadd.xlane.f32.xlu2 %v10606_v39  ;;  %v10886_v39 = vpop.permute.xlu0 %3675 }
 0x849   : > { %v2910_v3 = vpop.permute.xlu1 %2909 }
 0x84a   : > { %v2931_v45 = vsub.f32 %v10347_v56, %v2910_v3  ;;  %v3626_v56 = vsub.f32 %v10574_v28, %v10577_v18 }
 0x84c   : > { %v2961_v27 = vmul.f32 1.442695, %v2931_v45  ;;  %v3221_v26 = vpop.f32.mrf.mxu1  ;;  %v3643_v5 = vmul.f32 1.442695, %v3626_v56  ;;  %v10909_v45 = vld [vmem:[#allocation2 + $0xf8] sm:$0xff] }
 0x84d   : > { %v3249_v15 = vadd.f32 %v3221_v26, %v3168_v52 }
 0x84e   : > { %8116 = vpow2.f32 %v2961_v27  ;;  %3009 = vadd.xlane.f32.xlu0 %v10673_v59  ;;  %v3655_v59 = vmul.f32 1.442695, %v3632_v60 }
 0x84f   : > { %3265 = vst.msk [vmem:[#allocation4 + $0x50] sm:$0xff] %vm2563_vm4, %v3249_v15  ;;  %8118 = vpow2.f32 %v2963_v34 }
 0x850   : > { %8120 = vpow2.f32 %v3643_v5  ;;  %v10896_v28 = vpop.permute.xlu0 %3917  ;;  %v3170_v5 = vmul.f32 %v3141_v11, %v3074_v40 }
 0x851   : > { %8122 = vpow2.f32 %v3655_v59 }
 0x854   : > { %v10881_v46 = vpop.eup %8116 }
 0x855   : > { %3232 = vmatmul.f32.gmra.mxu1 %v10881_v46  ;;  %v10890_v26 = vpop.eup %8118 }
 0x856   : > { %v10898_v18 = vpop.eup %8120 }
 0x857   : > { %v10901_v15 = vpop.eup %8122 }
 0x85d   : > { %3685 = vperm.xlu1 %7955, %v10586_v1   ;;  %3235 = vmatmul.f32.gmra.mxu1 %v10890_v26  ;;  %v2983_v1 = vmul.f32 %v10520_v6, %v2967_v38  ;;  %v3073_v6 = vld [vmem:[#allocation4 + $0x58] sm:$0xff]  ;;  %v3075_v38 = vld [vmem:[#allocation4 + $0x68] sm:$0xff] }
 0x85e   : > { %v3169_v0 = vmul.f32 %v10806_v19, %v3073_v6 }
 0x860   : > { %3695 = vperm.xlu2 %7956, %v10636_v2  }
 0x862   : > { %3715 = vperm.xlu0 %7957, %v10717_v23  }
 0x865   : > { %3922 = vperm.xlu1 %7955, %v10898_v18  }
 0x86a   : > { %3952 = vperm.xlu0 %7957, %v10901_v15  }
 0x86b   : > { %v3002_v51 = vpop.xlane.xlu0 %3001 }
 0x86c   : > { %v3031_v2 = vadd.f32 %v3002_v51, %v2983_v1  ;;  %v3171_v1 = vmul.f32 %v10870_v54, %v3075_v38  ;;  %v3661_v54 = vmul.f32 1.442695, %v3635_v4 }
 0x86e   : > { %3048 = vst.msk [vmem:[#allocation3 + $0x10] sm:$0xff] %vm3045_vm5, %v3031_v2 }
 0x872   : > { %v2998_v3 = vpop.xlane.xlu2 %2997 }
 0x873   : > { %v3029_v52 = vadd.f32 %v2998_v3, %v2981_v55 }
 0x874   : > { %v3608_v49 = vpop.xlane.xlu1 %3607 }
 0x875   : > { %3046 = vst.msk [vmem:[#allocation3] sm:$0xff] %vm3045_vm5, %v3029_v52  ;;  %v10913_v27 = vmax.f32 %v10909_v45, %v3608_v49 }
 0x877   : > { %4187 = vst.msk [vmem:[#allocation2 + $0xf8] sm:$0xff] %vm3045_vm5, %v10913_v27 }
 0x87e   : > { %v10927_v2 = vpop.permute.xlu0 %3690 }
 0x886   : > { %v10934_v55 = vpop.permute.xlu0 %3932 }
 0x887   : > { %v3224_v34 = vpop.f32.mrf.mxu1 }
 0x888   : > { %v3250_v56 = vadd.f32 %v3224_v34, %v3169_v0  ;;  %v2968_v0 = vld [vmem:[#allocation3 + $0x18] sm:$0xff] }
 0x889   : > { %3007 = vadd.xlane.f32.xlu2 %v10666_v10  ;;  %v3631_v10 = vsub.f32 %v10703_v22, %v10706_v7  ;;  %v10940_v22 = vpop.permute.xlu2 %3680  ;;  %v2984_v40 = vmul.f32 %v10559_v35, %v2968_v0  ;;  %v3077_v35 = vld [vmem:[#allocation4 + $0x78] sm:$0xff]  ;;  %v2969_v0 = vld [vmem:[#allocation3 + $0x20] sm:$0xff] }
 0x88a   : > { %3266 = vst.msk [vmem:[#allocation4 + $0x58] sm:$0xff] %vm2563_vm4, %v3250_v56 }
 0x88b   : > { %v3653_v11 = vmul.f32 1.442695, %v3631_v10 }
 0x88d   : > { %8124 = vpow2.f32 %v3653_v11 }
 0x88e   : > { %v10947_v29 = vpop.permute.xlu0 %3700 }
 0x88f   : > { %3005 = vadd.xlane.f32.xlu1 %v10661_v16  ;;  %v3227_v60 = vpop.f32.mrf.mxu1  ;;  %v3630_v16 = vsub.f32 %v10643_v41, %v10646_v61 }
 0x890   : > { %v3251_v59 = vadd.f32 %v3227_v60, %v3170_v5 }
 0x891   : > { %v10951_v52 = vpop.permute.xlu2 %3927 }
 0x892   : > { %3267 = vst.msk [vmem:[#allocation4 + $0x60] sm:$0xff] %vm2563_vm4, %v3251_v59  ;;  %v2971_v59 = vld [vmem:[#allocation3 + $0x30] sm:$0xff] }
 0x893   : > { %v10936_v3 = vpop.eup %8124  ;;  %v2987_v38 = vmul.f32 %v10615_v62, %v2971_v59  ;;  %v2974_v59 = vld [vmem:[#allocation3 + $0x48] sm:$0xff] }
 0x894   : > { %3015 = vadd.xlane.f32.xlu0 %v10753_v24  ;;  %v3651_v24 = vmul.f32 1.442695, %v3630_v16 }
 0x896   : > { %8126 = vpow2.f32 %v3651_v24  ;;  %v10954_v56 = vpop.permute.xlu0 %3937  ;;  %v3634_v24 = vsub.f32 %v10779_v48, %v10782_v37 }
 0x897   : > { %v3230_v19 = vpop.f32.mrf.mxu1  ;;  %8128 = vpow2.f32 %v3661_v54 }
 0x898   : > { %v3252_v51 = vadd.f32 %v3230_v19, %v3171_v1 }
 0x89a   : > { %3268 = vst.msk [vmem:[#allocation4 + $0x68] sm:$0xff] %vm2563_vm4, %v3252_v51 }
 0x89c   : > { %v10943_v41 = vpop.eup %8126 }
 0x89d   : > { %v10945_v61 = vpop.eup %8128 }
 0x8a1   : > { %3710 = vperm.xlu2 %7956, %v10695_v33   ;;  %v3156_v33 = vpop.permute.xlu1 %3155 }
 0x8a2   : > { %v3173_v16 = vmul.f32 %v3156_v33, %v3077_v35  ;;  %v3637_v35 = vsub.f32 %v10854_v32, %v10857_v13 }
 0x8a8   : > { %3705 = vperm.xlu1 %7955, %v10706_v7   ;;  %3730 = vperm.xlu0 %7957, %v10792_v25   ;;  %v2966_v7 = vld [vmem:[#allocation3 + $0x8] sm:$0xff] }
 0x8a9   : > { %3947 = vperm.xlu2 %7956, %v10936_v3   ;;  %v2982_v49 = vmul.f32 %v10389_v42, %v2966_v7  ;;  %v3076_v42 = vld [vmem:[#allocation4 + $0x70] sm:$0xff] }
 0x8aa   : > { %v3172_v51 = vmul.f32 %v10903_v9, %v3076_v42  ;;  %v3659_v9 = vmul.f32 1.442695, %v3634_v24  ;;  %v12879_v42 = vld [vmem:[#allocation30_spill] sm:$0xff] }
 0x8ac   : > { %8130 = vpow2.f32 %v3659_v9 }
 0x8b0   : > { %3942 = vperm.xlu1 %7955, %v10943_v41   ;;  %3967 = vperm.xlu0 %7957, %v10945_v61  }
 0x8b7   : > { %v3000_v6 = vpop.xlane.xlu1 %2999 }
 0x8b8   : > { %v3030_v34 = vadd.f32 %v3000_v6, %v2982_v49 }
 0x8ba   : > { %3047 = vst.msk [vmem:[#allocation3 + $0x8] sm:$0xff] %vm3045_vm5, %v3030_v34 }
 0x8bb   : > { %v3004_v5 = vpop.xlane.xlu2 %3003 }
 0x8bc   : > { %v3032_v60 = vadd.f32 %v3004_v5, %v2984_v40 }
 0x8be   : > { %3049 = vst.msk [vmem:[#allocation3 + $0x18] sm:$0xff] %vm3045_vm5, %v3032_v60 }
 0x8c1   : > { %v3010_v1 = vpop.xlane.xlu0 %3009 }
 0x8c2   : > { %v3035_v19 = vadd.f32 %v3010_v1, %v2987_v38  ;;  %v12878_v38 = vld [vmem:[#allocation45_spill] sm:$0xff] }
 0x8c3   : > { %v10979_v48 = vpop.permute.xlu2 %3695  ;;  %v2990_v1 = vmul.f32 %v12878_v38, %v2974_v59 }
 0x8c4   : > { %3052 = vst.msk [vmem:[#allocation3 + $0x30] sm:$0xff] %vm3045_vm5, %v3035_v19 }
 0x8d2   : > { %3013 = vadd.xlane.f32.xlu2 %v10743_v12  ;;  %v3233_v10 = vpop.f32.mrf.mxu1  ;;  %v3633_v12 = vsub.f32 %v10713_v36, %v10717_v23 }
 0x8d3   : > { %v3253_v11 = vadd.f32 %v3233_v10, %v3172_v51  ;;  %v3754_v51 = vsub.f32 %v12879_v42, %v10940_v22  ;;  %v12882_v42 = vld [vmem:[#allocation33_spill] sm:$0xff] }
 0x8d4   : > { %v3657_v54 = vmul.f32 1.442695, %v3633_v12  ;;  %v10981_v33 = vpop.permute.xlu0 %3715 }
 0x8d5   : > { %3269 = vst.msk [vmem:[#allocation4 + $0x70] sm:$0xff] %vm2563_vm4, %v3253_v11  ;;  %v3771_v10 = vmul.f32 1.442695, %v3754_v51  ;;  %v3757_v51 = vsub.f32 %v12882_v42, %v10979_v48  ;;  %v4192_v48 = vld [vmem:[%s8755_s18 + $0x20] sm:$0xff]  ;;  %v2975_v42 = vld [vmem:[#allocation3 + $0x50] sm:$0xff] }
 0x8d6   : > { %8132 = vpow2.f32 %v3657_v54 }
 0x8d7   : > { %8134 = vpow2.f32 %v3771_v10  ;;  %v3777_v10 = vmul.f32 1.442695, %v3757_v51  ;;  %v12885_v51 = vld [vmem:[#allocation43_spill] sm:$0xff] }
 0x8da   : > { %3011 = vadd.xlane.f32.xlu1 %v10682_v20  ;;  %3021 = vadd.xlane.f32.xlu0 %v10825_v58  ;;  %v3236_v62 = vpop.f32.mrf.mxu1  ;;  %v10973_v20 = vpop.permute.xlu1 %3685 }
 0x8db   : > { %v3254_v4 = vadd.f32 %v3236_v62, %v3173_v16  ;;  %v10975_v58 = vpop.eup %8130  ;;  %v3331_v16 = vld [vmem:[%s8759_s23 + $0x60] sm:$0xff]  ;;  %v3332_v62 = vld [vmem:[%s8759_s23 + $0x68] sm:$0xff] }
 0x8dc   : > { %v10983_v7 = vpop.eup %8132  ;;  %v10989_v34 = vpop.permute.xlu0 %3952  ;;  %v7958_v22 = vpack.i.bf16 %v3332_v62, %v3331_v16 }
 0x8dd   : > { %3270 = vst.msk [vmem:[#allocation4 + $0x78] sm:$0xff] %vm2563_vm4, %v3254_v4  ;;  %v11000_v11 = vpop.eup %8134  ;;  %v3665_v4 = vmul.f32 1.442695, %v3637_v35  ;;  %v12883_v35 = vld [vmem:[#allocation29_spill] sm:$0xff] }
 0x8de   : > { %v3753_v16 = vsub.f32 %v12883_v35, %v10886_v39 }
 0x8df   : > { %8136 = vpow2.f32 %v3665_v4 }
 0x8e0   : > { %v3769_v62 = vmul.f32 1.442695, %v3753_v16 }
 0x8e2   : > { %v10985_v23 = vpop.permute.xlu1 %3922 }
 0x8e5   : > { %v11015_v9 = vpop.eup %8136 }
 0x8ea   : > { %3725 = vperm.xlu2 %7956, %v10771_v21   ;;  %v2970_v21 = vld [vmem:[#allocation3 + $0x28] sm:$0xff] }
 0x8eb   : > { %v2986_v36 = vmul.f32 %v10563_v53, %v2970_v21  ;;  %v2973_v21 = vld [vmem:[#allocation3 + $0x40] sm:$0xff] }
 0x8ee   : > { %3745 = vperm.xlu0 %7957, %v10864_v57  }
 0x8f2   : > { %3962 = vperm.xlu2 %7956, %v10975_v58  }
 0x8f3   : > { %3720 = vperm.xlu1 %7955, %v10782_v37   ;;  %v12877_v37 = vld [vmem:[#allocation35_spill] sm:$0xff] }
 0x8f4   : > { %v2985_v40 = vmul.f32 %v12877_v37, %v2969_v0 }
 0x8fb   : > { %3957 = vperm.xlu1 %7955, %v10983_v7  }
 0x8fc   : > { %v3008_v49 = vpop.xlane.xlu2 %3007 }
 0x8fd   : > { %v3034_v6 = vadd.f32 %v3008_v49, %v2986_v36 }
 0x8ff   : > { %3051 = vst.msk [vmem:[#allocation3 + $0x28] sm:$0xff] %vm3045_vm5, %v3034_v6 }
 0x902   : > { %v3006_v5 = vpop.xlane.xlu1 %3005 }
 0x903   : > { %v3033_v60 = vadd.f32 %v3006_v5, %v2985_v40  ;;  %v2972_v40 = vld [vmem:[#allocation3 + $0x38] sm:$0xff]  ;;  %v2977_v5 = vld [vmem:[#allocation3 + $0x60] sm:$0xff] }
 0x904   : > { %v11008_v24 = vpop.permute.xlu2 %3710  ;;  %v2993_v38 = vmul.f32 %v10759_v63, %v2977_v5 }
 0x905   : > { %3050 = vst.msk [vmem:[#allocation3 + $0x20] sm:$0xff] %vm3045_vm5, %v3033_v60  ;;  %v12881_v60 = vld [vmem:[#allocation38_spill] sm:$0xff] }
 0x907   : > { %v3016_v19 = vpop.xlane.xlu0 %3015 }
 0x908   : > { %v3038_v53 = vadd.f32 %v3016_v19, %v2990_v1 }
 0x90a   : > { %3055 = vst.msk [vmem:[#allocation3 + $0x48] sm:$0xff] %vm3045_vm5, %v3038_v53 }
 0x90c   : > { %v11023_v54 = vpop.permute.xlu2 %3947 }
 0x918   : > { %3027 = vadd.xlane.f32.xlu0 %v10890_v26  ;;  %v4189_v26 = vld [vmem:[%s8755_s18 + $0x8] sm:$0xff] }
 0x91a   : > { %v11017_v12 = vpop.permute.xlu1 %3705  ;;  %v11020_v32 = vpop.permute.xlu0 %3730 }
 0x91b   : > { %3019 = vadd.xlane.f32.xlu2 %v10816_v8  ;;  %v3636_v8 = vsub.f32 %v10788_v17, %v10792_v25  ;;  %v12880_v25 = vld [vmem:[#allocation40_spill] sm:$0xff] }
 0x91c   : > { %v2989_v17 = vmul.f32 %v12880_v25, %v2973_v21  ;;  %v2980_v25 = vld [vmem:[#allocation3 + $0x78] sm:$0xff] }
 0x920   : > { %3836 = vadd.xlane.f32.xlu0 %v11000_v11 }
 0x922   : > { %v11029_v49 = vpop.permute.xlu1 %3942  ;;  %v11031_v0 = vpop.permute.xlu0 %3967 }
 0x925   : > { %3017 = vadd.xlane.f32.xlu1 %v10765_v14  ;;  %v3663_v14 = vmul.f32 1.442695, %v3636_v8  ;;  %v4188_v8 = vld [vmem:[%s8755_s18] sm:$0xff] }
 0x927   : > { %8138 = vpow2.f32 %v3663_v14 }
 0x928   : > { %8140 = vpow2.f32 %v3777_v10  ;;  %v2991_v10 = vmul.f32 %v12885_v51, %v2975_v42  ;;  %v2979_v42 = vld [vmem:[#allocation3 + $0x70] sm:$0xff]  ;;  %v3806_v51 = vld [vmem:[#allocation3 + $0xa0] sm:$0xff] }
 0x929   : > { %8142 = vpow2.f32 %v3769_v62  ;;  %v12886_v62 = vld [vmem:[#allocation37_spill] sm:$0xff] }
 0x92d   : > { %v11027_v36 = vpop.eup %8138 }
 0x92e   : > { %v11044_v63 = vpop.eup %8140 }
 0x92f   : > { %v11047_v4 = vpop.eup %8142 }
 0x933   : > { %3740 = vperm.xlu2 %7956, %v10836_v30  }
 0x934   : > { %7959 = vrot.lane.b32.xlu0 %v7958_v22, %s8530_s10  ;;  %v4195_v22 = vld [vmem:[%s8755_s18 + $0x38] sm:$0xff] }
 0x93b   : > { %3977 = vperm.xlu2 %7956, %v11015_v9  }
 0x93c   : > { %4254 = vrot.lane.b32.xlu0 %v4189_v26, %s8532_s11 }
 0x93e   : > { %3735 = vperm.xlu1 %7955, %v10857_v13   ;;  %v2988_v13 = vmul.f32 %v12881_v60, %v2972_v40  ;;  %v12884_v40 = vld [vmem:[#allocation46_spill] sm:$0xff] }
 0x945   : > { %v3014_v6 = vpop.xlane.xlu2 %3013 }
 0x946   : > { %v3037_v37 = vadd.f32 %v3014_v6, %v2989_v17  ;;  %3972 = vperm.xlu1 %7955, %v11027_v36   ;;  %v4191_v17 = vld [vmem:[%s8755_s18 + $0x18] sm:$0xff]  ;;  %v2996_v6 = vmul.f32 %v10839_v50, %v2980_v25  ;;  %v12888_v25 = vld [vmem:[#allocation31_spill] sm:$0xff] }
 0x948   : > { %3054 = vst.msk [vmem:[#allocation3 + $0x40] sm:$0xff] %vm3045_vm5, %v3037_v37  ;;  %v2976_v37 = vld [vmem:[#allocation3 + $0x58] sm:$0xff] }
 0x949   : > { %v2992_v5 = vmul.f32 %v12884_v40, %v2976_v37  ;;  %v4194_v40 = vld [vmem:[%s8755_s18 + $0x30] sm:$0xff] }
 0x94d   : > { %v3012_v59 = vpop.xlane.xlu1 %3011  ;;  %v3022_v19 = vpop.xlane.xlu0 %3021 }
 0x94e   : > { %v3036_v1 = vadd.f32 %v3012_v59, %v2988_v13  ;;  %v3041_v53 = vadd.f32 %v3022_v19, %v2993_v38  ;;  %v11053_v39 = vpop.permute.xlu2 %3725  ;;  %v3803_v59 = vld [vmem:[#allocation3 + $0x88] sm:$0xff] }
 0x94f   : > { %v3819_v50 = vmul.f32 %v10898_v18, %v3803_v59 }
 0x950   : > { %3053 = vst.msk [vmem:[#allocation3 + $0x38] sm:$0xff] %vm3045_vm5, %v3036_v1 }
 0x951   : > { %3058 = vst.msk [vmem:[#allocation3 + $0x60] sm:$0xff] %vm3045_vm5, %v3041_v53 }
 0x956   : > { %v11063_v21 = vpop.permute.xlu2 %3962 }
 0x960   : > { %v11060_v26 = vpop.permute.xlu0 %3745 }
 0x964   : > { %3025 = vadd.xlane.f32.xlu2 %v10881_v46  ;;  %v3639_v46 = vsub.f32 %v10861_v31, %v10864_v57 }
 0x966   : > { %3842 = vadd.xlane.f32.xlu0 %v11044_v63  ;;  %v3669_v14 = vmul.f32 1.442695, %v3639_v46 }
 0x968   : > { %8144 = vpow2.f32 %v3669_v14 }
 0x96c   : > { %3834 = vadd.xlane.f32.xlu2 %v11047_v4 }
 0x96e   : > { %v11073_v38 = vpop.eup %8144 }
 0x970   : > { %3023 = vadd.xlane.f32.xlu1 %v10843_v43  ;;  %v11065_v43 = vpop.permute.xlu1 %3720 }
 0x978   : > { %v11075_v1 = vpop.permute.xlu1 %3957 }
 0x97a   : > { %4260 = vrot.lane.b32.xlu0 %v4192_v48, %s8532_s11  ;;  %v3760_v48 = vsub.f32 %v12886_v62, %v11008_v24  ;;  %v3822_v62 = vmul.f32 %v10851_v47, %v3806_v51  ;;  %v12891_v47 = vld [vmem:[#allocation49_spill] sm:$0xff] }
 0x982   : > { %4266 = vrot.lane.b32.xlu0 %v4195_v22, %s8532_s11  ;;  %v3783_v22 = vmul.f32 1.442695, %v3760_v48 }
 0x984   : > { %4252 = vrot.lane.b32.xlu2 %v4188_v8, %s8532_s11  ;;  %8146 = vpow2.f32 %v3783_v22  ;;  %v12887_v8 = vld [vmem:[#allocation32_spill] sm:$0xff]  ;;  %v11122_v22 = vld [vmem:[%s8755_s18 + $0x10] sm:$0xff] }
 0x985   : > { %v3756_v18 = vsub.f32 %v12887_v8, %v10927_v2  ;;  %v4198_v2 = vld [vmem:[%s8755_s18 + $0x50] sm:$0xff]  ;;  %12889 = vst [vmem:[#allocation35_spill] sm:$0xff] %v11122_v22 }
 0x987   : > { %v3775_v46 = vmul.f32 1.442695, %v3756_v18 }
 0x989   : > { %3750 = vperm.xlu1 %7955, %v10913_v27   ;;  %8148 = vpow2.f32 %v3775_v46  ;;  %v3802_v46 = vld [vmem:[#allocation3 + $0x80] sm:$0xff] }
 0x98a   : > { %v11087_v14 = vpop.eup %8146 }
 0x98b   : > { %v3028_v31 = vpop.xlane.xlu0 %3027 }
 0x98c   : > { %v3044_v57 = vadd.f32 %v3028_v31, %v2996_v6  ;;  %4258 = vrot.lane.b32.xlu2 %v4191_v17, %s8532_s11  ;;  %v3755_v17 = vsub.f32 %v12888_v25, %v10973_v20  ;;  %v4201_v31 = vld [vmem:[%s8755_s18 + $0x68] sm:$0xff]  ;;  %v12890_v25 = vld [vmem:[#allocation51_spill] sm:$0xff] }
 0x98e   : > { %3061 = vst.msk [vmem:[#allocation3 + $0x78] sm:$0xff] %vm3045_vm5, %v3044_v57  ;;  %v3020_v60 = vpop.xlane.xlu2 %3019  ;;  %v3773_v6 = vmul.f32 1.442695, %v3755_v17 }
 0x98f   : > { %v3040_v13 = vadd.f32 %v3020_v60, %v2992_v5  ;;  %v11092_v24 = vpop.eup %8148  ;;  %v3333_v5 = vld [vmem:[%s8759_s23 + $0x70] sm:$0xff]  ;;  %v3334_v60 = vld [vmem:[%s8759_s23 + $0x78] sm:$0xff] }
 0x990   : > { %8150 = vpow2.f32 %v3773_v6  ;;  %v2978_v6 = vld [vmem:[#allocation3 + $0x68] sm:$0xff] }
 0x991   : > { %3057 = vst.msk [vmem:[#allocation3 + $0x58] sm:$0xff] %vm3045_vm5, %v3040_v13  ;;  %3987 = vperm.xlu1 %7955, %v11073_v38  }
 0x993   : > { %v3837_v19 = vpop.xlane.xlu0 %3836 }
 0x994   : > { %v3867_v53 = vadd.f32 %v3837_v19, %v3819_v50  ;;  %v7963_v50 = vpack.i.bf16 %v3334_v60, %v3333_v5 }
 0x996   : > { %3883 = vst.msk [vmem:[#allocation3 + $0x88] sm:$0xff] %vm3045_vm5, %v3867_v53  ;;  %v11095_v37 = vpop.eup %8150  ;;  %v11100_v20 = vpop.permute.xlu2 %3740  ;;  %v4197_v53 = vld [vmem:[%s8755_s18 + $0x48] sm:$0xff] }
 0x998   : > { %v3018_v35 = vpop.xlane.xlu1 %3017 }
 0x999   : > { %v3039_v16 = vadd.f32 %v3018_v35, %v2991_v10  ;;  %v2995_v10 = vmul.f32 %v10775_v44, %v2979_v42  ;;  %v3818_v44 = vmul.f32 %v12890_v25, %v3802_v46  ;;  %v12893_v42 = vld [vmem:[#allocation36_spill] sm:$0xff]  ;;  %v11155_v46 = vld [vmem:[%s8757_s12 + $0x18] sm:$0xff]  ;;  %v4200_v25 = vld [vmem:[%s8755_s18 + $0x60] sm:$0xff] }
 0x99a   : > { %v3759_v51 = vsub.f32 %v12893_v42, %v11017_v12  ;;  %v3805_v42 = vld [vmem:[#allocation3 + $0x98] sm:$0xff] }
 0x99b   : > { %3056 = vst.msk [vmem:[#allocation3 + $0x50] sm:$0xff] %vm3045_vm5, %v3039_v16 }
 0x99e   : > { %v11110_v13 = vpop.permute.xlu2 %3977 }
 0x9a6   : > { %v11103_v57 = vpop.permute.xlu0 %7959 }
 0x9ac   : > { %3848 = vadd.xlane.f32.xlu0 %v11087_v14 }
 0x9ae   : > { %v11112_v59 = vpop.permute.xlu0 %4254 }
 0x9b0   : > { %v11114_v19 = vpop.permute.xlu1 %3735 }
 0x9b5   : > { %3840 = vadd.xlane.f32.xlu2 %v11092_v24 }
 0x9b8   : > { %v11125_v18 = vpop.permute.xlu1 %3972 }
 0x9bb   : > { %3838 = vadd.xlane.f32.xlu1 %v11095_v37 }
 0x9c0   : > { %4272 = vrot.lane.b32.xlu0 %v4198_v2, %s8532_s11 }
 0x9c8   : > { %4278 = vrot.lane.b32.xlu0 %v4201_v31, %s8532_s11  ;;  %v2994_v31 = vmul.f32 %v12891_v47, %v2978_v6  ;;  %v4203_v6 = vld [vmem:[%s8755_s18 + $0x78] sm:$0xff] }
 0x9cd   : > { %4264 = vrot.lane.b32.xlu2 %v4194_v40, %s8532_s11  ;;  %v12892_v40 = vld [vmem:[#allocation42_spill] sm:$0xff] }
 0x9ce   : > { %v3763_v5 = vsub.f32 %v12892_v40, %v11053_v39 }
 0x9d4   : > { %7964 = vrot.lane.b32.xlu1 %v7963_v50, %s8530_s10 }
 0x9d5   : > { %4270 = vrot.lane.b32.xlu2 %v4197_v53, %s8532_s11  ;;  %v3789_v53 = vmul.f32 1.442695, %v3763_v5 }
 0x9d7   : > { %v3026_v35 = vpop.xlane.xlu2 %3025  ;;  %8152 = vpow2.f32 %v3789_v53  ;;  %v4196_v53 = vld [vmem:[%s8755_s18 + $0x40] sm:$0xff] }
 0x9d8   : > { %v3043_v16 = vadd.f32 %v3026_v35, %v2995_v10  ;;  %v3781_v35 = vmul.f32 1.442695, %v3759_v51 }
 0x9d9   : > { %v3843_v48 = vpop.xlane.xlu0 %3842 }
 0x9da   : > { %3060 = vst.msk [vmem:[#allocation3 + $0x70] sm:$0xff] %vm3045_vm5, %v3043_v16  ;;  %v3870_v8 = vadd.f32 %v3843_v48, %v3822_v62  ;;  %v12894_v16 = vld [vmem:[#allocation34_spill] sm:$0xff]  ;;  %8154 = vpow2.f32 %v3781_v35  ;;  %v12896_v35 = vld [vmem:[#allocation53_spill] sm:$0xff] }
 0x9db   : > { %v3758_v39 = vsub.f32 %v12894_v16, %v10947_v29  ;;  %v3821_v16 = vmul.f32 %v12896_v35, %v3805_v42  ;;  %v12900_v35 = vld [vmem:[#allocation39_spill] sm:$0xff] }
 0x9dc   : > { %3886 = vst.msk [vmem:[#allocation3 + $0xa0] sm:$0xff] %vm3045_vm5, %v3870_v8  ;;  %4256 = vrot.lane.b32.xlu1 %v11122_v22, %s8532_s11  ;;  %v11147_v8 = vld [vmem:[%s8757_s12] sm:$0xff] }
 0x9dd   : > { %v11138_v10 = vpop.eup %8152  ;;  %v3779_v62 = vmul.f32 1.442695, %v3758_v39 }
 0x9df   : > { %v3835_v17 = vpop.xlane.xlu2 %3834  ;;  %8156 = vpow2.f32 %v3779_v62 }
 0x9e0   : > { %v3866_v2 = vadd.f32 %v3835_v17, %v3818_v44  ;;  %v11143_v48 = vpop.eup %8154 }
 0x9e2   : > { %3882 = vst.msk [vmem:[#allocation3 + $0x80] sm:$0xff] %vm3045_vm5, %v3866_v2  ;;  %v3809_v2 = vld [vmem:[#allocation3 + $0xb8] sm:$0xff] }
 0x9e3   : > { %v3024_v60 = vpop.xlane.xlu1 %3023  ;;  %v3825_v40 = vmul.f32 %v10901_v15, %v3809_v2  ;;  %v12897_v15 = vld [vmem:[#allocation48_spill] sm:$0xff] }
 0x9e4   : > { %v3042_v50 = vadd.f32 %v3024_v60, %v2994_v31  ;;  %v11171_v31 = vld [vmem:[%s8755_s18 + $0x28] sm:$0xff]  ;;  %v3766_v62 = vsub.f32 %v12897_v15, %v11100_v20 }
 0x9e5   : > { %v11149_v12 = vpop.eup %8156  ;;  %12895 = vst [vmem:[#allocation45_spill] sm:$0xff] %v11171_v31 }
 0x9e6   : > { %3059 = vst.msk [vmem:[#allocation3 + $0x68] sm:$0xff] %vm3045_vm5, %v3042_v50  ;;  %v3795_v2 = vmul.f32 1.442695, %v3766_v62 }
 0x9e7   : > { %v11164_v17 = vpop.permute.xlu2 %4252 }
 0x9e8   : > { %8158 = vpow2.f32 %v3795_v2  ;;  %v12901_v2 = vld [vmem:[#allocation28_spill] sm:$0xff] }
 0x9ec   : > { %v11157_v29 = vpop.permute.xlu0 %4260 }
 0x9ee   : > { %v11190_v22 = vpop.eup %8158 }
 0x9ef   : > { %v11177_v60 = vpop.permute.xlu2 %4258 }
 0x9f2   : > { %3854 = vadd.xlane.f32.xlu0 %v11138_v10 }
 0x9f4   : > { %v11162_v44 = vpop.permute.xlu0 %4266 }
 0x9fb   : > { %v11168_v47 = vpop.permute.xlu1 %3750 }
 0x9fe   : > { %3846 = vadd.xlane.f32.xlu2 %v11143_v48 }
 0xa03   : > { %v11181_v51 = vpop.permute.xlu1 %3987 }
 0xa06   : > { %4300 = vrot.lane.b32.xlu0 %v11147_v8, %s8532_s11  ;;  %3844 = vadd.xlane.f32.xlu1 %v11149_v12 }
 0xa0e   : > { %4306 = vrot.lane.b32.xlu0 %v11155_v46, %s8532_s11 }
 0xa16   : > { %4276 = vrot.lane.b32.xlu2 %v4200_v25, %s8532_s11 }
 0xa1e   : > { %4282 = vrot.lane.b32.xlu2 %v4203_v6, %s8532_s11  ;;  %v3804_v6 = vld [vmem:[#allocation3 + $0x90] sm:$0xff] }
 0xa1f   : > { %4262 = vrot.lane.b32.xlu1 %v11171_v31, %s8532_s11  ;;  %v3849_v5 = vpop.xlane.xlu0 %3848 }
 0xa20   : > { %v3873_v50 = vadd.f32 %v3849_v5, %v3825_v40  ;;  %v12898_v40 = vld [vmem:[#allocation55_spill] sm:$0xff] }
 0xa21   : > { %v3820_v5 = vmul.f32 %v12898_v40, %v3804_v6  ;;  %v7962_v6 = vunpack.i.h.bf16 %v11103_v57  ;;  %v7954_v40 = vunpack.i.h.bf16 %v12901_v2 }
 0xa22   : > { %3889 = vst.msk [vmem:[#allocation3 + $0xb8] sm:$0xff] %vm3045_vm5, %v3873_v50 }
 0xa27   : > { %4268 = vrot.lane.b32.xlu1 %v4196_v53, %s8532_s11  ;;  %v12899_v53 = vld [vmem:[#allocation41_spill] sm:$0xff] }
 0xa28   : > { %v3841_v39 = vpop.xlane.xlu2 %3840  ;;  %v3762_v42 = vsub.f32 %v12899_v53, %v11065_v43  ;;  %v7961_v43 = vunpack.i.l.bf16 %v11103_v57  ;;  %v12902_v53 = vld [vmem:[#allocation26_spill] sm:$0xff]  ;;  %v12903_v57 = vld [vmem:[#allocation24_spill] sm:$0xff] }
 0xa29   : > { %v3869_v25 = vadd.f32 %v3841_v39, %v3821_v16  ;;  %v3761_v16 = vsub.f32 %v12900_v35, %v10981_v33  ;;  %v7944_v35 = vunpack.i.h.bf16 %v12903_v57 }
 0xa2a   : > { %v3787_v20 = vmul.f32 1.442695, %v3762_v42  ;;  %v7949_v42 = vunpack.i.h.bf16 %v12902_v53 }
 0xa2b   : > { %3885 = vst.msk [vmem:[#allocation3 + $0x98] sm:$0xff] %vm3045_vm5, %v3869_v25  ;;  %v3785_v15 = vmul.f32 1.442695, %v3761_v16  ;;  %v7943_v16 = vunpack.i.l.bf16 %v12903_v57 }
 0xa2c   : > { %8160 = vpow2.f32 %v3787_v20  ;;  %v7948_v20 = vunpack.i.l.bf16 %v12902_v53  ;;  %v3812_v53 = vld [vmem:[#allocation3 + $0xd0] sm:$0xff] }
 0xa2d   : > { %8162 = vpow2.f32 %v3785_v15  ;;  %v3828_v57 = vmul.f32 %v10945_v61, %v3812_v53  ;;  %v3808_v61 = vld [vmem:[#allocation3 + $0xb0] sm:$0xff] }
 0xa2e   : > { %v3839_v50 = vpop.xlane.xlu1 %3838 }
 0xa2f   : > { %v3868_v31 = vadd.f32 %v3839_v50, %v3820_v5  ;;  %v7953_v5 = vunpack.i.l.bf16 %v12901_v2  ;;  %v12905_v2 = vld [vmem:[#allocation25_spill] sm:$0xff] }
 0xa31   : > { %3884 = vst.msk [vmem:[#allocation3 + $0x90] sm:$0xff] %vm3045_vm5, %v3868_v31 }
 0xa32   : > { %v11197_v39 = vpop.eup %8160  ;;  %v11207_v50 = vpop.permute.xlu0 %4272 }
 0xa33   : > { %v11203_v33 = vpop.eup %8162 }
 0xa38   : > { %3860 = vadd.xlane.f32.xlu0 %v11190_v22 }
 0xa3a   : > { %v11213_v15 = vpop.permute.xlu0 %4278 }
 0xa46   : > { %v7965_v62 = vpop.permute.xlu1 %7964 }
 0xa47   : > { %3852 = vadd.xlane.f32.xlu2 %v11197_v39  ;;  %v7967_v25 = vunpack.i.h.bf16 %v7965_v62  ;;  %v7966_v31 = vunpack.i.l.bf16 %v7965_v62  ;;  %v12904_v62 = vld [vmem:[#allocation27_spill] sm:$0xff] }
 0xa49   : > { %4075 = vmatpush.msra.mxu3 %v7967_v25  ;;  %v7939_v25 = vunpack.i.h.bf16 %v12904_v62 }
 0xa4b   : > { %4076 = vmatpush.msra.mxu3 %v7966_v31  ;;  %v11217_v31 = vld [vmem:[%s8757_s12 + $0x10] sm:$0xff] }
 0xa4d   : > { %4077 = vmatpush.msra.mxu3 %v7962_v6  ;;  %v7938_v6 = vunpack.i.l.bf16 %v12904_v62 }
 0xa4e   : > { %v11243_v53 = vpop.permute.xlu1 %4256 }
 0xa4f   : > { %4078 = vmatpush.msra.mxu3 %v7961_v43  ;;  %v11220_v43 = vpop.permute.xlu2 %4264 }
 0xa51   : > { %3850 = vadd.xlane.f32.xlu1 %v11203_v33  ;;  %4079 = vmatpush.msra.mxu3 %v7954_v40  ;;  %v7934_v40 = vunpack.i.h.bf16 %v12905_v2 }
 0xa53   : > { %4080 = vmatpush.msra.mxu3 %v7953_v5  ;;  %v7933_v5 = vunpack.i.l.bf16 %v12905_v2 }
 0xa55   : > { %4081 = vmatpush.msra.mxu3 %v7949_v42  ;;  %v12906_v42 = vld [vmem:[#allocation23_spill] sm:$0xff] }
 0xa56   : > { %v7928_v62 = vunpack.i.l.bf16 %v12906_v42 }
 0xa57   : > { %4082 = vmatpush.msra.mxu3 %v7948_v20  ;;  %v7929_v20 = vunpack.i.h.bf16 %v12906_v42  ;;  %v11237_v2 = vpop.permute.xlu2 %4270 }
 0xa59   : > { %4083 = vmatpush.msra.mxu3 %v7944_v35  ;;  %v11229_v35 = vld [vmem:[%s8757_s12 + $0x28] sm:$0xff] }
 0xa5b   : > { %4084 = vmatpush.msra.mxu3 %v7943_v16 }
 0xa5d   : > { %4085 = vmatpush.msra.mxu3 %v7939_v25 }
 0xa5f   : > { %4304 = vrot.lane.b32.xlu2 %v11217_v31, %s8532_s11  ;;  %4086 = vmatpush.msra.mxu3 %v7938_v6  ;;  %v4199_v6 = vld [vmem:[%s8755_s18 + $0x58] sm:$0xff] }
 0xa61   : > { %4087 = vmatpush.msra.mxu3 %v7934_v40  ;;  %v4202_v40 = vld [vmem:[%s8755_s18 + $0x70] sm:$0xff] }
 0xa63   : > { %4088 = vmatpush.msra.mxu3 %v7933_v5  ;;  %v3824_v5 = vmul.f32 %v10936_v3, %v3808_v61  ;;  %v12907_v3 = vld [vmem:[#allocation47_spill] sm:$0xff] }
 0xa65   : > { %v3855_v16 = vpop.xlane.xlu0 %3854  ;;  %4089 = vmatpush.msra.mxu3 %v7929_v20 }
 0xa66   : > { %v3876_v25 = vadd.f32 %v3855_v16, %v3828_v57  ;;  %v3807_v57 = vld [vmem:[#allocation3 + $0xa8] sm:$0xff] }
 0xa67   : > { %4310 = vrot.lane.b32.xlu2 %v11229_v35, %s8532_s11  ;;  %4090 = vmatpush.msra.mxu3 %v7928_v62 }
 0xa68   : > { %3892 = vst.msk [vmem:[#allocation3 + $0xd0] sm:$0xff] %vm3045_vm5, %v3876_v25  ;;  %4091 = vmatmul.f32.vlgmr.msra.gmra.mxu3 %v11047_v4  ;;  %v3823_v4 = vmul.f32 %v10943_v41, %v3807_v57 }
 0xa6a   : > { %4274 = vrot.lane.b32.xlu1 %v4199_v6, %s8532_s11  ;;  %v12908_v6 = vld [vmem:[#allocation44_spill] sm:$0xff] }
 0xa6b   : > { %v3764_v61 = vsub.f32 %v12908_v6, %v11020_v32  ;;  %v11295_v6 = vld [vmem:[%s8757_s12 + $0x20] sm:$0xff] }
 0xa6d   : > { %v3791_v41 = vmul.f32 1.442695, %v3764_v61 }
 0xa70   : > { %4094 = vmatmul.f32.gmra.mxu3 %v11000_v11  ;;  %v3765_v11 = vsub.f32 %v12907_v3, %v11114_v19  ;;  %v11288_v3 = vld [vmem:[%s8757_s12 + $0x8] sm:$0xff] }
 0xa71   : > { %v3847_v42 = vpop.xlane.xlu2 %3846 }
 0xa72   : > { %v3872_v20 = vadd.f32 %v3847_v42, %v3824_v5  ;;  %4280 = vrot.lane.b32.xlu1 %v4202_v40, %s8532_s11  ;;  %v3793_v25 = vmul.f32 1.442695, %v3765_v11 }
 0xa74   : > { %3888 = vst.msk [vmem:[#allocation3 + $0xb0] sm:$0xff] %vm3045_vm5, %v3872_v20  ;;  %8164 = vpow2.f32 %v3793_v25  ;;  %v3815_v20 = vld [vmem:[#allocation3 + $0xe8] sm:$0xff] }
 0xa75   : > { %8166 = vpow2.f32 %v3791_v41  ;;  %v3810_v41 = vld [vmem:[#allocation3 + $0xc0] sm:$0xff] }
 0xa78   : > { %4097 = vmatmul.f32.gmra.mxu3 %v11095_v37  ;;  %v11257_v40 = vpop.permute.xlu0 %4300 }
 0xa79   : > { %v3845_v16 = vpop.xlane.xlu1 %3844  ;;  %v11270_v57 = vpop.permute.xlu2 %4276 }
 0xa7a   : > { %v3871_v62 = vadd.f32 %v3845_v16, %v3823_v4  ;;  %v8165_v37 = vpop.eup %8164  ;;  %v11277_v4 = vld [vmem:[%s8757_s12 + $0x58] sm:$0xff] }
 0xa7c   : > { %3887 = vst.msk [vmem:[#allocation3 + $0xa8] sm:$0xff] %vm3045_vm5, %v3871_v62 }
 0xa80   : > { %4100 = vmatmul.f32.gmra.mxu3 %v11092_v24  ;;  %v12909_v24 = vld [vmem:[#allocation54_spill] sm:$0xff]  ;;  %v11263_v32 = vpop.permute.xlu0 %4306 }
 0xa81   : > { %v3638_v19 = vsub.f32 %v12909_v24, %v10836_v30  ;;  %v11285_v62 = vpop.permute.xlu2 %4282  ;;  %v3826_v24 = vmul.f32 %v10983_v7, %v3810_v41  ;;  %v11315_v7 = vld [vmem:[%s8757_s12 + $0x48] sm:$0xff] }
 0xa82   : > { %v3900_v41 = vld [vmem:[#allocation4 + $0x88] sm:$0xff] }
 0xa83   : > { %v3667_v5 = vmul.f32 1.442695, %v3638_v19 }
 0xa85   : > { %8168 = vpow2.f32 %v3667_v5 }
 0xa88   : > { %4103 = vmatmul.f32.gmra.mxu3 %v11044_v63  ;;  %v8167_v63 = vpop.eup %8166 }
 0xa8b   : > { %v11268_v42 = vpop.eup %8168 }
 0xa8c   : > { %v3831_v30 = vmul.f32 %v11268_v42, %v3815_v20  ;;  %v12911_v20 = vld [vmem:[#allocation52_spill] sm:$0xff] }
 0xa90   : > { %3858 = vadd.xlane.f32.xlu2 %v8165_v37  ;;  %4106 = vmatmul.f32.gmra.mxu3 %v11149_v12  ;;  %v11266_v12 = vld [vmem:[%s8757_s12 + $0x40] sm:$0xff] }
 0xa91   : > { %v11283_v16 = vpop.permute.xlu1 %4262 }
 0xa98   : > { %4109 = vmatmul.f32.gmra.mxu3 %v11143_v48 }
 0xa9c   : > { %3856 = vadd.xlane.f32.xlu1 %v8167_v63 }
 0xaa0   : > { %4112 = vmatmul.f32.gmra.mxu3 %v11087_v14 }
 0xaa8   : > { %4316 = vrot.lane.b32.xlu2 %v11266_v12, %s8532_s11  ;;  %4115 = vmatmul.f32.gmra.mxu3 %v11203_v33  ;;  %v3811_v33 = vld [vmem:[#allocation3 + $0xc8] sm:$0xff] }
 0xaa9   : > { %v3827_v11 = vmul.f32 %v10975_v58, %v3811_v33  ;;  %v12910_v58 = vld [vmem:[#allocation50_spill] sm:$0xff]  ;;  %v11309_v33 = vld [vmem:[%s8757_s12 + $0x30] sm:$0xff] }
 0xaaa   : > { %v3767_v5 = vsub.f32 %v12910_v58, %v11060_v26  ;;  %4312 = vrot.lane.b32.xlu0 %v11309_v33, %s8532_s11 }
 0xaab   : > { %v3861_v14 = vpop.xlane.xlu0 %3860 }
 0xaac   : > { %v3879_v48 = vadd.f32 %v3861_v14, %v3831_v30  ;;  %v3768_v30 = vsub.f32 %v12911_v20, %v11168_v47  ;;  %v3797_v14 = vmul.f32 1.442695, %v3767_v5  ;;  %v11320_v47 = vld [vmem:[%s8757_s12 + $0x60] sm:$0xff]  ;;  %v3901_v5 = vld [vmem:[#allocation4 + $0x90] sm:$0xff] }
 0xaad   : > { %v3997_v20 = vmul.f32 %v10951_v52, %v3901_v5 }
 0xaae   : > { %3895 = vst.msk [vmem:[#allocation3 + $0xe8] sm:$0xff] %vm3045_vm5, %v3879_v48  ;;  %v3799_v48 = vmul.f32 1.442695, %v3768_v30  ;;  %8170 = vpow2.f32 %v3797_v14 }
 0xab0   : > { %4322 = vrot.lane.b32.xlu2 %v11277_v4, %s8532_s11  ;;  %4118 = vmatmul.f32.gmra.mxu3 %v11197_v39  ;;  %v11297_v39 = vpop.permute.xlu1 %4268  ;;  %8172 = vpow2.f32 %v3799_v48 }
 0xab2   : > { %4318 = vrot.lane.b32.xlu0 %v11315_v7, %s8532_s11 }
 0xab5   : > { %4302 = vrot.lane.b32.xlu1 %v11288_v3, %s8532_s11 }
 0xab8   : > { %4121 = vmatmul.f32.gmra.mxu3 %v11138_v10 }
 0xaba   : > { %v3853_v25 = vpop.xlane.xlu2 %3852  ;;  %4324 = vrot.lane.b32.xlu0 %v11320_v47, %s8532_s11 }
 0xabb   : > { %v3875_v61 = vadd.f32 %v3853_v25, %v3827_v11 }
 0xabd   : > { %3891 = vst.msk [vmem:[#allocation3 + $0xc8] sm:$0xff] %vm3045_vm5, %v3875_v61  ;;  %4308 = vrot.lane.b32.xlu1 %v11295_v6, %s8532_s11 }
 0xac0   : > { %4124 = vmatmul.f32.gmra.mxu3 %v8167_v63  ;;  %v3899_v63 = vld [vmem:[#allocation4 + $0x80] sm:$0xff] }
 0xac1   : > { %v3995_v11 = vmul.f32 %v10896_v28, %v3899_v63 }
 0xac4   : > { %v3851_v10 = vpop.xlane.xlu1 %3850 }
 0xac5   : > { %v3874_v19 = vadd.f32 %v3851_v10, %v3826_v24  ;;  %v11331_v24 = vpop.permute.xlu2 %4304  ;;  %v3996_v10 = vmul.f32 %v10985_v23, %v3900_v41  ;;  %v3902_v23 = vld [vmem:[#allocation4 + $0x98] sm:$0xff] }
 0xac6   : > { %v3998_v63 = vmul.f32 %v10934_v55, %v3902_v23 }
 0xac7   : > { %3890 = vst.msk [vmem:[#allocation3 + $0xc0] sm:$0xff] %vm3045_vm5, %v3874_v19 }
 0xac8   : > { %4127 = vmatmul.f32.gmra.mxu3 %v8165_v37  ;;  %v8171_v37 = vpop.eup %8170 }
 0xac9   : > { %v8173_v26 = vpop.eup %8172 }
 0xacd   : > { %v11336_v30 = vpop.permute.xlu2 %4310 }
 0xad0   : > { %4130 = vmatmul.f32.gmra.mxu3 %v11190_v22  ;;  %v11325_v22 = vld [vmem:[%s8757_s12 + $0x78] sm:$0xff] }
 0xad1   : > { %4330 = vrot.lane.b32.xlu0 %v11325_v22, %s8532_s11 }
 0xad8   : > { %4133 = vmatmul.f32.gmra.mxu3 %v8171_v37 }
 0xad9   : > { %3864 = vadd.xlane.f32.xlu2 %v8173_v26 }
 0xadc   : > { %v11338_v48 = vpop.permute.xlu1 %4274 }
 0xae0   : > { %4136 = vmatmul.f32.gmra.mxu3 %v8173_v26  ;;  %v3814_v26 = vld [vmem:[#allocation3 + $0xe0] sm:$0xff] }
 0xae1   : > { %v3830_v52 = vmul.f32 %v11015_v9, %v3814_v26  ;;  %v3904_v26 = vld [vmem:[#allocation4 + $0xa8] sm:$0xff] }
 0xae4   : > { %v11357_v5 = vpop.permute.xlu1 %4280 }
 0xae7   : > { %3862 = vadd.xlane.f32.xlu1 %v8171_v37  ;;  %v11341_v37 = vld [vmem:[%s8757_s12 + $0x38] sm:$0xff] }
 0xaeb   : > { %v4092_v25 = vpop.f32.mrf.mxu3 }
 0xaec   : > { %v4140_v61 = vadd.f32 %v4092_v25, %v3995_v11 }
 0xaee   : > { %4156 = vst.msk [vmem:[#allocation4 + $0x80] sm:$0xff] %vm2563_vm4, %v4140_v61 }
 0xaf3   : > { %v4095_v19 = vpop.f32.mrf.mxu3 }
 0xaf4   : > { %v4141_v58 = vadd.f32 %v4095_v19, %v3996_v10  ;;  %v11349_v10 = vld [vmem:[%s8757_s12 + $0x70] sm:$0xff] }
 0xaf5   : > { %v11352_v19 = vld [vmem:[%s8757_s12 + $0x50] sm:$0xff]  ;;  %4328 = vrot.lane.b32.xlu2 %v11349_v10, %s8532_s11 }
 0xaf6   : > { %4157 = vst.msk [vmem:[#allocation4 + $0x88] sm:$0xff] %vm2563_vm4, %v4141_v58  ;;  %v3903_v58 = vld [vmem:[#allocation4 + $0xa0] sm:$0xff] }
 0xaf7   : > { %v3999_v55 = vmul.f32 %v10954_v56, %v3903_v58 }
 0xafb   : > { %v4098_v28 = vpop.f32.mrf.mxu3 }
 0xafc   : > { %v4142_v14 = vadd.f32 %v4098_v28, %v3997_v20  ;;  %v3813_v20 = vld [vmem:[#allocation3 + $0xd8] sm:$0xff] }
 0xafd   : > { %v3829_v23 = vmul.f32 %v11027_v36, %v3813_v20  ;;  %v3906_v36 = vld [vmem:[#allocation4 + $0xb8] sm:$0xff] }
 0xafe   : > { %4158 = vst.msk [vmem:[#allocation4 + $0x90] sm:$0xff] %vm2563_vm4, %v4142_v14  ;;  %v11364_v14 = vld [vmem:[%s8757_s12 + $0x68] sm:$0xff]  ;;  %s8533_s12 = smov 32  }
 0xb00   : > { %4314 = vrot.lane.b32.xlu1 %v11341_v37, %s8532_s11 }
 0xb03   : > { %v3859_v11 = vpop.xlane.xlu2 %3858  ;;  %v4101_v25 = vpop.f32.mrf.mxu3 }
 0xb04   : > { %v3878_v61 = vadd.f32 %v3859_v11, %v3830_v52  ;;  %v4143_v41 = vadd.f32 %v4101_v25, %v3998_v63  ;;  %v4000_v11 = vmul.f32 %v11029_v49, %v3904_v26  ;;  %v3907_v49 = vld [vmem:[#allocation4 + $0xc0] sm:$0xff] }
 0xb06   : > { %3894 = vst.msk [vmem:[#allocation3 + $0xe0] sm:$0xff] %vm3045_vm5, %v3878_v61  ;;  %v3905_v61 = vld [vmem:[#allocation4 + $0xb0] sm:$0xff] }
 0xb07   : > { %4159 = vst.msk [vmem:[#allocation4 + $0x98] sm:$0xff] %vm2563_vm4, %v4143_v41  ;;  %v4001_v41 = vmul.f32 %v11023_v54, %v3905_v61 }
 0xb08   : > { %4320 = vrot.lane.b32.xlu1 %v11352_v19, %s8532_s11 }
 0xb0b   : > { %v4104_v9 = vpop.f32.mrf.mxu3 }
 0xb0c   : > { %v4144_v28 = vadd.f32 %v4104_v9, %v3999_v55  ;;  %v4002_v9 = vmul.f32 %v10989_v34, %v3906_v36  ;;  %v3640_v34 = vsub.f32 %v10909_v45, %v10913_v27  ;;  %v3910_v36 = vld [vmem:[#allocation4 + $0xd8] sm:$0xff] }
 0xb0e   : > { %4160 = vst.msk [vmem:[#allocation4 + $0xa0] sm:$0xff] %vm2563_vm4, %v4144_v28 }
 0xb0f   : > { %v3857_v63 = vpop.xlane.xlu1 %3856 }
 0xb10   : > { %v3877_v52 = vadd.f32 %v3857_v63, %v3829_v23  ;;  %4326 = vrot.lane.b32.xlu1 %v11364_v14, %s8532_s11  ;;  %v4003_v23 = vmul.f32 %v11075_v1, %v3907_v49 }
 0xb12   : > { %3893 = vst.msk [vmem:[#allocation3 + $0xd8] sm:$0xff] %vm3045_vm5, %v3877_v52  ;;  %v3908_v52 = vld [vmem:[#allocation4 + $0xc8] sm:$0xff] }
 0xb13   : > { %v4107_v56 = vpop.f32.mrf.mxu3  ;;  %v4004_v54 = vmul.f32 %v11063_v21, %v3908_v52  ;;  %v4006_v21 = vmul.f32 %v11125_v18, %v3910_v36 }
 0xb14   : > { %v4145_v25 = vadd.f32 %v4107_v56, %v4000_v11 }
 0xb16   : > { %4161 = vst.msk [vmem:[#allocation4 + $0xa8] sm:$0xff] %vm2563_vm4, %v4145_v25  ;;  %v3909_v25 = vld [vmem:[#allocation4 + $0xd0] sm:$0xff] }
 0xb17   : > { %v4005_v61 = vmul.f32 %v11031_v0, %v3909_v25  ;;  %v3817_v0 = vld [vmem:[#allocation3 + $0xf8] sm:$0xff] }
 0xb1b   : > { %v4110_v58 = vpop.f32.mrf.mxu3 }
 0xb1c   : > { %v4146_v55 = vadd.f32 %v4110_v58, %v4001_v41  ;;  %v4317_v41 = vpop.permute.xlu2 %4316 }
 0xb1e   : > { %4162 = vst.msk [vmem:[#allocation4 + $0xb0] sm:$0xff] %vm2563_vm4, %v4146_v55  ;;  %v3671_v55 = vmul.f32 1.442695, %v3640_v34 }
 0xb20   : > { %8174 = vpow2.f32 %v3671_v55 }
 0xb23   : > { %v4113_v20 = vpop.f32.mrf.mxu3 }
 0xb24   : > { %v4147_v28 = vadd.f32 %v4113_v20, %v4002_v9  ;;  %v4313_v9 = vpop.permute.xlu0 %4312 }
 0xb26   : > { %4163 = vst.msk [vmem:[#allocation4 + $0xb8] sm:$0xff] %vm2563_vm4, %v4147_v28  ;;  %v4323_v28 = vpop.permute.xlu2 %4322  ;;  %v11387_v45 = vpop.eup %8174 }
 0xb27   : > { %v4303_v27 = vpop.permute.xlu1 %4302 }
 0xb2b   : > { %v4116_v26 = vpop.f32.mrf.mxu3 }
 0xb2c   : > { %v4148_v63 = vadd.f32 %v4116_v26, %v4003_v23  ;;  %v3911_v23 = vld [vmem:[#allocation4 + $0xe0] sm:$0xff]  ;;  %v4319_v26 = vpop.permute.xlu0 %4318 }
 0xb2e   : > { %4164 = vst.msk [vmem:[#allocation4 + $0xc0] sm:$0xff] %vm2563_vm4, %v4148_v63  ;;  %v4007_v63 = vmul.f32 %v11110_v13, %v3911_v23 }
 0xb2f   : > { %v4309_v18 = vpop.permute.xlu1 %4308 }
 0xb33   : > { %v4119_v11 = vpop.f32.mrf.mxu3 }
 0xb34   : > { %v4149_v56 = vadd.f32 %v4119_v11, %v4004_v54  ;;  %v3833_v54 = vmul.f32 %v11387_v45, %v3817_v0  ;;  %v4325_v34 = vpop.permute.xlu0 %4324 }
 0xb36   : > { %4165 = vst.msk [vmem:[#allocation4 + $0xc8] sm:$0xff] %vm2563_vm4, %v4149_v56 }
 0xb3b   : > { %v4122_v58 = vpop.f32.mrf.mxu3 }
 0xb3c   : > { %v4150_v1 = vadd.f32 %v4122_v58, %v4005_v61  ;;  %v3816_v58 = vld [vmem:[#allocation3 + $0xf0] sm:$0xff] }
 0xb3d   : > { %v3832_v55 = vmul.f32 %v11073_v38, %v3816_v58  ;;  %v11561_v58 = vld [vmem:[#allocation2 + $0x130] sm:$0xff] }
 0xb3e   : > { %4166 = vst.msk [vmem:[#allocation4 + $0xd0] sm:$0xff] %vm2563_vm4, %v4150_v1  ;;  %v3913_v1 = vld [vmem:[#allocation4 + $0xf0] sm:$0xff] }
 0xb3f   : > { %v4009_v13 = vmul.f32 %v11181_v51, %v3913_v1 }
 0xb43   : > { %v4125_v20 = vpop.f32.mrf.mxu3 }
 0xb44   : > { %v4151_v49 = vadd.f32 %v4125_v20, %v4006_v21  ;;  %v4331_v21 = vpop.permute.xlu0 %4330 }
 0xb45   : > { %7536 = vmatpush.xpose.msk.msrb.mxu1 %vm2563_vm4, %v4331_v21 }
 0xb46   : > { %4167 = vst.msk [vmem:[#allocation4 + $0xd8] sm:$0xff] %vm2563_vm4, %v4151_v49 }
 0xb4b   : > { %v4128_v52 = vpop.f32.mrf.mxu3 }
 0xb4c   : > { %v4152_v11 = vadd.f32 %v4128_v52, %v4007_v63  ;;  %v3865_v56 = vpop.xlane.xlu2 %3864 }
 0xb4d   : > { %v3881_v25 = vadd.f32 %v3865_v56, %v3833_v54 }
 0xb4e   : > { %4168 = vst.msk [vmem:[#allocation4 + $0xe0] sm:$0xff] %vm2563_vm4, %v4152_v11  ;;  %v11546_v11 = vld [vmem:[#allocation2 + $0x128] sm:$0xff] }
 0xb4f   : > { %3897 = vst.msk [vmem:[#allocation3 + $0xf8] sm:$0xff] %vm3045_vm5, %v3881_v25 }
 0xb53   : > { %v11393_v61 = vpop.f32.mrf.mxu3 }
 0xb54   : > { %v4329_v0 = vpop.permute.xlu2 %4328 }
 0xb55   : > { %7537 = vmatpush.xpose.msk.msrb.mxu1 %vm2563_vm4, %v4329_v0 }
 0xb5a   : > { %v3863_v36 = vpop.xlane.xlu1 %3862 }
 0xb5b   : > { %v3880_v20 = vadd.f32 %v3863_v36, %v3832_v55  ;;  %v4134_v49 = vpop.f32.mrf.mxu3 }
 0xb5c   : > { %v4154_v23 = vadd.f32 %v4134_v49, %v4009_v13  ;;  %v11572_v13 = vld [vmem:[#allocation2 + $0x138] sm:$0xff]  ;;  %v11581_v49 = vld [vmem:[#allocation2 + $0x140] sm:$0xff] }
 0xb5d   : > { %3896 = vst.msk [vmem:[#allocation3 + $0xf0] sm:$0xff] %vm3045_vm5, %v3880_v20  ;;  %v3914_v20 = vld [vmem:[#allocation4 + $0xf8] sm:$0xff] }
 0xb5e   : > { %4170 = vst.msk [vmem:[#allocation4 + $0xf0] sm:$0xff] %vm2563_vm4, %v4154_v23 }
 0xb72   : > { %v4315_v63 = vpop.permute.xlu1 %4314 }
 0xb7a   : > { %v4321_v52 = vpop.permute.xlu1 %4320 }
 0xb82   : > { %v4327_v54 = vpop.permute.xlu1 %4326 }
 0xb83   : > { %7538 = vmatpush.xpose.msk.msrb.mxu1 %vm2563_vm4, %v4327_v54 }
 0xb87   : > { %7539 = vmatpush.xpose.msk.msrb.mxu1 %vm2563_vm4, %v4325_v34 }
 0xb8b   : > { %7540 = vmatpush.xpose.msk.msrb.mxu1 %vm2563_vm4, %v4323_v28 }
 0xb8f   : > { %7541 = vmatpush.xpose.msk.msrb.mxu1 %vm2563_vm4, %v4321_v52  ;;  %v4137_v52 = vpop.f32.mrf.mxu3 }
 0xb93   : > { %7542 = vmatpush.xpose.msk.msrb.mxu1 %vm2563_vm4, %v4319_v26 }
 0xb97   : > { %7543 = vmatpush.xpose.msk.msrb.mxu1 %vm2563_vm4, %v4317_v41 }
 0xb9b   : > { %7544 = vmatpush.xpose.msk.msrb.mxu1 %vm2563_vm4, %v4315_v63 }
 0xb9f   : > { %7545 = vmatpush.xpose.msk.msrb.mxu1 %vm2563_vm4, %v4313_v9  ;;  %v11771_v9 = vld [vmem:[%s8759_s23 + $0x28] sm:$0xff] }
 0xba0   : > { %12917 = vst [vmem:[#allocation33_spill] sm:$0xff] %v11771_v9 }
 0xba3   : > { %7546 = vmatpush.xpose.msk.msrb.mxu1 %vm2563_vm4, %v11336_v30 }
 0xba7   : > { %7547 = vmatpush.xpose.msk.msrb.mxu1 %vm2563_vm4, %v4309_v18 }
 0xbab   : > { %7548 = vmatpush.xpose.msk.msrb.mxu1 %vm2563_vm4, %v11263_v32 }
 0xbaf   : > { %7549 = vmatpush.xpose.msk.msrb.mxu1 %vm2563_vm4, %v11331_v24 }
 0xbb3   : > { %7550 = vmatpush.xpose.msk.msrb.mxu1 %vm2563_vm4, %v4303_v27 }
 0xbb7   : > { %7551 = vmatpush.xpose.msk.msrb.mxu1 %vm2563_vm4, %v11257_v40 }
 0xbba   : > { %7552 = vmatmul.msk.f32.vlgmr.msrb.gmra.mxu1 %vm2563_vm4, %v11164_v17 }
 0xbc2   : > { %7553 = vmatmul.msk.f32.gmra.mxu1 %vm2563_vm4, %v11112_v59 }
 0xbca   : > { %7554 = vmatmul.msk.f32.gmra.mxu1 %vm2563_vm4, %v11243_v53  ;;  %v11493_v53 = vld [vmem:[#allocation2 + $0x100] sm:$0xff] }
 0xbd2   : > { %7555 = vmatmul.msk.f32.gmra.mxu1 %vm2563_vm4, %v11177_v60 }
 0xbda   : > { %7556 = vmatmul.msk.f32.gmra.mxu1 %vm2563_vm4, %v11157_v29 }
 0xbe2   : > { %7557 = vmatmul.msk.f32.gmra.mxu1 %vm2563_vm4, %v11283_v16  ;;  %v11504_v16 = vld [vmem:[#allocation2 + $0x108] sm:$0xff] }
 0xbea   : > { %7558 = vmatmul.msk.f32.gmra.mxu1 %vm2563_vm4, %v11220_v43 }
 0xbf2   : > { %7559 = vmatmul.msk.f32.gmra.mxu1 %vm2563_vm4, %v11162_v44 }
 0xbfa   : > { %7560 = vmatmul.msk.f32.gmra.mxu1 %vm2563_vm4, %v11297_v39 }
 0xc02   : > { %7561 = vmatmul.msk.f32.gmra.mxu1 %vm2563_vm4, %v11237_v2 }
 0xc0a   : > { %7562 = vmatmul.msk.f32.gmra.mxu1 %vm2563_vm4, %v11207_v50 }
 0xc12   : > { %7563 = vmatmul.msk.f32.gmra.mxu1 %vm2563_vm4, %v11338_v48 }
 0xc1a   : > { %7564 = vmatmul.msk.f32.gmra.mxu1 %vm2563_vm4, %v11270_v57  ;;  %v5098_v57 = vld [vmem:[%s8755_s18 + $0x48] sm:$0xff] }
 0xc22   : > { %7565 = vmatmul.msk.f32.gmra.mxu1 %vm2563_vm4, %v11213_v15 }
 0xc2a   : > { %7566 = vmatmul.msk.f32.gmra.mxu1 %vm2563_vm4, %v11357_v5  ;;  %v11527_v5 = vld [vmem:[#allocation2 + $0x118] sm:$0xff] }
 0xc32   : > { %7567 = vmatmul.msk.f32.gmra.mxu1 %vm2563_vm4, %v11285_v62 }
 0xc37   : > { %v11451_v38 = vpop.f32.mrf.mxu1 }
 0xc38   : > { %4478 = vmax.xlane.f32.xlu1 %v11451_v38 }
 0xc3f   : > { %v11454_v59 = vpop.f32.mrf.mxu1 }
 0xc40   : > { %4480 = vmax.xlane.f32.xlu2 %v11454_v59 }
 0xc47   : > { %v11457_v29 = vpop.f32.mrf.mxu1 }
 0xc48   : > { %4482 = vmax.xlane.f32.xlu0 %v11457_v29 }
 0xc4f   : > { %v11460_v44 = vpop.f32.mrf.mxu1 }
 0xc50   : > { %4484 = vmax.xlane.f32.xlu1 %v11460_v44 }
 0xc57   : > { %v11463_v17 = vpop.f32.mrf.mxu1 }
 0xc58   : > { %4486 = vmax.xlane.f32.xlu2 %v11463_v17 }
 0xc5f   : > { %v11466_v60 = vpop.f32.mrf.mxu1 }
 0xc60   : > { %4488 = vmax.xlane.f32.xlu0 %v11466_v60 }
 0xc67   : > { %v11469_v51 = vpop.f32.mrf.mxu1 }
 0xc68   : > { %4490 = vmax.xlane.f32.xlu1 %v11469_v51 }
 0xc6f   : > { %v11472_v50 = vpop.f32.mrf.mxu1 }
 0xc70   : > { %4492 = vmax.xlane.f32.xlu2 %v11472_v50 }
 0xc77   : > { %v11475_v15 = vpop.f32.mrf.mxu1 }
 0xc78   : > { %4494 = vmax.xlane.f32.xlu0 %v11475_v15 }
 0xc7f   : > { %v11478_v43 = vpop.f32.mrf.mxu1 }
 0xc80   : > { %4496 = vmax.xlane.f32.xlu1 %v11478_v43 }
 0xc87   : > { %v11489_v2 = vpop.f32.mrf.mxu1 }
 0xc88   : > { %3992 = vperm.xlu2 %7956, %v11387_v45   ;;  %v11538_v45 = vld [vmem:[#allocation2 + $0x120] sm:$0xff] }
 0xc8c   : > { %3982 = vperm.xlu0 %7957, %v11268_v42  }
 0xc8f   : > { %v11495_v40 = vpop.f32.mrf.mxu1 }
 0xc90   : > { %5227 = vrot.lane.b32.xlu2 %v11364_v14, %s8533_s12 }
 0xc94   : > { %5231 = vrot.lane.b32.xlu0 %v11325_v22, %s8533_s12  ;;  %v11514_v22 = vld [vmem:[#allocation2 + $0x110] sm:$0xff] }
 0xc97   : > { %v11506_v39 = vpop.f32.mrf.mxu1 }
 0xc99   : > { %5229 = vrot.lane.b32.xlu1 %v11349_v10, %s8533_s12 }
 0xc9f   : > { %v11519_v48 = vpop.f32.mrf.mxu1 }
 0xca1   : > { %5223 = vrot.lane.b32.xlu1 %v11277_v4, %s8533_s12 }
 0xca7   : > { %v11536_v28 = vpop.f32.mrf.mxu1 }
 0xcab   : > { %v4479_v32 = vpop.xlane.xlu1 %4478 }
 0xcac   : > { %v11498_v42 = vmax.f32 %v11493_v53, %v4479_v32  ;;  %v11743_v32 = vld [vmem:[%s8759_s23 + $0x18] sm:$0xff] }
 0xcad   : > { %12915 = vst [vmem:[#allocation40_spill] sm:$0xff] %v11743_v32 }
 0xcae   : > { %5073 = vst.msk [vmem:[#allocation2 + $0x100] sm:$0xff] %vm3045_vm5, %v11498_v42 }
 0xcaf   : > { %v11548_v56 = vpop.f32.mrf.mxu1 }
 0xcb3   : > { %v4481_v62 = vpop.xlane.xlu2 %4480 }
 0xcb4   : > { %v11509_v4 = vmax.f32 %v11504_v16, %v4481_v62 }
 0xcb6   : > { %5074 = vst.msk [vmem:[#allocation2 + $0x108] sm:$0xff] %vm3045_vm5, %v11509_v4 }
 0xcb9   : > { %4498 = vmax.xlane.f32.xlu2 %v11489_v2 }
 0xcbb   : > { %v4483_v24 = vpop.xlane.xlu0 %4482 }
 0xcbc   : > { %v11517_v30 = vmax.f32 %v11514_v22, %v4483_v24 }
 0xcbe   : > { %5075 = vst.msk [vmem:[#allocation2 + $0x110] sm:$0xff] %vm3045_vm5, %v11517_v30  ;;  %4500 = vmax.xlane.f32.xlu0 %v11495_v40 }
 0xcc1   : > { %4504 = vmax.xlane.f32.xlu2 %v11519_v48 }
 0xcc3   : > { %v4485_v14 = vpop.xlane.xlu1 %4484 }
 0xcc4   : > { %v11530_v41 = vmax.f32 %v11527_v5, %v4485_v14 }
 0xcc6   : > { %5076 = vst.msk [vmem:[#allocation2 + $0x118] sm:$0xff] %vm3045_vm5, %v11530_v41 }
 0xccb   : > { %v4487_v27 = vpop.xlane.xlu2 %4486  ;;  %4502 = vmax.xlane.f32.xlu1 %v11506_v39 }
 0xccc   : > { %v11542_v26 = vmax.f32 %v11538_v45, %v4487_v27 }
 0xcce   : > { %5077 = vst.msk [vmem:[#allocation2 + $0x120] sm:$0xff] %vm3045_vm5, %v11542_v26 }
 0xcd2   : > { %5225 = vrot.lane.b32.xlu0 %v11320_v47, %s8533_s12 }
 0xcd3   : > { %v4489_v25 = vpop.xlane.xlu0 %4488  ;;  %4508 = vmax.xlane.f32.xlu1 %v11548_v56 }
 0xcd4   : > { %v11554_v18 = vmax.f32 %v11546_v11, %v4489_v25 }
 0xcd6   : > { %5078 = vst.msk [vmem:[#allocation2 + $0x128] sm:$0xff] %vm3045_vm5, %v11554_v18 }
 0xcd9   : > { %4576 = vperm.xlu2 %7956, %v11498_v42  }
 0xcdb   : > { %v4491_v1 = vpop.xlane.xlu1 %4490 }
 0xcdc   : > { %v11564_v55 = vmax.f32 %v11561_v58, %v4491_v1 }
 0xcde   : > { %5079 = vst.msk [vmem:[#allocation2 + $0x130] sm:$0xff] %vm3045_vm5, %v11564_v55 }
 0xce1   : > { %5217 = vrot.lane.b32.xlu2 %v11266_v12, %s8533_s12 }
 0xce3   : > { %v4493_v36 = vpop.xlane.xlu2 %4492 }
 0xce4   : > { %v11575_v21 = vmax.f32 %v11572_v13, %v4493_v36  ;;  %v4220_v36 = vld [vmem:[%s8759_s23] sm:$0xff] }
 0xce6   : > { %5080 = vst.msk [vmem:[#allocation2 + $0x138] sm:$0xff] %vm3045_vm5, %v11575_v21 }
 0xce9   : > { %5211 = vrot.lane.b32.xlu2 %v11229_v35, %s8533_s12  ;;  %v11595_v35 = vld [vmem:[#allocation2 + $0x148] sm:$0xff] }
 0xceb   : > { %v3993_v23 = vpop.permute.xlu2 %3992  ;;  %v4495_v0 = vpop.xlane.xlu0 %4494 }
 0xcec   : > { %v4010_v63 = vmul.f32 %v3993_v23, %v3914_v20  ;;  %v11584_v12 = vmax.f32 %v11581_v49, %v4495_v0  ;;  %5219 = vrot.lane.b32.xlu1 %v11315_v7, %s8533_s12  ;;  %v4221_v20 = vld [vmem:[%s8759_s23 + $0x8] sm:$0xff]  ;;  %v8304_v0 = vld [vmem:[%s8755_s18 + $0x30] sm:$0xff] }
 0xced   : > { %v7968_v23 = vpack.i.bf16 %v4221_v20, %v4220_v36 }
 0xcee   : > { %v4155_v54 = vadd.f32 %v4137_v52, %v4010_v63  ;;  %5081 = vst.msk [vmem:[#allocation2 + $0x140] sm:$0xff] %vm3045_vm5, %v11584_v12 }
 0xcf0   : > { %4171 = vst.msk [vmem:[#allocation4 + $0xf8] sm:$0xff] %vm2563_vm4, %v4155_v54  ;;  %v11653_v54 = vld [vmem:[#allocation2 + $0x158] sm:$0xff] }
 0xcf1   : > { %5207 = vrot.lane.b32.xlu2 %v11155_v46, %s8533_s12  ;;  %v3912_v46 = vld [vmem:[#allocation4 + $0xe8] sm:$0xff] }
 0xcf3   : > { %v4497_v62 = vpop.xlane.xlu1 %4496 }
 0xcf4   : > { %v11598_v24 = vmax.f32 %v11595_v35, %v4497_v62  ;;  %4586 = vperm.xlu1 %7955, %v11517_v30  }
 0xcf6   : > { %5082 = vst.msk [vmem:[#allocation2 + $0x148] sm:$0xff] %vm3045_vm5, %v11598_v24 }
 0xcf9   : > { %4591 = vperm.xlu2 %7956, %v11530_v41  }
 0xcfc   : > { %4506 = vmax.xlane.f32.xlu0 %v11536_v28  ;;  %5213 = vrot.lane.b32.xlu1 %v11309_v33, %s8533_s12 }
 0xcfe   : > { %v3983_v14 = vpop.permute.xlu0 %3982 }
 0xcff   : > { %v4008_v27 = vmul.f32 %v3983_v14, %v3912_v46  ;;  %v11660_v14 = vld [vmem:[#allocation2 + $0x168] sm:$0xff] }
 0xd01   : > { %v4153_v25 = vadd.f32 %v11393_v61, %v4008_v27  ;;  %5201 = vrot.lane.b32.xlu2 %v11147_v8, %s8533_s12  ;;  %v5228_v8 = vpop.permute.xlu2 %5227  ;;  %v5093_v61 = vld [vmem:[%s8755_s18 + $0x20] sm:$0xff] }
 0xd03   : > { %4169 = vst.msk [vmem:[#allocation4 + $0xe8] sm:$0xff] %vm2563_vm4, %v4153_v25 }
 0xd04   : > { %5209 = vrot.lane.b32.xlu1 %v11295_v6, %s8533_s12  ;;  %v5090_v6 = vld [vmem:[%s8755_s18 + $0x8] sm:$0xff] }
 0xd06   : > { %v5232_v1 = vpop.permute.xlu0 %5231 }
 0xd07   : > { %7568 = vmatpush.xpose.msk.msrb.mxu0 %vm2563_vm4, %v5232_v1  ;;  %7667 = vmatpush.xpose.msk.msra.mxu1 %vm2563_vm4, %v5232_v1 }
 0xd09   : > { %4601 = vperm.xlu2 %7956, %v11554_v18  }
 0xd0b   : > { %v5230_v33 = vpop.permute.xlu1 %5229 }
 0xd0c   : > { %5203 = vrot.lane.b32.xlu1 %v11288_v3, %s8533_s12  ;;  %7569 = vmatpush.xpose.msk.msrb.mxu0 %vm2563_vm4, %v5230_v33  ;;  %v12912_v3 = vld [vmem:[#allocation35_spill] sm:$0xff] }
 0xd0d   : > { %7668 = vmatpush.xpose.msk.msra.mxu1 %vm2563_vm4, %v5230_v33 }
 0xd10   : > { %4581 = vperm.xlu0 %7957, %v11509_v4   ;;  %7570 = vmatpush.xpose.msk.msrb.mxu0 %vm2563_vm4, %v5228_v8 }
 0xd11   : > { %5155 = vrot.lane.b32.xlu2 %v5090_v6, %s8533_s12  ;;  %7669 = vmatpush.xpose.msk.msra.mxu1 %vm2563_vm4, %v5228_v8  ;;  %v11676_v6 = vld [vmem:[#allocation2 + $0x160] sm:$0xff]  ;;  %v11710_v8 = vld [vmem:[#allocation2 + $0x170] sm:$0xff] }
 0xd13   : > { %v5224_v1 = vpop.permute.xlu1 %5223 }
 0xd14   : > { %4606 = vperm.xlu1 %7955, %v11564_v55  }
 0xd18   : > { %5221 = vrot.lane.b32.xlu0 %v11352_v19, %s8533_s12  ;;  %v11643_v19 = vld [vmem:[#allocation2 + $0x150] sm:$0xff] }
 0xd19   : > { %5161 = vrot.lane.b32.xlu2 %v5093_v61, %s8533_s12 }
 0xd1c   : > { %5157 = vrot.lane.b32.xlu1 %v12912_v3, %s8533_s12 }
 0xd20   : > { %5215 = vrot.lane.b32.xlu0 %v11341_v37, %s8533_s12 }
 0xd21   : > { %4616 = vperm.xlu2 %7956, %v11584_v12  }
 0xd24   : > { %7969 = vrot.lane.b32.xlu1 %v7968_v23, %s8532_s11  ;;  %v11687_v23 = vld [vmem:[#allocation2 + $0x178] sm:$0xff] }
 0xd28   : > { %4596 = vperm.xlu0 %7957, %v11542_v26  }
 0xd29   : > { %5165 = vrot.lane.b32.xlu2 %v8304_v0, %s8533_s12  ;;  %v5092_v0 = vld [vmem:[%s8755_s18 + $0x18] sm:$0xff] }
 0xd2c   : > { %v4499_v63 = vpop.xlane.xlu2 %4498  ;;  %4621 = vperm.xlu1 %7955, %v11598_v24  }
 0xd2d   : > { %v11647_v52 = vmax.f32 %v11643_v19, %v4499_v63 }
 0xd2f   : > { %5083 = vst.msk [vmem:[#allocation2 + $0x150] sm:$0xff] %vm3045_vm5, %v11647_v52 }
 0xd30   : > { %5205 = vrot.lane.b32.xlu0 %v11217_v31, %s8533_s12  ;;  %v5089_v31 = vld [vmem:[%s8755_s18] sm:$0xff] }
 0xd31   : > { %v4501_v62 = vpop.xlane.xlu0 %4500 }
 0xd32   : > { %v11658_v46 = vmax.f32 %v11653_v54, %v4501_v62 }
 0xd34   : > { %5084 = vst.msk [vmem:[#allocation2 + $0x158] sm:$0xff] %vm3045_vm5, %v11658_v46  ;;  %4631 = vperm.xlu2 %7956, %v11658_v46   ;;  %v4505_v25 = vpop.xlane.xlu2 %4504 }
 0xd35   : > { %v11668_v33 = vmax.f32 %v11660_v14, %v4505_v25 }
 0xd37   : > { %5086 = vst.msk [vmem:[#allocation2 + $0x168] sm:$0xff] %vm3045_vm5, %v11668_v33 }
 0xd38   : > { %5153 = vrot.lane.b32.xlu0 %v5089_v31, %s8533_s12  ;;  %v5096_v31 = vld [vmem:[%s8755_s18 + $0x38] sm:$0xff] }
 0xd3e   : > { %v4503_v61 = vpop.xlane.xlu1 %4502 }
 0xd3f   : > { %v11679_v3 = vmax.f32 %v11676_v6, %v4503_v61  ;;  %v12913_v61 = vld [vmem:[#allocation45_spill] sm:$0xff] }
 0xd40   : > { %4611 = vperm.xlu0 %7957, %v11575_v21  }
 0xd41   : > { %5085 = vst.msk [vmem:[#allocation2 + $0x160] sm:$0xff] %vm3045_vm5, %v11679_v3  ;;  %4636 = vperm.xlu1 %7955, %v11679_v3  }
 0xd44   : > { %v5226_v20 = vpop.permute.xlu0 %5225 }
 0xd45   : > { %7571 = vmatpush.xpose.msk.msrb.mxu0 %vm2563_vm4, %v5226_v20  ;;  %7670 = vmatpush.xpose.msk.msra.mxu1 %vm2563_vm4, %v5226_v20 }
 0xd46   : > { %v4509_v63 = vpop.xlane.xlu1 %4508 }
 0xd47   : > { %v11693_v62 = vmax.f32 %v11687_v23, %v4509_v63 }
 0xd48   : > { %5159 = vrot.lane.b32.xlu0 %v5092_v0, %s8533_s12 }
 0xd49   : > { %5088 = vst.msk [vmem:[#allocation2 + $0x178] sm:$0xff] %vm3045_vm5, %v11693_v62  ;;  %4651 = vperm.xlu1 %7955, %v11693_v62   ;;  %7572 = vmatpush.xpose.msk.msrb.mxu0 %vm2563_vm4, %v5224_v1 }
 0xd4a   : > { %7671 = vmatpush.xpose.msk.msra.mxu1 %vm2563_vm4, %v5224_v1 }
 0xd50   : > { %5163 = vrot.lane.b32.xlu0 %v12913_v61, %s8533_s12 }
 0xd51   : > { %5167 = vrot.lane.b32.xlu1 %v5096_v31, %s8533_s12  ;;  %v4577_v31 = vpop.permute.xlu2 %4576 }
 0xd58   : > { %4626 = vperm.xlu0 %7957, %v11647_v52  }
 0xd5e   : > { %v5220_v20 = vpop.permute.xlu1 %5219 }
 0xd60   : > { %4641 = vperm.xlu0 %7957, %v11668_v33  }
 0xd66   : > { %v4587_v0 = vpop.permute.xlu1 %4586 }
 0xd67   : > { %v4656_v63 = vsub.f32 %v11457_v29, %v4587_v0  ;;  %v4654_v0 = vsub.f32 %v11451_v38, %v4577_v31  ;;  %v4226_v38 = vld [vmem:[%s8759_s23 + $0x30] sm:$0xff]  ;;  %v4227_v31 = vld [vmem:[%s8759_s23 + $0x38] sm:$0xff] }
 0xd68   : > { %v7983_v47 = vpack.i.bf16 %v4227_v31, %v4226_v38 }
 0xd69   : > { %v4674_v25 = vmul.f32 1.442695, %v4656_v63  ;;  %v5218_v63 = vpop.permute.xlu2 %5217 }
 0xd6b   : > { %8176 = vpow2.f32 %v4674_v25 }
 0xd6f   : > { %v4507_v37 = vpop.xlane.xlu0 %4506 }
 0xd70   : > { %v11713_v1 = vmax.f32 %v11710_v8, %v4507_v37  ;;  %v4670_v37 = vmul.f32 1.442695, %v4654_v0  ;;  %v5214_v0 = vpop.permute.xlu1 %5213 }
 0xd71   : > { %v11720_v29 = vpop.eup %8176  ;;  %v5212_v27 = vpop.permute.xlu2 %5211 }
 0xd72   : > { %5087 = vst.msk [vmem:[#allocation2 + $0x170] sm:$0xff] %vm3045_vm5, %v11713_v1  ;;  %4646 = vperm.xlu2 %7956, %v11713_v1   ;;  %8178 = vpow2.f32 %v4670_v37 }
 0xd78   : > { %v11724_v7 = vpop.eup %8178 }
 0xd7b   : > { %4739 = vadd.xlane.f32.xlu1 %v11720_v29 }
 0xd82   : > { %v4582_v36 = vpop.permute.xlu0 %4581 }
 0xd83   : > { %v4655_v25 = vsub.f32 %v11454_v59, %v4582_v36  ;;  %v5208_v59 = vpop.permute.xlu2 %5207 }
 0xd85   : > { %v4672_v37 = vmul.f32 1.442695, %v4655_v25  ;;  %v5099_v25 = vld [vmem:[%s8755_s18 + $0x50] sm:$0xff] }
 0xd87   : > { %8180 = vpow2.f32 %v4672_v37 }
 0xd8a   : > { %4735 = vadd.xlane.f32.xlu0 %v11724_v7  ;;  %v5222_v61 = vpop.permute.xlu0 %5221 }
 0xd8b   : > { %7573 = vmatpush.xpose.msk.msrb.mxu0 %vm2563_vm4, %v5222_v61  ;;  %7672 = vmatpush.xpose.msk.msra.mxu1 %vm2563_vm4, %v5222_v61  ;;  %v11740_v61 = vld [vmem:[%s8759_s23 + $0x10] sm:$0xff] }
 0xd8c   : > { %12914 = vst [vmem:[#allocation30_spill] sm:$0xff] %v11740_v61 }
 0xd8d   : > { %v11746_v38 = vpop.eup %8180 }
 0xd8f   : > { %7574 = vmatpush.xpose.msk.msrb.mxu0 %vm2563_vm4, %v5220_v20  ;;  %7673 = vmatpush.xpose.msk.msra.mxu1 %vm2563_vm4, %v5220_v20  ;;  %v5210_v20 = vpop.permute.xlu1 %5209 }
 0xd92   : > { %v5216_v36 = vpop.permute.xlu0 %5215 }
 0xd93   : > { %7575 = vmatpush.xpose.msk.msrb.mxu0 %vm2563_vm4, %v5218_v63  ;;  %7674 = vmatpush.xpose.msk.msra.mxu1 %vm2563_vm4, %v5218_v63  ;;  %v7973_v63 = vpack.i.bf16 %v11743_v32, %v11740_v61 }
 0xd94   : > { %7984 = vrot.lane.b32.xlu1 %v7983_v47, %s8532_s11  ;;  %v4592_v47 = vpop.permute.xlu2 %4591 }
 0xd97   : > { %7576 = vmatpush.xpose.msk.msrb.mxu0 %vm2563_vm4, %v5216_v36  ;;  %7675 = vmatpush.xpose.msk.msra.mxu1 %vm2563_vm4, %v5216_v36  ;;  %v5204_v37 = vpop.permute.xlu1 %5203  ;;  %v5097_v36 = vld [vmem:[%s8755_s18 + $0x40] sm:$0xff] }
 0xd9a   : > { %v4597_v31 = vpop.permute.xlu0 %4596 }
 0xd9b   : > { %4737 = vadd.xlane.f32.xlu2 %v11746_v38  ;;  %7577 = vmatpush.xpose.msk.msrb.mxu0 %vm2563_vm4, %v5214_v0 }
 0xd9c   : > { %7676 = vmatpush.xpose.msk.msra.mxu1 %vm2563_vm4, %v5214_v0  ;;  %5173 = vrot.lane.b32.xlu1 %v5099_v25, %s8533_s12  ;;  %v5202_v0 = vpop.permute.xlu2 %5201 }
 0xd9e   : > { %7974 = vrot.lane.b32.xlu0 %v7973_v63, %s8532_s11 }
 0xd9f   : > { %7578 = vmatpush.xpose.msk.msrb.mxu0 %vm2563_vm4, %v5212_v27  ;;  %v11764_v63 = vpop.permute.xlu1 %4606 }
 0xda0   : > { %7677 = vmatpush.xpose.msk.msra.mxu1 %vm2563_vm4, %v5212_v27  ;;  %v11768_v27 = vld [vmem:[%s8759_s23 + $0x20] sm:$0xff] }
 0xda1   : > { %12916 = vst [vmem:[#allocation38_spill] sm:$0xff] %v11768_v27 }
 0xda2   : > { %v5206_v25 = vpop.permute.xlu0 %5205 }
 0xda3   : > { %7579 = vmatpush.xpose.msk.msrb.mxu0 %vm2563_vm4, %v5210_v20 }
 0xda4   : > { %7678 = vmatpush.xpose.msk.msra.mxu1 %vm2563_vm4, %v5210_v20  ;;  %v7978_v20 = vpack.i.bf16 %v11771_v9, %v11768_v27  ;;  %v5102_v9 = vld [vmem:[%s8755_s18 + $0x68] sm:$0xff] }
 0xda6   : > { %5169 = vrot.lane.b32.xlu0 %v5097_v36, %s8533_s12 }
 0xda7   : > { %7580 = vmatpush.xpose.msk.msrb.mxu0 %vm2563_vm4, %v5208_v59 }
 0xda8   : > { %7679 = vmatpush.xpose.msk.msra.mxu1 %vm2563_vm4, %v5208_v59  ;;  %v4602_v59 = vpop.permute.xlu2 %4601 }
 0xda9   : > { %v4659_v34 = vsub.f32 %v11466_v60, %v4602_v59 }
 0xdaa   : > { %v5154_v36 = vpop.permute.xlu0 %5153 }
 0xdab   : > { %7581 = vmatpush.xpose.msk.msrb.mxu0 %vm2563_vm4, %v5206_v25  ;;  %v4680_v10 = vmul.f32 1.442695, %v4659_v34 }
 0xdac   : > { %7680 = vmatpush.xpose.msk.msra.mxu1 %vm2563_vm4, %v5206_v25  ;;  %v5158_v25 = vpop.permute.xlu1 %5157 }
 0xdad   : > { %8182 = vpow2.f32 %v4680_v10 }
 0xdaf   : > { %7582 = vmatpush.xpose.msk.msrb.mxu0 %vm2563_vm4, %v5204_v37 }
 0xdb0   : > { %7681 = vmatpush.xpose.msk.msra.mxu1 %vm2563_vm4, %v5204_v37  ;;  %v5156_v61 = vpop.permute.xlu2 %5155 }
 0xdb2   : > { %v11788_v32 = vpop.permute.xlu0 %4611 }
 0xdb3   : > { %7979 = vrot.lane.b32.xlu2 %v7978_v20, %s8532_s11  ;;  %7583 = vmatpush.xpose.msk.msrb.mxu0 %vm2563_vm4, %v5202_v0  ;;  %v4657_v20 = vsub.f32 %v11460_v44, %v4592_v47 }
 0xdb4   : > { %7682 = vmatpush.xpose.msk.msra.mxu1 %vm2563_vm4, %v5202_v0  ;;  %v11785_v37 = vpop.permute.xlu1 %7969  ;;  %v11790_v0 = vpop.eup %8182 }
 0xdb5   : > { %12918 = vst [vmem:[#allocation29_spill] sm:$0xff] %v11790_v0  ;;  %v4676_v27 = vmul.f32 1.442695, %v4657_v20  ;;  %v11808_v20 = vld [vmem:[%s8759_s23 + $0x40] sm:$0xff] }
 0xdb6   : > { %7584 = vmatmul.msk.f32.vlgmr.msrb.gmra.mxu0 %vm2563_vm4, %v5154_v36  ;;  %v5101_v36 = vld [vmem:[%s8755_s18 + $0x60] sm:$0xff]  ;;  %12919 = vst [vmem:[#allocation46_spill] sm:$0xff] %v11808_v20 }
 0xdb7   : > { %8184 = vpow2.f32 %v4676_v27 }
 0xdb8   : > { %v5162_v44 = vpop.permute.xlu2 %5161 }
 0xdbb   : > { %5171 = vrot.lane.b32.xlu2 %v5098_v57, %s8533_s12  ;;  %v5160_v57 = vpop.permute.xlu0 %5159 }
 0xdbc   : > { %v11794_v60 = vpop.permute.xlu1 %4621 }
 0xdbd   : > { %v11797_v10 = vpop.eup %8184 }
 0xdbe   : > { %7585 = vmatmul.msk.f32.gmra.mxu0 %vm2563_vm4, %v5156_v61  ;;  %v4658_v61 = vsub.f32 %v11463_v17, %v4597_v31  ;;  %v12921_v17 = vsub.f32 %v11514_v22, %v11517_v30 }
 0xdc0   : > { %v4678_v47 = vmul.f32 1.442695, %v4658_v61  ;;  %v4617_v27 = vpop.permute.xlu2 %4616  ;;  %v4546_v31 = vmul.f32 1.442695, %v12921_v17  ;;  %v4705_v17 = vld [vmem:[#allocation3 + $0x110] sm:$0xff] }
 0xdc2   : > { %8186 = vpow2.f32 %v4678_v47 }
 0xdc3   : > { %8188 = vpow2.f32 %v4546_v31 }
 0xdc4   : > { %v11800_v34 = vpop.permute.xlu1 %4636 }
 0xdc6   : > { %4745 = vadd.xlane.f32.xlu1 %v11790_v0  ;;  %7586 = vmatmul.msk.f32.gmra.mxu0 %vm2563_vm4, %v5158_v25  ;;  %v5164_v25 = vpop.permute.xlu0 %5163 }
 0xdc8   : > { %v11820_v61 = vpop.eup %8186  ;;  %v5166_v0 = vpop.permute.xlu2 %5165 }
 0xdc9   : > { %12922 = vst [vmem:[#allocation37_spill] sm:$0xff] %v11820_v61  ;;  %v11835_v30 = vpop.eup %8188 }
 0xdca   : > { %12925 = vst [vmem:[#allocation51_spill] sm:$0xff] %v11835_v30 }
 0xdcc   : > { %v11804_v59 = vpop.permute.xlu1 %4651 }
 0xdce   : > { %7587 = vmatmul.msk.f32.gmra.mxu0 %vm2563_vm4, %v5160_v57  ;;  %v11811_v57 = vld [vmem:[%s8759_s23 + $0x48] sm:$0xff]  ;;  %v11837_v31 = vpop.permute.xlu0 %4626 }
 0xdcf   : > { %12920 = vst [vmem:[#allocation43_spill] sm:$0xff] %v11811_v57 }
 0xdd0   : > { %4741 = vadd.xlane.f32.xlu0 %v11797_v10 }
 0xdd4   : > { %v5168_v47 = vpop.permute.xlu1 %5167 }
 0xdd6   : > { %7588 = vmatmul.msk.f32.gmra.mxu0 %vm2563_vm4, %v5162_v44  ;;  %v7988_v44 = vpack.i.bf16 %v11811_v57, %v11808_v20 }
 0xdde   : > { %7589 = vmatmul.msk.f32.gmra.mxu0 %vm2563_vm4, %v5164_v25  ;;  %v11826_v25 = vld [vmem:[%s8759_s23 + $0x50] sm:$0xff] }
 0xddf   : > { %5177 = vrot.lane.b32.xlu1 %v5101_v36, %s8533_s12  ;;  %12923 = vst [vmem:[#allocation32_spill] sm:$0xff] %v11826_v25  ;;  %v11829_v36 = vld [vmem:[%s8759_s23 + $0x58] sm:$0xff] }
 0xde0   : > { %12924 = vst [vmem:[#allocation31_spill] sm:$0xff] %v11829_v36  ;;  %v7993_v22 = vpack.i.bf16 %v11829_v36, %v11826_v25  ;;  %v11846_v25 = vpop.permute.xlu0 %4641 }
 0xde4   : > { %7989 = vrot.lane.b32.xlu0 %v7988_v44, %s8532_s11  ;;  %4743 = vadd.xlane.f32.xlu2 %v11820_v61  ;;  %v4721_v44 = vmul.f32 %v11835_v30, %v4705_v17  ;;  %v5100_v61 = vld [vmem:[%s8755_s18 + $0x58] sm:$0xff]  ;;  %v4527_v17 = vsub.f32 %v11504_v16, %v11509_v4  ;;  %v4660_v16 = vsub.f32 %v11469_v51, %v11764_v63 }
 0xde6   : > { %7590 = vmatmul.msk.f32.gmra.mxu0 %vm2563_vm4, %v5166_v0  ;;  %v12926_v0 = vsub.f32 %v11493_v53, %v11498_v42  ;;  %v4632_v42 = vpop.permute.xlu2 %4631 }
 0xde7   : > { %5179 = vrot.lane.b32.xlu1 %v5102_v9, %s8533_s12 }
 0xde8   : > { %v4542_v57 = vmul.f32 1.442695, %v12926_v0 }
 0xdea   : > { %8190 = vpow2.f32 %v4542_v57  ;;  %v5103_v57 = vld [vmem:[%s8755_s18 + $0x70] sm:$0xff] }
 0xdec   : > { %7994 = vrot.lane.b32.xlu0 %v7993_v22, %s8532_s11  ;;  %v4703_v22 = vld [vmem:[#allocation3 + $0x100] sm:$0xff] }
 0xdee   : > { %v4740_v20 = vpop.xlane.xlu1 %4739  ;;  %7591 = vmatmul.msk.f32.gmra.mxu0 %vm2563_vm4, %v5168_v47  ;;  %v4647_v30 = vpop.permute.xlu2 %4646 }
 0xdef   : > { %v4769_v9 = vadd.f32 %v4740_v20, %v4721_v44  ;;  %v4544_v20 = vmul.f32 1.442695, %v4527_v17  ;;  %v4662_v44 = vsub.f32 %v11475_v15, %v4617_v27  ;;  %v4682_v17 = vmul.f32 1.442695, %v4660_v16 }
 0xdf0   : > { %v11848_v36 = vpop.eup %8190  ;;  %v4668_v51 = vsub.f32 %v11536_v28, %v4647_v30  ;;  %v4661_v28 = vsub.f32 %v11472_v50, %v11788_v32  ;;  %v12930_v32 = vsub.f32 %v11546_v11, %v11554_v18  ;;  %v12932_v18 = vsub.f32 %v11527_v5, %v11530_v41 }
 0xdf1   : > { %4785 = vst.msk [vmem:[#allocation3 + $0x110] sm:$0xff] %vm3045_vm5, %v4769_v9  ;;  %v4719_v47 = vmul.f32 %v11848_v36, %v4703_v22  ;;  %8192 = vpow2.f32 %v4544_v20  ;;  %v4686_v9 = vmul.f32 1.442695, %v4662_v44  ;;  %v4704_v22 = vld [vmem:[#allocation3 + $0x108] sm:$0xff]  ;;  %v4530_v41 = vsub.f32 %v11538_v45, %v11542_v26 }
 0xdf2   : > { %v4698_v63 = vmul.f32 1.442695, %v4668_v51  ;;  %v4666_v45 = vsub.f32 %v11506_v39, %v11800_v34  ;;  %v4664_v39 = vsub.f32 %v11489_v2, %v11837_v31 }
 0xdf3   : > { %8194 = vpow2.f32 %v4686_v9 }
 0xdf4   : > { %8196 = vpow2.f32 %v4682_v17  ;;  %v11893_v17 = vld [vmem:[%s8759_s23 + $0x68] sm:$0xff] }
 0xdf5   : > { %12929 = vst [vmem:[#allocation36_spill] sm:$0xff] %v11893_v17 }
 0xdf7   : > { %v11861_v4 = vpop.eup %8192 }
 0xdf8   : > { %12927 = vst [vmem:[#allocation49_spill] sm:$0xff] %v11861_v4 }
 0xdf9   : > { %v11865_v27 = vpop.eup %8194 }
 0xdfc   : > { %5175 = vrot.lane.b32.xlu2 %v5100_v61, %s8533_s12  ;;  %v4665_v61 = vsub.f32 %v11495_v40, %v4632_v42  ;;  %v11872_v40 = vpop.eup %8196 }
 0xdfd   : > { %v4736_v53 = vpop.xlane.xlu0 %4735 }
 0xdfe   : > { %v4767_v0 = vadd.f32 %v4736_v53, %v4719_v47  ;;  %v4720_v47 = vmul.f32 %v11861_v4, %v4704_v22  ;;  %v4692_v53 = vmul.f32 1.442695, %v4665_v61  ;;  %v4684_v61 = vmul.f32 1.442695, %v4661_v28  ;;  %v11890_v22 = vld [vmem:[%s8759_s23 + $0x60] sm:$0xff] }
 0xdff   : > { %12928 = vst [vmem:[#allocation42_spill] sm:$0xff] %v11890_v22  ;;  %v4548_v28 = vmul.f32 1.442695, %v12932_v18  ;;  %v4550_v18 = vmul.f32 1.442695, %v4530_v41 }
 0xe00   : > { %4783 = vst.msk [vmem:[#allocation3 + $0x100] sm:$0xff] %vm3045_vm5, %v4767_v0  ;;  %8198 = vpow2.f32 %v4692_v53  ;;  %v4552_v53 = vmul.f32 1.442695, %v12930_v32 }
 0xe01   : > { %8200 = vpow2.f32 %v4698_v63 }
 0xe02   : > { %8202 = vpow2.f32 %v4684_v61 }
 0xe03   : > { %8204 = vpow2.f32 %v4552_v53 }
 0xe04   : > { %5181 = vrot.lane.b32.xlu2 %v5103_v57, %s8533_s12  ;;  %8206 = vpow2.f32 %v4548_v28 }
 0xe05   : > { %8208 = vpow2.f32 %v4550_v18 }
 0xe06   : > { %v11877_v57 = vpop.eup %8198  ;;  %v11883_v30 = vpop.permute.xlu1 %7984 }
 0xe07   : > { %v11885_v9 = vpop.eup %8200 }
 0xe08   : > { %v11908_v51 = vpop.eup %8202 }
 0xe09   : > { %v11917_v11 = vpop.eup %8204 }
 0xe0a   : > { %v11926_v53 = vpop.eup %8206 }
 0xe0e   : > { %v4738_v0 = vpop.xlane.xlu2 %4737  ;;  %v5174_v50 = vpop.permute.xlu1 %5173 }
 0xe0f   : > { %v4768_v15 = vadd.f32 %v4738_v0, %v4720_v47  ;;  %v7998_v47 = vpack.i.bf16 %v11893_v17, %v11890_v22  ;;  %v11903_v0 = vld [vmem:[%s8759_s23 + $0x70] sm:$0xff]  ;;  %v5104_v22 = vld [vmem:[%s8755_s18 + $0x78] sm:$0xff] }
 0xe10   : > { %v11867_v20 = vpop.permute.xlu0 %7974 }
 0xe11   : > { %4784 = vst.msk [vmem:[#allocation3 + $0x108] sm:$0xff] %vm3045_vm5, %v4768_v15  ;;  %4751 = vadd.xlane.f32.xlu1 %v11865_v27  ;;  %v11906_v15 = vld [vmem:[%s8759_s23 + $0x78] sm:$0xff] }
 0xe12   : > { %v8003_v63 = vpack.i.bf16 %v11906_v15, %v11903_v0 }
 0xe16   : > { %v11874_v42 = vpop.permute.xlu2 %7979  ;;  %4747 = vadd.xlane.f32.xlu0 %v11872_v40 }
 0xe18   : > { %v5170_v44 = vpop.permute.xlu0 %5169 }
 0xe19   : > { %4757 = vadd.xlane.f32.xlu1 %v11877_v57  ;;  %7592 = vmatmul.msk.f32.gmra.mxu0 %vm2563_vm4, %v5170_v44 }
 0xe1e   : > { %v5172_v16 = vpop.permute.xlu2 %5171 }
 0xe21   : > { %4763 = vadd.xlane.f32.xlu1 %v11885_v9  ;;  %7593 = vmatmul.msk.f32.gmra.mxu0 %vm2563_vm4, %v5172_v16  ;;  %v4708_v16 = vld [vmem:[#allocation3 + $0x128] sm:$0xff] }
 0xe22   : > { %v4724_v61 = vmul.f32 %v11917_v11, %v4708_v16  ;;  %v4663_v16 = vsub.f32 %v11478_v43, %v11794_v60  ;;  %v4669_v60 = vsub.f32 %v11548_v56, %v11804_v59  ;;  %v4667_v56 = vsub.f32 %v11519_v48, %v11846_v25 }
 0xe24   : > { %v4700_v41 = vmul.f32 1.442695, %v4669_v60  ;;  %v4696_v31 = vmul.f32 1.442695, %v4667_v56  ;;  %v4709_v56 = vld [vmem:[#allocation3 + $0x130] sm:$0xff] }
 0xe29   : > { %7594 = vmatmul.msk.f32.gmra.mxu0 %vm2563_vm4, %v5174_v50 }
 0xe2a   : > { %7999 = vrot.lane.b32.xlu0 %v7998_v47, %s8532_s11 }
 0xe2d   : > { %4749 = vadd.xlane.f32.xlu2 %v11908_v51 }
 0xe32   : > { %8004 = vrot.lane.b32.xlu0 %v8003_v63, %s8532_s11  ;;  %v4706_v63 = vld [vmem:[#allocation3 + $0x118] sm:$0xff] }
 0xe33   : > { %v11914_v44 = vpop.f32.mrf.mxu0 }
 0xe34   : > { %12931 = vst [vmem:[#allocation34_spill] sm:$0xff] %v11914_v44  ;;  %5379 = vmax.xlane.f32.xlu1 %v11914_v44  ;;  %v4722_v44 = vmul.f32 %v11926_v53, %v4706_v63  ;;  %v4694_v63 = vmul.f32 1.442695, %v4666_v45 }
 0xe39   : > { %v4746_v47 = vpop.xlane.xlu1 %4745 }
 0xe3a   : > { %v4772_v50 = vadd.f32 %v4746_v47, %v4724_v61  ;;  %v4688_v61 = vmul.f32 1.442695, %v4663_v16  ;;  %v11941_v47 = vpop.eup %8208  ;;  %v4690_v16 = vmul.f32 1.442695, %v4664_v39  ;;  %v12935_v39 = vsub.f32 %v11653_v54, %v11658_v46 }
 0xe3b   : > { %v11923_v32 = vpop.f32.mrf.mxu0  ;;  %v12936_v54 = vsub.f32 %v11710_v8, %v11713_v1  ;;  %v4533_v1 = vsub.f32 %v11572_v13, %v11575_v21 }
 0xe3c   : > { %4788 = vst.msk [vmem:[#allocation3 + $0x128] sm:$0xff] %vm3045_vm5, %v4772_v50  ;;  %8210 = vpow2.f32 %v4688_v61 }
 0xe3d   : > { %8212 = vpow2.f32 %v4694_v63  ;;  %v12934_v63 = vsub.f32 %v11561_v58, %v11564_v55  ;;  %v4570_v46 = vmul.f32 1.442695, %v12936_v54 }
 0xe3e   : > { %8214 = vpow2.f32 %v4700_v41 }
 0xe3f   : > { %8216 = vpow2.f32 %v4690_v16  ;;  %v4554_v60 = vmul.f32 1.442695, %v12934_v63 }
 0xe40   : > { %8218 = vpow2.f32 %v4696_v31 }
 0xe43   : > { %v4742_v17 = vpop.xlane.xlu0 %4741  ;;  %v11930_v4 = vpop.f32.mrf.mxu0 }
 0xe44   : > { %v4770_v5 = vadd.f32 %v4742_v17, %v4722_v44  ;;  %v4707_v44 = vld [vmem:[#allocation3 + $0x120] sm:$0xff] }
 0xe45   : > { %5183 = vrot.lane.b32.xlu2 %v5104_v22, %s8533_s12  ;;  %v4723_v26 = vmul.f32 %v11941_v47, %v4707_v44 }
 0xe46   : > { %4786 = vst.msk [vmem:[#allocation3 + $0x118] sm:$0xff] %vm3045_vm5, %v4770_v5  ;;  %v11949_v5 = vpop.eup %8210 }
 0xe47   : > { %v11959_v18 = vpop.eup %8212 }
 0xe48   : > { %v11969_v59 = vpop.eup %8214 }
 0xe49   : > { %v11972_v45 = vpop.eup %8216 }
 0xe4a   : > { %v11977_v48 = vpop.eup %8218 }
 0xe4b   : > { %v11936_v28 = vpop.f32.mrf.mxu0 }
 0xe4c   : > { %5385 = vmax.xlane.f32.xlu1 %v11936_v28 }
 0xe51   : > { %v5178_v44 = vpop.permute.xlu1 %5177 }
 0xe53   : > { %v11943_v17 = vpop.f32.mrf.mxu0 }
 0xe56   : > { %v11979_v25 = vpop.permute.xlu0 %7989 }
 0xe57   : > { %v4744_v22 = vpop.xlane.xlu2 %4743 }
 0xe58   : > { %v4771_v50 = vadd.f32 %v4744_v22, %v4723_v26  ;;  %v12933_v22 = vsub.f32 %v11581_v49, %v11584_v12  ;;  %v4711_v12 = vld [vmem:[#allocation3 + $0x140] sm:$0xff] }
 0xe59   : > { %v5180_v26 = vpop.permute.xlu1 %5179 }
 0xe5a   : > { %4787 = vst.msk [vmem:[#allocation3 + $0x120] sm:$0xff] %vm3045_vm5, %v4771_v50  ;;  %v4558_v50 = vmul.f32 1.442695, %v12933_v22 }
 0xe5b   : > { %v11951_v43 = vpop.f32.mrf.mxu0 }
 0xe5c   : > { %4753 = vadd.xlane.f32.xlu0 %v11949_v5  ;;  %8220 = vpow2.f32 %v4558_v50 }
 0xe5d   : > { %8222 = vpow2.f32 %v4554_v60 }
 0xe5e   : > { %v11993_v41 = vpop.permute.xlu0 %7994 }
 0xe5f   : > { %v5176_v34 = vpop.permute.xlu2 %5175 }
 0xe60   : > { %7595 = vmatmul.msk.f32.gmra.mxu0 %vm2563_vm4, %v5176_v34  ;;  %v4564_v34 = vmul.f32 1.442695, %v12935_v39 }
 0xe62   : > { %v11995_v49 = vpop.eup %8220  ;;  %8224 = vpow2.f32 %v4564_v34 }
 0xe63   : > { %v11961_v61 = vpop.f32.mrf.mxu0  ;;  %v4727_v16 = vmul.f32 %v11995_v49, %v4711_v12  ;;  %v11998_v58 = vpop.eup %8222  ;;  %8226 = vpow2.f32 %v4570_v46  ;;  %v4717_v12 = vld [vmem:[#allocation3 + $0x170] sm:$0xff]  ;;  %v4710_v46 = vld [vmem:[#allocation3 + $0x138] sm:$0xff] }
 0xe64   : > { %5391 = vmax.xlane.f32.xlu1 %v11961_v61  ;;  %4759 = vadd.xlane.f32.xlu0 %v11959_v18  ;;  %v4725_v31 = vmul.f32 %v11998_v58, %v4709_v56 }
 0xe67   : > { %v5182_v2 = vpop.permute.xlu2 %5181 }
 0xe68   : > { %7596 = vmatmul.msk.f32.gmra.mxu0 %vm2563_vm4, %v5178_v44  ;;  %7598 = vmatmul.msk.f32.vlgmr.msra.gmra.mxu1 %vm2563_vm4, %v5182_v2  ;;  %v12005_v2 = vpop.eup %8224 }
 0xe69   : > { %v12016_v34 = vpop.eup %8226 }
 0xe6b   : > { %v12010_v39 = vpop.f32.mrf.mxu0 }
 0xe6c   : > { %4765 = vadd.xlane.f32.xlu0 %v11969_v59 }
 0xe6e   : > { %4755 = vadd.xlane.f32.xlu2 %v11972_v45 }
 0xe70   : > { %7597 = vmatmul.msk.f32.gmra.mxu0 %vm2563_vm4, %v5180_v26  ;;  %v4714_v26 = vld [vmem:[#allocation3 + $0x158] sm:$0xff] }
 0xe71   : > { %v4730_v63 = vmul.f32 %v12005_v2, %v4714_v26 }
 0xe74   : > { %5383 = vmax.xlane.f32.xlu0 %v11930_v4 }
 0xe76   : > { %4761 = vadd.xlane.f32.xlu2 %v11977_v48 }
 0xe7c   : > { %5389 = vmax.xlane.f32.xlu0 %v11951_v43 }
 0xe7e   : > { %5381 = vmax.xlane.f32.xlu2 %v11923_v32 }
 0xe84   : > { %v4752_v44 = vpop.xlane.xlu1 %4751 }
 0xe85   : > { %v4775_v55 = vadd.f32 %v4752_v44, %v4727_v16  ;;  %v4556_v16 = vmul.f32 1.442695, %v4533_v1  ;;  %v4733_v44 = vmul.f32 %v12016_v34, %v4717_v12  ;;  %v12030_v1 = vld [vmem:[#allocation2 + $0x180] sm:$0xff] }
 0xe86   : > { %5387 = vmax.xlane.f32.xlu2 %v11943_v17 }
 0xe87   : > { %4791 = vst.msk [vmem:[#allocation3 + $0x140] sm:$0xff] %vm3045_vm5, %v4775_v55  ;;  %8228 = vpow2.f32 %v4556_v16 }
 0xe89   : > { %v4748_v22 = vpop.xlane.xlu0 %4747 }
 0xe8a   : > { %v4773_v50 = vadd.f32 %v4748_v22, %v4725_v31 }
 0xe8c   : > { %4789 = vst.msk [vmem:[#allocation3 + $0x130] sm:$0xff] %vm3045_vm5, %v4773_v50  ;;  %v4758_v60 = vpop.xlane.xlu1 %4757 }
 0xe8d   : > { %v4778_v8 = vadd.f32 %v4758_v60, %v4730_v63  ;;  %v12023_v13 = vpop.eup %8228 }
 0xe8e   : > { %5393 = vmax.xlane.f32.xlu2 %v12010_v39  ;;  %v4726_v26 = vmul.f32 %v12023_v13, %v4710_v46  ;;  %v7997_v46 = vunpack.i.h.bf16 %v11993_v41 }
 0xe8f   : > { %4794 = vst.msk [vmem:[#allocation3 + $0x158] sm:$0xff] %vm3045_vm5, %v4778_v8 }
 0xe94   : > { %v4764_v55 = vpop.xlane.xlu1 %4763 }
 0xe95   : > { %v4781_v56 = vadd.f32 %v4764_v55, %v4733_v44 }
 0xe96   : > { %v12019_v54 = vpop.f32.mrf.mxu0 }
 0xe97   : > { %4797 = vst.msk [vmem:[#allocation3 + $0x170] sm:$0xff] %vm3045_vm5, %v4781_v56  ;;  %5395 = vmax.xlane.f32.xlu0 %v12019_v54 }
 0xe9c   : > { %v8000_v21 = vpop.permute.xlu0 %7999 }
 0xe9d   : > { %v8002_v12 = vunpack.i.h.bf16 %v8000_v21  ;;  %v8001_v56 = vunpack.i.l.bf16 %v8000_v21  ;;  %v7987_v21 = vunpack.i.h.bf16 %v11883_v30 }
 0xe9e   : > { %v12025_v31 = vpop.f32.mrf.mxu0 }
 0xe9f   : > { %5397 = vmax.xlane.f32.xlu1 %v12025_v31 }
 0xea0   : > { %v4750_v22 = vpop.xlane.xlu2 %4749 }
 0xea1   : > { %v4774_v50 = vadd.f32 %v4750_v22, %v4726_v26  ;;  %v7996_v26 = vunpack.i.l.bf16 %v11993_v41  ;;  %v7992_v22 = vunpack.i.h.bf16 %v11979_v25  ;;  %v7982_v41 = vunpack.i.h.bf16 %v11874_v42 }
 0xea3   : > { %4790 = vst.msk [vmem:[#allocation3 + $0x138] sm:$0xff] %vm3045_vm5, %v4774_v50  ;;  %v7991_v50 = vunpack.i.l.bf16 %v11979_v25  ;;  %v7977_v25 = vunpack.i.h.bf16 %v11867_v20 }
 0xea4   : > { %v8005_v63 = vpop.permute.xlu0 %8004 }
 0xea5   : > { %v8007_v60 = vunpack.i.h.bf16 %v8005_v63  ;;  %v8006_v8 = vunpack.i.l.bf16 %v8005_v63 }
 0xea6   : > { %v12042_v63 = vpop.f32.mrf.mxu0 }
 0xea7   : > { %4976 = vmatpush.msrb.mxu3 %v8007_v60  ;;  %v5380_v16 = vpop.xlane.xlu1 %5379  ;;  %5399 = vmax.xlane.f32.xlu2 %v12042_v63  ;;  %v7986_v60 = vunpack.i.l.bf16 %v11883_v30  ;;  %v12937_v30 = vsub.f32 %v11595_v35, %v11598_v24  ;;  %v4712_v35 = vld [vmem:[#allocation3 + $0x148] sm:$0xff] }
 0xea8   : > { %v5184_v44 = vpop.permute.xlu2 %5183  ;;  %v12033_v55 = vmax.f32 %v12030_v1, %v5380_v16  ;;  %v7976_v16 = vunpack.i.l.bf16 %v11867_v20  ;;  %v12938_v20 = vsub.f32 %v11676_v6, %v11679_v3  ;;  %v12940_v6 = vsub.f32 %v11643_v19, %v11647_v52 }
 0xea9   : > { %4977 = vmatpush.msrb.mxu3 %v8006_v8  ;;  %7599 = vmatmul.msk.f32.gmra.mxu1 %vm2563_vm4, %v5184_v44  ;;  %v7981_v8 = vunpack.i.l.bf16 %v11874_v42  ;;  %v7971_v42 = vunpack.i.l.bf16 %v11785_v37  ;;  %v12941_v19 = vsub.f32 %v11660_v14, %v11668_v33 }
 0xeaa   : > { %5974 = vst.msk [vmem:[#allocation2 + $0x180] sm:$0xff] %vm3045_vm5, %v12033_v55  ;;  %v4562_v3 = vmul.f32 1.442695, %v12940_v6  ;;  %v12942_v6 = vld [vmem:[#allocation37_spill] sm:$0xff] }
 0xeab   : > { %4978 = vmatpush.msrb.mxu3 %v8002_v12  ;;  %v12050_v12 = vld [vmem:[#allocation2 + $0x198] sm:$0xff]  ;;  %v4568_v52 = vmul.f32 1.442695, %v12941_v19  ;;  %v12943_v19 = vld [vmem:[#allocation29_spill] sm:$0xff] }
 0xead   : > { %4979 = vmatpush.msrb.mxu3 %v8001_v56 }
 0xeaf   : > { %4980 = vmatpush.msrb.mxu3 %v7997_v46  ;;  %v4560_v46 = vmul.f32 1.442695, %v12937_v30 }
 0xeb1   : > { %4981 = vmatpush.msrb.mxu3 %v7996_v26  ;;  %v7972_v26 = vunpack.i.h.bf16 %v11785_v37  ;;  %8230 = vpow2.f32 %v4560_v46  ;;  %v12939_v37 = vsub.f32 %v11687_v23, %v11693_v62 }
 0xeb3   : > { %4982 = vmatpush.msrb.mxu3 %v7992_v22  ;;  %v4566_v22 = vmul.f32 1.442695, %v12938_v20 }
 0xeb5   : > { %4983 = vmatpush.msrb.mxu3 %v7991_v50  ;;  %8232 = vpow2.f32 %v4566_v22 }
 0xeb7   : > { %4984 = vmatpush.msrb.mxu3 %v7987_v21  ;;  %v12067_v50 = vpop.eup %8230 }
 0xeb8   : > { %v4728_v24 = vmul.f32 %v12067_v50, %v4712_v35 }
 0xeb9   : > { %4985 = vmatpush.msrb.mxu3 %v7986_v60 }
 0xebb   : > { %4986 = vmatpush.msrb.mxu3 %v7982_v41  ;;  %v4572_v41 = vmul.f32 1.442695, %v12939_v37 }
 0xebd   : > { %4987 = vmatpush.msrb.mxu3 %v7981_v8  ;;  %v4715_v8 = vld [vmem:[#allocation3 + $0x160] sm:$0xff]  ;;  %8234 = vpow2.f32 %v4572_v41  ;;  %v12109_v41 = vld [vmem:[#allocation2 + $0x190] sm:$0xff] }
 0xebe   : > { %8236 = vpow2.f32 %v4562_v3 }
 0xebf   : > { %4988 = vmatpush.msrb.mxu3 %v7977_v25  ;;  %v5386_v44 = vpop.xlane.xlu1 %5385  ;;  %v12080_v25 = vld [vmem:[#allocation2 + $0x1b0] sm:$0xff]  ;;  %8238 = vpow2.f32 %v4568_v52  ;;  %v12124_v52 = vld [vmem:[#allocation2 + $0x188] sm:$0xff] }
 0xec0   : > { %v12054_v56 = vmax.f32 %v12050_v12, %v5386_v44 }
 0xec1   : > { %4989 = vmatpush.msrb.mxu3 %v7976_v16 }
 0xec2   : > { %5977 = vst.msk [vmem:[#allocation2 + $0x198] sm:$0xff] %vm3045_vm5, %v12054_v56 }
 0xec3   : > { %4990 = vmatpush.msrb.mxu3 %v7972_v26 }
 0xec5   : > { %4991 = vmatpush.msrb.mxu3 %v7971_v42  ;;  %v4713_v42 = vld [vmem:[#allocation3 + $0x150] sm:$0xff] }
 0xec6   : > { %4992 = vmatmul.f32.vlgmr.msrb.gmra.mxu3 %v11724_v7  ;;  %v12075_v7 = vpop.eup %8232 }
 0xec7   : > { %v12088_v30 = vpop.eup %8234 }
 0xec8   : > { %v12095_v46 = vpop.eup %8236 }
 0xec9   : > { %v4729_v14 = vmul.f32 %v12095_v46, %v4713_v42 }
 0xece   : > { %4995 = vmatmul.f32.gmra.mxu3 %v11746_v38  ;;  %v4731_v38 = vmul.f32 %v12075_v7, %v4715_v8 }
 0xecf   : > { %v4754_v21 = vpop.xlane.xlu0 %4753 }
 0xed0   : > { %v4776_v60 = vadd.f32 %v4754_v21, %v4728_v24  ;;  %v8239_v21 = vpop.eup %8238 }
 0xed2   : > { %4792 = vst.msk [vmem:[#allocation3 + $0x148] sm:$0xff] %vm3045_vm5, %v4776_v60 }
 0xed6   : > { %4998 = vmatmul.f32.gmra.mxu3 %v11720_v29  ;;  %v4718_v29 = vld [vmem:[#allocation3 + $0x178] sm:$0xff] }
 0xed7   : > { %v4760_v16 = vpop.xlane.xlu0 %4759  ;;  %v5392_v23 = vpop.xlane.xlu1 %5391  ;;  %v4734_v20 = vmul.f32 %v12088_v30, %v4718_v29 }
 0xed8   : > { %v4779_v62 = vadd.f32 %v4760_v16, %v4731_v38  ;;  %v12085_v44 = vmax.f32 %v12080_v25, %v5392_v23 }
 0xeda   : > { %4795 = vst.msk [vmem:[#allocation3 + $0x160] sm:$0xff] %vm3045_vm5, %v4779_v62 }
 0xedb   : > { %5980 = vst.msk [vmem:[#allocation2 + $0x1b0] sm:$0xff] %vm3045_vm5, %v12085_v44 }
 0xedd   : > { %v12097_v26 = vpop.f32.mrf.mxu0 }
 0xede   : > { %5401 = vmax.xlane.f32.xlu0 %v12097_v26  ;;  %5001 = vmatmul.f32.gmra.mxu3 %v11797_v10  ;;  %v4716_v10 = vld [vmem:[#allocation3 + $0x168] sm:$0xff] }
 0xedf   : > { %v4766_v22 = vpop.xlane.xlu0 %4765  ;;  %v4732_v38 = vmul.f32 %v8239_v21, %v4716_v10 }
 0xee0   : > { %v4782_v35 = vadd.f32 %v4766_v22, %v4734_v20  ;;  %v12132_v20 = vld [vmem:[#allocation2 + $0x1a0] sm:$0xff] }
 0xee1   : > { %v4756_v33 = vpop.xlane.xlu2 %4755 }
 0xee2   : > { %4798 = vst.msk [vmem:[#allocation3 + $0x178] sm:$0xff] %vm3045_vm5, %v4782_v35  ;;  %v4777_v24 = vadd.f32 %v4756_v33, %v4729_v14  ;;  %v12134_v35 = vld [vmem:[#allocation2 + $0x1a8] sm:$0xff] }
 0xee4   : > { %4793 = vst.msk [vmem:[#allocation3 + $0x150] sm:$0xff] %vm3045_vm5, %v4777_v24  ;;  %v12944_v24 = vld [vmem:[#allocation51_spill] sm:$0xff] }
 0xee5   : > { %v12105_v60 = vpop.f32.mrf.mxu0  ;;  %v12107_v37 = vpop.f32.mrf.mxu1 }
 0xee6   : > { %5407 = vmax.xlane.f32.xlu0 %v12107_v37  ;;  %5004 = vmatmul.f32.gmra.mxu3 %v12942_v6 }
 0xee7   : > { %v5384_v3 = vpop.xlane.xlu0 %5383  ;;  %5403 = vmax.xlane.f32.xlu1 %v12105_v60 }
 0xee8   : > { %v12115_v8 = vmax.f32 %v12109_v41, %v5384_v3 }
 0xee9   : > { %v4762_v16 = vpop.xlane.xlu2 %4761 }
 0xeea   : > { %5976 = vst.msk [vmem:[#allocation2 + $0x190] sm:$0xff] %vm3045_vm5, %v12115_v8  ;;  %v4780_v23 = vadd.f32 %v4762_v16, %v4732_v38 }
 0xeec   : > { %4796 = vst.msk [vmem:[#allocation3 + $0x168] sm:$0xff] %vm3045_vm5, %v4780_v23  ;;  %v5122_v23 = vld [vmem:[%s8759_s23 + $0x8] sm:$0xff] }
 0xeed   : > { %v12120_v62 = vpop.f32.mrf.mxu0 }
 0xeee   : > { %5405 = vmax.xlane.f32.xlu2 %v12120_v62  ;;  %5007 = vmatmul.f32.gmra.mxu3 %v12943_v19  ;;  %v12954_v19 = vld [vmem:[#allocation43_spill] sm:$0xff] }
 0xeef   : > { %v5390_v14 = vpop.xlane.xlu0 %5389 }
 0xef0   : > { %v12141_v10 = vmax.f32 %v12134_v35, %v5390_v14  ;;  %v12956_v14 = vld [vmem:[#allocation49_spill] sm:$0xff] }
 0xef1   : > { %v5382_v29 = vpop.xlane.xlu2 %5381 }
 0xef2   : > { %v12127_v42 = vmax.f32 %v12124_v52, %v5382_v29  ;;  %5979 = vst.msk [vmem:[#allocation2 + $0x1a8] sm:$0xff] %vm3045_vm5, %v12141_v10  ;;  %v12955_v29 = vld [vmem:[#allocation46_spill] sm:$0xff] }
 0xef4   : > { %5975 = vst.msk [vmem:[#allocation2 + $0x188] sm:$0xff] %vm3045_vm5, %v12127_v42 }
 0xef6   : > { %5010 = vmatmul.f32.gmra.mxu3 %v11872_v40  ;;  %v12148_v40 = vld [vmem:[#allocation2 + $0x1b8] sm:$0xff] }
 0xef7   : > { %12945 = vst [vmem:[#allocation53_spill] sm:$0xff] %v12148_v40 }
 0xef9   : > { %v5388_v22 = vpop.xlane.xlu2 %5387 }
 0xefa   : > { %v12137_v33 = vmax.f32 %v12132_v20, %v5388_v22  ;;  %4828 = vperm.xlu0 %7957, %v12944_v24   ;;  %v8023_v22 = vpack.i.bf16 %v12955_v29, %v12954_v19  ;;  %v12957_v24 = vld [vmem:[#allocation40_spill] sm:$0xff]  ;;  %v12962_v19 = vld [vmem:[#allocation42_spill] sm:$0xff] }
 0xefc   : > { %5978 = vst.msk [vmem:[#allocation2 + $0x1a0] sm:$0xff] %vm3045_vm5, %v12137_v33 }
 0xefe   : > { %5013 = vmatmul.f32.gmra.mxu3 %v11908_v51  ;;  %v12161_v51 = vld [vmem:[#allocation2 + $0x1c8] sm:$0xff] }
 0xeff   : > { %12946 = vst [vmem:[#allocation48_spill] sm:$0xff] %v12161_v51 }
 0xf01   : > { %v5394_v6 = vpop.xlane.xlu2 %5393 }
 0xf02   : > { %4838 = vperm.xlu0 %7957, %v11941_v47   ;;  %v12152_v3 = vmax.f32 %v12148_v40, %v5394_v6  ;;  %v12958_v6 = vld [vmem:[#allocation30_spill] sm:$0xff] }
 0xf04   : > { %5981 = vst.msk [vmem:[#allocation2 + $0x1b8] sm:$0xff] %vm3045_vm5, %v12152_v3 }
 0xf06   : > { %4818 = vperm.xlu2 %7956, %v11848_v36   ;;  %5016 = vmatmul.f32.gmra.mxu3 %v11865_v27  ;;  %v8008_v36 = vpack.i.bf16 %v11903_v0, %v11906_v15  ;;  %v12966_v15 = vld [vmem:[#allocation34_spill] sm:$0xff] }
 0xf0a   : > { %4853 = vperm.xlu0 %7957, %v12023_v13  }
 0xf0e   : > { %4833 = vperm.xlu2 %7956, %v11926_v53   ;;  %5019 = vmatmul.f32.gmra.mxu3 %v11949_v5  ;;  %v12948_v53 = vld [vmem:[#allocation31_spill] sm:$0xff]  ;;  %v12949_v5 = vld [vmem:[#allocation32_spill] sm:$0xff] }
 0xf12   : > { %4873 = vperm.xlu0 %7957, %v12005_v2   ;;  %v5398_v47 = vpop.xlane.xlu1 %5397  ;;  %v12951_v2 = vld [vmem:[#allocation38_spill] sm:$0xff] }
 0xf13   : > { %v12165_v38 = vmax.f32 %v12161_v51, %v5398_v47  ;;  %v8038_v47 = vpack.i.bf16 %v12958_v6, %v12957_v24  ;;  %v4802_v6 = vld [vmem:[#allocation4 + $0x110] sm:$0xff] }
 0xf15   : > { %12947 = vst [vmem:[#allocation55_spill] sm:$0xff] %v12165_v38 }
 0xf16   : > { %5983 = vst.msk [vmem:[#allocation2 + $0x1c8] sm:$0xff] %vm3045_vm5, %v12165_v38  ;;  %4848 = vperm.xlu2 %7956, %v11998_v58   ;;  %5022 = vmatmul.f32.gmra.mxu3 %v11972_v45  ;;  %v8018_v58 = vpack.i.bf16 %v12949_v5, %v12948_v53  ;;  %v12183_v45 = vld [vmem:[#allocation2 + $0x1c0] sm:$0xff] }
 0xf1a   : > { %4883 = vperm.xlu0 %7957, %v8239_v21  }
 0xf1e   : > { %4863 = vperm.xlu2 %7956, %v12067_v50   ;;  %5025 = vmatmul.f32.gmra.mxu3 %v11877_v57  ;;  %v5396_v57 = vpop.xlane.xlu0 %5395  ;;  %v12197_v50 = vld [vmem:[#allocation2 + $0x1d0] sm:$0xff] }
 0xf1f   : > { %v12186_v0 = vmax.f32 %v12183_v45, %v5396_v57  ;;  %12952 = vst [vmem:[#allocation41_spill] sm:$0xff] %v12197_v50 }
 0xf21   : > { %5982 = vst.msk [vmem:[#allocation2 + $0x1c0] sm:$0xff] %vm3045_vm5, %v12186_v0 }
 0xf22   : > { %8009 = vrot.lane.b32.xlu0 %v8008_v36, %s8533_s12  ;;  %v12224_v36 = vld [vmem:[#allocation2 + $0x1d8] sm:$0xff] }
 0xf26   : > { %v12176_v27 = vpop.f32.mrf.mxu1  ;;  %4868 = vperm.xlu2 %7956, %v12095_v46   ;;  %5028 = vmatmul.f32.gmra.mxu3 %v11959_v18  ;;  %v12950_v18 = vld [vmem:[#allocation33_spill] sm:$0xff]  ;;  %v5400_v46 = vpop.xlane.xlu2 %5399 }
 0xf27   : > { %5409 = vmax.xlane.f32.xlu1 %v12176_v27  ;;  %v8033_v13 = vpack.i.bf16 %v12951_v2, %v12950_v18  ;;  %v12200_v21 = vmax.f32 %v12197_v50, %v5400_v46 }
 0xf29   : > { %12953 = vst [vmem:[#allocation39_spill] sm:$0xff] %v12200_v21 }
 0xf2a   : > { %8019 = vrot.lane.b32.xlu0 %v8018_v58, %s8533_s12  ;;  %5984 = vst.msk [vmem:[#allocation2 + $0x1d0] sm:$0xff] %vm3045_vm5, %v12200_v21  ;;  %v12238_v58 = vld [vmem:[#allocation2 + $0x1f0] sm:$0xff] }
 0xf2e   : > { %4888 = vperm.xlu2 %7956, %v12016_v34   ;;  %5031 = vmatmul.f32.gmra.mxu3 %v11977_v48  ;;  %v5121_v34 = vld [vmem:[%s8759_s23] sm:$0xff] }
 0xf2f   : > { %v8043_v48 = vpack.i.bf16 %v5121_v34, %v5122_v23 }
 0xf32   : > { %8034 = vrot.lane.b32.xlu0 %v8033_v13, %s8533_s12  ;;  %v12250_v13 = vld [vmem:[#allocation2 + $0x1e8] sm:$0xff] }
 0xf33   : > { %12959 = vst [vmem:[#allocation28_spill] sm:$0xff] %v12250_v13 }
 0xf36   : > { %5477 = vperm.xlu2 %7956, %v12033_v55   ;;  %5034 = vmatmul.f32.gmra.mxu3 %v11885_v9 }
 0xf3a   : > { %8044 = vrot.lane.b32.xlu0 %v8043_v48, %s8533_s12  ;;  %v12961_v48 = vld [vmem:[#allocation36_spill] sm:$0xff] }
 0xf3b   : > { %v8013_v29 = vpack.i.bf16 %v12962_v19, %v12961_v48  ;;  %v4803_v19 = vld [vmem:[#allocation4 + $0x118] sm:$0xff] }
 0xf3e   : > { %8024 = vrot.lane.b32.xlu2 %v8023_v22, %s8533_s12  ;;  %5037 = vmatmul.f32.gmra.mxu3 %v11969_v59  ;;  %v4800_v22 = vld [vmem:[#allocation4 + $0x100] sm:$0xff] }
 0xf40   : > { %4823 = vperm.xlu1 %7955, %v12956_v14  }
 0xf42   : > { %5497 = vperm.xlu0 %7957, %v12137_v33  }
 0xf46   : > { %8039 = vrot.lane.b32.xlu2 %v8038_v47, %s8533_s12 }
 0xf48   : > { %4843 = vperm.xlu1 %7955, %v11917_v11  }
 0xf49   : > { %v4993_v9 = vpop.f32.mrf.mxu3 }
 0xf4a   : > { %5512 = vperm.xlu0 %7957, %v12152_v3  }
 0xf4e   : > { %5487 = vperm.xlu2 %7956, %v12115_v8  }
 0xf50   : > { %4858 = vperm.xlu1 %7955, %v11995_v49  }
 0xf51   : > { %v5402_v59 = vpop.xlane.xlu0 %5401  ;;  %v12227_v53 = vpop.f32.mrf.mxu3 }
 0xf52   : > { %v12230_v5 = vmax.f32 %v12224_v36, %v5402_v59  ;;  %5527 = vperm.xlu0 %7957, %v12200_v21   ;;  %v4814_v21 = vld [vmem:[#allocation4 + $0x170] sm:$0xff] }
 0xf54   : > { %5985 = vst.msk [vmem:[#allocation2 + $0x1d8] sm:$0xff] %vm3045_vm5, %v12230_v5 }
 0xf56   : > { %5502 = vperm.xlu2 %7956, %v12141_v10  }
 0xf58   : > { %4878 = vperm.xlu1 %7955, %v12075_v7  }
 0xf59   : > { %v5408_v49 = vpop.xlane.xlu0 %5407  ;;  %v4999_v57 = vpop.f32.mrf.mxu3 }
 0xf5a   : > { %v12242_v18 = vmax.f32 %v12238_v58, %v5408_v49  ;;  %v8305_v49 = vld [vmem:[%s8759_s23 + $0x30] sm:$0xff] }
 0xf5c   : > { %5988 = vst.msk [vmem:[#allocation2 + $0x1f0] sm:$0xff] %vm3045_vm5, %v12242_v18  ;;  %5547 = vperm.xlu0 %7957, %v12242_v18  }
 0xf5e   : > { %5517 = vperm.xlu2 %7956, %v12186_v0  }
 0xf60   : > { %4893 = vperm.xlu1 %7955, %v12088_v30  }
 0xf61   : > { %v5406_v7 = vpop.xlane.xlu2 %5405  ;;  %v5002_v46 = vpop.f32.mrf.mxu3 }
 0xf62   : > { %v12254_v34 = vmax.f32 %v12250_v13, %v5406_v7  ;;  %v8306_v7 = vld [vmem:[%s8759_s23 + $0x38] sm:$0xff]  ;;  %s12986_s23 = sld [smem:[#allocation56_spill]] (!%p7600_p3) }
 0xf63   : > { %v8028_v23 = vpack.i.bf16 %v8305_v49, %v8306_v7 }
 0xf64   : > { %12960 = vst [vmem:[#allocation26_spill] sm:$0xff] %v12254_v34 }
 0xf65   : > { %5987 = vst.msk [vmem:[#allocation2 + $0x1e8] sm:$0xff] %vm3045_vm5, %v12254_v34 }
 0xf66   : > { %5532 = vperm.xlu2 %7956, %v12230_v5  }
 0xf68   : > { %8014 = vrot.lane.b32.xlu1 %v8013_v29, %s8533_s12 }
 0xf69   : > { %v4819_v30 = vpop.permute.xlu2 %4818  ;;  %v5005_v14 = vpop.f32.mrf.mxu3 }
 0xf6a   : > { %v4896_v24 = vmul.f32 %v4819_v30, %v4800_v22  ;;  %v12272_v30 = vld [vmem:[#allocation2 + $0x1e0] sm:$0xff] }
 0xf6b   : > { %12963 = vst [vmem:[#allocation24_spill] sm:$0xff] %v12272_v30 }
 0xf6c   : > { %v5041_v47 = vadd.f32 %v4993_v9, %v4896_v24  ;;  %v4829_v59 = vpop.permute.xlu0 %4828  ;;  %v4804_v9 = vld [vmem:[#allocation4 + $0x120] sm:$0xff]  ;;  %v5404_v24 = vpop.xlane.xlu1 %5403 }
 0xf6d   : > { %v4898_v16 = vmul.f32 %v4829_v59, %v4802_v6 }
 0xf6e   : > { %5057 = vst.msk [vmem:[#allocation4 + $0x100] sm:$0xff] %vm2563_vm4, %v5041_v47  ;;  %5542 = vperm.xlu2 %7956, %v12254_v34   ;;  %v12275_v47 = vmax.f32 %v12272_v30, %v5404_v24 }
 0xf6f   : > { %v5043_v48 = vadd.f32 %v4999_v57, %v4898_v16 }
 0xf70   : > { %8029 = vrot.lane.b32.xlu1 %v8028_v23, %s8533_s12  ;;  %12964 = vst [vmem:[#allocation27_spill] sm:$0xff] %v12275_v47  ;;  %v4806_v23 = vld [vmem:[#allocation4 + $0x130] sm:$0xff] }
 0xf71   : > { %5059 = vst.msk [vmem:[#allocation4 + $0x110] sm:$0xff] %vm2563_vm4, %v5043_v48  ;;  %v4834_v29 = vpop.permute.xlu2 %4833  ;;  %v12270_v2 = vpop.f32.mrf.mxu3 }
 0xf72   : > { %v4899_v22 = vmul.f32 %v4834_v29, %v4803_v19  ;;  %5986 = vst.msk [vmem:[#allocation2 + $0x1e0] sm:$0xff] %vm3045_vm5, %v12275_v47 }
 0xf74   : > { %v5044_v49 = vadd.f32 %v5002_v46, %v4899_v22  ;;  %v4839_v6 = vpop.permute.xlu0 %4838  ;;  %v4807_v22 = vld [vmem:[#allocation4 + $0x138] sm:$0xff] }
 0xf75   : > { %v4900_v59 = vmul.f32 %v4839_v6, %v4804_v9 }
 0xf76   : > { %5060 = vst.msk [vmem:[#allocation4 + $0x118] sm:$0xff] %vm2563_vm4, %v5044_v49 }
 0xf77   : > { %v5045_v57 = vadd.f32 %v5005_v14, %v4900_v59 }
 0xf78   : > { %5482 = vperm.xlu1 %7955, %v12127_v42  }
 0xf79   : > { %5061 = vst.msk [vmem:[#allocation4 + $0x120] sm:$0xff] %vm2563_vm4, %v5045_v57  ;;  %v4849_v46 = vpop.permute.xlu2 %4848  ;;  %v5011_v7 = vpop.f32.mrf.mxu3 }
 0xf7a   : > { %v4902_v48 = vmul.f32 %v4849_v46, %v4806_v23  ;;  %v4809_v46 = vld [vmem:[#allocation4 + $0x148] sm:$0xff] }
 0xf7c   : > { %v5047_v19 = vadd.f32 %v5011_v7, %v4902_v48  ;;  %v4854_v29 = vpop.permute.xlu0 %4853 }
 0xf7d   : > { %v4903_v9 = vmul.f32 %v4854_v29, %v4807_v22 }
 0xf7e   : > { %5063 = vst.msk [vmem:[#allocation4 + $0x130] sm:$0xff] %vm2563_vm4, %v5047_v19 }
 0xf80   : > { %5492 = vperm.xlu1 %7955, %v12054_v56  }
 0xf81   : > { %v4864_v14 = vpop.permute.xlu2 %4863  ;;  %v5014_v24 = vpop.f32.mrf.mxu3 }
 0xf82   : > { %v5048_v49 = vadd.f32 %v5014_v24, %v4903_v9  ;;  %v4905_v7 = vmul.f32 %v4864_v14, %v4809_v46  ;;  %v4810_v9 = vld [vmem:[#allocation4 + $0x150] sm:$0xff] }
 0xf84   : > { %5064 = vst.msk [vmem:[#allocation4 + $0x138] sm:$0xff] %vm2563_vm4, %v5048_v49  ;;  %v4874_v6 = vpop.permute.xlu0 %4873  ;;  %v12293_v49 = vld [vmem:[#allocation2 + $0x1f8] sm:$0xff] }
 0xf85   : > { %12965 = vst [vmem:[#allocation25_spill] sm:$0xff] %v12293_v49 }
 0xf88   : > { %5507 = vperm.xlu1 %7955, %v12085_v44  }
 0xf89   : > { %v4869_v59 = vpop.permute.xlu2 %4868  ;;  %v12288_v57 = vpop.f32.mrf.mxu3 }
 0xf8a   : > { %v4906_v24 = vmul.f32 %v4869_v59, %v4810_v9  ;;  %v4801_v59 = vld [vmem:[#allocation4 + $0x108] sm:$0xff] }
 0xf8c   : > { %v4884_v23 = vpop.permute.xlu0 %4883 }
 0xf90   : > { %5522 = vperm.xlu1 %7955, %v12165_v38  }
 0xf91   : > { %v4889_v48 = vpop.permute.xlu2 %4888  ;;  %v5020_v19 = vpop.f32.mrf.mxu3 }
 0xf92   : > { %v5050_v29 = vadd.f32 %v5020_v19, %v4905_v7  ;;  %v4811_v7 = vld [vmem:[#allocation4 + $0x158] sm:$0xff] }
 0xf94   : > { %5066 = vst.msk [vmem:[#allocation4 + $0x148] sm:$0xff] %vm2563_vm4, %v5050_v29  ;;  %v8010_v22 = vpop.permute.xlu0 %8009  ;;  %v4907_v29 = vmul.f32 %v4874_v6, %v4811_v7 }
 0xf95   : > { %v8012_v6 = vunpack.i.h.bf16 %v8010_v22 }
 0xf98   : > { %5537 = vperm.xlu1 %7955, %v12275_v47  }
 0xf99   : > { %v5478_v16 = vpop.permute.xlu2 %5477  ;;  %v5023_v11 = vpop.f32.mrf.mxu3 }
 0xf9a   : > { %v5555_v34 = vsub.f32 %v12966_v15, %v5478_v16  ;;  %v5051_v13 = vadd.f32 %v5023_v11, %v4906_v24  ;;  %v5410_v14 = vpop.xlane.xlu1 %5409 }
 0xf9b   : > { %v12297_v46 = vmax.f32 %v12293_v49, %v5410_v14  ;;  %v4813_v14 = vld [vmem:[#allocation4 + $0x168] sm:$0xff] }
 0xf9c   : > { %v5571_v30 = vmul.f32 1.442695, %v5555_v34  ;;  %5067 = vst.msk [vmem:[#allocation4 + $0x150] sm:$0xff] %vm2563_vm4, %v5051_v13  ;;  %v12304_v19 = vpop.permute.xlu0 %8019  ;;  %v4909_v7 = vmul.f32 %v4884_v23, %v4813_v14  ;;  %v4910_v23 = vmul.f32 %v4889_v48, %v4814_v21 }
 0xf9d   : > { %12967 = vst [vmem:[#allocation23_spill] sm:$0xff] %v12297_v46 }
 0xf9e   : > { %5989 = vst.msk [vmem:[#allocation2 + $0x1f8] sm:$0xff] %vm3045_vm5, %v12297_v46  ;;  %8240 = vpow2.f32 %v5571_v30  ;;  %v8011_v30 = vunpack.i.l.bf16 %v8010_v22  ;;  %v4805_v22 = vld [vmem:[#allocation4 + $0x128] sm:$0xff] }
 0xfa0   : > { %5552 = vperm.xlu1 %7955, %v12297_v46   ;;  %5877 = vmatpush.msrb.mxu2 %v8011_v30 }
 0xfa1   : > { %v12307_v15 = vpop.permute.xlu2 %8024  ;;  %v5026_v11 = vpop.f32.mrf.mxu3  ;;  %7683 = vmatpush.msra.mxu3 %v8011_v30 }
 0xfa2   : > { %v5052_v16 = vadd.f32 %v5026_v11, %v4907_v29  ;;  %5878 = vmatpush.msrb.mxu2 %v8012_v6 }
 0xfa3   : > { %7684 = vmatpush.msra.mxu3 %v8012_v6 }
 0xfa4   : > { %v12309_v34 = vpop.eup %8240  ;;  %5068 = vst.msk [vmem:[#allocation4 + $0x158] sm:$0xff] %vm2563_vm4, %v5052_v16  ;;  %v12313_v13 = vpop.permute.xlu0 %8034 }
 0xfa5   : > { %5636 = vadd.xlane.f32.xlu0 %v12309_v34 }
 0xfa9   : > { %v12315_v9 = vpop.permute.xlu2 %8039  ;;  %v5029_v24 = vpop.f32.mrf.mxu3 }
 0xfac   : > { %v12317_v46 = vpop.permute.xlu0 %8044 }
 0xfb1   : > { %v5032_v49 = vpop.f32.mrf.mxu3  ;;  %v5488_v29 = vpop.permute.xlu2 %5487 }
 0xfb2   : > { %v5054_v11 = vadd.f32 %v5032_v49, %v4909_v7  ;;  %v4824_v16 = vpop.permute.xlu1 %4823  ;;  %v5557_v30 = vsub.f32 %v11930_v4, %v5488_v29 }
 0xfb3   : > { %v4897_v47 = vmul.f32 %v4824_v16, %v4801_v59 }
 0xfb4   : > { %5070 = vst.msk [vmem:[#allocation4 + $0x168] sm:$0xff] %vm2563_vm4, %v5054_v11  ;;  %v12323_v49 = vpop.permute.xlu0 %5497  ;;  %v5575_v7 = vmul.f32 1.442695, %v5557_v30 }
 0xfb5   : > { %v5042_v50 = vadd.f32 %v12227_v53, %v4897_v47  ;;  %v4808_v53 = vld [vmem:[#allocation4 + $0x140] sm:$0xff] }
 0xfb6   : > { %8242 = vpow2.f32 %v5575_v7 }
 0xfb7   : > { %5058 = vst.msk [vmem:[#allocation4 + $0x108] sm:$0xff] %vm2563_vm4, %v5042_v50 }
 0xfb9   : > { %v5035_v14 = vpop.f32.mrf.mxu3  ;;  %v5503_v59 = vpop.permute.xlu2 %5502 }
 0xfba   : > { %v5055_v51 = vadd.f32 %v5035_v14, %v4910_v23  ;;  %v4844_v38 = vpop.permute.xlu1 %4843  ;;  %v5560_v21 = vsub.f32 %v11951_v43, %v5503_v59  ;;  %v4815_v14 = vld [vmem:[#allocation4 + $0x178] sm:$0xff] }
 0xfbb   : > { %v4901_v40 = vmul.f32 %v4844_v38, %v4805_v22 }
 0xfbc   : > { %5071 = vst.msk [vmem:[#allocation4 + $0x170] sm:$0xff] %vm2563_vm4, %v5055_v51  ;;  %v12330_v4 = vpop.permute.xlu0 %5512  ;;  %v5581_v29 = vmul.f32 1.442695, %v5560_v21  ;;  %v4812_v51 = vld [vmem:[#allocation4 + $0x160] sm:$0xff]  ;;  %v12333_v11 = vpop.eup %8242 }
 0xfbd   : > { %v5046_v6 = vadd.f32 %v12270_v2, %v4901_v40 }
 0xfbe   : > { %8244 = vpow2.f32 %v5581_v29 }
 0xfbf   : > { %5062 = vst.msk [vmem:[#allocation4 + $0x128] sm:$0xff] %vm2563_vm4, %v5046_v6 }
 0xfc1   : > { %v5518_v38 = vpop.permute.xlu2 %5517 }
 0xfc2   : > { %v4859_v50 = vpop.permute.xlu1 %4858  ;;  %v5563_v2 = vsub.f32 %v12019_v54, %v5518_v38 }
 0xfc3   : > { %v4904_v47 = vmul.f32 %v4859_v50, %v4808_v53  ;;  %v5038_v53 = vpop.f32.mrf.mxu3 }
 0xfc4   : > { %v5587_v23 = vmul.f32 1.442695, %v5563_v2  ;;  %v12340_v30 = vpop.eup %8244  ;;  %v8022_v2 = vunpack.i.h.bf16 %v12304_v19 }
 0xfc5   : > { %v5049_v48 = vadd.f32 %v12288_v57, %v4904_v47  ;;  %v12338_v57 = vpop.permute.xlu0 %5527 }
 0xfc6   : > { %8246 = vpow2.f32 %v5587_v23 }
 0xfc7   : > { %5065 = vst.msk [vmem:[#allocation4 + $0x140] sm:$0xff] %vm2563_vm4, %v5049_v48 }
 0xfc9   : > { %v5533_v22 = vpop.permute.xlu2 %5532 }
 0xfca   : > { %5640 = vadd.xlane.f32.xlu1 %v12333_v11  ;;  %v4879_v40 = vpop.permute.xlu1 %4878  ;;  %v5566_v6 = vsub.f32 %v12097_v26, %v5533_v22  ;;  %v8021_v26 = vunpack.i.l.bf16 %v12304_v19  ;;  %v8036_v19 = vunpack.i.l.bf16 %v12313_v13 }
 0xfcb   : > { %v4908_v16 = vmul.f32 %v4879_v40, %v4812_v51 }
 0xfcc   : > { %v5593_v50 = vmul.f32 1.442695, %v5566_v6  ;;  %v12345_v21 = vpop.eup %8246 }
 0xfcd   : > { %v5053_v43 = vadd.f32 %v5029_v24, %v4908_v16  ;;  %v8026_v16 = vunpack.i.l.bf16 %v12307_v15 }
 0xfce   : > { %v5548_v24 = vpop.permute.xlu0 %5547  ;;  %8248 = vpow2.f32 %v5593_v50  ;;  %v8042_v50 = vunpack.i.h.bf16 %v12315_v9 }
 0xfcf   : > { %5069 = vst.msk [vmem:[#allocation4 + $0x160] sm:$0xff] %vm2563_vm4, %v5053_v43  ;;  %v5569_v48 = vsub.f32 %v12107_v37, %v5548_v24  ;;  %v8027_v43 = vunpack.i.h.bf16 %v12307_v15  ;;  %v8037_v15 = vunpack.i.h.bf16 %v12313_v13  ;;  %v5428_v13 = vsub.f32 %v12124_v52, %v12127_v42 }
 0xfd1   : > { %v5599_v51 = vmul.f32 1.442695, %v5569_v48 }
 0xfd2   : > { %5646 = vadd.xlane.f32.xlu1 %v12340_v30  ;;  %v4894_v59 = vpop.permute.xlu1 %4893 }
 0xfd3   : > { %v4911_v7 = vmul.f32 %v4894_v59, %v4815_v14  ;;  %8250 = vpow2.f32 %v5599_v51 }
 0xfd4   : > { %v12350_v40 = vpop.eup %8248 }
 0xfd5   : > { %v5056_v54 = vadd.f32 %v5038_v53, %v4911_v7  ;;  %v8041_v53 = vunpack.i.l.bf16 %v12315_v9  ;;  %v5562_v9 = vsub.f32 %v12010_v39, %v12330_v4  ;;  %v5565_v39 = vsub.f32 %v12042_v63, %v12338_v57 }
 0xfd6   : > { %v5427_v63 = vsub.f32 %v12030_v1, %v12033_v55 }
 0xfd7   : > { %5072 = vst.msk [vmem:[#allocation4 + $0x178] sm:$0xff] %vm2563_vm4, %v5056_v54  ;;  %v5559_v54 = vsub.f32 %v11943_v17, %v12323_v49  ;;  %v8047_v49 = vunpack.i.h.bf16 %v12317_v46 }
 0xfd9   : > { %v8251_v22 = vpop.eup %8250  ;;  %v5579_v24 = vmul.f32 1.442695, %v5559_v54 }
 0xfda   : > { %5652 = vadd.xlane.f32.xlu1 %v12345_v21  ;;  %v8015_v47 = vpop.permute.xlu1 %8014 }
 0xfdb   : > { %v8016_v38 = vunpack.i.l.bf16 %v8015_v47  ;;  %v8017_v29 = vunpack.i.h.bf16 %v8015_v47 }
 0xfdd   : > { %5879 = vmatpush.msrb.mxu2 %v8016_v38  ;;  %7685 = vmatpush.msra.mxu3 %v8016_v38 }
 0xfdf   : > { %5880 = vmatpush.msrb.mxu2 %v8017_v29  ;;  %7686 = vmatpush.msra.mxu3 %v8017_v29  ;;  %v5585_v29 = vmul.f32 1.442695, %v5562_v9 }
 0xfe1   : > { %5881 = vmatpush.msrb.mxu2 %v8021_v26  ;;  %7687 = vmatpush.msra.mxu3 %v8021_v26 }
 0xfe2   : > { %5658 = vadd.xlane.f32.xlu1 %v12350_v40  ;;  %v8030_v37 = vpop.permute.xlu1 %8029 }
 0xfe3   : > { %5882 = vmatpush.msrb.mxu2 %v8022_v2  ;;  %7688 = vmatpush.msra.mxu3 %v8022_v2  ;;  %v8031_v23 = vunpack.i.l.bf16 %v8030_v37  ;;  %v8032_v14 = vunpack.i.h.bf16 %v8030_v37  ;;  %v5543_v37 = vpop.permute.xlu2 %5542 }
 0xfe5   : > { %5883 = vmatpush.msrb.mxu2 %v8026_v16  ;;  %7689 = vmatpush.msra.mxu3 %v8026_v16  ;;  %v5591_v16 = vmul.f32 1.442695, %v5565_v39 }
 0xfe7   : > { %5884 = vmatpush.msrb.mxu2 %v8027_v43  ;;  %7690 = vmatpush.msra.mxu3 %v8027_v43 }
 0xfe9   : > { %5885 = vmatpush.msrb.mxu2 %v8031_v23  ;;  %7691 = vmatpush.msra.mxu3 %v8031_v23  ;;  %v5568_v23 = vsub.f32 %v12120_v62, %v5543_v37 }
 0xfea   : > { %5664 = vadd.xlane.f32.xlu1 %v8251_v22  ;;  %v5483_v59 = vpop.permute.xlu1 %5482 }
 0xfeb   : > { %v5556_v6 = vsub.f32 %v11923_v32, %v5483_v59  ;;  %5886 = vmatpush.msrb.mxu2 %v8032_v14  ;;  %7692 = vmatpush.msra.mxu3 %v8032_v14  ;;  %v8046_v32 = vunpack.i.l.bf16 %v12317_v46  ;;  %v5432_v46 = vsub.f32 %v12134_v35, %v12141_v10  ;;  %v5443_v14 = vmul.f32 1.442695, %v5427_v63 }
 0xfec   : > { %v5597_v59 = vmul.f32 1.442695, %v5568_v23 }
 0xfed   : > { %v5573_v7 = vmul.f32 1.442695, %v5556_v6  ;;  %5887 = vmatpush.msrb.mxu2 %v8036_v19  ;;  %7693 = vmatpush.msra.mxu3 %v8036_v19 }
 0xfef   : > { %8252 = vpow2.f32 %v5573_v7  ;;  %5888 = vmatpush.msrb.mxu2 %v8037_v15  ;;  %7694 = vmatpush.msra.mxu3 %v8037_v15 }
 0xff0   : > { %8254 = vpow2.f32 %v5579_v24 }
 0xff1   : > { %5889 = vmatpush.msrb.mxu2 %v8041_v53  ;;  %7695 = vmatpush.msra.mxu3 %v8041_v53 }
 0xff2   : > { %v5493_v47 = vpop.permute.xlu1 %5492 }
 0xff3   : > { %v5558_v48 = vsub.f32 %v11936_v28, %v5493_v47  ;;  %5890 = vmatpush.msrb.mxu2 %v8042_v50  ;;  %7696 = vmatpush.msra.mxu3 %v8042_v50  ;;  %v5445_v28 = vmul.f32 1.442695, %v5428_v13  ;;  %v5604_v50 = vld [vmem:[#allocation3 + $0x180] sm:$0xff] }
 0xff5   : > { %v8253_v38 = vpop.eup %8252  ;;  %v5577_v17 = vmul.f32 1.442695, %v5558_v48  ;;  %5891 = vmatpush.msrb.mxu2 %v8046_v32  ;;  %7697 = vmatpush.msra.mxu3 %v8046_v32 }
 0xff6   : > { %5638 = vadd.xlane.f32.xlu2 %v8253_v38  ;;  %v8255_v26 = vpop.eup %8254 }
 0xff7   : > { %8256 = vpow2.f32 %v5577_v17  ;;  %5892 = vmatpush.msrb.mxu2 %v8047_v49  ;;  %7698 = vmatpush.msra.mxu3 %v8047_v49 }
 0xff8   : > { %5893 = vmatmul.f32.vlgmr.msrb.gmra.mxu2 %v12309_v34  ;;  %5935 = vmatmul.f32.vlgmr.msra.gmra.mxu3 %v8251_v22  ;;  %8258 = vpow2.f32 %v5445_v28  ;;  %v5453_v34 = vmul.f32 1.442695, %v5432_v46  ;;  %v5431_v28 = vsub.f32 %v12132_v20, %v12137_v33  ;;  %v12972_v33 = vld [vmem:[#allocation55_spill] sm:$0xff] }
 0xff9   : > { %8260 = vpow2.f32 %v5585_v29 }
 0xffa   : > { %v5508_v52 = vpop.permute.xlu1 %5507  ;;  %v5451_v29 = vmul.f32 1.442695, %v5431_v28 }
 0xffb   : > { %v5561_v42 = vsub.f32 %v11961_v61, %v5508_v52 }
 0xffd   : > { %v8257_v51 = vpop.eup %8256  ;;  %v5583_v2 = vmul.f32 1.442695, %v5561_v42  ;;  %v12973_v42 = vld [vmem:[#allocation48_spill] sm:$0xff] }
 0xffe   : > { %5644 = vadd.xlane.f32.xlu2 %v8255_v26  ;;  %5642 = vadd.xlane.f32.xlu0 %v8257_v51  ;;  %v12376_v4 = vpop.eup %8258 }
 0xfff   : > { %8262 = vpow2.f32 %v5583_v2  ;;  %v12380_v35 = vpop.eup %8260 }
0x1000   : > { %5896 = vmatmul.f32.gmra.mxu2 %v8253_v38  ;;  %8264 = vpow2.f32 %v5453_v34  ;;  %v12974_v34 = vld [vmem:[#allocation41_spill] sm:$0xff] }
0x1001   : > { %8266 = vpow2.f32 %v5591_v16  ;;  %v12975_v16 = vld [vmem:[#allocation39_spill] sm:$0xff] }
0x1002   : > { %v5523_v61 = vpop.permute.xlu1 %5522 }
0x1003   : > { %v5564_v43 = vsub.f32 %v12025_v31, %v5523_v61  ;;  %5724 = vperm.xlu1 %7955, %v12376_v4   ;;  %v12968_v31 = vsub.f32 %v12183_v45, %v12186_v0  ;;  %v12969_v45 = vsub.f32 %v12224_v36, %v12230_v5  ;;  %v12970_v5 = vsub.f32 %v12238_v58, %v12242_v18 }
0x1004   : > { %v5429_v58 = vsub.f32 %v12109_v41, %v12115_v8  ;;  %v5430_v18 = vsub.f32 %v12050_v12, %v12054_v56  ;;  %v12971_v12 = vld [vmem:[#allocation53_spill] sm:$0xff]  ;;  %v12976_v61 = vsub.f32 %v12974_v34, %v12975_v16  ;;  %v5702_v34 = vld [vmem:[#allocation4 + $0x188] sm:$0xff] }
0x1005   : > { %v8263_v10 = vpop.eup %8262  ;;  %v5589_v57 = vmul.f32 1.442695, %v5564_v43  ;;  %v5459_v22 = vmul.f32 1.442695, %v12968_v31  ;;  %v5465_v0 = vmul.f32 1.442695, %v12969_v45  ;;  %v5434_v56 = vsub.f32 %v12971_v12, %v12152_v3 }
0x1006   : > { %5650 = vadd.xlane.f32.xlu2 %v12380_v35  ;;  %5648 = vadd.xlane.f32.xlu0 %v8263_v10  ;;  %v12390_v19 = vpop.eup %8264  ;;  %v5471_v47 = vmul.f32 1.442695, %v12970_v5  ;;  %v5447_v49 = vmul.f32 1.442695, %v5429_v58  ;;  %v5449_v9 = vmul.f32 1.442695, %v5430_v18 }
0x1007   : > { %8268 = vpow2.f32 %v5589_v57  ;;  %v12394_v55 = vpop.eup %8266  ;;  %v5457_v20 = vmul.f32 1.442695, %v5434_v56  ;;  %v5463_v37 = vmul.f32 1.442695, %v12976_v61  ;;  %v5609_v43 = vld [vmem:[#allocation3 + $0x1a8] sm:$0xff]  ;;  %v5612_v45 = vld [vmem:[#allocation3 + $0x1c0] sm:$0xff] }
0x1008   : > { %5899 = vmatmul.f32.gmra.mxu2 %v12333_v11  ;;  %8270 = vpow2.f32 %v5459_v22  ;;  %v5625_v23 = vmul.f32 %v12390_v19, %v5609_v43  ;;  %v5615_v5 = vld [vmem:[#allocation3 + $0x1d8] sm:$0xff] }
0x1009   : > { %8272 = vpow2.f32 %v5443_v14 }
0x100a   : > { %v5538_v6 = vpop.permute.xlu1 %5537  ;;  %8274 = vpow2.f32 %v5597_v59  ;;  %v12980_v59 = vld [vmem:[#allocation28_spill] sm:$0xff] }
0x100b   : > { %v5567_v1 = vsub.f32 %v12105_v60, %v5538_v6  ;;  %5744 = vperm.xlu1 %7955, %v12390_v19   ;;  %v12981_v6 = vld [vmem:[#allocation26_spill] sm:$0xff]  ;;  %v12983_v19 = vld [vmem:[#allocation25_spill] sm:$0xff] }
0x100d   : > { %v12396_v62 = vpop.eup %8268  ;;  %v5595_v7 = vmul.f32 1.442695, %v5567_v1  ;;  %v12982_v1 = vsub.f32 %v12980_v59, %v12981_v6 }
0x100e   : > { %5656 = vadd.xlane.f32.xlu2 %v12394_v55  ;;  %5654 = vadd.xlane.f32.xlu0 %v12396_v62  ;;  %v12403_v60 = vpop.eup %8270 }
0x100f   : > { %8276 = vpow2.f32 %v5595_v7  ;;  %v8273_v15 = vpop.eup %8272 }
0x1010   : > { %5902 = vmatmul.f32.gmra.mxu2 %v8257_v51  ;;  %v12407_v54 = vpop.eup %8274  ;;  %8278 = vpow2.f32 %v5465_v0  ;;  %v5620_v36 = vmul.f32 %v8273_v15, %v5604_v50  ;;  %v12984_v0 = vld [vmem:[#allocation23_spill] sm:$0xff] }
0x1012   : > { %v5553_v11 = vpop.permute.xlu1 %5552 }
0x1013   : > { %v5570_v53 = vsub.f32 %v12176_v27, %v5553_v11  ;;  %5759 = vperm.xlu1 %7955, %v12403_v60   ;;  %v12985_v11 = vsub.f32 %v12983_v19, %v12984_v0  ;;  %v5619_v19 = vld [vmem:[#allocation3 + $0x1f8] sm:$0xff]  ;;  %v5701_v0 = vld [vmem:[#allocation4 + $0x180] sm:$0xff] }
0x1015   : > { %v12409_v32 = vpop.eup %8276  ;;  %v5601_v24 = vmul.f32 1.442695, %v5570_v53  ;;  %v5628_v53 = vmul.f32 %v12403_v60, %v5612_v45 }
0x1016   : > { %5662 = vadd.xlane.f32.xlu2 %v12407_v54  ;;  %5660 = vadd.xlane.f32.xlu0 %v12409_v32  ;;  %v12416_v13 = vpop.eup %8278 }
0x1017   : > { %8280 = vpow2.f32 %v5601_v24 }
0x1018   : > { %v5637_v27 = vpop.xlane.xlu0 %5636  ;;  %5905 = vmatmul.f32.gmra.mxu2 %v8255_v26  ;;  %8282 = vpow2.f32 %v5471_v47  ;;  %v5436_v26 = vsub.f32 %v12973_v42, %v12972_v33  ;;  %v5631_v47 = vmul.f32 %v12416_v13, %v5615_v5 }
0x1019   : > { %v5668_v48 = vadd.f32 %v5637_v27, %v5620_v36  ;;  %8284 = vpow2.f32 %v5447_v49 }
0x101a   : > { %8286 = vpow2.f32 %v5449_v9  ;;  %v5461_v46 = vmul.f32 1.442695, %v5436_v26 }
0x101b   : > { %5684 = vst.msk [vmem:[#allocation3 + $0x180] sm:$0xff] %vm3045_vm5, %v5668_v48  ;;  %5774 = vperm.xlu1 %7955, %v12416_v13   ;;  %8288 = vpow2.f32 %v5451_v29  ;;  %v5605_v13 = vld [vmem:[#allocation3 + $0x188] sm:$0xff]  ;;  %v5607_v29 = vld [vmem:[#allocation3 + $0x198] sm:$0xff] }
0x101c   : > { %v5621_v49 = vmul.f32 %v12376_v4, %v5605_v13  ;;  %v5611_v4 = vld [vmem:[#allocation3 + $0x1b8] sm:$0xff] }
0x101d   : > { %v8281_v38 = vpop.eup %8280 }
0x101e   : > { %5666 = vadd.xlane.f32.xlu0 %v8281_v38  ;;  %5938 = vmatmul.f32.gmra.mxu3 %v8281_v38  ;;  %v12421_v17 = vpop.eup %8282  ;;  %v5618_v38 = vld [vmem:[#allocation3 + $0x1f0] sm:$0xff] }
0x101f   : > { %v8285_v41 = vpop.eup %8284  ;;  %v5634_v58 = vmul.f32 %v12421_v17, %v5618_v38  ;;  %v5704_v38 = vld [vmem:[#allocation4 + $0x198] sm:$0xff] }
0x1020   : > { %5908 = vmatmul.f32.gmra.mxu2 %v12340_v30  ;;  %v5433_v30 = vsub.f32 %v12080_v25, %v12085_v44  ;;  %v12435_v52 = vpop.eup %8286  ;;  %v5606_v44 = vld [vmem:[#allocation3 + $0x190] sm:$0xff] }
0x1021   : > { %v12441_v25 = vpop.eup %8288  ;;  %v5622_v51 = vmul.f32 %v8285_v41, %v5606_v44 }
0x1022   : > { %v5455_v8 = vmul.f32 1.442695, %v5433_v30  ;;  %v5608_v30 = vld [vmem:[#allocation3 + $0x1a0] sm:$0xff] }
0x1023   : > { %5789 = vperm.xlu1 %7955, %v12421_v17  }
0x1024   : > { %8290 = vpow2.f32 %v5455_v8 }
0x1025   : > { %8292 = vpow2.f32 %v5457_v20  ;;  %v5610_v20 = vld [vmem:[#allocation3 + $0x1b0] sm:$0xff] }
0x1026   : > { %8294 = vpow2.f32 %v5461_v46 }
0x1027   : > { %8296 = vpow2.f32 %v5463_v37 }
0x1028   : > { %5911 = vmatmul.f32.gmra.mxu2 %v8263_v10  ;;  %v12978_v10 = vld [vmem:[#allocation27_spill] sm:$0xff] }
0x102a   : > { %v12444_v3 = vpop.eup %8290 }
0x102b   : > { %v5626_v42 = vmul.f32 %v12444_v3, %v5610_v20 }
0x102e   : > { %5719 = vperm.xlu2 %7956, %v8273_v15   ;;  %v5473_v15 = vmul.f32 1.442695, %v12985_v11 }
0x1030   : > { %5914 = vmatmul.f32.gmra.mxu2 %v12380_v35  ;;  %v12977_v35 = vld [vmem:[#allocation24_spill] sm:$0xff] }
0x1031   : > { %v12979_v63 = vsub.f32 %v12977_v35, %v12978_v10 }
0x1032   : > { %5729 = vperm.xlu0 %7957, %v8285_v41   ;;  %v5623_v41 = vmul.f32 %v12435_v52, %v5607_v29 }
0x1033   : > { %v5467_v57 = vmul.f32 1.442695, %v12979_v63 }
0x1035   : > { %8298 = vpow2.f32 %v5467_v57 }
0x1036   : > { %5734 = vperm.xlu2 %7956, %v12435_v52  }
0x1038   : > { %5917 = vmatmul.f32.gmra.mxu2 %v12345_v21  ;;  %v8293_v21 = vpop.eup %8292 }
0x1039   : > { %v12456_v31 = vpop.eup %8294  ;;  %v5627_v33 = vmul.f32 %v8293_v21, %v5611_v4  ;;  %v5705_v4 = vld [vmem:[#allocation4 + $0x1a0] sm:$0xff] }
0x103a   : > { %5739 = vperm.xlu0 %7957, %v12441_v25   ;;  %v8297_v7 = vpop.eup %8296 }
0x103b   : > { %v12468_v50 = vpop.eup %8298 }
0x103d   : > { %v5641_v2 = vpop.xlane.xlu1 %5640 }
0x103e   : > { %v5670_v39 = vadd.f32 %v5641_v2, %v5622_v51  ;;  %5749 = vperm.xlu2 %7956, %v12444_v3   ;;  %v5614_v2 = vld [vmem:[#allocation3 + $0x1d0] sm:$0xff] }
0x103f   : > { %v5630_v16 = vmul.f32 %v8297_v7, %v5614_v2 }
0x1040   : > { %5686 = vst.msk [vmem:[#allocation3 + $0x190] sm:$0xff] %vm3045_vm5, %v5670_v39  ;;  %5920 = vmatmul.f32.gmra.mxu2 %v12396_v62  ;;  %v5469_v62 = vmul.f32 1.442695, %v12982_v1  ;;  %v5613_v39 = vld [vmem:[#allocation3 + $0x1c8] sm:$0xff] }
0x1041   : > { %v5629_v61 = vmul.f32 %v12456_v31, %v5613_v39  ;;  %v5709_v39 = vld [vmem:[#allocation4 + $0x1c0] sm:$0xff] }
0x1042   : > { %5754 = vperm.xlu0 %7957, %v8293_v21   ;;  %8300 = vpow2.f32 %v5469_v62 }
0x1043   : > { %8302 = vpow2.f32 %v5473_v15 }
0x1045   : > { %v5647_v22 = vpop.xlane.xlu1 %5646 }
0x1046   : > { %v5673_v14 = vadd.f32 %v5647_v22, %v5625_v23  ;;  %5764 = vperm.xlu2 %7956, %v12456_v31   ;;  %v5617_v23 = vld [vmem:[#allocation3 + $0x1e8] sm:$0xff]  ;;  %v5616_v22 = vld [vmem:[#allocation3 + $0x1e0] sm:$0xff] }
0x1047   : > { %v5632_v31 = vmul.f32 %v12468_v50, %v5616_v22 }
0x1048   : > { %5689 = vst.msk [vmem:[#allocation3 + $0x1a8] sm:$0xff] %vm3045_vm5, %v5673_v14  ;;  %5923 = vmatmul.f32.gmra.mxu2 %v12394_v55  ;;  %v8301_v55 = vpop.eup %8300 }
0x1049   : > { %v12474_v27 = vpop.eup %8302  ;;  %v5633_v14 = vmul.f32 %v8301_v55, %v5617_v23 }
0x104a   : > { %5769 = vperm.xlu0 %7957, %v8297_v7   ;;  %v5635_v11 = vmul.f32 %v12474_v27, %v5619_v19 }
0x104d   : > { %v5653_v24 = vpop.xlane.xlu1 %5652 }
0x104e   : > { %v5676_v36 = vadd.f32 %v5653_v24, %v5628_v53  ;;  %5779 = vperm.xlu2 %7956, %v12468_v50  }
0x1050   : > { %5692 = vst.msk [vmem:[#allocation3 + $0x1c0] sm:$0xff] %vm3045_vm5, %v5676_v36  ;;  %5926 = vmatmul.f32.gmra.mxu2 %v12350_v40 }
0x1052   : > { %5784 = vperm.xlu0 %7957, %v8301_v55   ;;  %v5715_v55 = vld [vmem:[#allocation4 + $0x1f0] sm:$0xff] }
0x1055   : > { %v5659_v48 = vpop.xlane.xlu1 %5658 }
0x1056   : > { %v5679_v60 = vadd.f32 %v5659_v48, %v5631_v47  ;;  %5794 = vperm.xlu2 %7956, %v12474_v27  }
0x1058   : > { %5695 = vst.msk [vmem:[#allocation3 + $0x1d8] sm:$0xff] %vm3045_vm5, %v5679_v60  ;;  %5929 = vmatmul.f32.gmra.mxu2 %v12409_v32  ;;  %v5624_v32 = vmul.f32 %v12441_v25, %v5608_v30  ;;  %v5703_v30 = vld [vmem:[#allocation4 + $0x190] sm:$0xff] }
0x105d   : > { %v5665_v18 = vpop.xlane.xlu1 %5664 }
0x105e   : > { %v5682_v40 = vadd.f32 %v5665_v18, %v5634_v58 }
0x1060   : > { %5698 = vst.msk [vmem:[#allocation3 + $0x1f0] sm:$0xff] %vm3045_vm5, %v5682_v40  ;;  %5932 = vmatmul.f32.gmra.mxu2 %v12407_v54 }
0x1069   : > { %v5639_v9 = vpop.xlane.xlu2 %5638 }
0x106a   : > { %v5669_v28 = vadd.f32 %v5639_v9, %v5621_v49  ;;  %v5706_v49 = vld [vmem:[#allocation4 + $0x1a8] sm:$0xff] }
0x106c   : > { %5685 = vst.msk [vmem:[#allocation3 + $0x188] sm:$0xff] %vm3045_vm5, %v5669_v28 }
0x1071   : > { %v5645_v17 = vpop.xlane.xlu2 %5644  ;;  %v5643_v8 = vpop.xlane.xlu0 %5642 }
0x1072   : > { %v5672_v12 = vadd.f32 %v5645_v17, %v5624_v32  ;;  %v5671_v56 = vadd.f32 %v5643_v8, %v5623_v41  ;;  %v5707_v8 = vld [vmem:[#allocation4 + $0x1b0] sm:$0xff] }
0x1074   : > { %5688 = vst.msk [vmem:[#allocation3 + $0x1a0] sm:$0xff] %vm3045_vm5, %v5672_v12 }
0x1075   : > { %5687 = vst.msk [vmem:[#allocation3 + $0x198] sm:$0xff] %vm3045_vm5, %v5671_v56  ;;  %v5725_v54 = vpop.permute.xlu1 %5724 }
0x1076   : > { %v5798_v43 = vmul.f32 %v5725_v54, %v5702_v34 }
0x1079   : > { %v5651_v26 = vpop.xlane.xlu2 %5650  ;;  %v5649_v44 = vpop.xlane.xlu0 %5648 }
0x107a   : > { %v5675_v46 = vadd.f32 %v5651_v26, %v5627_v33  ;;  %v5674_v25 = vadd.f32 %v5649_v44, %v5626_v42 }
0x107b   : > { %v5894_v51 = vpop.f32.mrf.mxu2  ;;  %v5936_v60 = vpop.f32.mrf.mxu3 }
0x107c   : > { %5691 = vst.msk [vmem:[#allocation3 + $0x1b8] sm:$0xff] %vm3045_vm5, %v5675_v46 }
0x107d   : > { %5690 = vst.msk [vmem:[#allocation3 + $0x1b0] sm:$0xff] %vm3045_vm5, %v5674_v25  ;;  %v5745_v52 = vpop.permute.xlu1 %5744  ;;  %v5708_v25 = vld [vmem:[#allocation4 + $0x1b8] sm:$0xff] }
0x107e   : > { %v5802_v28 = vmul.f32 %v5745_v52, %v5706_v49 }
0x1081   : > { %v5657_v37 = vpop.xlane.xlu2 %5656  ;;  %v5655_v21 = vpop.xlane.xlu0 %5654 }
0x1082   : > { %v5678_v3 = vadd.f32 %v5657_v37, %v5630_v16  ;;  %v5677_v35 = vadd.f32 %v5655_v21, %v5629_v61  ;;  %v5716_v16 = vld [vmem:[#allocation4 + $0x1f8] sm:$0xff] }
0x1083   : > { %v5897_v10 = vpop.f32.mrf.mxu2 }
0x1084   : > { %5694 = vst.msk [vmem:[#allocation3 + $0x1d0] sm:$0xff] %vm3045_vm5, %v5678_v3  ;;  %v5943_v63 = vadd.f32 %v5897_v10, %v5798_v43 }
0x1085   : > { %5693 = vst.msk [vmem:[#allocation3 + $0x1c8] sm:$0xff] %vm3045_vm5, %v5677_v35  ;;  %v12494_v57 = vpop.permute.xlu1 %5759 }
0x1086   : > { %5959 = vst.msk [vmem:[#allocation4 + $0x188] sm:$0xff] %vm2563_vm4, %v5943_v63  ;;  %v5805_v37 = vmul.f32 %v12494_v57, %v5709_v39  ;;  %v5710_v63 = vld [vmem:[#allocation4 + $0x1c8] sm:$0xff] }
0x1089   : > { %v5663_v59 = vpop.xlane.xlu2 %5662  ;;  %v5661_v6 = vpop.xlane.xlu0 %5660 }
0x108a   : > { %v5681_v1 = vadd.f32 %v5663_v59, %v5633_v14  ;;  %v5680_v62 = vadd.f32 %v5661_v6, %v5632_v31  ;;  %v5711_v31 = vld [vmem:[#allocation4 + $0x1d0] sm:$0xff] }
0x108b   : > { %v5900_v7 = vpop.f32.mrf.mxu2 }
0x108c   : > { %5697 = vst.msk [vmem:[#allocation3 + $0x1e8] sm:$0xff] %vm3045_vm5, %v5681_v1 }
0x108d   : > { %5696 = vst.msk [vmem:[#allocation3 + $0x1e0] sm:$0xff] %vm3045_vm5, %v5680_v62  ;;  %v12500_v45 = vpop.permute.xlu1 %5774  ;;  %v5712_v62 = vld [vmem:[#allocation4 + $0x1d8] sm:$0xff] }
0x1091   : > { %v5720_v15 = vpop.permute.xlu2 %5719  ;;  %v5667_v53 = vpop.xlane.xlu0 %5666 }
0x1092   : > { %v5797_v24 = vmul.f32 %v5720_v15, %v5701_v0  ;;  %v5683_v36 = vadd.f32 %v5667_v53, %v5635_v11  ;;  %v5713_v11 = vld [vmem:[#allocation4 + $0x1e0] sm:$0xff] }
0x1093   : > { %v5903_v50 = vpop.f32.mrf.mxu2 }
0x1094   : > { %v5942_v5 = vadd.f32 %v5894_v51, %v5797_v24  ;;  %5699 = vst.msk [vmem:[#allocation3 + $0x1f8] sm:$0xff] %vm3045_vm5, %v5683_v36  ;;  %v5714_v36 = vld [vmem:[#allocation4 + $0x1e8] sm:$0xff] }
0x1095   : > { %v5790_v47 = vpop.permute.xlu1 %5789 }
0x1096   : > { %5958 = vst.msk [vmem:[#allocation4 + $0x180] sm:$0xff] %vm2563_vm4, %v5942_v5  ;;  %v5811_v48 = vmul.f32 %v5790_v47, %v5715_v55 }
0x1098   : > { %v5956_v58 = vadd.f32 %v5936_v60, %v5811_v48 }
0x1099   : > { %v5735_v18 = vpop.permute.xlu2 %5734 }
0x109a   : > { %5972 = vst.msk [vmem:[#allocation4 + $0x1f0] sm:$0xff] %vm2563_vm4, %v5956_v58  ;;  %v5800_v27 = vmul.f32 %v5735_v18, %v5704_v38 }
0x109b   : > { %v5906_v40 = vpop.f32.mrf.mxu2 }
0x109c   : > { %v5945_v13 = vadd.f32 %v5903_v50, %v5800_v27 }
0x109e   : > { %5961 = vst.msk [vmem:[#allocation4 + $0x198] sm:$0xff] %vm2563_vm4, %v5945_v13 }
0x10a1   : > { %v5750_v9 = vpop.permute.xlu2 %5749  ;;  %v5939_v43 = vpop.f32.mrf.mxu3 }
0x10a2   : > { %v5803_v54 = vmul.f32 %v5750_v9, %v5707_v8 }
0x10a3   : > { %v5909_v29 = vpop.f32.mrf.mxu2 }
0x10a4   : > { %v5947_v32 = vadd.f32 %v5909_v29, %v5802_v28  ;;  %v5730_v41 = vpop.permute.xlu0 %5729 }
0x10a5   : > { %v5799_v17 = vmul.f32 %v5730_v41, %v5703_v30 }
0x10a6   : > { %5963 = vst.msk [vmem:[#allocation4 + $0x1a8] sm:$0xff] %vm2563_vm4, %v5947_v32 }
0x10a7   : > { %v5944_v12 = vadd.f32 %v5900_v7, %v5799_v17  ;;  %v5808_v7 = vmul.f32 %v12500_v45, %v5712_v62 }
0x10a9   : > { %5960 = vst.msk [vmem:[#allocation4 + $0x190] sm:$0xff] %vm2563_vm4, %v5944_v12  ;;  %v5765_v56 = vpop.permute.xlu2 %5764 }
0x10aa   : > { %v5806_v23 = vmul.f32 %v5765_v56, %v5710_v63 }
0x10ab   : > { %v5912_v20 = vpop.f32.mrf.mxu2 }
0x10ac   : > { %v5948_v33 = vadd.f32 %v5912_v20, %v5803_v54  ;;  %v5740_v42 = vpop.permute.xlu0 %5739 }
0x10ad   : > { %v5801_v26 = vmul.f32 %v5740_v42, %v5705_v4 }
0x10ae   : > { %5964 = vst.msk [vmem:[#allocation4 + $0x1b0] sm:$0xff] %vm2563_vm4, %v5948_v33 }
0x10af   : > { %v5946_v44 = vadd.f32 %v5906_v40, %v5801_v26 }
0x10b1   : > { %5962 = vst.msk [vmem:[#allocation4 + $0x1a0] sm:$0xff] %vm2563_vm4, %v5946_v44  ;;  %v5780_v46 = vpop.permute.xlu2 %5779 }
0x10b2   : > { %v5809_v15 = vmul.f32 %v5780_v46, %v5713_v11 }
0x10b3   : > { %v5915_v51 = vpop.f32.mrf.mxu2 }
0x10b4   : > { %v5755_v52 = vpop.permute.xlu0 %5754 }
0x10b5   : > { %v5804_v2 = vmul.f32 %v5755_v52, %v5708_v25 }
0x10b7   : > { %v5949_v34 = vadd.f32 %v5915_v51, %v5804_v2 }
0x10b9   : > { %5965 = vst.msk [vmem:[#allocation4 + $0x1b8] sm:$0xff] %vm2563_vm4, %v5949_v34  ;;  %v5795_v61 = vpop.permute.xlu2 %5794 }
0x10ba   : > { %v5812_v21 = vmul.f32 %v5795_v61, %v5716_v16 }
0x10bb   : > { %v5918_v3 = vpop.f32.mrf.mxu2 }
0x10bc   : > { %v5957_v35 = vadd.f32 %v5939_v43, %v5812_v21  ;;  %v5950_v10 = vadd.f32 %v5918_v3, %v5805_v37  ;;  %v5770_v59 = vpop.permute.xlu0 %5769 }
0x10bd   : > { %v5807_v6 = vmul.f32 %v5770_v59, %v5711_v31 }
0x10be   : > { %5973 = vst.msk [vmem:[#allocation4 + $0x1f8] sm:$0xff] %vm2563_vm4, %v5957_v35 }
0x10bf   : > { %5966 = vst.msk [vmem:[#allocation4 + $0x1c0] sm:$0xff] %vm2563_vm4, %v5950_v10 }
0x10c3   : > { %v5921_v22 = vpop.f32.mrf.mxu2 }
0x10c4   : > { %v5951_v14 = vadd.f32 %v5921_v22, %v5806_v23  ;;  %v5785_v50 = vpop.permute.xlu0 %5784 }
0x10c5   : > { %v5810_v55 = vmul.f32 %v5785_v50, %v5714_v36 }
0x10c6   : > { %5967 = vst.msk [vmem:[#allocation4 + $0x1c8] sm:$0xff] %vm2563_vm4, %v5951_v14 }
0x10cb   : > { %v5924_v1 = vpop.f32.mrf.mxu2 }
0x10cc   : > { %v5952_v57 = vadd.f32 %v5924_v1, %v5807_v6 }
0x10ce   : > { %5968 = vst.msk [vmem:[#allocation4 + $0x1d0] sm:$0xff] %vm2563_vm4, %v5952_v57 }
0x10d3   : > { %v5927_v19 = vpop.f32.mrf.mxu2 }
0x10d4   : > { %v5953_v0 = vadd.f32 %v5927_v19, %v5808_v7 }
0x10d6   : > { %5969 = vst.msk [vmem:[#allocation4 + $0x1d8] sm:$0xff] %vm2563_vm4, %v5953_v0 }
0x10db   : > { %v5930_v53 = vpop.f32.mrf.mxu2 }
0x10dc   : > { %v5954_v24 = vadd.f32 %v5930_v53, %v5809_v15 }
0x10de   : > { %5970 = vst.msk [vmem:[#allocation4 + $0x1e0] sm:$0xff] %vm2563_vm4, %v5954_v24 }
0x10e2   : > { %5993 = sbr.rel (%p7600_p3) target bundleno = 4813 (0x12cd), region = 166 }
0x10e3   : > { %v5933_v5 = vpop.f32.mrf.mxu2 }
0x10e4   : > { %v5955_v47 = vadd.f32 %v5933_v5, %v5810_v55 }
0x10e6   : > { %5971 = vst.msk [vmem:[#allocation4 + $0x1e8] sm:$0xff] %vm2563_vm4, %v5955_v47 }
0x10e7   : > { %v6015_v45 = vld [vmem:[#allocation3 + $0x20] sm:$0xff]  ;;  %v6013_v48 = vld [vmem:[#allocation3 + $0x10] sm:$0xff]  ;;  %v8534_v38 = vmov 0   ;;  %v6016_v58 = vld [vmem:[#allocation3 + $0x28] sm:$0xff] }
0x10e8   : > { %v6011_v60 = vld [vmem:[#allocation3] sm:$0xff]  ;;  %8309 = vset.pattern.permute.xlu2 %v8534_v38  ;;  %8308 = vset.pattern.permute.xlu1 %v8534_v38  ;;  %8311 = vrcp.f32 %v6015_v45  ;;  %v6014_v18 = vld [vmem:[#allocation3 + $0x18] sm:$0xff]  ;;  %v6012_v27 = vld [vmem:[#allocation3 + $0x8] sm:$0xff] }
0x10e9   : > { %8307 = vset.pattern.permute.xlu0 %v8534_v38  ;;  %8313 = vrcp.f32 %v6013_v48  ;;  %v6019_v9 = vld [vmem:[#allocation3 + $0x40] sm:$0xff]  ;;  %v6018_v30 = vld [vmem:[#allocation3 + $0x38] sm:$0xff]  ;;  %v6017_v32 = vld [vmem:[#allocation3 + $0x30] sm:$0xff] }
0x10ea   : > { %8315 = vrcp.f32 %v6011_v60  ;;  %v6022_v17 = vld [vmem:[#allocation3 + $0x58] sm:$0xff]  ;;  %v6021_v12 = vld [vmem:[#allocation3 + $0x50] sm:$0xff]  ;;  %v6020_v54 = vld [vmem:[#allocation3 + $0x48] sm:$0xff] }
0x10eb   : > { %8317 = vrcp.f32 %v6016_v58  ;;  %v6025_v20 = vld [vmem:[#allocation3 + $0x70] sm:$0xff]  ;;  %v6024_v42 = vld [vmem:[#allocation3 + $0x68] sm:$0xff]  ;;  %v6023_v44 = vld [vmem:[#allocation3 + $0x60] sm:$0xff] }
0x10ec   : > { %8319 = vrcp.f32 %v6014_v18  ;;  %v6292_v25 = vld [vmem:[#allocation3 + $0x88] sm:$0xff]  ;;  %v6291_v52 = vld [vmem:[#allocation3 + $0x80] sm:$0xff]  ;;  %v6026_v39 = vld [vmem:[#allocation3 + $0x78] sm:$0xff] }
0x10ed   : > { %8321 = vrcp.f32 %v6012_v27  ;;  %v6295_v16 = vld [vmem:[#allocation3 + $0xa0] sm:$0xff]  ;;  %v6294_v37 = vld [vmem:[#allocation3 + $0x98] sm:$0xff]  ;;  %v6293_v43 = vld [vmem:[#allocation3 + $0x90] sm:$0xff] }
0x10ee   : > { %v8312_v40 = vpop.eup %8311  ;;  %8323 = vrcp.f32 %v6019_v9  ;;  %v6845_v35 = vld [vmem:[#allocation3 + $0x180] sm:$0xff]  ;;  %v6296_v22 = vld [vmem:[#allocation3 + $0xa8] sm:$0xff]  ;;  %v6570_v31 = vld [vmem:[#allocation3 + $0x110] sm:$0xff] }
0x10ef   : > { %v8314_v13 = vpop.eup %8313  ;;  %6065 = vperm.xlu2 %8309, %v8312_v40   ;;  %8325 = vrcp.f32 %v6018_v30  ;;  %v6568_v63 = vld [vmem:[#allocation3 + $0x100] sm:$0xff]  ;;  %v6846_v6 = vld [vmem:[#allocation3 + $0x188] sm:$0xff]  ;;  %v6848_v7 = vld [vmem:[#allocation3 + $0x198] sm:$0xff] }
0x10f0   : > { %v8316_v49 = vpop.eup %8315  ;;  %6055 = vperm.xlu1 %8308, %v8314_v13   ;;  %8327 = vrcp.f32 %v6017_v32  ;;  %v6569_v57 = vld [vmem:[#allocation3 + $0x108] sm:$0xff]  ;;  %v6571_v0 = vld [vmem:[#allocation3 + $0x118] sm:$0xff]  ;;  %v6847_v15 = vld [vmem:[#allocation3 + $0x190] sm:$0xff] }
0x10f1   : > { %6045 = vperm.xlu0 %8307, %v8316_v49   ;;  %v8318_v28 = vpop.eup %8317  ;;  %8329 = vrcp.f32 %v6022_v17  ;;  %v6573_v24 = vld [vmem:[#allocation3 + $0x128] sm:$0xff]  ;;  %v6849_v50 = vld [vmem:[#allocation3 + $0x1a0] sm:$0xff]  ;;  %v6142_v45 = vld [vmem:[%s12735_s4 + $0x18] sm:$0xff] }
0x10f2   : > { %v8320_v29 = vpop.eup %8319  ;;  %8331 = vrcp.f32 %v6021_v12  ;;  %v6572_v5 = vld [vmem:[#allocation3 + $0x120] sm:$0xff]  ;;  %v6141_v48 = vld [vmem:[%s12735_s4 + $0x10] sm:$0xff]  ;;  %6203 = vmatpush.msra.mxu0 %v6142_v45  ;;  %v6850_v27 = vld [vmem:[#allocation3 + $0x1a8] sm:$0xff] }
0x10f3   : > { %v8322_v41 = vpop.eup %8321  ;;  %8333 = vrcp.f32 %v6020_v54  ;;  %v6851_v60 = vld [vmem:[#allocation3 + $0x1b0] sm:$0xff]  ;;  %v6140_v13 = vld [vmem:[%s12735_s4 + $0x8] sm:$0xff]  ;;  %v6852_v49 = vld [vmem:[#allocation3 + $0x1b8] sm:$0xff] }
0x10f4   : > { %v8324_v8 = vpop.eup %8323  ;;  %8335 = vrcp.f32 %v6025_v20  ;;  %v6574_v58 = vld [vmem:[#allocation3 + $0x130] sm:$0xff]  ;;  %6204 = vmatpush.msra.mxu0 %v6141_v48  ;;  %v6139_v30 = vld [vmem:[%s12735_s4] sm:$0xff]  ;;  %v6302_v48 = vld [vmem:[#allocation3 + $0xd8] sm:$0xff] }
0x10f5   : > { %v8326_v56 = vpop.eup %8325  ;;  %8337 = vrcp.f32 %v6024_v42  ;;  %v6297_v32 = vld [vmem:[#allocation3 + $0xb0] sm:$0xff]  ;;  %v6854_v42 = vld [vmem:[#allocation3 + $0x1c8] sm:$0xff] }
0x10f6   : > { %v8328_v4 = vpop.eup %8327  ;;  %8339 = vrcp.f32 %v6023_v44  ;;  %6205 = vmatpush.msra.mxu0 %v6140_v13  ;;  %v6577_v44 = vld [vmem:[#allocation3 + $0x148] sm:$0xff] }
0x10f7   : > { %6070 = vperm.xlu2 %8309, %v8318_v28   ;;  %v8330_v33 = vpop.eup %8329  ;;  %8341 = vrcp.f32 %v6292_v25  ;;  %v6575_v28 = vld [vmem:[#allocation3 + $0x138] sm:$0xff]  ;;  %v6299_v25 = vld [vmem:[#allocation3 + $0xc0] sm:$0xff] }
0x10f8   : > { %6060 = vperm.xlu1 %8308, %v8320_v29   ;;  %v8332_v26 = vpop.eup %8331  ;;  %8343 = vrcp.f32 %v6291_v52  ;;  %6206 = vmatpush.msra.mxu0 %v6139_v30  ;;  %v6303_v30 = vld [vmem:[#allocation3 + $0xe0] sm:$0xff] }
0x10f9   : > { %6050 = vperm.xlu0 %8307, %v8322_v41   ;;  %v8334_v46 = vpop.eup %8333  ;;  %8345 = vrcp.f32 %v6026_v39 }
0x10fa   : > { %v8336_v51 = vpop.eup %8335  ;;  %8347 = vrcp.f32 %v6295_v16 }
0x10fb   : > { %v8338_v2 = vpop.eup %8337  ;;  %8349 = vrcp.f32 %v6294_v37 }
0x10fc   : > { %v8340_v34 = vpop.eup %8339  ;;  %8351 = vrcp.f32 %v6293_v43  ;;  %v6975_v43 = vld [vmem:[%s12735_s4 + $0x70] sm:$0xff] }
0x10fd   : > { %v8342_v61 = vpop.eup %8341  ;;  %8353 = vrcp.f32 %v6845_v35  ;;  %v5995_v35 = vld [vmem:[#allocation4] sm:$0xff] }
0x10fe   : > { %v8344_v21 = vpop.eup %8343  ;;  %8355 = vrcp.f32 %v6568_v63 }
0x10ff   : > { %6085 = vperm.xlu2 %8309, %v8324_v8   ;;  %v8346_v3 = vpop.eup %8345  ;;  %8357 = vrcp.f32 %v6296_v22  ;;  %v6853_v8 = vld [vmem:[#allocation3 + $0x1c0] sm:$0xff]  ;;  %v6856_v22 = vld [vmem:[#allocation3 + $0x1d8] sm:$0xff] }
0x1100   : > { %6080 = vperm.xlu1 %8308, %v8326_v56   ;;  %v8348_v10 = vpop.eup %8347  ;;  %8359 = vrcp.f32 %v6570_v31  ;;  %v6576_v56 = vld [vmem:[#allocation3 + $0x140] sm:$0xff] }
0x1101   : > { %6075 = vperm.xlu0 %8307, %v8328_v4   ;;  %v8350_v23 = vpop.eup %8349  ;;  %8361 = vrcp.f32 %v6846_v6  ;;  %v6298_v4 = vld [vmem:[#allocation3 + $0xb8] sm:$0xff]  ;;  %v6973_v6 = vld [vmem:[%s12735_s4 + $0x60] sm:$0xff] }
0x1102   : > { %v8352_v14 = vpop.eup %8351  ;;  %8363 = vrcp.f32 %v6569_v57  ;;  %v6301_v57 = vld [vmem:[#allocation3 + $0xd0] sm:$0xff] }
0x1103   : > { %v8354_v59 = vpop.eup %8353  ;;  %8365 = vrcp.f32 %v6848_v7  ;;  %v6422_v7 = vld [vmem:[%s12735_s4 + $0x38] sm:$0xff] }
0x1104   : > { %v8356_v1 = vpop.eup %8355  ;;  %8367 = vrcp.f32 %v6571_v0  ;;  %6483 = vmatpush.msra.mxu1 %v6422_v7 }
0x1105   : > { %v8358_v62 = vpop.eup %8357  ;;  %8369 = vrcp.f32 %v6847_v15  ;;  %v6420_v15 = vld [vmem:[%s12735_s4 + $0x28] sm:$0xff] }
0x1106   : > { %v8360_v19 = vpop.eup %8359  ;;  %8371 = vrcp.f32 %v6573_v24 }
0x1107   : > { %6100 = vperm.xlu2 %8309, %v8330_v33   ;;  %v8362_v11 = vpop.eup %8361  ;;  %8373 = vrcp.f32 %v6849_v50 }
0x1108   : > { %6095 = vperm.xlu1 %8308, %v8332_v26   ;;  %v8364_v53 = vpop.eup %8363  ;;  %8375 = vrcp.f32 %v6572_v5  ;;  %v6580_v5 = vld [vmem:[#allocation3 + $0x160] sm:$0xff] }
0x1109   : > { %6090 = vperm.xlu0 %8307, %v8334_v46   ;;  %v8366_v36 = vpop.eup %8365  ;;  %8377 = vrcp.f32 %v6851_v60 }
0x110a   : > { %v8368_v55 = vpop.eup %8367  ;;  %8379 = vrcp.f32 %v6574_v58 }
0x110b   : > { %v8370_v47 = vpop.eup %8369  ;;  %8381 = vrcp.f32 %v6850_v27 }
0x110c   : > { %v8372_v38 = vpop.eup %8371  ;;  %8383 = vrcp.f32 %v6852_v49 }
0x110d   : > { %v8374_v18 = vpop.eup %8373  ;;  %8385 = vrcp.f32 %v6575_v28 }
0x110e   : > { %v8376_v40 = vpop.eup %8375  ;;  %8387 = vrcp.f32 %v6297_v32  ;;  %v6699_v32 = vld [vmem:[%s12735_s4 + $0x58] sm:$0xff] }
0x110f   : > { %6115 = vperm.xlu2 %8309, %v8336_v51   ;;  %v8378_v9 = vpop.eup %8377  ;;  %8389 = vrcp.f32 %v6853_v8  ;;  %6760 = vmatpush.msra.mxu2 %v6699_v32  ;;  %v5998_v8 = vld [vmem:[#allocation4 + $0x18] sm:$0xff] }
0x1110   : > { %6110 = vperm.xlu1 %8308, %v8338_v2   ;;  %v8380_v29 = vpop.eup %8379  ;;  %8391 = vrcp.f32 %v6576_v56  ;;  %v6855_v2 = vld [vmem:[#allocation3 + $0x1d0] sm:$0xff]  ;;  %v6697_v56 = vld [vmem:[%s12735_s4 + $0x48] sm:$0xff] }
0x1111   : > { %6105 = vperm.xlu0 %8307, %v8340_v34   ;;  %v8382_v41 = vpop.eup %8381  ;;  %8393 = vrcp.f32 %v6298_v4  ;;  %v6578_v34 = vld [vmem:[#allocation3 + $0x150] sm:$0xff] }
0x1112   : > { %v8384_v12 = vpop.eup %8383  ;;  %8395 = vrcp.f32 %v6854_v42 }
0x1113   : > { %v8386_v54 = vpop.eup %8385  ;;  %8397 = vrcp.f32 %v6577_v44  ;;  %v6582_v44 = vld [vmem:[#allocation3 + $0x170] sm:$0xff] }
0x1114   : > { %v8388_v20 = vpop.eup %8387  ;;  %8399 = vrcp.f32 %v6299_v25 }
0x1115   : > { %v8390_v26 = vpop.eup %8389  ;;  %8401 = vrcp.f32 %v6855_v2 }
0x1116   : > { %v8392_v46 = vpop.eup %8391  ;;  %8403 = vrcp.f32 %v6578_v34  ;;  %v5999_v34 = vld [vmem:[#allocation4 + $0x20] sm:$0xff] }
0x1117   : > { %6330 = vperm.xlu2 %8309, %v8342_v61   ;;  %v8394_v51 = vpop.eup %8393  ;;  %v6300_v61 = vld [vmem:[#allocation3 + $0xc8] sm:$0xff] }
0x1118   : > { %6325 = vperm.xlu1 %8308, %v8344_v21   ;;  %v8396_v39 = vpop.eup %8395  ;;  %v6976_v21 = vld [vmem:[%s12735_s4 + $0x78] sm:$0xff]  ;;  %8405 = vrcp.f32 %v6300_v61 }
0x1119   : > { %6120 = vperm.xlu0 %8307, %v8346_v3   ;;  %v8398_v16 = vpop.eup %8397  ;;  %7037 = vmatpush.msra.mxu3 %v6976_v21  ;;  %8407 = vrcp.f32 %v6856_v22  ;;  %v6305_v22 = vld [vmem:[#allocation3 + $0xf0] sm:$0xff] }
0x111a   : > { %v8400_v37 = vpop.eup %8399 }
0x111b   : > { %7038 = vmatpush.msra.mxu3 %v6975_v43  ;;  %v6860_v43 = vld [vmem:[#allocation3 + $0x1f8] sm:$0xff] }
0x111f   : > { %6345 = vperm.xlu2 %8309, %v8348_v10   ;;  %v6974_v10 = vld [vmem:[%s12735_s4 + $0x68] sm:$0xff] }
0x1120   : > { %6340 = vperm.xlu1 %8308, %v8350_v23   ;;  %7039 = vmatpush.msra.mxu3 %v6974_v10 }
0x1121   : > { %6335 = vperm.xlu0 %8307, %v8352_v14   ;;  %v8402_v14 = vpop.eup %8401 }
0x1122   : > { %7040 = vmatpush.msra.mxu3 %v6973_v6 }
0x1127   : > { %6879 = vperm.xlu2 %8309, %v8354_v59   ;;  %v6579_v59 = vld [vmem:[#allocation3 + $0x158] sm:$0xff] }
0x1128   : > { %6602 = vperm.xlu1 %8308, %v8356_v1   ;;  %v8404_v1 = vpop.eup %8403  ;;  %8409 = vrcp.f32 %v6579_v59  ;;  %v6000_v59 = vld [vmem:[#allocation4 + $0x28] sm:$0xff] }
0x1129   : > { %6350 = vperm.xlu0 %8307, %v8358_v62   ;;  %v8406_v62 = vpop.eup %8405  ;;  %8411 = vrcp.f32 %v6301_v57 }
0x112a   : > { %v8408_v50 = vpop.eup %8407 }
0x112e   : > { %v8410_v45 = vpop.eup %8409 }
0x112f   : > { %6612 = vperm.xlu2 %8309, %v8360_v19   ;;  %v6421_v19 = vld [vmem:[%s12735_s4 + $0x30] sm:$0xff]  ;;  %v8412_v60 = vpop.eup %8411 }
0x1130   : > { %6884 = vperm.xlu1 %8308, %v8362_v11   ;;  %v5996_v11 = vld [vmem:[#allocation4 + $0x8] sm:$0xff]  ;;  %6484 = vmatpush.msra.mxu1 %v6421_v19  ;;  %v6306_v19 = vld [vmem:[#allocation3 + $0xf8] sm:$0xff] }
0x1131   : > { %6607 = vperm.xlu0 %8307, %v8364_v53  }
0x1132   : > { %6485 = vmatpush.msra.mxu1 %v6420_v15  ;;  %v6276_v15 = vld [vmem:[#allocation4 + $0x88] sm:$0xff] }
0x1137   : > { %6894 = vperm.xlu2 %8309, %v8366_v36   ;;  %v6857_v36 = vld [vmem:[#allocation3 + $0x1e0] sm:$0xff] }
0x1138   : > { %6617 = vperm.xlu1 %8308, %v8368_v55   ;;  %8413 = vrcp.f32 %v6857_v36 }
0x1139   : > { %6889 = vperm.xlu0 %8307, %v8370_v47   ;;  %v6419_v47 = vld [vmem:[%s12735_s4 + $0x20] sm:$0xff]  ;;  %8415 = vrcp.f32 %v6580_v5  ;;  %v6277_v5 = vld [vmem:[#allocation4 + $0x90] sm:$0xff] }
0x113a   : > { %6486 = vmatpush.msra.mxu1 %v6419_v47  ;;  %8417 = vrcp.f32 %v6302_v48  ;;  %v6552_v47 = vld [vmem:[#allocation4 + $0x100] sm:$0xff] }
0x113e   : > { %v8414_v13 = vpop.eup %8413 }
0x113f   : > { %6627 = vperm.xlu2 %8309, %v8372_v38   ;;  %v5997_v38 = vld [vmem:[#allocation4 + $0x10] sm:$0xff]  ;;  %v8416_v28 = vpop.eup %8415 }
0x1140   : > { %6899 = vperm.xlu1 %8308, %v8374_v18  }
0x1141   : > { %6622 = vperm.xlu0 %8307, %v8376_v40   ;;  %v6858_v40 = vld [vmem:[#allocation3 + $0x1e8] sm:$0xff] }
0x1142   : > { %8419 = vrcp.f32 %v6858_v40 }
0x1147   : > { %6909 = vperm.xlu2 %8309, %v8378_v9   ;;  %v6581_v9 = vld [vmem:[#allocation3 + $0x168] sm:$0xff] }
0x1148   : > { %6632 = vperm.xlu1 %8308, %v8380_v29   ;;  %v8418_v29 = vpop.eup %8417  ;;  %8421 = vrcp.f32 %v6581_v9  ;;  %v6003_v9 = vld [vmem:[#allocation4 + $0x40] sm:$0xff] }
0x1149   : > { %6904 = vperm.xlu0 %8307, %v8382_v41   ;;  %v12534_v17 = vpop.permute.xlu2 %6065  ;;  %v6698_v41 = vld [vmem:[%s12735_s4 + $0x50] sm:$0xff]  ;;  %8423 = vrcp.f32 %v6303_v30  ;;  %v8420_v42 = vpop.eup %8419 }
0x114a   : > { %6761 = vmatpush.msra.mxu2 %v6698_v41  ;;  %v6127_v10 = vmul.f32 %v12534_v17, %v5999_v34 }
0x114c   : > { %6762 = vmatpush.msra.mxu2 %v6697_v56 }
0x114e   : > { %v8422_v25 = vpop.eup %8421 }
0x114f   : > { %6914 = vperm.xlu2 %8309, %v8384_v12   ;;  %v8424_v2 = vpop.eup %8423 }
0x1150   : > { %6637 = vperm.xlu1 %8308, %v8386_v54  }
0x1151   : > { %6355 = vperm.xlu0 %8307, %v8388_v20   ;;  %v12536_v33 = vpop.permute.xlu2 %6070  ;;  %v6859_v20 = vld [vmem:[#allocation3 + $0x1f0] sm:$0xff] }
0x1152   : > { %8425 = vrcp.f32 %v6859_v20 }
0x1153   : > { %8427 = vrcp.f32 %v6582_v44  ;;  %v6831_v44 = vld [vmem:[#allocation4 + $0x190] sm:$0xff] }
0x1157   : > { %6919 = vperm.xlu2 %8309, %v8390_v26  }
0x1158   : > { %6642 = vperm.xlu1 %8308, %v8392_v46   ;;  %v6696_v46 = vld [vmem:[%s12735_s4 + $0x40] sm:$0xff] }
0x1159   : > { %6360 = vperm.xlu0 %8307, %v8394_v51   ;;  %v12538_v52 = vpop.permute.xlu2 %6085  ;;  %v6304_v51 = vld [vmem:[#allocation3 + $0xe8] sm:$0xff]  ;;  %6763 = vmatpush.msra.mxu2 %v6696_v46 }
0x115a   : > { %8429 = vrcp.f32 %v6304_v51 }
0x115b   : > { %8431 = vrcp.f32 %v6860_v43  ;;  %v6555_v43 = vld [vmem:[#allocation4 + $0x118] sm:$0xff] }
0x115f   : > { %6924 = vperm.xlu2 %8309, %v8396_v39   ;;  %v6829_v39 = vld [vmem:[#allocation4 + $0x180] sm:$0xff] }
0x1160   : > { %6647 = vperm.xlu1 %8308, %v8398_v16  }
0x1161   : > { %6365 = vperm.xlu0 %8307, %v8400_v37   ;;  %v12546_v3 = vpop.permute.xlu2 %6100 }
0x1162   : > { %v6056_v63 = vpop.permute.xlu1 %6055 }
0x1163   : > { %v6046_v23 = vpop.permute.xlu0 %6045  ;;  %v6125_v49 = vmul.f32 %v6056_v63, %v5997_v38  ;;  %v6583_v63 = vld [vmem:[#allocation3 + $0x178] sm:$0xff] }
0x1164   : > { %v6123_v31 = vmul.f32 %v6046_v23, %v5995_v35  ;;  %v8426_v35 = vpop.eup %8425  ;;  %8433 = vrcp.f32 %v6583_v63 }
0x1165   : > { %v8428_v23 = vpop.eup %8427  ;;  %8435 = vrcp.f32 %v6305_v22 }
0x1166   : > { %7601 = vmatmul.msk.f32.vlgmr.msra.gmra.mxu0 %vm2563_vm4, %v6123_v31  ;;  %v6275_v31 = vld [vmem:[#allocation4 + $0x80] sm:$0xff]  ;;  %8437 = vrcp.f32 %v6306_v19 }
0x1167   : > { %6929 = vperm.xlu2 %8309, %v8402_v14   ;;  %v8430_v14 = vpop.eup %8429  ;;  %v6007_v19 = vld [vmem:[#allocation4 + $0x60] sm:$0xff] }
0x1168   : > { %6652 = vperm.xlu1 %8308, %v8404_v1   ;;  %v8432_v17 = vpop.eup %8431 }
0x1169   : > { %6370 = vperm.xlu0 %8307, %v8406_v62   ;;  %v12561_v0 = vpop.permute.xlu2 %6115  ;;  %v6128_v62 = vmul.f32 %v12536_v33, %v6000_v59  ;;  %v6556_v59 = vld [vmem:[#allocation4 + $0x120] sm:$0xff] }
0x116a   : > { %v6061_v53 = vpop.permute.xlu1 %6060  ;;  %v8434_v7 = vpop.eup %8433 }
0x116b   : > { %v6051_v24 = vpop.permute.xlu0 %6050  ;;  %v6126_v26 = vmul.f32 %v6061_v53, %v5998_v8  ;;  %v6001_v53 = vld [vmem:[#allocation4 + $0x30] sm:$0xff]  ;;  %v6131_v8 = vmul.f32 %v12538_v52, %v6003_v9 }
0x116c   : > { %v6124_v55 = vmul.f32 %v6051_v24, %v5996_v11  ;;  %v8436_v11 = vpop.eup %8435  ;;  %v6009_v9 = vld [vmem:[#allocation4 + $0x70] sm:$0xff] }
0x116d   : > { %v8438_v33 = vpop.eup %8437 }
0x116e   : > { %7602 = vmatmul.msk.f32.gmra.mxu0 %vm2563_vm4, %v6124_v55 }
0x116f   : > { %6934 = vperm.xlu2 %8309, %v8408_v50  }
0x1170   : > { %6657 = vperm.xlu1 %8308, %v8410_v45   ;;  %v6002_v45 = vld [vmem:[#allocation4 + $0x38] sm:$0xff] }
0x1171   : > { %6375 = vperm.xlu0 %8307, %v8412_v60   ;;  %v12570_v58 = vpop.permute.xlu2 %6330 }
0x1172   : > { %v12572_v18 = vpop.permute.xlu1 %6080  ;;  %v6404_v36 = vmul.f32 %v12570_v58, %v6276_v15  ;;  %v6278_v58 = vld [vmem:[#allocation4 + $0x98] sm:$0xff]  ;;  %v6557_v15 = vld [vmem:[#allocation4 + $0x128] sm:$0xff] }
0x1173   : > { %v12574_v27 = vpop.permute.xlu0 %6075 }
0x1174   : > { %v6129_v55 = vmul.f32 %v12574_v27, %v6001_v53  ;;  %v6830_v27 = vld [vmem:[#allocation4 + $0x188] sm:$0xff] }
0x1176   : > { %7603 = vmatmul.msk.f32.gmra.mxu0 %vm2563_vm4, %v6125_v49  ;;  %v6130_v49 = vmul.f32 %v12572_v18, %v6002_v45  ;;  %v6279_v18 = vld [vmem:[#allocation4 + $0xa0] sm:$0xff]  ;;  %v6282_v45 = vld [vmem:[#allocation4 + $0xb8] sm:$0xff] }
0x1177   : > { %6939 = vperm.xlu2 %8309, %v8414_v13  }
0x1178   : > { %6662 = vperm.xlu1 %8308, %v8416_v28   ;;  %v6553_v28 = vld [vmem:[#allocation4 + $0x108] sm:$0xff] }
0x1179   : > { %6380 = vperm.xlu0 %8307, %v8418_v29   ;;  %v12583_v12 = vpop.permute.xlu2 %6345 }
0x117a   : > { %v12588_v54 = vpop.permute.xlu1 %6095 }
0x117b   : > { %v12590_v4 = vpop.permute.xlu0 %6090 }
0x117e   : > { %7604 = vmatmul.msk.f32.gmra.mxu0 %vm2563_vm4, %v6126_v26  ;;  %v6554_v26 = vld [vmem:[#allocation4 + $0x110] sm:$0xff] }
0x117f   : > { %6944 = vperm.xlu2 %8309, %v8420_v42   ;;  %v6004_v42 = vld [vmem:[#allocation4 + $0x48] sm:$0xff] }
0x1180   : > { %6667 = vperm.xlu1 %8308, %v8422_v25   ;;  %v6407_v25 = vmul.f32 %v12583_v12, %v6279_v18  ;;  %v6132_v52 = vmul.f32 %v12590_v4, %v6004_v42  ;;  %v6010_v42 = vld [vmem:[#allocation4 + $0x78] sm:$0xff] }
0x1181   : > { %6385 = vperm.xlu0 %8307, %v8424_v2   ;;  %v6880_v16 = vpop.permute.xlu2 %6879 }
0x1182   : > { %v6957_v61 = vmul.f32 %v6880_v16, %v6829_v39  ;;  %v12596_v37 = vpop.permute.xlu1 %6110  ;;  %v6280_v16 = vld [vmem:[#allocation4 + $0xa8] sm:$0xff] }
0x1183   : > { %v12598_v21 = vpop.permute.xlu0 %6105 }
0x1184   : > { %7649 = vmatmul.msk.f32.vlgmr.msra.gmra.mxu3 %vm2563_vm4, %v6957_v61  ;;  %v6005_v61 = vld [vmem:[#allocation4 + $0x50] sm:$0xff] }
0x1185   : > { %v6133_v4 = vmul.f32 %v12588_v54, %v6005_v61  ;;  %v6838_v61 = vld [vmem:[#allocation4 + $0x1c8] sm:$0xff] }
0x1186   : > { %7605 = vmatmul.msk.f32.gmra.mxu0 %vm2563_vm4, %v6127_v10 }
0x1187   : > { %6949 = vperm.xlu2 %8309, %v8426_v35   ;;  %v6832_v35 = vld [vmem:[#allocation4 + $0x198] sm:$0xff] }
0x1188   : > { %6672 = vperm.xlu1 %8308, %v8428_v23  }
0x1189   : > { %6390 = vperm.xlu0 %8307, %v8430_v14   ;;  %v6613_v48 = vpop.permute.xlu2 %6612 }
0x118a   : > { %v6326_v6 = vpop.permute.xlu1 %6325  ;;  %v6682_v2 = vmul.f32 %v6613_v48, %v6554_v26  ;;  %v6835_v48 = vld [vmem:[#allocation4 + $0x1b0] sm:$0xff]  ;;  %v6284_v26 = vld [vmem:[#allocation4 + $0xc8] sm:$0xff] }
0x118b   : > { %v6403_v1 = vmul.f32 %v6326_v6, %v6275_v31  ;;  %v12603_v57 = vpop.permute.xlu0 %6120  ;;  %v6006_v31 = vld [vmem:[#allocation4 + $0x58] sm:$0xff]  ;;  %v6833_v6 = vld [vmem:[#allocation4 + $0x1a0] sm:$0xff] }
0x118d   : > { %7617 = vmatmul.msk.f32.vlgmr.msra.gmra.mxu1 %vm2563_vm4, %v6403_v1 }
0x118e   : > { %7606 = vmatmul.msk.f32.gmra.mxu0 %vm2563_vm4, %v6128_v62  ;;  %v6134_v62 = vmul.f32 %v12546_v3, %v6006_v31 }
0x118f   : > { %6954 = vperm.xlu2 %8309, %v8432_v17  }
0x1190   : > { %6677 = vperm.xlu1 %8308, %v8434_v7  }
0x1191   : > { %6395 = vperm.xlu0 %8307, %v8436_v11   ;;  %v6895_v56 = vpop.permute.xlu2 %6894  ;;  %v6281_v11 = vld [vmem:[#allocation4 + $0xb0] sm:$0xff] }
0x1192   : > { %v6341_v24 = vpop.permute.xlu1 %6340  ;;  %v6960_v22 = vmul.f32 %v6895_v56, %v6832_v35 }
0x1193   : > { %v6336_v50 = vpop.permute.xlu0 %6335  ;;  %v6406_v29 = vmul.f32 %v6341_v24, %v6278_v58  ;;  %v6834_v24 = vld [vmem:[#allocation4 + $0x1a8] sm:$0xff] }
0x1194   : > { %v6405_v38 = vmul.f32 %v6336_v50, %v6277_v5 }
0x1195   : > { %7618 = vmatmul.msk.f32.gmra.mxu1 %vm2563_vm4, %v6404_v36 }
0x1196   : > { %7607 = vmatmul.msk.f32.gmra.mxu0 %vm2563_vm4, %v6129_v55  ;;  %v6135_v55 = vmul.f32 %v12598_v21, %v6007_v19 }
0x1199   : > { %6400 = vperm.xlu0 %8307, %v8438_v33   ;;  %v6628_v34 = vpop.permute.xlu2 %6627 }
0x119a   : > { %v6603_v60 = vpop.permute.xlu1 %6602  ;;  %v6685_v5 = vmul.f32 %v6628_v34, %v6557_v15 }
0x119b   : > { %v6680_v40 = vmul.f32 %v6603_v60, %v6552_v47  ;;  %v6351_v13 = vpop.permute.xlu0 %6350  ;;  %v6008_v47 = vld [vmem:[#allocation4 + $0x68] sm:$0xff]  ;;  %v6558_v60 = vld [vmem:[#allocation4 + $0x130] sm:$0xff] }
0x119c   : > { %v6408_v12 = vmul.f32 %v6351_v13, %v6280_v16  ;;  %v6285_v16 = vld [vmem:[#allocation4 + $0xd0] sm:$0xff] }
0x119d   : > { %7619 = vmatmul.msk.f32.gmra.mxu1 %vm2563_vm4, %v6405_v38  ;;  %7633 = vmatmul.msk.f32.vlgmr.msra.gmra.mxu2 %vm2563_vm4, %v6680_v40  ;;  %v6136_v40 = vmul.f32 %v12596_v37, %v6008_v47  ;;  %v6137_v37 = vmul.f32 %v12561_v0, %v6009_v9  ;;  %v6138_v0 = vmul.f32 %v12603_v57, %v6010_v42 }
0x119e   : > { %7608 = vmatmul.msk.f32.gmra.mxu0 %vm2563_vm4, %v6130_v49 }
0x11a1   : > { %v6910_v14 = vpop.permute.xlu2 %6909 }
0x11a2   : > { %v6885_v30 = vpop.permute.xlu1 %6884  ;;  %v6963_v58 = vmul.f32 %v6910_v14, %v6835_v48 }
0x11a3   : > { %v6958_v32 = vmul.f32 %v6885_v30, %v6830_v27  ;;  %v6608_v41 = vpop.permute.xlu0 %6607  ;;  %v6836_v30 = vld [vmem:[#allocation4 + $0x1b8] sm:$0xff] }
0x11a4   : > { %v6681_v20 = vmul.f32 %v6608_v41, %v6553_v28  ;;  %v6283_v28 = vld [vmem:[#allocation4 + $0xc0] sm:$0xff] }
0x11a5   : > { %7620 = vmatmul.msk.f32.gmra.mxu1 %vm2563_vm4, %v6406_v29  ;;  %7650 = vmatmul.msk.f32.gmra.mxu3 %vm2563_vm4, %v6958_v32  ;;  %v6559_v29 = vld [vmem:[#allocation4 + $0x138] sm:$0xff] }
0x11a6   : > { %7609 = vmatmul.msk.f32.gmra.mxu0 %vm2563_vm4, %v6131_v8  ;;  %7634 = vmatmul.msk.f32.gmra.mxu2 %vm2563_vm4, %v6681_v20 }
0x11a9   : > { %v6915_v53 = vpop.permute.xlu2 %6914 }
0x11aa   : > { %v6618_v46 = vpop.permute.xlu1 %6617  ;;  %v6964_v8 = vmul.f32 %v6915_v53, %v6836_v30 }
0x11ab   : > { %v6890_v51 = vpop.permute.xlu0 %6889  ;;  %v6683_v23 = vmul.f32 %v6618_v46, %v6555_v43  ;;  %v6560_v46 = vld [vmem:[#allocation4 + $0x140] sm:$0xff]  ;;  %v6561_v43 = vld [vmem:[#allocation4 + $0x148] sm:$0xff] }
0x11ac   : > { %v6959_v39 = vmul.f32 %v6890_v51, %v6831_v44  ;;  %v6837_v44 = vld [vmem:[#allocation4 + $0x1c0] sm:$0xff] }
0x11ad   : > { %7621 = vmatmul.msk.f32.gmra.mxu1 %vm2563_vm4, %v6407_v25 }
0x11ae   : > { %7610 = vmatmul.msk.f32.gmra.mxu0 %vm2563_vm4, %v6132_v52  ;;  %7635 = vmatmul.msk.f32.gmra.mxu2 %vm2563_vm4, %v6682_v2 }
0x11af   : > { %7651 = vmatmul.msk.f32.gmra.mxu3 %vm2563_vm4, %v6959_v39 }
0x11b1   : > { %v6920_v13 = vpop.permute.xlu2 %6919 }
0x11b2   : > { %v6900_v10 = vpop.permute.xlu1 %6899  ;;  %v6965_v52 = vmul.f32 %v6920_v13, %v6837_v44  ;;  %v6565_v13 = vld [vmem:[#allocation4 + $0x168] sm:$0xff] }
0x11b3   : > { %v6623_v63 = vpop.permute.xlu0 %6622  ;;  %v6961_v54 = vmul.f32 %v6900_v10, %v6833_v6 }
0x11b4   : > { %v6684_v7 = vmul.f32 %v6623_v63, %v6556_v59  ;;  %v6286_v63 = vld [vmem:[#allocation4 + $0xd8] sm:$0xff] }
0x11b5   : > { %7622 = vmatmul.msk.f32.gmra.mxu1 %vm2563_vm4, %v6408_v12 }
0x11b6   : > { %7611 = vmatmul.msk.f32.gmra.mxu0 %vm2563_vm4, %v6133_v4  ;;  %7636 = vmatmul.msk.f32.gmra.mxu2 %vm2563_vm4, %v6683_v23  ;;  %v6839_v4 = vld [vmem:[#allocation4 + $0x1d0] sm:$0xff] }
0x11b7   : > { %7652 = vmatmul.msk.f32.gmra.mxu3 %vm2563_vm4, %v6960_v22  ;;  %v6562_v22 = vld [vmem:[#allocation4 + $0x150] sm:$0xff] }
0x11b9   : > { %v6925_v20 = vpop.permute.xlu2 %6924 }
0x11ba   : > { %v6633_v1 = vpop.permute.xlu1 %6632  ;;  %v6966_v12 = vmul.f32 %v6925_v20, %v6838_v61 }
0x11bb   : > { %v6905_v17 = vpop.permute.xlu0 %6904  ;;  %v6686_v27 = vmul.f32 %v6633_v1, %v6558_v60 }
0x11bc   : > { %v6962_v3 = vmul.f32 %v6905_v17, %v6834_v24  ;;  %v6287_v17 = vld [vmem:[#allocation4 + $0xe0] sm:$0xff] }
0x11be   : > { %7612 = vmatmul.msk.f32.gmra.mxu0 %vm2563_vm4, %v6134_v62  ;;  %7637 = vmatmul.msk.f32.gmra.mxu2 %vm2563_vm4, %v6684_v7  ;;  %v6840_v62 = vld [vmem:[#allocation4 + $0x1d8] sm:$0xff] }
0x11bf   : > { %7653 = vmatmul.msk.f32.gmra.mxu3 %vm2563_vm4, %v6961_v54  ;;  %v6563_v7 = vld [vmem:[#allocation4 + $0x158] sm:$0xff] }
0x11c1   : > { %v6930_v39 = vpop.permute.xlu2 %6929 }
0x11c2   : > { %v6638_v36 = vpop.permute.xlu1 %6637  ;;  %v6967_v6 = vmul.f32 %v6930_v39, %v6839_v4 }
0x11c3   : > { %v6356_v50 = vpop.permute.xlu0 %6355  ;;  %v6687_v56 = vmul.f32 %v6638_v36, %v6559_v29  ;;  %v6288_v36 = vld [vmem:[#allocation4 + $0xe8] sm:$0xff]  ;;  %v6290_v29 = vld [vmem:[#allocation4 + $0xf8] sm:$0xff] }
0x11c4   : > { %v6409_v33 = vmul.f32 %v6356_v50, %v6281_v11  ;;  %v6841_v50 = vld [vmem:[#allocation4 + $0x1e0] sm:$0xff] }
0x11c6   : > { %7613 = vmatmul.msk.f32.gmra.mxu0 %vm2563_vm4, %v6135_v55  ;;  %7623 = vmatmul.msk.f32.gmra.mxu1 %vm2563_vm4, %v6409_v33  ;;  %v6564_v55 = vld [vmem:[#allocation4 + $0x160] sm:$0xff] }
0x11c7   : > { %7638 = vmatmul.msk.f32.gmra.mxu2 %vm2563_vm4, %v6685_v5  ;;  %7654 = vmatmul.msk.f32.gmra.mxu3 %vm2563_vm4, %v6962_v3 }
0x11c9   : > { %v6935_v23 = vpop.permute.xlu2 %6934 }
0x11ca   : > { %v6643_v21 = vpop.permute.xlu1 %6642  ;;  %v6968_v53 = vmul.f32 %v6935_v23, %v6840_v62 }
0x11cb   : > { %v6361_v38 = vpop.permute.xlu0 %6360  ;;  %v6688_v2 = vmul.f32 %v6643_v21, %v6560_v46  ;;  %v6567_v46 = vld [vmem:[#allocation4 + $0x178] sm:$0xff] }
0x11cc   : > { %v6410_v49 = vmul.f32 %v6361_v38, %v6282_v45  ;;  %v6289_v38 = vld [vmem:[#allocation4 + $0xf0] sm:$0xff] }
0x11ce   : > { %7614 = vmatmul.msk.f32.gmra.mxu0 %vm2563_vm4, %v6136_v40  ;;  %7624 = vmatmul.msk.f32.gmra.mxu1 %vm2563_vm4, %v6410_v49  ;;  %v6842_v40 = vld [vmem:[#allocation4 + $0x1e8] sm:$0xff] }
0x11cf   : > { %7639 = vmatmul.msk.f32.gmra.mxu2 %vm2563_vm4, %v6686_v27  ;;  %7655 = vmatmul.msk.f32.gmra.mxu3 %vm2563_vm4, %v6963_v58 }
0x11d1   : > { %v6940_v19 = vpop.permute.xlu2 %6939 }
0x11d2   : > { %v6648_v18 = vpop.permute.xlu1 %6647  ;;  %v6969_v3 = vmul.f32 %v6940_v19, %v6841_v50 }
0x11d3   : > { %v6366_v32 = vpop.permute.xlu0 %6365  ;;  %v6689_v57 = vmul.f32 %v6648_v18, %v6561_v43 }
0x11d4   : > { %v6411_v41 = vmul.f32 %v6366_v32, %v6283_v28  ;;  %v6843_v32 = vld [vmem:[#allocation4 + $0x1f0] sm:$0xff] }
0x11d6   : > { %7615 = vmatmul.msk.f32.gmra.mxu0 %vm2563_vm4, %v6137_v37  ;;  %7625 = vmatmul.msk.f32.gmra.mxu1 %vm2563_vm4, %v6411_v41  ;;  %v6566_v37 = vld [vmem:[#allocation4 + $0x170] sm:$0xff] }
0x11d7   : > { %7640 = vmatmul.msk.f32.gmra.mxu2 %vm2563_vm4, %v6687_v56  ;;  %7656 = vmatmul.msk.f32.gmra.mxu3 %vm2563_vm4, %v6964_v8 }
0x11d9   : > { %v6945_v48 = vpop.permute.xlu2 %6944 }
0x11da   : > { %v6653_v34 = vpop.permute.xlu1 %6652  ;;  %v6970_v58 = vmul.f32 %v6945_v48, %v6842_v40 }
0x11db   : > { %v6371_v25 = vpop.permute.xlu0 %6370  ;;  %v6690_v1 = vmul.f32 %v6653_v34, %v6562_v22 }
0x11dc   : > { %v6412_v51 = vmul.f32 %v6371_v25, %v6284_v26  ;;  %v6844_v26 = vld [vmem:[#allocation4 + $0x1f8] sm:$0xff] }
0x11de   : > { %7616 = vmatmul.msk.f32.gmra.mxu0 %vm2563_vm4, %v6138_v0  ;;  %7626 = vmatmul.msk.f32.gmra.mxu1 %vm2563_vm4, %v6412_v51 }
0x11df   : > { %7641 = vmatmul.msk.f32.gmra.mxu2 %vm2563_vm4, %v6688_v2  ;;  %7657 = vmatmul.msk.f32.gmra.mxu3 %vm2563_vm4, %v6965_v52  ;;  %v12679_v2 = vld [vmem:[%s12986_s23] ss:$0 sm:$0xff] }
0x11e1   : > { %v6950_v28 = vpop.permute.xlu2 %6949 }
0x11e2   : > { %v6658_v14 = vpop.permute.xlu1 %6657  ;;  %v6971_v20 = vmul.f32 %v6950_v28, %v6843_v32 }
0x11e3   : > { %v6376_v35 = vpop.permute.xlu0 %6375  ;;  %v6691_v24 = vmul.f32 %v6658_v14, %v6563_v7  ;;  %v6208_v47 = vpop.f32.mrf.mxu0 }
0x11e4   : > { %v6413_v10 = vmul.f32 %v6376_v35, %v6285_v16  ;;  %v6259_v34 = vadd.f32 %v12679_v2, %v6208_v47 }
0x11e6   : > { %7627 = vmatmul.msk.f32.gmra.mxu1 %vm2563_vm4, %v6413_v10 }
0x11e7   : > { %7642 = vmatmul.msk.f32.gmra.mxu2 %vm2563_vm4, %v6689_v57  ;;  %7658 = vmatmul.msk.f32.gmra.mxu3 %vm2563_vm4, %v6966_v12 }
0x11e9   : > { %v6955_v44 = vpop.permute.xlu2 %6954 }
0x11ea   : > { %v6663_v11 = vpop.permute.xlu1 %6662  ;;  %v6972_v51 = vmul.f32 %v6955_v44, %v6844_v26 }
0x11eb   : > { %v6381_v31 = vpop.permute.xlu0 %6380  ;;  %v6692_v45 = vmul.f32 %v6663_v11, %v6564_v55  ;;  %v6211_v9 = vpop.f32.mrf.mxu0 }
0x11ec   : > { %v6414_v59 = vmul.f32 %v6381_v31, %v6286_v63  ;;  %v6260_v63 = vadd.f32 %v12679_v2, %v6211_v9 }
0x11ee   : > { %7628 = vmatmul.msk.f32.gmra.mxu1 %vm2563_vm4, %v6414_v59 }
0x11ef   : > { %7643 = vmatmul.msk.f32.gmra.mxu2 %vm2563_vm4, %v6690_v1  ;;  %7659 = vmatmul.msk.f32.gmra.mxu3 %vm2563_vm4, %v6967_v6 }
0x11f2   : > { %v6668_v60 = vpop.permute.xlu1 %6667 }
0x11f3   : > { %v6386_v54 = vpop.permute.xlu0 %6385  ;;  %v6693_v27 = vmul.f32 %v6668_v60, %v6565_v13  ;;  %v6214_v42 = vpop.f32.mrf.mxu0 }
0x11f4   : > { %v6415_v15 = vmul.f32 %v6386_v54, %v6287_v17  ;;  %v6261_v6 = vadd.f32 %v12679_v2, %v6214_v42 }
0x11f6   : > { %7629 = vmatmul.msk.f32.gmra.mxu1 %vm2563_vm4, %v6415_v15 }
0x11f7   : > { %7644 = vmatmul.msk.f32.gmra.mxu2 %vm2563_vm4, %v6691_v24  ;;  %7660 = vmatmul.msk.f32.gmra.mxu3 %vm2563_vm4, %v6968_v53 }
0x11fa   : > { %v6673_v30 = vpop.permute.xlu1 %6672 }
0x11fb   : > { %v6391_v33 = vpop.permute.xlu0 %6390  ;;  %v6694_v18 = vmul.f32 %v6673_v30, %v6566_v37  ;;  %v6217_v39 = vpop.f32.mrf.mxu0 }
0x11fc   : > { %v6416_v5 = vmul.f32 %v6391_v33, %v6288_v36  ;;  %v6262_v15 = vadd.f32 %v12679_v2, %v6217_v39 }
0x11fe   : > { %7630 = vmatmul.msk.f32.gmra.mxu1 %vm2563_vm4, %v6416_v5 }
0x11ff   : > { %7645 = vmatmul.msk.f32.gmra.mxu2 %vm2563_vm4, %v6692_v45  ;;  %7661 = vmatmul.msk.f32.gmra.mxu3 %vm2563_vm4, %v6969_v3 }
0x1202   : > { %v6678_v25 = vpop.permute.xlu1 %6677 }
0x1203   : > { %v6396_v21 = vpop.permute.xlu0 %6395  ;;  %v6695_v52 = vmul.f32 %v6678_v25, %v6567_v46  ;;  %v6220_v57 = vpop.f32.mrf.mxu0 }
0x1204   : > { %v6417_v49 = vmul.f32 %v6396_v21, %v6289_v38  ;;  %v6263_v3 = vadd.f32 %v12679_v2, %v6220_v57 }
0x1206   : > { %7631 = vmatmul.msk.f32.gmra.mxu1 %vm2563_vm4, %v6417_v49 }
0x1207   : > { %7646 = vmatmul.msk.f32.gmra.mxu2 %vm2563_vm4, %v6693_v27  ;;  %7662 = vmatmul.msk.f32.gmra.mxu3 %vm2563_vm4, %v6970_v58  ;;  %v7042_v43 = vpop.f32.mrf.mxu3 }
0x120a   : > { %v6488_v41 = vpop.f32.mrf.mxu1 }
0x120b   : > { %v6401_v8 = vpop.permute.xlu0 %6400  ;;  %v6536_v61 = vadd.f32 %v6488_v41, %v6259_v34  ;;  %v6223_v1 = vpop.f32.mrf.mxu0 }
0x120c   : > { %v6418_v56 = vmul.f32 %v6401_v8, %v6290_v29  ;;  %v6264_v21 = vadd.f32 %v12679_v2, %v6223_v1 }
0x120e   : > { %7632 = vmatmul.msk.f32.gmra.mxu1 %vm2563_vm4, %v6418_v56 }
0x120f   : > { %7647 = vmatmul.msk.f32.gmra.mxu2 %vm2563_vm4, %v6694_v18  ;;  %7663 = vmatmul.msk.f32.gmra.mxu3 %vm2563_vm4, %v6971_v20 }
0x1212   : > { %v6491_v0 = vpop.f32.mrf.mxu1 }
0x1213   : > { %v6537_v23 = vadd.f32 %v6491_v0, %v6260_v63  ;;  %v6226_v24 = vpop.f32.mrf.mxu0 }
0x1214   : > { %v6265_v32 = vadd.f32 %v12679_v2, %v6226_v24 }
0x1217   : > { %7648 = vmatmul.msk.f32.gmra.mxu2 %vm2563_vm4, %v6695_v52  ;;  %7664 = vmatmul.msk.f32.gmra.mxu3 %vm2563_vm4, %v6972_v51 }
0x121a   : > { %v6494_v16 = vpop.f32.mrf.mxu1 }
0x121b   : > { %v6538_v17 = vadd.f32 %v6494_v16, %v6261_v6  ;;  %v6229_v38 = vpop.f32.mrf.mxu0 }
0x121c   : > { %v6266_v42 = vadd.f32 %v12679_v2, %v6229_v38 }
0x1220   : > { %v6765_v35 = vpop.f32.mrf.mxu2 }
0x1221   : > { %v6813_v10 = vadd.f32 %v6765_v35, %v6536_v61 }
0x1222   : > { %v6497_v4 = vpop.f32.mrf.mxu1 }
0x1223   : > { %v7090_v12 = vadd.f32 %v7042_v43, %v6813_v10  ;;  %v6539_v53 = vadd.f32 %v6497_v4, %v6262_v15  ;;  %v6232_v30 = vpop.f32.mrf.mxu0 }
0x1224   : > { %v6267_v39 = vadd.f32 %v12679_v2, %v6232_v30 }
0x1225   : > { %7106 = vxpose.xlu1.b32.start [1/16] (narrow) %v7090_v12, 8 }
0x1228   : > { %v7045_v22 = vpop.f32.mrf.mxu3 }
0x1229   : > { %v6768_v14 = vpop.f32.mrf.mxu2 }
0x122a   : > { %v6814_v31 = vadd.f32 %v6768_v14, %v6537_v23  ;;  %v6500_v62 = vpop.f32.mrf.mxu1 }
0x122b   : > { %v6540_v47 = vadd.f32 %v6500_v62, %v6263_v3  ;;  %v6235_v26 = vpop.f32.mrf.mxu0 }
0x122c   : > { %v7091_v59 = vadd.f32 %v7045_v22, %v6814_v31  ;;  %v6268_v57 = vadd.f32 %v12679_v2, %v6235_v26 }
0x122e   : > { %7107 = vxpose.xlu1.b32.cont [2/16] (narrow) %v7091_v59, 8 }
0x1231   : > { %v6771_v7 = vpop.f32.mrf.mxu2 }
0x1232   : > { %v6815_v54 = vadd.f32 %v6771_v7, %v6538_v17  ;;  %v7048_v19 = vpop.f32.mrf.mxu3  ;;  %v6503_v33 = vpop.f32.mrf.mxu1 }
0x1233   : > { %v6541_v49 = vadd.f32 %v6503_v33, %v6264_v21  ;;  %v6238_v34 = vpop.f32.mrf.mxu0 }
0x1234   : > { %v7092_v11 = vadd.f32 %v7048_v19, %v6815_v54  ;;  %v6269_v6 = vadd.f32 %v12679_v2, %v6238_v34 }
0x1236   : > { %7108 = vxpose.xlu1.b32.cont [3/16] (narrow) %v7092_v11, 8 }
0x1239   : > { %v6774_v36 = vpop.f32.mrf.mxu2 }
0x123a   : > { %v6816_v50 = vadd.f32 %v6774_v36, %v6539_v53  ;;  %v7051_v55 = vpop.f32.mrf.mxu3 }
0x123b   : > { %v6241_v22 = vpop.f32.mrf.mxu0 }
0x123c   : > { %v7093_v5 = vadd.f32 %v7051_v55, %v6816_v50  ;;  %v6270_v11 = vadd.f32 %v12679_v2, %v6241_v22 }
0x123e   : > { %7109 = vxpose.xlu1.b32.cont [4/16] (narrow) %v7093_v5, 8 }
0x1241   : > { %v6777_v45 = vpop.f32.mrf.mxu2 }
0x1242   : > { %v6817_v48 = vadd.f32 %v6777_v45, %v6540_v47  ;;  %v7054_v60 = vpop.f32.mrf.mxu3 }
0x1243   : > { %v6506_v40 = vpop.f32.mrf.mxu1  ;;  %v6244_v54 = vpop.f32.mrf.mxu0 }
0x1244   : > { %v7094_v13 = vadd.f32 %v7054_v60, %v6817_v48  ;;  %v6542_v37 = vadd.f32 %v6506_v40, %v6265_v32  ;;  %v6271_v33 = vadd.f32 %v12679_v2, %v6244_v54 }
0x1246   : > { %7110 = vxpose.xlu1.b32.cont [5/16] (narrow) %v7094_v13, 8 }
0x124a   : > { %v6780_v58 = vpop.f32.mrf.mxu2  ;;  %v7057_v27 = vpop.f32.mrf.mxu3 }
0x124b   : > { %v6818_v9 = vadd.f32 %v6780_v58, %v6541_v49  ;;  %v6509_v28 = vpop.f32.mrf.mxu1  ;;  %v6247_v5 = vpop.f32.mrf.mxu0 }
0x124c   : > { %v6543_v44 = vadd.f32 %v6509_v28, %v6266_v42  ;;  %v6272_v40 = vadd.f32 %v12679_v2, %v6247_v5 }
0x124d   : > { %v7095_v29 = vadd.f32 %v7057_v27, %v6818_v9 }
0x124f   : > { %7111 = vxpose.xlu1.b32.cont [6/16] (narrow) %v7095_v29, 8 }
0x1252   : > { %v6783_v41 = vpop.f32.mrf.mxu2  ;;  %v7060_v8 = vpop.f32.mrf.mxu3 }
0x1253   : > { %v6819_v56 = vadd.f32 %v6783_v41, %v6542_v37  ;;  %v6512_v20 = vpop.f32.mrf.mxu1  ;;  %v6250_v13 = vpop.f32.mrf.mxu0 }
0x1254   : > { %v6544_v16 = vadd.f32 %v6512_v20, %v6267_v39  ;;  %v6273_v30 = vadd.f32 %v12679_v2, %v6250_v13 }
0x1255   : > { %v7096_v18 = vadd.f32 %v7060_v8, %v6819_v56 }
0x1257   : > { %7112 = vxpose.xlu1.b32.cont [7/16] (narrow) %v7096_v18, 8 }
0x125a   : > { %v6786_v46 = vpop.f32.mrf.mxu2  ;;  %v7063_v25 = vpop.f32.mrf.mxu3 }
0x125b   : > { %v6820_v0 = vadd.f32 %v6786_v46, %v6543_v44  ;;  %v6515_v51 = vpop.f32.mrf.mxu1  ;;  %v6253_v8 = vpop.f32.mrf.mxu0 }
0x125c   : > { %v6545_v63 = vadd.f32 %v6515_v51, %v6268_v57  ;;  %v6274_v18 = vadd.f32 %v12679_v2, %v6253_v8 }
0x125d   : > { %v7097_v52 = vadd.f32 %v7063_v25, %v6820_v0 }
0x125f   : > { %7113 = vxpose.xlu1.b32.cont [8/16] (narrow) %v7097_v52, 8 }
0x1262   : > { %v6789_v61 = vpop.f32.mrf.mxu2  ;;  %v7066_v43 = vpop.f32.mrf.mxu3 }
0x1263   : > { %v6821_v35 = vadd.f32 %v6789_v61, %v6544_v16  ;;  %v6518_v10 = vpop.f32.mrf.mxu1 }
0x1264   : > { %v6546_v1 = vadd.f32 %v6518_v10, %v6269_v6 }
0x1265   : > { %v7098_v12 = vadd.f32 %v7066_v43, %v6821_v35 }
0x1267   : > { %7114 = vxpose.xlu1.b32.cont [9/16] (narrow) %v7098_v12, 8 }
0x126a   : > { %v6792_v4 = vpop.f32.mrf.mxu2  ;;  %v7069_v23 = vpop.f32.mrf.mxu3 }
0x126b   : > { %v6822_v14 = vadd.f32 %v6792_v4, %v6545_v63  ;;  %v6521_v59 = vpop.f32.mrf.mxu1 }
0x126c   : > { %v6547_v53 = vadd.f32 %v6521_v59, %v6270_v11 }
0x126d   : > { %v7099_v31 = vadd.f32 %v7069_v23, %v6822_v14 }
0x126f   : > { %7115 = vxpose.xlu1.b32.cont [10/16] (narrow) %v7099_v31, 8 }
0x1272   : > { %v6795_v17 = vpop.f32.mrf.mxu2  ;;  %v7072_v62 = vpop.f32.mrf.mxu3 }
0x1273   : > { %v6823_v7 = vadd.f32 %v6795_v17, %v6546_v1  ;;  %v6524_v15 = vpop.f32.mrf.mxu1 }
0x1274   : > { %v6548_v3 = vadd.f32 %v6524_v15, %v6271_v33 }
0x1275   : > { %v7100_v19 = vadd.f32 %v7072_v62, %v6823_v7 }
0x1277   : > { %7116 = vxpose.xlu1.b32.cont [11/16] (narrow) %v7100_v19, 8 }
0x127a   : > { %v6798_v24 = vpop.f32.mrf.mxu2  ;;  %v7075_v36 = vpop.f32.mrf.mxu3 }
0x127b   : > { %v6824_v50 = vadd.f32 %v6798_v24, %v6547_v53  ;;  %v6527_v47 = vpop.f32.mrf.mxu1 }
0x127c   : > { %v6549_v21 = vadd.f32 %v6527_v47, %v6272_v40 }
0x127d   : > { %v7101_v55 = vadd.f32 %v7075_v36, %v6824_v50 }
0x127f   : > { %7117 = vxpose.xlu1.b32.cont [12/16] (narrow) %v7101_v55, 8 }
0x1282   : > { %v6801_v45 = vpop.f32.mrf.mxu2  ;;  %v7078_v48 = vpop.f32.mrf.mxu3 }
0x1283   : > { %v6825_v60 = vadd.f32 %v6801_v45, %v6548_v3  ;;  %v6530_v9 = vpop.f32.mrf.mxu1 }
0x1284   : > { %v6550_v29 = vadd.f32 %v6530_v9, %v6273_v30 }
0x1285   : > { %v7102_v38 = vadd.f32 %v7078_v48, %v6825_v60 }
0x1287   : > { %7118 = vxpose.xlu1.b32.cont [13/16] (narrow) %v7102_v38, 8 }
0x128a   : > { %v6804_v49 = vpop.f32.mrf.mxu2  ;;  %v7081_v58 = vpop.f32.mrf.mxu3 }
0x128b   : > { %v6826_v27 = vadd.f32 %v6804_v49, %v6549_v21  ;;  %v6533_v20 = vpop.f32.mrf.mxu1 }
0x128c   : > { %v6551_v42 = vadd.f32 %v6533_v20, %v6274_v18 }
0x128d   : > { %v7103_v28 = vadd.f32 %v7081_v58, %v6826_v27 }
0x128f   : > { %7119 = vxpose.xlu1.b32.cont [14/16] (narrow) %v7103_v28, 8 }
0x1292   : > { %v6807_v32 = vpop.f32.mrf.mxu2  ;;  %v7084_v37 = vpop.f32.mrf.mxu3 }
0x1293   : > { %v6827_v41 = vadd.f32 %v6807_v32, %v6550_v29 }
0x1295   : > { %v7104_v56 = vadd.f32 %v7084_v37, %v6827_v41 }
0x1297   : > { %7120 = vxpose.xlu1.b32.cont [15/16] (narrow) %v7104_v56, 8 }
0x129a   : > { %v6810_v26 = vpop.f32.mrf.mxu2  ;;  %v7087_v46 = vpop.f32.mrf.mxu3 }
0x129b   : > { %v6828_v44 = vadd.f32 %v6810_v26, %v6551_v42 }
0x129d   : > { %v7105_v25 = vadd.f32 %v7087_v46, %v6828_v44 }
0x129f   : > { %7121 = vxpose.xlu1.b32.end [16/16] (narrow) %v7105_v25, 8 }
0x12cb   : > { %v7122_v0 = vpop.trf.xlu1 }
0x12cc   : > { %7138 = vst [vmem:[%s8753_s16] sm:$0xff] %v7122_v0 }
0x12cd PF: > { %s16_s7 = sadd.s32 1, %s8525_s7   ;;  %s12987_s19 = sld [smem:[#allocation8_spill]] }
0x12ce   : > { %p13_p4 = scmp.ge.s32.totalorder %s16_s7, 10   ;;  %s12988_s13 = sld [smem:[#allocation9_spill]] }
0x12cf   : > { %s12989_s14 = sld [smem:[#allocation10_spill]]  ;;  %s12990_s21 = smov %s8489_s22 }
0x12d0   : > { %s12991_s22 = smov %s8661_s5  ;;  %s12992_s23 = smov %s8497_s24 }
0x12d1   : > { %s12993_s24 = smov %s8658_s20  ;;  %s12994_s25 = smov %s8513_s28 }
0x12d2   : > { %s12995_s26 = smov %s8517_s29  ;;  %s12996_s27 = smov %s8521_s30 }
0x12d3   : > { %s12997_s28 = smov %s12987_s19  ;;  %15 = sbr.rel (!%p13_p4) target bundleno = 8 (0x8), region = 242 }
0x12d4   : > { %s12998_s29 = smov %s12988_s13 }
0x12d5   : > { %s12999_s30 = smov %s12989_s14 }

</bundles_post_ra>
